<compile_context>
chip_gen: v7x
topology: tpu7x:2x2x1
jax: 0.10.0
libtpu: 0.0.40
codegen_flags: <defaults>
</compile_context>

<pallas_src>
import functools
import math

import jax
import jax.numpy as jnp
from jax.experimental import pallas as pl
from jax.experimental.pallas import tpu as pltpu


CFG = dict(
    vocab=512, max_pos=32, type_vocab=2,
    hidden=384, heads=6, intermediate=1536,
)

_MASK_W = 128            # width of every "mask_*" feature in the torch module
_HEAD_SLICES = {         # column ranges of the packed classifier-output slab
    "privilege_required": (0, 4),
    "attack_vector": (4, 6),
    "impact_1": (6, 11),
    "impact_2": (11, 18),
    "impact_3": (18, 22),
}


# ------------------------------ kernel helpers ------------------------------ #

def _layernorm_f32(y, g, b, eps):
    mean = jnp.mean(y, axis=-1, keepdims=True)
    var = jnp.mean(jnp.square(y - mean), axis=-1, keepdims=True)
    return (y - mean) * jax.lax.rsqrt(var + eps) * g + b


def _gelu_exact(x):
    # Exact (erf-based) BERT GELU.  erf is evaluated with the Abramowitz-Stegun
    # 7.1.26 rational approximation (|err| < 1.5e-7) so it lowers to exp/mul/add
    # only, which is guaranteed to be supported by Mosaic.
    z = x * 0.7071067811865476
    a = jnp.abs(z)
    t = 1.0 / (1.0 + 0.3275911 * a)
    poly = t * (0.254829592 + t * (-0.284496736 + t * (1.421413741
             + t * (-1.453152027 + t * 1.061405429))))
    erf_abs = 1.0 - poly * jnp.exp(-a * a)
    erf = jnp.where(z >= 0.0, erf_abs, -erf_abs)
    return 0.5 * x * (1.0 + erf)


# ------------------------------- Pallas kernels ----------------------------- #

def _ln_kernel(x_ref, g_ref, b_ref, o_ref, *, eps):
    o_ref[...] = _layernorm_f32(
        x_ref[...].astype(jnp.float32), g_ref[...], b_ref[...], eps
    ).astype(o_ref.dtype)


def _attn_block_kernel(x_ref, wqkv_ref, bqkv_ref, wo_ref, bo_ref, mask_ref,
                       g_ref, b_ref, o_ref, qkv_ref, *, B, S, nH, P, eps):
    """Fused: QKV projection + multi-head attention + out-proj + residual + LN."""
    HP = nH * P                                   # padded per-head concat width
    x = x_ref[...]                                # (B*S, H) f32
    xb = x.astype(jnp.bfloat16)

    # fused QKV projection -> VMEM scratch, written in 3 lane-aligned chunks
    for i in range(3):
        qkv_ref[:, i * HP:(i + 1) * HP] = (
            jnp.dot(xb, wqkv_ref[:, i * HP:(i + 1) * HP],
                    preferred_element_type=jnp.float32)
            + bqkv_ref[:, i * HP:(i + 1) * HP])

    rows = []
    for bb in range(B):                           # static unroll over batch
        r0 = bb * S
        amask = mask_ref[bb:bb + 1, :]            # (1, S) additive key mask, f32
        acc = None
        for h in range(nH):                       # static unroll over heads
            c0 = h * P                            # 128-aligned per-head offset
            q = qkv_ref[r0:r0 + S, c0:c0 + P]              # (S, P); lanes >= Dh are 0
            k = qkv_ref[r0:r0 + S, HP + c0:HP + c0 + P]
            v = qkv_ref[r0:r0 + S, 2 * HP + c0:2 * HP + c0 + P]
            # 1/sqrt(Dh) already folded into the Q weights/bias.
            s = jnp.dot(q, k.T, preferred_element_type=jnp.float32)   # (S, S)
            s = s + amask
            s = s - jnp.max(s, axis=-1, keepdims=True)
            p = jnp.exp(s)
            p = p * pl.reciprocal(jnp.sum(p, axis=-1, keepdims=True), approx=True)
            ctx = jnp.dot(p, v, preferred_element_type=jnp.float32)   # (S, P)
            proj = jnp.dot(ctx.astype(jnp.bfloat16), wo_ref[c0:c0 + P, :],
                           preferred_element_type=jnp.float32)        # (S, H)
            acc = proj if acc is None else acc + proj
        rows.append(acc)

    attn = jnp.concatenate(rows, axis=0) + bo_ref[...]                # (B*S, H)
    y = x + attn
    o_ref[...] = _layernorm_f32(y, g_ref[...], b_ref[...], eps).astype(o_ref.dtype)


def _ffn_block_kernel(x_ref, wi_ref, bi_ref, wf_ref, bf_ref, g_ref, b_ref, o_ref, *, eps):
    """Fused: x@Wi + bias + GELU + (.)@Wf + bias + residual + LN."""
    x = x_ref[...]                                                    # (B*S, H) f32
    h = jnp.dot(x.astype(jnp.bfloat16), wi_ref[...],
                preferred_element_type=jnp.float32) + bi_ref[...]     # (B*S, I)
    h = _gelu_exact(h)
    y = jnp.dot(h.astype(jnp.bfloat16), wf_ref[...],
                preferred_element_type=jnp.float32) + bf_ref[...]     # (B*S, H)
    y = x + y
    o_ref[...] = _layernorm_f32(y, g_ref[...], b_ref[...], eps).astype(o_ref.dtype)


def _heads_kernel(cls_ref, pw_ref, pb_ref, m3w_ref, m3b_ref,
                  mi2w_ref, mi2b_ref, mi3w_ref, mi3b_ref,
                  wout_ref, bout_ref, o_ref):
    """Fused: pooler tanh + all classifier heads -> one lane-dense (B,128) slab."""
    pooled = jnp.tanh(
        jnp.dot(cls_ref[...].astype(jnp.bfloat16), pw_ref[...],
                preferred_element_type=jnp.float32) + pb_ref[...])            # (B, H)
    # first-level masks fused: [mask_pr | mask_av | mask_i1], each 128 wide
    m3 = jnp.dot(pooled.astype(jnp.bfloat16), m3w_ref[...],
                 preferred_element_type=jnp.float32) + m3b_ref[...]           # (B, 384)
    m_i1 = m3[:, 2 * _MASK_W:3 * _MASK_W]                                     # (B, 128)
    m_i2 = jnp.dot(m_i1.astype(jnp.bfloat16), mi2w_ref[...],
                   preferred_element_type=jnp.float32) + mi2b_ref[...]        # (B, 128)
    m_i3 = jnp.dot(m_i2.astype(jnp.bfloat16), mi3w_ref[...],
                   preferred_element_type=jnp.float32) + mi3b_ref[...]        # (B, 128)
    # block-"diagonal" packed output weight: rows [0:384]->m3, [384:512]->m_i2,
    # [512:640]->m_i3; valid logits live in columns 0..21 of the 128-lane slab.
    n1 = 3 * _MASK_W
    logits = (
        jnp.dot(m3.astype(jnp.bfloat16), wout_ref[0:n1, :],
                preferred_element_type=jnp.float32)
        + jnp.dot(m_i2.astype(jnp.bfloat16), wout_ref[n1:n1 + _MASK_W, :],
                  preferred_element_type=jnp.float32)
        + jnp.dot(m_i3.astype(jnp.bfloat16), wout_ref[n1 + _MASK_W:n1 + 2 * _MASK_W, :],
                  preferred_element_type=jnp.float32)
        + bout_ref[...])
    o_ref[...] = logits.astype(o_ref.dtype)


# ------------------------------ kernel wrappers ------------------------------ #

def _spec(shape):
    n = len(shape)
    return pl.BlockSpec(shape, lambda i, n=n: (0,) * n)


def _call_single_block(kernel, out_shape, args, scratch_shapes=()):
    return pl.pallas_call(
        kernel,
        out_shape=out_shape,
        grid=(1,),
        in_specs=[_spec(a.shape) for a in args],
        out_specs=_spec(out_shape.shape),
        scratch_shapes=list(scratch_shapes),
    )(*args)


def layernorm(x, g, b, eps=1e-12):
    M, H = x.shape
    return _call_single_block(
        functools.partial(_ln_kernel, eps=eps),
        jax.ShapeDtypeStruct((M, H), jnp.float32),
        (x, g.reshape(1, H), b.reshape(1, H)))


def attention_block(x, wqkv, bqkv, wo, bo, add_mask, g, b, *, B, S, nH, eps=1e-12):
    BS, H = x.shape
    W3 = wqkv.shape[1]                       # 3 * nH * P
    P = W3 // (3 * nH)
    return _call_single_block(
        functools.partial(_attn_block_kernel, B=B, S=S, nH=nH, P=P, eps=eps),
        jax.ShapeDtypeStruct((BS, H), jnp.float32),
        (x, wqkv, bqkv.reshape(1, W3), wo, bo.reshape(1, H), add_mask,
         g.reshape(1, H), b.reshape(1, H)),
        scratch_shapes=(pltpu.VMEM((BS, W3), jnp.float32),))


def ffn_block(x, wi, bi, wf, bf_, g, b, eps=1e-12):
    BS, H = x.shape
    I = wi.shape[1]
    return _call_single_block(
        functools.partial(_ffn_block_kernel, eps=eps),
        jax.ShapeDtypeStruct((BS, H), jnp.float32),
        (x, wi, bi.reshape(1, I), wf, bf_.reshape(1, H),
         g.reshape(1, H), b.reshape(1, H)))


def heads_block(cls, pw, pb, m3w, m3b, mi2w, mi2b, mi3w, mi3b, wout, bout):
    B, H = cls.shape
    return _call_single_block(
        _heads_kernel,
        jax.ShapeDtypeStruct((B, wout.shape[1]), jnp.float32),
        (cls, pw, pb.reshape(1, H), m3w, m3b.reshape(1, m3w.shape[1]),
         mi2w, mi2b.reshape(1, _MASK_W), mi3w, mi3b.reshape(1, _MASK_W),
         wout, bout.reshape(1, wout.shape[1])))


# ------------------------------ parameter setup ------------------------------ #

def init_params(key, cfg):
    """Raw, torch-layout parameters (weights stored as (in_features, out_features))."""
    H, I = cfg["hidden"], cfg["intermediate"]
    std = 0.02

    def nrm(key, shape):
        return jax.random.normal(key, shape, jnp.float32) * std

    names_shapes = [
        ("word_emb", (cfg["vocab"], H)), ("pos_emb", (cfg["max_pos"], H)),
        ("type_emb", (cfg["type_vocab"], H)),
        ("wq", (H, H)), ("wk", (H, H)), ("wv", (H, H)), ("wo", (H, H)),
        ("wi", (H, I)), ("wf", (I, H)),
        ("pooler_w", (H, H)),
        ("mask_pr_w", (H, 128)), ("out_pr_w", (128, 4)),
        ("mask_av_w", (H, 128)), ("out_av_w", (128, 2)),
        ("mask_i1_w", (H, 128)), ("out_i1_w", (128, 5)),
        ("mask_i2_w", (128, 128)), ("out_i2_w", (128, 7)),
        ("mask_i3_w", (128, 128)), ("out_i3_w", (128, 4)),
    ]
    keys = jax.random.split(key, len(names_shapes))
    p = {n: nrm(k, s) for (n, s), k in zip(names_shapes, keys)}

    zeros = lambda n: jnp.zeros((n,), jnp.float32)
    ones = lambda n: jnp.ones((n,), jnp.float32)
    p.update({
        "emb_ln_g": ones(H), "emb_ln_b": zeros(H),
        "attn_ln_g": ones(H), "attn_ln_b": zeros(H),
        "out_ln_g": ones(H), "out_ln_b": zeros(H),
        "bq": zeros(H), "bk": zeros(H), "bv": zeros(H), "bo": zeros(H),
        "bi": zeros(I), "bf": zeros(H), "pooler_b": zeros(H),
        "mask_pr_b": zeros(128), "out_pr_b": zeros(4),
        "mask_av_b": zeros(128), "out_av_b": zeros(2),
        "mask_i1_b": zeros(128), "out_i1_b": zeros(5),
        "mask_i2_b": zeros(128), "out_i2_b": zeros(7),
        "mask_i3_b": zeros(128), "out_i3_b": zeros(4),
    })
    return p


def prepare_params(p, cfg):
    """One-time fusion / lane-padding / bf16 cast of the raw params (done outside jit)."""
    H, nH = cfg["hidden"], cfg["heads"]
    Dh = H // nH
    P = ((Dh + 127) // 128) * 128            # per-head width padded to a lane tile
    scale = 1.0 / math.sqrt(Dh)
    bf = lambda a: a.astype(jnp.bfloat16)

    def pad_head_cols(w):                    # (H, nH*Dh) -> (H, nH*P), zero padded
        return jnp.concatenate(
            [jnp.pad(w[:, h * Dh:(h + 1) * Dh], ((0, 0), (0, P - Dh)))
             for h in range(nH)], axis=1)

    def pad_head_bias(b):                    # (nH*Dh,) -> (nH*P,), zero padded
        return jnp.concatenate(
            [jnp.pad(b[h * Dh:(h + 1) * Dh], (0, P - Dh)) for h in range(nH)])

    f = {
        "word_emb": p["word_emb"], "pos_emb": p["pos_emb"], "type_emb": p["type_emb"],
        "emb_ln_g": p["emb_ln_g"], "emb_ln_b": p["emb_ln_b"],
        "attn_ln_g": p["attn_ln_g"], "attn_ln_b": p["attn_ln_b"],
        "out_ln_g": p["out_ln_g"], "out_ln_b": p["out_ln_b"],
        # fused QKV projection, head-padded to P lanes/head, 1/sqrt(Dh) folded into Q
        "wqkv": bf(jnp.concatenate([pad_head_cols(p["wq"] * scale),
                                    pad_head_cols(p["wk"]),
                                    pad_head_cols(p["wv"])], axis=1)),   # (H, 3*nH*P)
        "bqkv": jnp.concatenate([pad_head_bias(p["bq"] * scale),
                                 pad_head_bias(p["bk"]),
                                 pad_head_bias(p["bv"])]),               # (3*nH*P,)
        # attention output projection, rows padded per head to match padded context
        "wo": bf(jnp.concatenate(
            [jnp.pad(p["wo"][h * Dh:(h + 1) * Dh, :], ((0, P - Dh), (0, 0)))
             for h in range(nH)], axis=0)),                              # (nH*P, H)
        "bo": p["bo"],
        "w_ffn_in": bf(p["wi"]), "b_ffn_in": p["bi"],
        "w_ffn_out": bf(p["wf"]), "b_ffn_out": p["bf"],
        "pooler_w": bf(p["pooler_w"]), "pooler_b": p["pooler_b"],
        # first-level mask linears fused into one (H, 3*128) matmul: [pr | av | i1]
        "mask3_w": bf(jnp.concatenate([p["mask_pr_w"], p["mask_av_w"], p["mask_i1_w"]],
                                      axis=1)),
        "mask3_b": jnp.concatenate([p["mask_pr_b"], p["mask_av_b"], p["mask_i1_b"]]),
        "mi2_w": bf(p["mask_i2_w"]), "mi2_b": p["mask_i2_b"],
        "mi3_w": bf(p["mask_i3_w"]), "mi3_b": p["mask_i3_b"],
    }
    # all 5 tiny output heads packed into one lane-dense block-"diagonal" (640,128) weight
    sizes = [4, 2, 5, 7, 4]
    ws = [p["out_pr_w"], p["out_av_w"], p["out_i1_w"], p["out_i2_w"], p["out_i3_w"]]
    bs = [p["out_pr_b"], p["out_av_b"], p["out_i1_b"], p["out_i2_b"], p["out_i3_b"]]
    blocks, col = [], 0
    for w, n in zip(ws, sizes):
        blocks.append(jnp.pad(w, ((0, 0), (col, 128 - col - n))))
        col += n
    f["w_heads_out"] = bf(jnp.concatenate(blocks, axis=0))               # (5*128, 128)
    f["b_heads_out"] = jnp.pad(jnp.concatenate(bs), (0, 128 - col))      # (128,)
    return f


# --------------------------------- forward ----------------------------------- #

def vuln_classifier_forward(fp, input_ids, attention_mask, cfg=CFG):
    B, S = input_ids.shape
    H, nH = cfg["hidden"], cfg["heads"]

    # embeddings (gathers + adds are plain-JAX glue; dropout is an eval-mode no-op)
    emb = (fp["word_emb"][input_ids]
           + fp["pos_emb"][:S][None, :, :]
           + fp["type_emb"][0][None, None, :]).reshape(B * S, H)
    x = layernorm(emb, fp["emb_ln_g"], fp["emb_ln_b"])

    # one fused encoder layer
    add_mask = (1.0 - attention_mask.astype(jnp.float32)) * -10000.0        # (B, S)
    x = attention_block(x, fp["wqkv"], fp["bqkv"], fp["wo"], fp["bo"], add_mask,
                        fp["attn_ln_g"], fp["attn_ln_b"], B=B, S=S, nH=nH)
    x = ffn_block(x, fp["w_ffn_in"], fp["b_ffn_in"], fp["w_ffn_out"], fp["b_ffn_out"],
                  fp["out_ln_g"], fp["out_ln_b"])

    # pooler + all classifier heads in one kernel -> one lane-dense slab
    cls = x.reshape(B, S, H)[:, 0, :]                                       # (B, H)
    slab = heads_block(cls, fp["pooler_w"], fp["pooler_b"],
                       fp["mask3_w"], fp["mask3_b"],
                       fp["mi2_w"], fp["mi2_b"], fp["mi3_w"], fp["mi3_b"],
                       fp["w_heads_out"], fp["b_heads_out"])                # (B, 128)
    return {name: slab[:, lo:hi] for name, (lo, hi) in _HEAD_SLICES.items()}


# ----------------------------------- main ------------------------------------ #

if __name__ == "__main__":
    key = jax.random.PRNGKey(0)
    k_param, k_ids = jax.random.split(key)

    B, S = 2, 8
    raw_params = init_params(k_param, CFG)
    params = prepare_params(raw_params, CFG)      # one-time fuse / pad / bf16 cast

    input_ids = jax.random.randint(k_ids, (B, S), 0, CFG["vocab"], dtype=jnp.int32)
    attention_mask = jnp.ones((B, S), jnp.int32).at[1, -2:].set(0)   # pad last 2 of batch 1

    fwd = jax.jit(functools.partial(vuln_classifier_forward, cfg=CFG))
    out = jax.block_until_ready(fwd(params, input_ids, attention_mask))

    expected = {"privilege_required": 4, "attack_vector": 2,
                "impact_1": 5, "impact_2": 7, "impact_3": 4}
    for name, ncls in expected.items():
        assert out[name].shape == (B, ncls), (name, out[name].shape)
        assert bool(jnp.all(jnp.isfinite(out[name])))
    print("KERNEL_OK")
</pallas_src>

<mosaic_0001>
module attributes {stable_mosaic.version = 11 : i64} {
  func.func @_ln_kernel(%arg0: i32, %arg1: memref<16x384xf32, #tpu.memory_space<vmem>>, %arg2: memref<1x384xf32, #tpu.memory_space<vmem>>, %arg3: memref<1x384xf32, #tpu.memory_space<vmem>>, %arg4: memref<16x384xf32, #tpu.memory_space<vmem>>) attributes {dimension_semantics = [#tpu.dimension_semantics<arbitrary>], iteration_bounds = array<i64: 1>, scalar_prefetch = 0 : i64, scratch_operands = 0 : i64, tpu.core_type = #tpu.core_type<tc>, window_params = [{pipeline_mode = #tpu.pipeline_mode<synchronous>, transform_indices = @transform_0, window_bounds = array<i64: 16, 384>}, {pipeline_mode = #tpu.pipeline_mode<synchronous>, transform_indices = @transform_1, window_bounds = array<i64: 1, 384>}, {pipeline_mode = #tpu.pipeline_mode<synchronous>, transform_indices = @transform_2, window_bounds = array<i64: 1, 384>}, {pipeline_mode = #tpu.pipeline_mode<synchronous>, transform_indices = @transform_3, window_bounds = array<i64: 16, 384>}]} {
    %c0 = arith.constant 0 : index
    %c0_0 = arith.constant 0 : index
    %0 = vector.load %arg1[%c0, %c0_0] : memref<16x384xf32, #tpu.memory_space<vmem>>, vector<16x384xf32>
    %c0_1 = arith.constant 0 : index
    %c0_2 = arith.constant 0 : index
    %1 = vector.load %arg2[%c0_1, %c0_2] : memref<1x384xf32, #tpu.memory_space<vmem>>, vector<1x384xf32>
    %c0_3 = arith.constant 0 : index
    %c0_4 = arith.constant 0 : index
    %2 = vector.load %arg3[%c0_3, %c0_4] : memref<1x384xf32, #tpu.memory_space<vmem>>, vector<1x384xf32>
    %cst = arith.constant dense<0.000000e+00> : vector<16xf32>
    %3 = vector.multi_reduction <add>, %0, %cst [1] : vector<16x384xf32> to vector<16xf32>
    %4 = vector.shape_cast %3 : vector<16xf32> to vector<16x1xf32>
    %cst_5 = arith.constant 3.840000e+02 : f32
    %5 = vector.broadcast %cst_5 : f32 to vector<16x1xf32>
    %6 = arith.divf %4, %5 : vector<16x1xf32>
    %7 = vector.broadcast %6 : vector<16x1xf32> to vector<16x384xf32>
    %8 = arith.subf %0, %7 : vector<16x384xf32>
    %9 = arith.mulf %8, %8 : vector<16x384xf32>
    %cst_6 = arith.constant dense<0.000000e+00> : vector<16xf32>
    %10 = vector.multi_reduction <add>, %9, %cst_6 [1] : vector<16x384xf32> to vector<16xf32>
    %11 = vector.shape_cast %10 : vector<16xf32> to vector<16x1xf32>
    %cst_7 = arith.constant 3.840000e+02 : f32
    %12 = vector.broadcast %cst_7 : f32 to vector<16x1xf32>
    %13 = arith.divf %11, %12 : vector<16x1xf32>
    %14 = vector.broadcast %6 : vector<16x1xf32> to vector<16x384xf32>
    %15 = arith.subf %0, %14 : vector<16x384xf32>
    %cst_8 = arith.constant 9.99999996E-13 : f32
    %16 = vector.broadcast %cst_8 : f32 to vector<16x1xf32>
    %17 = arith.addf %13, %16 : vector<16x1xf32>
    %18 = math.rsqrt %17 : vector<16x1xf32>
    %19 = vector.broadcast %18 : vector<16x1xf32> to vector<16x384xf32>
    %20 = arith.mulf %15, %19 : vector<16x384xf32>
    %21 = vector.broadcast %1 : vector<1x384xf32> to vector<16x384xf32>
    %22 = arith.mulf %20, %21 : vector<16x384xf32>
    %23 = vector.broadcast %2 : vector<1x384xf32> to vector<16x384xf32>
    %24 = arith.addf %22, %23 : vector<16x384xf32>
    %c0_9 = arith.constant 0 : index
    %c0_10 = arith.constant 0 : index
    %25 = vector.load %arg4[%c0_9, %c0_10] : memref<16x384xf32, #tpu.memory_space<vmem>>, vector<16x384xf32>
    tpu.vector_store %arg4[%c0_9, %c0_10], %24 {strides = array<i32>} : memref<16x384xf32, #tpu.memory_space<vmem>>, vector<16x384xf32>,
    return
  }
  func.func @transform_0(%arg0: i32) -> (i32, i32) {
    %c0_i32 = arith.constant 0 : i32
    %c0_i32_0 = arith.constant 0 : i32
    %c0_i32_1 = arith.constant 0 : i32
    return %c0_i32, %c0_i32_0 : i32, i32
  }
  func.func @transform_1(%arg0: i32) -> (i32, i32) {
    %c0_i32 = arith.constant 0 : i32
    %c0_i32_0 = arith.constant 0 : i32
    %c0_i32_1 = arith.constant 0 : i32
    return %c0_i32, %c0_i32_0 : i32, i32
  }
  func.func @transform_2(%arg0: i32) -> (i32, i32) {
    %c0_i32 = arith.constant 0 : i32
    %c0_i32_0 = arith.constant 0 : i32
    %c0_i32_1 = arith.constant 0 : i32
    return %c0_i32, %c0_i32_0 : i32, i32
  }
  func.func @transform_3(%arg0: i32) -> (i32, i32) {
    %c0_i32 = arith.constant 0 : i32
    %c0_i32_0 = arith.constant 0 : i32
    %c0_i32_1 = arith.constant 0 : i32
    return %c0_i32, %c0_i32_0 : i32, i32
  }
}

module attributes {stable_mosaic.version = 11 : i64} {
  func.func @_attn_block_kernel(%arg0: i32, %arg1: memref<16x384xf32, #tpu.memory_space<vmem>>, %arg2: memref<384x2304xbf16, #tpu.memory_space<vmem>>, %arg3: memref<1x2304xf32, #tpu.memory_space<vmem>>, %arg4: memref<768x384xbf16, #tpu.memory_space<vmem>>, %arg5: memref<1x384xf32, #tpu.memory_space<vmem>>, %arg6: memref<2x8xf32, #tpu.memory_space<vmem>>, %arg7: memref<1x384xf32, #tpu.memory_space<vmem>>, %arg8: memref<1x384xf32, #tpu.memory_space<vmem>>, %arg9: memref<16x384xf32, #tpu.memory_space<vmem>>, %arg10: memref<16x2304xf32, #tpu.memory_space<vmem>>) attributes {dimension_semantics = [#tpu.dimension_semantics<arbitrary>], iteration_bounds = array<i64: 1>, scalar_prefetch = 0 : i64, scratch_operands = 1 : i64, tpu.core_type = #tpu.core_type<tc>, window_params = [{pipeline_mode = #tpu.pipeline_mode<synchronous>, transform_indices = @transform_0, window_bounds = array<i64: 16, 384>}, {pipeline_mode = #tpu.pipeline_mode<synchronous>, transform_indices = @transform_1, window_bounds = array<i64: 384, 2304>}, {pipeline_mode = #tpu.pipeline_mode<synchronous>, transform_indices = @transform_2, window_bounds = array<i64: 1, 2304>}, {pipeline_mode = #tpu.pipeline_mode<synchronous>, transform_indices = @transform_3, window_bounds = array<i64: 768, 384>}, {pipeline_mode = #tpu.pipeline_mode<synchronous>, transform_indices = @transform_4, window_bounds = array<i64: 1, 384>}, {pipeline_mode = #tpu.pipeline_mode<synchronous>, transform_indices = @transform_5, window_bounds = array<i64: 2, 8>}, {pipeline_mode = #tpu.pipeline_mode<synchronous>, transform_indices = @transform_6, window_bounds = array<i64: 1, 384>}, {pipeline_mode = #tpu.pipeline_mode<synchronous>, transform_indices = @transform_7, window_bounds = array<i64: 1, 384>}, {pipeline_mode = #tpu.pipeline_mode<synchronous>, transform_indices = @transform_8, window_bounds = array<i64: 16, 384>}]} {
    %c0 = arith.constant 0 : index
    %c0_0 = arith.constant 0 : index
    %0 = vector.load %arg1[%c0, %c0_0] : memref<16x384xf32, #tpu.memory_space<vmem>>, vector<16x384xf32>
    %1 = arith.truncf %0 : vector<16x384xf32> to vector<16x384xbf16>
    %c0_1 = arith.constant 0 : index
    %c0_2 = arith.constant 0 : index
    %2 = vector.load %arg2[%c0_1, %c0_2] : memref<384x2304xbf16, #tpu.memory_space<vmem>>, vector<384x768xbf16>
    %cst = arith.constant dense<0.000000e+00> : vector<16x768xf32>
    %3 = tpu.matmul %1, %2, %cst {dimension_numbers = #tpu.dot_dimension_numbers<[1], [0], [0], [1], [0, 0, 1, 1], [], []>} : vector<16x384xbf16>, vector<384x768xbf16>, vector<16x768xf32> -> vector<16x768xf32>
    %c0_3 = arith.constant 0 : index
    %c0_4 = arith.constant 0 : index
    %4 = vector.load %arg3[%c0_3, %c0_4] : memref<1x2304xf32, #tpu.memory_space<vmem>>, vector<1x768xf32>
    %5 = vector.broadcast %4 : vector<1x768xf32> to vector<16x768xf32>
    %6 = arith.addf %3, %5 : vector<16x768xf32>
    %c0_5 = arith.constant 0 : index
    %c0_6 = arith.constant 0 : index
    %7 = vector.load %arg10[%c0_5, %c0_6] : memref<16x2304xf32, #tpu.memory_space<vmem>>, vector<16x768xf32>
    tpu.vector_store %arg10[%c0_5, %c0_6], %6 {strides = array<i32>} : memref<16x2304xf32, #tpu.memory_space<vmem>>, vector<16x768xf32>,
    %c0_7 = arith.constant 0 : index
    %c768 = arith.constant 768 : index
    %8 = vector.load %arg2[%c0_7, %c768] : memref<384x2304xbf16, #tpu.memory_space<vmem>>, vector<384x768xbf16>
    %cst_8 = arith.constant dense<0.000000e+00> : vector<16x768xf32>
    %9 = tpu.matmul %1, %8, %cst_8 {dimension_numbers = #tpu.dot_dimension_numbers<[1], [0], [0], [1], [0, 0, 1, 1], [], []>} : vector<16x384xbf16>, vector<384x768xbf16>, vector<16x768xf32> -> vector<16x768xf32>
    %c0_9 = arith.constant 0 : index
    %c768_10 = arith.constant 768 : index
    %10 = vector.load %arg3[%c0_9, %c768_10] : memref<1x2304xf32, #tpu.memory_space<vmem>>, vector<1x768xf32>
    %11 = vector.broadcast %10 : vector<1x768xf32> to vector<16x768xf32>
    %12 = arith.addf %9, %11 : vector<16x768xf32>
    %c0_11 = arith.constant 0 : index
    %c768_12 = arith.constant 768 : index
    %13 = vector.load %arg10[%c0_11, %c768_12] : memref<16x2304xf32, #tpu.memory_space<vmem>>, vector<16x768xf32>
    tpu.vector_store %arg10[%c0_11, %c768_12], %12 {strides = array<i32>} : memref<16x2304xf32, #tpu.memory_space<vmem>>, vector<16x768xf32>,
    %c0_13 = arith.constant 0 : index
    %c1536 = arith.constant 1536 : index
    %14 = vector.load %arg2[%c0_13, %c1536] : memref<384x2304xbf16, #tpu.memory_space<vmem>>, vector<384x768xbf16>
    %cst_14 = arith.constant dense<0.000000e+00> : vector<16x768xf32>
    %15 = tpu.matmul %1, %14, %cst_14 {dimension_numbers = #tpu.dot_dimension_numbers<[1], [0], [0], [1], [0, 0, 1, 1], [], []>} : vector<16x384xbf16>, vector<384x768xbf16>, vector<16x768xf32> -> vector<16x768xf32>
    %c0_15 = arith.constant 0 : index
    %c1536_16 = arith.constant 1536 : index
    %16 = vector.load %arg3[%c0_15, %c1536_16] : memref<1x2304xf32, #tpu.memory_space<vmem>>, vector<1x768xf32>
    %17 = vector.broadcast %16 : vector<1x768xf32> to vector<16x768xf32>
    %18 = arith.addf %15, %17 : vector<16x768xf32>
    %c0_17 = arith.constant 0 : index
    %c1536_18 = arith.constant 1536 : index
    %19 = vector.load %arg10[%c0_17, %c1536_18] : memref<16x2304xf32, #tpu.memory_space<vmem>>, vector<16x768xf32>
    tpu.vector_store %arg10[%c0_17, %c1536_18], %18 {strides = array<i32>} : memref<16x2304xf32, #tpu.memory_space<vmem>>, vector<16x768xf32>,
    %c0_19 = arith.constant 0 : index
    %c0_20 = arith.constant 0 : index
    %20 = vector.load %arg6[%c0_19, %c0_20] : memref<2x8xf32, #tpu.memory_space<vmem>>, vector<1x8xf32>
    %c0_21 = arith.constant 0 : index
    %c0_22 = arith.constant 0 : index
    %21 = vector.load %arg10[%c0_21, %c0_22] : memref<16x2304xf32, #tpu.memory_space<vmem>>, vector<8x128xf32>
    %c0_23 = arith.constant 0 : index
    %c768_24 = arith.constant 768 : index
    %22 = vector.load %arg10[%c0_23, %c768_24] : memref<16x2304xf32, #tpu.memory_space<vmem>>, vector<8x128xf32>
    %c0_25 = arith.constant 0 : index
    %c1536_26 = arith.constant 1536 : index
    %23 = vector.load %arg10[%c0_25, %c1536_26] : memref<16x2304xf32, #tpu.memory_space<vmem>>, vector<8x128xf32>
    %24 = tpu.transpose %22, [1, 0] : vector<8x128xf32> -> vector<128x8xf32>
    %cst_27 = arith.constant dense<0.000000e+00> : vector<8x8xf32>
    %25 = tpu.matmul %21, %24, %cst_27 {dimension_numbers = #tpu.dot_dimension_numbers<[1], [0], [0], [1], [0, 0, 1, 1], [], []>} : vector<8x128xf32>, vector<128x8xf32>, vector<8x8xf32> -> vector<8x8xf32>
    %26 = vector.broadcast %20 : vector<1x8xf32> to vector<8x8xf32>
    %27 = arith.addf %25, %26 : vector<8x8xf32>
    %cst_28 = arith.constant dense<0xFF800000> : vector<8xf32>
    %28 = vector.multi_reduction <maximumf>, %27, %cst_28 [1] : vector<8x8xf32> to vector<8xf32>
    %29 = vector.shape_cast %28 : vector<8xf32> to vector<8x1xf32>
    %30 = vector.broadcast %29 : vector<8x1xf32> to vector<8x8xf32>
    %31 = arith.subf %27, %30 : vector<8x8xf32>
    %32 = math.exp %31 : vector<8x8xf32>
    %cst_29 = arith.constant dense<0.000000e+00> : vector<8xf32>
    %33 = vector.multi_reduction <add>, %32, %cst_29 [1] : vector<8x8xf32> to vector<8xf32>
    %34 = vector.shape_cast %33 : vector<8xf32> to vector<8x1xf32>
    %35 = tpu.reciprocal %34 {approx = true} : vector<8x1xf32> -> vector<8x1xf32>
    %36 = vector.broadcast %35 : vector<8x1xf32> to vector<8x8xf32>
    %37 = arith.mulf %32, %36 : vector<8x8xf32>
    %cst_30 = arith.constant dense<0.000000e+00> : vector<8x128xf32>
    %38 = tpu.matmul %37, %23, %cst_30 {dimension_numbers = #tpu.dot_dimension_numbers<[1], [0], [0], [1], [0, 0, 1, 1], [], []>} : vector<8x8xf32>, vector<8x128xf32>, vector<8x128xf32> -> vector<8x128xf32>
    %39 = arith.truncf %38 : vector<8x128xf32> to vector<8x128xbf16>
    %c0_31 = arith.constant 0 : index
    %c0_32 = arith.constant 0 : index
    %40 = vector.load %arg4[%c0_31, %c0_32] : memref<768x384xbf16, #tpu.memory_space<vmem>>, vector<128x384xbf16>
    %cst_33 = arith.constant dense<0.000000e+00> : vector<8x384xf32>
    %41 = tpu.matmul %39, %40, %cst_33 {dimension_numbers = #tpu.dot_dimension_numbers<[1], [0], [0], [1], [0, 0, 1, 1], [], []>} : vector<8x128xbf16>, vector<128x384xbf16>, vector<8x384xf32> -> vector<8x384xf32>
    %c0_34 = arith.constant 0 : index
    %c128 = arith.constant 128 : index
    %42 = vector.load %arg10[%c0_34, %c128] : memref<16x2304xf32, #tpu.memory_space<vmem>>, vector<8x128xf32>
    %c0_35 = arith.constant 0 : index
    %c896 = arith.constant 896 : index
    %43 = vector.load %arg10[%c0_35, %c896] : memref<16x2304xf32, #tpu.memory_space<vmem>>, vector<8x128xf32>
    %c0_36 = arith.constant 0 : index
    %c1664 = arith.constant 1664 : index
    %44 = vector.load %arg10[%c0_36, %c1664] : memref<16x2304xf32, #tpu.memory_space<vmem>>, vector<8x128xf32>
    %45 = tpu.transpose %43, [1, 0] : vector<8x128xf32> -> vector<128x8xf32>
    %cst_37 = arith.constant dense<0.000000e+00> : vector<8x8xf32>
    %46 = tpu.matmul %42, %45, %cst_37 {dimension_numbers = #tpu.dot_dimension_numbers<[1], [0], [0], [1], [0, 0, 1, 1], [], []>} : vector<8x128xf32>, vector<128x8xf32>, vector<8x8xf32> -> vector<8x8xf32>
    %47 = vector.broadcast %20 : vector<1x8xf32> to vector<8x8xf32>
    %48 = arith.addf %46, %47 : vector<8x8xf32>
    %cst_38 = arith.constant dense<0xFF800000> : vector<8xf32>
    %49 = vector.multi_reduction <maximumf>, %48, %cst_38 [1] : vector<8x8xf32> to vector<8xf32>
    %50 = vector.shape_cast %49 : vector<8xf32> to vector<8x1xf32>
    %51 = vector.broadcast %50 : vector<8x1xf32> to vector<8x8xf32>
    %52 = arith.subf %48, %51 : vector<8x8xf32>
    %53 = math.exp %52 : vector<8x8xf32>
    %cst_39 = arith.constant dense<0.000000e+00> : vector<8xf32>
    %54 = vector.multi_reduction <add>, %53, %cst_39 [1] : vector<8x8xf32> to vector<8xf32>
    %55 = vector.shape_cast %54 : vector<8xf32> to vector<8x1xf32>
    %56 = tpu.reciprocal %55 {approx = true} : vector<8x1xf32> -> vector<8x1xf32>
    %57 = vector.broadcast %56 : vector<8x1xf32> to vector<8x8xf32>
    %58 = arith.mulf %53, %57 : vector<8x8xf32>
    %cst_40 = arith.constant dense<0.000000e+00> : vector<8x128xf32>
    %59 = tpu.matmul %58, %44, %cst_40 {dimension_numbers = #tpu.dot_dimension_numbers<[1], [0], [0], [1], [0, 0, 1, 1], [], []>} : vector<8x8xf32>, vector<8x128xf32>, vector<8x128xf32> -> vector<8x128xf32>
    %60 = arith.truncf %59 : vector<8x128xf32> to vector<8x128xbf16>
    %c128_41 = arith.constant 128 : index
    %c0_42 = arith.constant 0 : index
    %61 = vector.load %arg4[%c128_41, %c0_42] : memref<768x384xbf16, #tpu.memory_space<vmem>>, vector<128x384xbf16>
    %cst_43 = arith.constant dense<0.000000e+00> : vector<8x384xf32>
    %62 = tpu.matmul %60, %61, %cst_43 {dimension_numbers = #tpu.dot_dimension_numbers<[1], [0], [0], [1], [0, 0, 1, 1], [], []>} : vector<8x128xbf16>, vector<128x384xbf16>, vector<8x384xf32> -> vector<8x384xf32>
    %63 = arith.addf %41, %62 : vector<8x384xf32>
    %c0_44 = arith.constant 0 : index
    %c256 = arith.constant 256 : index
    %64 = vector.load %arg10[%c0_44, %c256] : memref<16x2304xf32, #tpu.memory_space<vmem>>, vector<8x128xf32>
    %c0_45 = arith.constant 0 : index
    %c1024 = arith.constant 1024 : index
    %65 = vector.load %arg10[%c0_45, %c1024] : memref<16x2304xf32, #tpu.memory_space<vmem>>, vector<8x128xf32>
    %c0_46 = arith.constant 0 : index
    %c1792 = arith.constant 1792 : index
    %66 = vector.load %arg10[%c0_46, %c1792] : memref<16x2304xf32, #tpu.memory_space<vmem>>, vector<8x128xf32>
    %67 = tpu.transpose %65, [1, 0] : vector<8x128xf32> -> vector<128x8xf32>
    %cst_47 = arith.constant dense<0.000000e+00> : vector<8x8xf32>
    %68 = tpu.matmul %64, %67, %cst_47 {dimension_numbers = #tpu.dot_dimension_numbers<[1], [0], [0], [1], [0, 0, 1, 1], [], []>} : vector<8x128xf32>, vector<128x8xf32>, vector<8x8xf32> -> vector<8x8xf32>
    %69 = vector.broadcast %20 : vector<1x8xf32> to vector<8x8xf32>
    %70 = arith.addf %68, %69 : vector<8x8xf32>
    %cst_48 = arith.constant dense<0xFF800000> : vector<8xf32>
    %71 = vector.multi_reduction <maximumf>, %70, %cst_48 [1] : vector<8x8xf32> to vector<8xf32>
    %72 = vector.shape_cast %71 : vector<8xf32> to vector<8x1xf32>
    %73 = vector.broadcast %72 : vector<8x1xf32> to vector<8x8xf32>
    %74 = arith.subf %70, %73 : vector<8x8xf32>
    %75 = math.exp %74 : vector<8x8xf32>
    %cst_49 = arith.constant dense<0.000000e+00> : vector<8xf32>
    %76 = vector.multi_reduction <add>, %75, %cst_49 [1] : vector<8x8xf32> to vector<8xf32>
    %77 = vector.shape_cast %76 : vector<8xf32> to vector<8x1xf32>
    %78 = tpu.reciprocal %77 {approx = true} : vector<8x1xf32> -> vector<8x1xf32>
    %79 = vector.broadcast %78 : vector<8x1xf32> to vector<8x8xf32>
    %80 = arith.mulf %75, %79 : vector<8x8xf32>
    %cst_50 = arith.constant dense<0.000000e+00> : vector<8x128xf32>
    %81 = tpu.matmul %80, %66, %cst_50 {dimension_numbers = #tpu.dot_dimension_numbers<[1], [0], [0], [1], [0, 0, 1, 1], [], []>} : vector<8x8xf32>, vector<8x128xf32>, vector<8x128xf32> -> vector<8x128xf32>
    %82 = arith.truncf %81 : vector<8x128xf32> to vector<8x128xbf16>
    %c256_51 = arith.constant 256 : index
    %c0_52 = arith.constant 0 : index
    %83 = vector.load %arg4[%c256_51, %c0_52] : memref<768x384xbf16, #tpu.memory_space<vmem>>, vector<128x384xbf16>
    %cst_53 = arith.constant dense<0.000000e+00> : vector<8x384xf32>
    %84 = tpu.matmul %82, %83, %cst_53 {dimension_numbers = #tpu.dot_dimension_numbers<[1], [0], [0], [1], [0, 0, 1, 1], [], []>} : vector<8x128xbf16>, vector<128x384xbf16>, vector<8x384xf32> -> vector<8x384xf32>
    %85 = arith.addf %63, %84 : vector<8x384xf32>
    %c0_54 = arith.constant 0 : index
    %c384 = arith.constant 384 : index
    %86 = vector.load %arg10[%c0_54, %c384] : memref<16x2304xf32, #tpu.memory_space<vmem>>, vector<8x128xf32>
    %c0_55 = arith.constant 0 : index
    %c1152 = arith.constant 1152 : index
    %87 = vector.load %arg10[%c0_55, %c1152] : memref<16x2304xf32, #tpu.memory_space<vmem>>, vector<8x128xf32>
    %c0_56 = arith.constant 0 : index
    %c1920 = arith.constant 1920 : index
    %88 = vector.load %arg10[%c0_56, %c1920] : memref<16x2304xf32, #tpu.memory_space<vmem>>, vector<8x128xf32>
    %89 = tpu.transpose %87, [1, 0] : vector<8x128xf32> -> vector<128x8xf32>
    %cst_57 = arith.constant dense<0.000000e+00> : vector<8x8xf32>
    %90 = tpu.matmul %86, %89, %cst_57 {dimension_numbers = #tpu.dot_dimension_numbers<[1], [0], [0], [1], [0, 0, 1, 1], [], []>} : vector<8x128xf32>, vector<128x8xf32>, vector<8x8xf32> -> vector<8x8xf32>
    %91 = vector.broadcast %20 : vector<1x8xf32> to vector<8x8xf32>
    %92 = arith.addf %90, %91 : vector<8x8xf32>
    %cst_58 = arith.constant dense<0xFF800000> : vector<8xf32>
    %93 = vector.multi_reduction <maximumf>, %92, %cst_58 [1] : vector<8x8xf32> to vector<8xf32>
    %94 = vector.shape_cast %93 : vector<8xf32> to vector<8x1xf32>
    %95 = vector.broadcast %94 : vector<8x1xf32> to vector<8x8xf32>
    %96 = arith.subf %92, %95 : vector<8x8xf32>
    %97 = math.exp %96 : vector<8x8xf32>
    %cst_59 = arith.constant dense<0.000000e+00> : vector<8xf32>
    %98 = vector.multi_reduction <add>, %97, %cst_59 [1] : vector<8x8xf32> to vector<8xf32>
    %99 = vector.shape_cast %98 : vector<8xf32> to vector<8x1xf32>
    %100 = tpu.reciprocal %99 {approx = true} : vector<8x1xf32> -> vector<8x1xf32>
    %101 = vector.broadcast %100 : vector<8x1xf32> to vector<8x8xf32>
    %102 = arith.mulf %97, %101 : vector<8x8xf32>
    %cst_60 = arith.constant dense<0.000000e+00> : vector<8x128xf32>
    %103 = tpu.matmul %102, %88, %cst_60 {dimension_numbers = #tpu.dot_dimension_numbers<[1], [0], [0], [1], [0, 0, 1, 1], [], []>} : vector<8x8xf32>, vector<8x128xf32>, vector<8x128xf32> -> vector<8x128xf32>
    %104 = arith.truncf %103 : vector<8x128xf32> to vector<8x128xbf16>
    %c384_61 = arith.constant 384 : index
    %c0_62 = arith.constant 0 : index
    %105 = vector.load %arg4[%c384_61, %c0_62] : memref<768x384xbf16, #tpu.memory_space<vmem>>, vector<128x384xbf16>
    %cst_63 = arith.constant dense<0.000000e+00> : vector<8x384xf32>
    %106 = tpu.matmul %104, %105, %cst_63 {dimension_numbers = #tpu.dot_dimension_numbers<[1], [0], [0], [1], [0, 0, 1, 1], [], []>} : vector<8x128xbf16>, vector<128x384xbf16>, vector<8x384xf32> -> vector<8x384xf32>
    %107 = arith.addf %85, %106 : vector<8x384xf32>
    %c0_64 = arith.constant 0 : index
    %c512 = arith.constant 512 : index
    %108 = vector.load %arg10[%c0_64, %c512] : memref<16x2304xf32, #tpu.memory_space<vmem>>, vector<8x128xf32>
    %c0_65 = arith.constant 0 : index
    %c1280 = arith.constant 1280 : index
    %109 = vector.load %arg10[%c0_65, %c1280] : memref<16x2304xf32, #tpu.memory_space<vmem>>, vector<8x128xf32>
    %c0_66 = arith.constant 0 : index
    %c2048 = arith.constant 2048 : index
    %110 = vector.load %arg10[%c0_66, %c2048] : memref<16x2304xf32, #tpu.memory_space<vmem>>, vector<8x128xf32>
    %111 = tpu.transpose %109, [1, 0] : vector<8x128xf32> -> vector<128x8xf32>
    %cst_67 = arith.constant dense<0.000000e+00> : vector<8x8xf32>
    %112 = tpu.matmul %108, %111, %cst_67 {dimension_numbers = #tpu.dot_dimension_numbers<[1], [0], [0], [1], [0, 0, 1, 1], [], []>} : vector<8x128xf32>, vector<128x8xf32>, vector<8x8xf32> -> vector<8x8xf32>
    %113 = vector.broadcast %20 : vector<1x8xf32> to vector<8x8xf32>
    %114 = arith.addf %112, %113 : vector<8x8xf32>
    %cst_68 = arith.constant dense<0xFF800000> : vector<8xf32>
    %115 = vector.multi_reduction <maximumf>, %114, %cst_68 [1] : vector<8x8xf32> to vector<8xf32>
    %116 = vector.shape_cast %115 : vector<8xf32> to vector<8x1xf32>
    %117 = vector.broadcast %116 : vector<8x1xf32> to vector<8x8xf32>
    %118 = arith.subf %114, %117 : vector<8x8xf32>
    %119 = math.exp %118 : vector<8x8xf32>
    %cst_69 = arith.constant dense<0.000000e+00> : vector<8xf32>
    %120 = vector.multi_reduction <add>, %119, %cst_69 [1] : vector<8x8xf32> to vector<8xf32>
    %121 = vector.shape_cast %120 : vector<8xf32> to vector<8x1xf32>
    %122 = tpu.reciprocal %121 {approx = true} : vector<8x1xf32> -> vector<8x1xf32>
    %123 = vector.broadcast %122 : vector<8x1xf32> to vector<8x8xf32>
    %124 = arith.mulf %119, %123 : vector<8x8xf32>
    %cst_70 = arith.constant dense<0.000000e+00> : vector<8x128xf32>
    %125 = tpu.matmul %124, %110, %cst_70 {dimension_numbers = #tpu.dot_dimension_numbers<[1], [0], [0], [1], [0, 0, 1, 1], [], []>} : vector<8x8xf32>, vector<8x128xf32>, vector<8x128xf32> -> vector<8x128xf32>
    %126 = arith.truncf %125 : vector<8x128xf32> to vector<8x128xbf16>
    %c512_71 = arith.constant 512 : index
    %c0_72 = arith.constant 0 : index
    %127 = vector.load %arg4[%c512_71, %c0_72] : memref<768x384xbf16, #tpu.memory_space<vmem>>, vector<128x384xbf16>
    %cst_73 = arith.constant dense<0.000000e+00> : vector<8x384xf32>
    %128 = tpu.matmul %126, %127, %cst_73 {dimension_numbers = #tpu.dot_dimension_numbers<[1], [0], [0], [1], [0, 0, 1, 1], [], []>} : vector<8x128xbf16>, vector<128x384xbf16>, vector<8x384xf32> -> vector<8x384xf32>
    %129 = arith.addf %107, %128 : vector<8x384xf32>
    %c0_74 = arith.constant 0 : index
    %c640 = arith.constant 640 : index
    %130 = vector.load %arg10[%c0_74, %c640] : memref<16x2304xf32, #tpu.memory_space<vmem>>, vector<8x128xf32>
    %c0_75 = arith.constant 0 : index
    %c1408 = arith.constant 1408 : index
    %131 = vector.load %arg10[%c0_75, %c1408] : memref<16x2304xf32, #tpu.memory_space<vmem>>, vector<8x128xf32>
    %c0_76 = arith.constant 0 : index
    %c2176 = arith.constant 2176 : index
    %132 = vector.load %arg10[%c0_76, %c2176] : memref<16x2304xf32, #tpu.memory_space<vmem>>, vector<8x128xf32>
    %133 = tpu.transpose %131, [1, 0] : vector<8x128xf32> -> vector<128x8xf32>
    %cst_77 = arith.constant dense<0.000000e+00> : vector<8x8xf32>
    %134 = tpu.matmul %130, %133, %cst_77 {dimension_numbers = #tpu.dot_dimension_numbers<[1], [0], [0], [1], [0, 0, 1, 1], [], []>} : vector<8x128xf32>, vector<128x8xf32>, vector<8x8xf32> -> vector<8x8xf32>
    %135 = vector.broadcast %20 : vector<1x8xf32> to vector<8x8xf32>
    %136 = arith.addf %134, %135 : vector<8x8xf32>
    %cst_78 = arith.constant dense<0xFF800000> : vector<8xf32>
    %137 = vector.multi_reduction <maximumf>, %136, %cst_78 [1] : vector<8x8xf32> to vector<8xf32>
    %138 = vector.shape_cast %137 : vector<8xf32> to vector<8x1xf32>
    %139 = vector.broadcast %138 : vector<8x1xf32> to vector<8x8xf32>
    %140 = arith.subf %136, %139 : vector<8x8xf32>
    %141 = math.exp %140 : vector<8x8xf32>
    %cst_79 = arith.constant dense<0.000000e+00> : vector<8xf32>
    %142 = vector.multi_reduction <add>, %141, %cst_79 [1] : vector<8x8xf32> to vector<8xf32>
    %143 = vector.shape_cast %142 : vector<8xf32> to vector<8x1xf32>
    %144 = tpu.reciprocal %143 {approx = true} : vector<8x1xf32> -> vector<8x1xf32>
    %145 = vector.broadcast %144 : vector<8x1xf32> to vector<8x8xf32>
    %146 = arith.mulf %141, %145 : vector<8x8xf32>
    %cst_80 = arith.constant dense<0.000000e+00> : vector<8x128xf32>
    %147 = tpu.matmul %146, %132, %cst_80 {dimension_numbers = #tpu.dot_dimension_numbers<[1], [0], [0], [1], [0, 0, 1, 1], [], []>} : vector<8x8xf32>, vector<8x128xf32>, vector<8x128xf32> -> vector<8x128xf32>
    %148 = arith.truncf %147 : vector<8x128xf32> to vector<8x128xbf16>
    %c640_81 = arith.constant 640 : index
    %c0_82 = arith.constant 0 : index
    %149 = vector.load %arg4[%c640_81, %c0_82] : memref<768x384xbf16, #tpu.memory_space<vmem>>, vector<128x384xbf16>
    %cst_83 = arith.constant dense<0.000000e+00> : vector<8x384xf32>
    %150 = tpu.matmul %148, %149, %cst_83 {dimension_numbers = #tpu.dot_dimension_numbers<[1], [0], [0], [1], [0, 0, 1, 1], [], []>} : vector<8x128xbf16>, vector<128x384xbf16>, vector<8x384xf32> -> vector<8x384xf32>
    %151 = arith.addf %129, %150 : vector<8x384xf32>
    %c1 = arith.constant 1 : index
    %c0_84 = arith.constant 0 : index
    %152 = vector.load %arg6[%c1, %c0_84] : memref<2x8xf32, #tpu.memory_space<vmem>>, vector<1x8xf32>
    %c8 = arith.constant 8 : index
    %c0_85 = arith.constant 0 : index
    %153 = vector.load %arg10[%c8, %c0_85] : memref<16x2304xf32, #tpu.memory_space<vmem>>, vector<8x128xf32>
    %c8_86 = arith.constant 8 : index
    %c768_87 = arith.constant 768 : index
    %154 = vector.load %arg10[%c8_86, %c768_87] : memref<16x2304xf32, #tpu.memory_space<vmem>>, vector<8x128xf32>
    %c8_88 = arith.constant 8 : index
    %c1536_89 = arith.constant 1536 : index
    %155 = vector.load %arg10[%c8_88, %c1536_89] : memref<16x2304xf32, #tpu.memory_space<vmem>>, vector<8x128xf32>
    %156 = tpu.transpose %154, [1, 0] : vector<8x128xf32> -> vector<128x8xf32>
    %cst_90 = arith.constant dense<0.000000e+00> : vector<8x8xf32>
    %157 = tpu.matmul %153, %156, %cst_90 {dimension_numbers = #tpu.dot_dimension_numbers<[1], [0], [0], [1], [0, 0, 1, 1], [], []>} : vector<8x128xf32>, vector<128x8xf32>, vector<8x8xf32> -> vector<8x8xf32>
    %158 = vector.broadcast %152 : vector<1x8xf32> to vector<8x8xf32>
    %159 = arith.addf %157, %158 : vector<8x8xf32>
    %cst_91 = arith.constant dense<0xFF800000> : vector<8xf32>
    %160 = vector.multi_reduction <maximumf>, %159, %cst_91 [1] : vector<8x8xf32> to vector<8xf32>
    %161 = vector.shape_cast %160 : vector<8xf32> to vector<8x1xf32>
    %162 = vector.broadcast %161 : vector<8x1xf32> to vector<8x8xf32>
    %163 = arith.subf %159, %162 : vector<8x8xf32>
    %164 = math.exp %163 : vector<8x8xf32>
    %cst_92 = arith.constant dense<0.000000e+00> : vector<8xf32>
    %165 = vector.multi_reduction <add>, %164, %cst_92 [1] : vector<8x8xf32> to vector<8xf32>
    %166 = vector.shape_cast %165 : vector<8xf32> to vector<8x1xf32>
    %167 = tpu.reciprocal %166 {approx = true} : vector<8x1xf32> -> vector<8x1xf32>
    %168 = vector.broadcast %167 : vector<8x1xf32> to vector<8x8xf32>
    %169 = arith.mulf %164, %168 : vector<8x8xf32>
    %cst_93 = arith.constant dense<0.000000e+00> : vector<8x128xf32>
    %170 = tpu.matmul %169, %155, %cst_93 {dimension_numbers = #tpu.dot_dimension_numbers<[1], [0], [0], [1], [0, 0, 1, 1], [], []>} : vector<8x8xf32>, vector<8x128xf32>, vector<8x128xf32> -> vector<8x128xf32>
    %171 = arith.truncf %170 : vector<8x128xf32> to vector<8x128xbf16>
    %c0_94 = arith.constant 0 : index
    %c0_95 = arith.constant 0 : index
    %172 = vector.load %arg4[%c0_94, %c0_95] : memref<768x384xbf16, #tpu.memory_space<vmem>>, vector<128x384xbf16>
    %cst_96 = arith.constant dense<0.000000e+00> : vector<8x384xf32>
    %173 = tpu.matmul %171, %172, %cst_96 {dimension_numbers = #tpu.dot_dimension_numbers<[1], [0], [0], [1], [0, 0, 1, 1], [], []>} : vector<8x128xbf16>, vector<128x384xbf16>, vector<8x384xf32> -> vector<8x384xf32>
    %c8_97 = arith.constant 8 : index
    %c128_98 = arith.constant 128 : index
    %174 = vector.load %arg10[%c8_97, %c128_98] : memref<16x2304xf32, #tpu.memory_space<vmem>>, vector<8x128xf32>
    %c8_99 = arith.constant 8 : index
    %c896_100 = arith.constant 896 : index
    %175 = vector.load %arg10[%c8_99, %c896_100] : memref<16x2304xf32, #tpu.memory_space<vmem>>, vector<8x128xf32>
    %c8_101 = arith.constant 8 : index
    %c1664_102 = arith.constant 1664 : index
    %176 = vector.load %arg10[%c8_101, %c1664_102] : memref<16x2304xf32, #tpu.memory_space<vmem>>, vector<8x128xf32>
    %177 = tpu.transpose %175, [1, 0] : vector<8x128xf32> -> vector<128x8xf32>
    %cst_103 = arith.constant dense<0.000000e+00> : vector<8x8xf32>
    %178 = tpu.matmul %174, %177, %cst_103 {dimension_numbers = #tpu.dot_dimension_numbers<[1], [0], [0], [1], [0, 0, 1, 1], [], []>} : vector<8x128xf32>, vector<128x8xf32>, vector<8x8xf32> -> vector<8x8xf32>
    %179 = vector.broadcast %152 : vector<1x8xf32> to vector<8x8xf32>
    %180 = arith.addf %178, %179 : vector<8x8xf32>
    %cst_104 = arith.constant dense<0xFF800000> : vector<8xf32>
    %181 = vector.multi_reduction <maximumf>, %180, %cst_104 [1] : vector<8x8xf32> to vector<8xf32>
    %182 = vector.shape_cast %181 : vector<8xf32> to vector<8x1xf32>
    %183 = vector.broadcast %182 : vector<8x1xf32> to vector<8x8xf32>
    %184 = arith.subf %180, %183 : vector<8x8xf32>
    %185 = math.exp %184 : vector<8x8xf32>
    %cst_105 = arith.constant dense<0.000000e+00> : vector<8xf32>
    %186 = vector.multi_reduction <add>, %185, %cst_105 [1] : vector<8x8xf32> to vector<8xf32>
    %187 = vector.shape_cast %186 : vector<8xf32> to vector<8x1xf32>
    %188 = tpu.reciprocal %187 {approx = true} : vector<8x1xf32> -> vector<8x1xf32>
    %189 = vector.broadcast %188 : vector<8x1xf32> to vector<8x8xf32>
    %190 = arith.mulf %185, %189 : vector<8x8xf32>
    %cst_106 = arith.constant dense<0.000000e+00> : vector<8x128xf32>
    %191 = tpu.matmul %190, %176, %cst_106 {dimension_numbers = #tpu.dot_dimension_numbers<[1], [0], [0], [1], [0, 0, 1, 1], [], []>} : vector<8x8xf32>, vector<8x128xf32>, vector<8x128xf32> -> vector<8x128xf32>
    %192 = arith.truncf %191 : vector<8x128xf32> to vector<8x128xbf16>
    %c128_107 = arith.constant 128 : index
    %c0_108 = arith.constant 0 : index
    %193 = vector.load %arg4[%c128_107, %c0_108] : memref<768x384xbf16, #tpu.memory_space<vmem>>, vector<128x384xbf16>
    %cst_109 = arith.constant dense<0.000000e+00> : vector<8x384xf32>
    %194 = tpu.matmul %192, %193, %cst_109 {dimension_numbers = #tpu.dot_dimension_numbers<[1], [0], [0], [1], [0, 0, 1, 1], [], []>} : vector<8x128xbf16>, vector<128x384xbf16>, vector<8x384xf32> -> vector<8x384xf32>
    %195 = arith.addf %173, %194 : vector<8x384xf32>
    %c8_110 = arith.constant 8 : index
    %c256_111 = arith.constant 256 : index
    %196 = vector.load %arg10[%c8_110, %c256_111] : memref<16x2304xf32, #tpu.memory_space<vmem>>, vector<8x128xf32>
    %c8_112 = arith.constant 8 : index
    %c1024_113 = arith.constant 1024 : index
    %197 = vector.load %arg10[%c8_112, %c1024_113] : memref<16x2304xf32, #tpu.memory_space<vmem>>, vector<8x128xf32>
    %c8_114 = arith.constant 8 : index
    %c1792_115 = arith.constant 1792 : index
    %198 = vector.load %arg10[%c8_114, %c1792_115] : memref<16x2304xf32, #tpu.memory_space<vmem>>, vector<8x128xf32>
    %199 = tpu.transpose %197, [1, 0] : vector<8x128xf32> -> vector<128x8xf32>
    %cst_116 = arith.constant dense<0.000000e+00> : vector<8x8xf32>
    %200 = tpu.matmul %196, %199, %cst_116 {dimension_numbers = #tpu.dot_dimension_numbers<[1], [0], [0], [1], [0, 0, 1, 1], [], []>} : vector<8x128xf32>, vector<128x8xf32>, vector<8x8xf32> -> vector<8x8xf32>
    %201 = vector.broadcast %152 : vector<1x8xf32> to vector<8x8xf32>
    %202 = arith.addf %200, %201 : vector<8x8xf32>
    %cst_117 = arith.constant dense<0xFF800000> : vector<8xf32>
    %203 = vector.multi_reduction <maximumf>, %202, %cst_117 [1] : vector<8x8xf32> to vector<8xf32>
    %204 = vector.shape_cast %203 : vector<8xf32> to vector<8x1xf32>
    %205 = vector.broadcast %204 : vector<8x1xf32> to vector<8x8xf32>
    %206 = arith.subf %202, %205 : vector<8x8xf32>
    %207 = math.exp %206 : vector<8x8xf32>
    %cst_118 = arith.constant dense<0.000000e+00> : vector<8xf32>
    %208 = vector.multi_reduction <add>, %207, %cst_118 [1] : vector<8x8xf32> to vector<8xf32>
    %209 = vector.shape_cast %208 : vector<8xf32> to vector<8x1xf32>
    %210 = tpu.reciprocal %209 {approx = true} : vector<8x1xf32> -> vector<8x1xf32>
    %211 = vector.broadcast %210 : vector<8x1xf32> to vector<8x8xf32>
    %212 = arith.mulf %207, %211 : vector<8x8xf32>
    %cst_119 = arith.constant dense<0.000000e+00> : vector<8x128xf32>
    %213 = tpu.matmul %212, %198, %cst_119 {dimension_numbers = #tpu.dot_dimension_numbers<[1], [0], [0], [1], [0, 0, 1, 1], [], []>} : vector<8x8xf32>, vector<8x128xf32>, vector<8x128xf32> -> vector<8x128xf32>
    %214 = arith.truncf %213 : vector<8x128xf32> to vector<8x128xbf16>
    %c256_120 = arith.constant 256 : index
    %c0_121 = arith.constant 0 : index
    %215 = vector.load %arg4[%c256_120, %c0_121] : memref<768x384xbf16, #tpu.memory_space<vmem>>, vector<128x384xbf16>
    %cst_122 = arith.constant dense<0.000000e+00> : vector<8x384xf32>
    %216 = tpu.matmul %214, %215, %cst_122 {dimension_numbers = #tpu.dot_dimension_numbers<[1], [0], [0], [1], [0, 0, 1, 1], [], []>} : vector<8x128xbf16>, vector<128x384xbf16>, vector<8x384xf32> -> vector<8x384xf32>
    %217 = arith.addf %195, %216 : vector<8x384xf32>
    %c8_123 = arith.constant 8 : index
    %c384_124 = arith.constant 384 : index
    %218 = vector.load %arg10[%c8_123, %c384_124] : memref<16x2304xf32, #tpu.memory_space<vmem>>, vector<8x128xf32>
    %c8_125 = arith.constant 8 : index
    %c1152_126 = arith.constant 1152 : index
    %219 = vector.load %arg10[%c8_125, %c1152_126] : memref<16x2304xf32, #tpu.memory_space<vmem>>, vector<8x128xf32>
    %c8_127 = arith.constant 8 : index
    %c1920_128 = arith.constant 1920 : index
    %220 = vector.load %arg10[%c8_127, %c1920_128] : memref<16x2304xf32, #tpu.memory_space<vmem>>, vector<8x128xf32>
    %221 = tpu.transpose %219, [1, 0] : vector<8x128xf32> -> vector<128x8xf32>
    %cst_129 = arith.constant dense<0.000000e+00> : vector<8x8xf32>
    %222 = tpu.matmul %218, %221, %cst_129 {dimension_numbers = #tpu.dot_dimension_numbers<[1], [0], [0], [1], [0, 0, 1, 1], [], []>} : vector<8x128xf32>, vector<128x8xf32>, vector<8x8xf32> -> vector<8x8xf32>
    %223 = vector.broadcast %152 : vector<1x8xf32> to vector<8x8xf32>
    %224 = arith.addf %222, %223 : vector<8x8xf32>
    %cst_130 = arith.constant dense<0xFF800000> : vector<8xf32>
    %225 = vector.multi_reduction <maximumf>, %224, %cst_130 [1] : vector<8x8xf32> to vector<8xf32>
    %226 = vector.shape_cast %225 : vector<8xf32> to vector<8x1xf32>
    %227 = vector.broadcast %226 : vector<8x1xf32> to vector<8x8xf32>
    %228 = arith.subf %224, %227 : vector<8x8xf32>
    %229 = math.exp %228 : vector<8x8xf32>
    %cst_131 = arith.constant dense<0.000000e+00> : vector<8xf32>
    %230 = vector.multi_reduction <add>, %229, %cst_131 [1] : vector<8x8xf32> to vector<8xf32>
    %231 = vector.shape_cast %230 : vector<8xf32> to vector<8x1xf32>
    %232 = tpu.reciprocal %231 {approx = true} : vector<8x1xf32> -> vector<8x1xf32>
    %233 = vector.broadcast %232 : vector<8x1xf32> to vector<8x8xf32>
    %234 = arith.mulf %229, %233 : vector<8x8xf32>
    %cst_132 = arith.constant dense<0.000000e+00> : vector<8x128xf32>
    %235 = tpu.matmul %234, %220, %cst_132 {dimension_numbers = #tpu.dot_dimension_numbers<[1], [0], [0], [1], [0, 0, 1, 1], [], []>} : vector<8x8xf32>, vector<8x128xf32>, vector<8x128xf32> -> vector<8x128xf32>
    %236 = arith.truncf %235 : vector<8x128xf32> to vector<8x128xbf16>
    %c384_133 = arith.constant 384 : index
    %c0_134 = arith.constant 0 : index
    %237 = vector.load %arg4[%c384_133, %c0_134] : memref<768x384xbf16, #tpu.memory_space<vmem>>, vector<128x384xbf16>
    %cst_135 = arith.constant dense<0.000000e+00> : vector<8x384xf32>
    %238 = tpu.matmul %236, %237, %cst_135 {dimension_numbers = #tpu.dot_dimension_numbers<[1], [0], [0], [1], [0, 0, 1, 1], [], []>} : vector<8x128xbf16>, vector<128x384xbf16>, vector<8x384xf32> -> vector<8x384xf32>
    %239 = arith.addf %217, %238 : vector<8x384xf32>
    %c8_136 = arith.constant 8 : index
    %c512_137 = arith.constant 512 : index
    %240 = vector.load %arg10[%c8_136, %c512_137] : memref<16x2304xf32, #tpu.memory_space<vmem>>, vector<8x128xf32>
    %c8_138 = arith.constant 8 : index
    %c1280_139 = arith.constant 1280 : index
    %241 = vector.load %arg10[%c8_138, %c1280_139] : memref<16x2304xf32, #tpu.memory_space<vmem>>, vector<8x128xf32>
    %c8_140 = arith.constant 8 : index
    %c2048_141 = arith.constant 2048 : index
    %242 = vector.load %arg10[%c8_140, %c2048_141] : memref<16x2304xf32, #tpu.memory_space<vmem>>, vector<8x128xf32>
    %243 = tpu.transpose %241, [1, 0] : vector<8x128xf32> -> vector<128x8xf32>
    %cst_142 = arith.constant dense<0.000000e+00> : vector<8x8xf32>
    %244 = tpu.matmul %240, %243, %cst_142 {dimension_numbers = #tpu.dot_dimension_numbers<[1], [0], [0], [1], [0, 0, 1, 1], [], []>} : vector<8x128xf32>, vector<128x8xf32>, vector<8x8xf32> -> vector<8x8xf32>
    %245 = vector.broadcast %152 : vector<1x8xf32> to vector<8x8xf32>
    %246 = arith.addf %244, %245 : vector<8x8xf32>
    %cst_143 = arith.constant dense<0xFF800000> : vector<8xf32>
    %247 = vector.multi_reduction <maximumf>, %246, %cst_143 [1] : vector<8x8xf32> to vector<8xf32>
    %248 = vector.shape_cast %247 : vector<8xf32> to vector<8x1xf32>
    %249 = vector.broadcast %248 : vector<8x1xf32> to vector<8x8xf32>
    %250 = arith.subf %246, %249 : vector<8x8xf32>
    %251 = math.exp %250 : vector<8x8xf32>
    %cst_144 = arith.constant dense<0.000000e+00> : vector<8xf32>
    %252 = vector.multi_reduction <add>, %251, %cst_144 [1] : vector<8x8xf32> to vector<8xf32>
    %253 = vector.shape_cast %252 : vector<8xf32> to vector<8x1xf32>
    %254 = tpu.reciprocal %253 {approx = true} : vector<8x1xf32> -> vector<8x1xf32>
    %255 = vector.broadcast %254 : vector<8x1xf32> to vector<8x8xf32>
    %256 = arith.mulf %251, %255 : vector<8x8xf32>
    %cst_145 = arith.constant dense<0.000000e+00> : vector<8x128xf32>
    %257 = tpu.matmul %256, %242, %cst_145 {dimension_numbers = #tpu.dot_dimension_numbers<[1], [0], [0], [1], [0, 0, 1, 1], [], []>} : vector<8x8xf32>, vector<8x128xf32>, vector<8x128xf32> -> vector<8x128xf32>
    %258 = arith.truncf %257 : vector<8x128xf32> to vector<8x128xbf16>
    %c512_146 = arith.constant 512 : index
    %c0_147 = arith.constant 0 : index
    %259 = vector.load %arg4[%c512_146, %c0_147] : memref<768x384xbf16, #tpu.memory_space<vmem>>, vector<128x384xbf16>
    %cst_148 = arith.constant dense<0.000000e+00> : vector<8x384xf32>
    %260 = tpu.matmul %258, %259, %cst_148 {dimension_numbers = #tpu.dot_dimension_numbers<[1], [0], [0], [1], [0, 0, 1, 1], [], []>} : vector<8x128xbf16>, vector<128x384xbf16>, vector<8x384xf32> -> vector<8x384xf32>
    %261 = arith.addf %239, %260 : vector<8x384xf32>
    %c8_149 = arith.constant 8 : index
    %c640_150 = arith.constant 640 : index
    %262 = vector.load %arg10[%c8_149, %c640_150] : memref<16x2304xf32, #tpu.memory_space<vmem>>, vector<8x128xf32>
    %c8_151 = arith.constant 8 : index
    %c1408_152 = arith.constant 1408 : index
    %263 = vector.load %arg10[%c8_151, %c1408_152] : memref<16x2304xf32, #tpu.memory_space<vmem>>, vector<8x128xf32>
    %c8_153 = arith.constant 8 : index
    %c2176_154 = arith.constant 2176 : index
    %264 = vector.load %arg10[%c8_153, %c2176_154] : memref<16x2304xf32, #tpu.memory_space<vmem>>, vector<8x128xf32>
    %265 = tpu.transpose %263, [1, 0] : vector<8x128xf32> -> vector<128x8xf32>
    %cst_155 = arith.constant dense<0.000000e+00> : vector<8x8xf32>
    %266 = tpu.matmul %262, %265, %cst_155 {dimension_numbers = #tpu.dot_dimension_numbers<[1], [0], [0], [1], [0, 0, 1, 1], [], []>} : vector<8x128xf32>, vector<128x8xf32>, vector<8x8xf32> -> vector<8x8xf32>
    %267 = vector.broadcast %152 : vector<1x8xf32> to vector<8x8xf32>
    %268 = arith.addf %266, %267 : vector<8x8xf32>
    %cst_156 = arith.constant dense<0xFF800000> : vector<8xf32>
    %269 = vector.multi_reduction <maximumf>, %268, %cst_156 [1] : vector<8x8xf32> to vector<8xf32>
    %270 = vector.shape_cast %269 : vector<8xf32> to vector<8x1xf32>
    %271 = vector.broadcast %270 : vector<8x1xf32> to vector<8x8xf32>
    %272 = arith.subf %268, %271 : vector<8x8xf32>
    %273 = math.exp %272 : vector<8x8xf32>
    %cst_157 = arith.constant dense<0.000000e+00> : vector<8xf32>
    %274 = vector.multi_reduction <add>, %273, %cst_157 [1] : vector<8x8xf32> to vector<8xf32>
    %275 = vector.shape_cast %274 : vector<8xf32> to vector<8x1xf32>
    %276 = tpu.reciprocal %275 {approx = true} : vector<8x1xf32> -> vector<8x1xf32>
    %277 = vector.broadcast %276 : vector<8x1xf32> to vector<8x8xf32>
    %278 = arith.mulf %273, %277 : vector<8x8xf32>
    %cst_158 = arith.constant dense<0.000000e+00> : vector<8x128xf32>
    %279 = tpu.matmul %278, %264, %cst_158 {dimension_numbers = #tpu.dot_dimension_numbers<[1], [0], [0], [1], [0, 0, 1, 1], [], []>} : vector<8x8xf32>, vector<8x128xf32>, vector<8x128xf32> -> vector<8x128xf32>
    %280 = arith.truncf %279 : vector<8x128xf32> to vector<8x128xbf16>
    %c640_159 = arith.constant 640 : index
    %c0_160 = arith.constant 0 : index
    %281 = vector.load %arg4[%c640_159, %c0_160] : memref<768x384xbf16, #tpu.memory_space<vmem>>, vector<128x384xbf16>
    %cst_161 = arith.constant dense<0.000000e+00> : vector<8x384xf32>
    %282 = tpu.matmul %280, %281, %cst_161 {dimension_numbers = #tpu.dot_dimension_numbers<[1], [0], [0], [1], [0, 0, 1, 1], [], []>} : vector<8x128xbf16>, vector<128x384xbf16>, vector<8x384xf32> -> vector<8x384xf32>
    %283 = arith.addf %261, %282 : vector<8x384xf32>
    %284 = tpu.concatenate %151, %283 in 0 : vector<8x384xf32>, vector<8x384xf32> -> vector<16x384xf32>
    %c0_162 = arith.constant 0 : index
    %c0_163 = arith.constant 0 : index
    %285 = vector.load %arg5[%c0_162, %c0_163] : memref<1x384xf32, #tpu.memory_space<vmem>>, vector<1x384xf32>
    %286 = vector.broadcast %285 : vector<1x384xf32> to vector<16x384xf32>
    %287 = arith.addf %284, %286 : vector<16x384xf32>
    %288 = arith.addf %0, %287 : vector<16x384xf32>
    %c0_164 = arith.constant 0 : index
    %c0_165 = arith.constant 0 : index
    %289 = vector.load %arg7[%c0_164, %c0_165] : memref<1x384xf32, #tpu.memory_space<vmem>>, vector<1x384xf32>
    %c0_166 = arith.constant 0 : index
    %c0_167 = arith.constant 0 : index
    %290 = vector.load %arg8[%c0_166, %c0_167] : memref<1x384xf32, #tpu.memory_space<vmem>>, vector<1x384xf32>
    %cst_168 = arith.constant dense<0.000000e+00> : vector<16xf32>
    %291 = vector.multi_reduction <add>, %288, %cst_168 [1] : vector<16x384xf32> to vector<16xf32>
    %292 = vector.shape_cast %291 : vector<16xf32> to vector<16x1xf32>
    %cst_169 = arith.constant 3.840000e+02 : f32
    %293 = vector.broadcast %cst_169 : f32 to vector<16x1xf32>
    %294 = arith.divf %292, %293 : vector<16x1xf32>
    %295 = vector.broadcast %294 : vector<16x1xf32> to vector<16x384xf32>
    %296 = arith.subf %288, %295 : vector<16x384xf32>
    %297 = arith.mulf %296, %296 : vector<16x384xf32>
    %cst_170 = arith.constant dense<0.000000e+00> : vector<16xf32>
    %298 = vector.multi_reduction <add>, %297, %cst_170 [1] : vector<16x384xf32> to vector<16xf32>
    %299 = vector.shape_cast %298 : vector<16xf32> to vector<16x1xf32>
    %cst_171 = arith.constant 3.840000e+02 : f32
    %300 = vector.broadcast %cst_171 : f32 to vector<16x1xf32>
    %301 = arith.divf %299, %300 : vector<16x1xf32>
    %302 = vector.broadcast %294 : vector<16x1xf32> to vector<16x384xf32>
    %303 = arith.subf %288, %302 : vector<16x384xf32>
    %cst_172 = arith.constant 9.99999996E-13 : f32
    %304 = vector.broadcast %cst_172 : f32 to vector<16x1xf32>
    %305 = arith.addf %301, %304 : vector<16x1xf32>
    %306 = math.rsqrt %305 : vector<16x1xf32>
    %307 = vector.broadcast %306 : vector<16x1xf32> to vector<16x384xf32>
    %308 = arith.mulf %303, %307 : vector<16x384xf32>
    %309 = vector.broadcast %289 : vector<1x384xf32> to vector<16x384xf32>
    %310 = arith.mulf %308, %309 : vector<16x384xf32>
    %311 = vector.broadcast %290 : vector<1x384xf32> to vector<16x384xf32>
    %312 = arith.addf %310, %311 : vector<16x384xf32>
    %c0_173 = arith.constant 0 : index
    %c0_174 = arith.constant 0 : index
    %313 = vector.load %arg9[%c0_173, %c0_174] : memref<16x384xf32, #tpu.memory_space<vmem>>, vector<16x384xf32>
    tpu.vector_store %arg9[%c0_173, %c0_174], %312 {strides = array<i32>} : memref<16x384xf32, #tpu.memory_space<vmem>>, vector<16x384xf32>,
    return
  }
  func.func @transform_0(%arg0: i32) -> (i32, i32) {
    %c0_i32 = arith.constant 0 : i32
    %c0_i32_0 = arith.constant 0 : i32
    %c0_i32_1 = arith.constant 0 : i32
    return %c0_i32, %c0_i32_0 : i32, i32
  }
  func.func @transform_1(%arg0: i32) -> (i32, i32) {
    %c0_i32 = arith.constant 0 : i32
    %c0_i32_0 = arith.constant 0 : i32
    %c0_i32_1 = arith.constant 0 : i32
    return %c0_i32, %c0_i32_0 : i32, i32
  }
  func.func @transform_2(%arg0: i32) -> (i32, i32) {
    %c0_i32 = arith.constant 0 : i32
    %c0_i32_0 = arith.constant 0 : i32
    %c0_i32_1 = arith.constant 0 : i32
    return %c0_i32, %c0_i32_0 : i32, i32
  }
  func.func @transform_3(%arg0: i32) -> (i32, i32) {
    %c0_i32 = arith.constant 0 : i32
    %c0_i32_0 = arith.constant 0 : i32
    %c0_i32_1 = arith.constant 0 : i32
    return %c0_i32, %c0_i32_0 : i32, i32
  }
  func.func @transform_4(%arg0: i32) -> (i32, i32) {
    %c0_i32 = arith.constant 0 : i32
    %c0_i32_0 = arith.constant 0 : i32
    %c0_i32_1 = arith.constant 0 : i32
    return %c0_i32, %c0_i32_0 : i32, i32
  }
  func.func @transform_5(%arg0: i32) -> (i32, i32) {
    %c0_i32 = arith.constant 0 : i32
    %c0_i32_0 = arith.constant 0 : i32
    %c0_i32_1 = arith.constant 0 : i32
    return %c0_i32, %c0_i32_0 : i32, i32
  }
  func.func @transform_6(%arg0: i32) -> (i32, i32) {
    %c0_i32 = arith.constant 0 : i32
    %c0_i32_0 = arith.constant 0 : i32
    %c0_i32_1 = arith.constant 0 : i32
    return %c0_i32, %c0_i32_0 : i32, i32
  }
  func.func @transform_7(%arg0: i32) -> (i32, i32) {
    %c0_i32 = arith.constant 0 : i32
    %c0_i32_0 = arith.constant 0 : i32
    %c0_i32_1 = arith.constant 0 : i32
    return %c0_i32, %c0_i32_0 : i32, i32
  }
  func.func @transform_8(%arg0: i32) -> (i32, i32) {
    %c0_i32 = arith.constant 0 : i32
    %c0_i32_0 = arith.constant 0 : i32
    %c0_i32_1 = arith.constant 0 : i32
    return %c0_i32, %c0_i32_0 : i32, i32
  }
}

module attributes {stable_mosaic.version = 11 : i64} {
  func.func @_ffn_block_kernel(%arg0: i32, %arg1: memref<16x384xf32, #tpu.memory_space<vmem>>, %arg2: memref<384x1536xbf16, #tpu.memory_space<vmem>>, %arg3: memref<1x1536xf32, #tpu.memory_space<vmem>>, %arg4: memref<1536x384xbf16, #tpu.memory_space<vmem>>, %arg5: memref<1x384xf32, #tpu.memory_space<vmem>>, %arg6: memref<1x384xf32, #tpu.memory_space<vmem>>, %arg7: memref<1x384xf32, #tpu.memory_space<vmem>>, %arg8: memref<16x384xf32, #tpu.memory_space<vmem>>) attributes {dimension_semantics = [#tpu.dimension_semantics<arbitrary>], iteration_bounds = array<i64: 1>, scalar_prefetch = 0 : i64, scratch_operands = 0 : i64, tpu.core_type = #tpu.core_type<tc>, window_params = [{pipeline_mode = #tpu.pipeline_mode<synchronous>, transform_indices = @transform_0, window_bounds = array<i64: 16, 384>}, {pipeline_mode = #tpu.pipeline_mode<synchronous>, transform_indices = @transform_1, window_bounds = array<i64: 384, 1536>}, {pipeline_mode = #tpu.pipeline_mode<synchronous>, transform_indices = @transform_2, window_bounds = array<i64: 1, 1536>}, {pipeline_mode = #tpu.pipeline_mode<synchronous>, transform_indices = @transform_3, window_bounds = array<i64: 1536, 384>}, {pipeline_mode = #tpu.pipeline_mode<synchronous>, transform_indices = @transform_4, window_bounds = array<i64: 1, 384>}, {pipeline_mode = #tpu.pipeline_mode<synchronous>, transform_indices = @transform_5, window_bounds = array<i64: 1, 384>}, {pipeline_mode = #tpu.pipeline_mode<synchronous>, transform_indices = @transform_6, window_bounds = array<i64: 1, 384>}, {pipeline_mode = #tpu.pipeline_mode<synchronous>, transform_indices = @transform_7, window_bounds = array<i64: 16, 384>}]} {
    %c0 = arith.constant 0 : index
    %c0_0 = arith.constant 0 : index
    %0 = vector.load %arg1[%c0, %c0_0] : memref<16x384xf32, #tpu.memory_space<vmem>>, vector<16x384xf32>
    %1 = arith.truncf %0 : vector<16x384xf32> to vector<16x384xbf16>
    %c0_1 = arith.constant 0 : index
    %c0_2 = arith.constant 0 : index
    %2 = vector.load %arg2[%c0_1, %c0_2] : memref<384x1536xbf16, #tpu.memory_space<vmem>>, vector<384x1536xbf16>
    %cst = arith.constant dense<0.000000e+00> : vector<16x1536xf32>
    %3 = tpu.matmul %1, %2, %cst {dimension_numbers = #tpu.dot_dimension_numbers<[1], [0], [0], [1], [0, 0, 1, 1], [], []>} : vector<16x384xbf16>, vector<384x1536xbf16>, vector<16x1536xf32> -> vector<16x1536xf32>
    %c0_3 = arith.constant 0 : index
    %c0_4 = arith.constant 0 : index
    %4 = vector.load %arg3[%c0_3, %c0_4] : memref<1x1536xf32, #tpu.memory_space<vmem>>, vector<1x1536xf32>
    %5 = vector.broadcast %4 : vector<1x1536xf32> to vector<16x1536xf32>
    %6 = arith.addf %3, %5 : vector<16x1536xf32>
    %cst_5 = arith.constant 0.707106769 : f32
    %7 = vector.broadcast %cst_5 : f32 to vector<16x1536xf32>
    %8 = arith.mulf %6, %7 : vector<16x1536xf32>
    %9 = math.absf %8 : vector<16x1536xf32>
    %cst_6 = arith.constant 0.327591091 : f32
    %10 = vector.broadcast %cst_6 : f32 to vector<16x1536xf32>
    %11 = arith.mulf %10, %9 : vector<16x1536xf32>
    %cst_7 = arith.constant 1.000000e+00 : f32
    %12 = vector.broadcast %cst_7 : f32 to vector<16x1536xf32>
    %13 = arith.addf %12, %11 : vector<16x1536xf32>
    %cst_8 = arith.constant 1.000000e+00 : f32
    %14 = vector.broadcast %cst_8 : f32 to vector<16x1536xf32>
    %15 = arith.divf %14, %13 : vector<16x1536xf32>
    %cst_9 = arith.constant 1.06140542 : f32
    %16 = vector.broadcast %cst_9 : f32 to vector<16x1536xf32>
    %17 = arith.mulf %15, %16 : vector<16x1536xf32>
    %cst_10 = arith.constant -1.45315206 : f32
    %18 = vector.broadcast %cst_10 : f32 to vector<16x1536xf32>
    %19 = arith.addf %18, %17 : vector<16x1536xf32>
    %20 = arith.mulf %15, %19 : vector<16x1536xf32>
    %cst_11 = arith.constant 1.42141378 : f32
    %21 = vector.broadcast %cst_11 : f32 to vector<16x1536xf32>
    %22 = arith.addf %21, %20 : vector<16x1536xf32>
    %23 = arith.mulf %15, %22 : vector<16x1536xf32>
    %cst_12 = arith.constant -0.284496725 : f32
    %24 = vector.broadcast %cst_12 : f32 to vector<16x1536xf32>
    %25 = arith.addf %24, %23 : vector<16x1536xf32>
    %26 = arith.mulf %15, %25 : vector<16x1536xf32>
    %cst_13 = arith.constant 0.254829586 : f32
    %27 = vector.broadcast %cst_13 : f32 to vector<16x1536xf32>
    %28 = arith.addf %27, %26 : vector<16x1536xf32>
    %29 = arith.mulf %15, %28 : vector<16x1536xf32>
    %cst_14 = arith.constant 0.000000e+00 : f32
    %30 = vector.broadcast %cst_14 : f32 to vector<16x1536xf32>
    %31 = arith.subf %30, %9 : vector<16x1536xf32>
    %32 = arith.mulf %31, %9 : vector<16x1536xf32>
    %33 = math.exp %32 : vector<16x1536xf32>
    %34 = arith.mulf %29, %33 : vector<16x1536xf32>
    %cst_15 = arith.constant 1.000000e+00 : f32
    %35 = vector.broadcast %cst_15 : f32 to vector<16x1536xf32>
    %36 = arith.subf %35, %34 : vector<16x1536xf32>
    %cst_16 = arith.constant 0.000000e+00 : f32
    %37 = vector.broadcast %cst_16 : f32 to vector<16x1536xf32>
    %38 = arith.cmpf oge, %8, %37 : vector<16x1536xf32>
    %cst_17 = arith.constant 0.000000e+00 : f32
    %39 = vector.broadcast %cst_17 : f32 to vector<16x1536xf32>
    %40 = arith.subf %39, %36 : vector<16x1536xf32>
    %41 = arith.select %38, %36, %40 : vector<16x1536xi1>, vector<16x1536xf32>
    %cst_18 = arith.constant 5.000000e-01 : f32
    %42 = vector.broadcast %cst_18 : f32 to vector<16x1536xf32>
    %43 = arith.mulf %42, %6 : vector<16x1536xf32>
    %cst_19 = arith.constant 1.000000e+00 : f32
    %44 = vector.broadcast %cst_19 : f32 to vector<16x1536xf32>
    %45 = arith.addf %44, %41 : vector<16x1536xf32>
    %46 = arith.mulf %43, %45 : vector<16x1536xf32>
    %47 = arith.truncf %46 : vector<16x1536xf32> to vector<16x1536xbf16>
    %c0_20 = arith.constant 0 : index
    %c0_21 = arith.constant 0 : index
    %48 = vector.load %arg4[%c0_20, %c0_21] : memref<1536x384xbf16, #tpu.memory_space<vmem>>, vector<1536x384xbf16>
    %cst_22 = arith.constant dense<0.000000e+00> : vector<16x384xf32>
    %49 = tpu.matmul %47, %48, %cst_22 {dimension_numbers = #tpu.dot_dimension_numbers<[1], [0], [0], [1], [0, 0, 1, 1], [], []>} : vector<16x1536xbf16>, vector<1536x384xbf16>, vector<16x384xf32> -> vector<16x384xf32>
    %c0_23 = arith.constant 0 : index
    %c0_24 = arith.constant 0 : index
    %50 = vector.load %arg5[%c0_23, %c0_24] : memref<1x384xf32, #tpu.memory_space<vmem>>, vector<1x384xf32>
    %51 = vector.broadcast %50 : vector<1x384xf32> to vector<16x384xf32>
    %52 = arith.addf %49, %51 : vector<16x384xf32>
    %53 = arith.addf %0, %52 : vector<16x384xf32>
    %c0_25 = arith.constant 0 : index
    %c0_26 = arith.constant 0 : index
    %54 = vector.load %arg6[%c0_25, %c0_26] : memref<1x384xf32, #tpu.memory_space<vmem>>, vector<1x384xf32>
    %c0_27 = arith.constant 0 : index
    %c0_28 = arith.constant 0 : index
    %55 = vector.load %arg7[%c0_27, %c0_28] : memref<1x384xf32, #tpu.memory_space<vmem>>, vector<1x384xf32>
    %cst_29 = arith.constant dense<0.000000e+00> : vector<16xf32>
    %56 = vector.multi_reduction <add>, %53, %cst_29 [1] : vector<16x384xf32> to vector<16xf32>
    %57 = vector.shape_cast %56 : vector<16xf32> to vector<16x1xf32>
    %cst_30 = arith.constant 3.840000e+02 : f32
    %58 = vector.broadcast %cst_30 : f32 to vector<16x1xf32>
    %59 = arith.divf %57, %58 : vector<16x1xf32>
    %60 = vector.broadcast %59 : vector<16x1xf32> to vector<16x384xf32>
    %61 = arith.subf %53, %60 : vector<16x384xf32>
    %62 = arith.mulf %61, %61 : vector<16x384xf32>
    %cst_31 = arith.constant dense<0.000000e+00> : vector<16xf32>
    %63 = vector.multi_reduction <add>, %62, %cst_31 [1] : vector<16x384xf32> to vector<16xf32>
    %64 = vector.shape_cast %63 : vector<16xf32> to vector<16x1xf32>
    %cst_32 = arith.constant 3.840000e+02 : f32
    %65 = vector.broadcast %cst_32 : f32 to vector<16x1xf32>
    %66 = arith.divf %64, %65 : vector<16x1xf32>
    %67 = vector.broadcast %59 : vector<16x1xf32> to vector<16x384xf32>
    %68 = arith.subf %53, %67 : vector<16x384xf32>
    %cst_33 = arith.constant 9.99999996E-13 : f32
    %69 = vector.broadcast %cst_33 : f32 to vector<16x1xf32>
    %70 = arith.addf %66, %69 : vector<16x1xf32>
    %71 = math.rsqrt %70 : vector<16x1xf32>
    %72 = vector.broadcast %71 : vector<16x1xf32> to vector<16x384xf32>
    %73 = arith.mulf %68, %72 : vector<16x384xf32>
    %74 = vector.broadcast %54 : vector<1x384xf32> to vector<16x384xf32>
    %75 = arith.mulf %73, %74 : vector<16x384xf32>
    %76 = vector.broadcast %55 : vector<1x384xf32> to vector<16x384xf32>
    %77 = arith.addf %75, %76 : vector<16x384xf32>
    %c0_34 = arith.constant 0 : index
    %c0_35 = arith.constant 0 : index
    %78 = vector.load %arg8[%c0_34, %c0_35] : memref<16x384xf32, #tpu.memory_space<vmem>>, vector<16x384xf32>
    tpu.vector_store %arg8[%c0_34, %c0_35], %77 {strides = array<i32>} : memref<16x384xf32, #tpu.memory_space<vmem>>, vector<16x384xf32>,
    return
  }
  func.func @transform_0(%arg0: i32) -> (i32, i32) {
    %c0_i32 = arith.constant 0 : i32
    %c0_i32_0 = arith.constant 0 : i32
    %c0_i32_1 = arith.constant 0 : i32
    return %c0_i32, %c0_i32_0 : i32, i32
  }
  func.func @transform_1(%arg0: i32) -> (i32, i32) {
    %c0_i32 = arith.constant 0 : i32
    %c0_i32_0 = arith.constant 0 : i32
    %c0_i32_1 = arith.constant 0 : i32
    return %c0_i32, %c0_i32_0 : i32, i32
  }
  func.func @transform_2(%arg0: i32) -> (i32, i32) {
    %c0_i32 = arith.constant 0 : i32
    %c0_i32_0 = arith.constant 0 : i32
    %c0_i32_1 = arith.constant 0 : i32
    return %c0_i32, %c0_i32_0 : i32, i32
  }
  func.func @transform_3(%arg0: i32) -> (i32, i32) {
    %c0_i32 = arith.constant 0 : i32
    %c0_i32_0 = arith.constant 0 : i32
    %c0_i32_1 = arith.constant 0 : i32
    return %c0_i32, %c0_i32_0 : i32, i32
  }
  func.func @transform_4(%arg0: i32) -> (i32, i32) {
    %c0_i32 = arith.constant 0 : i32
    %c0_i32_0 = arith.constant 0 : i32
    %c0_i32_1 = arith.constant 0 : i32
    return %c0_i32, %c0_i32_0 : i32, i32
  }
  func.func @transform_5(%arg0: i32) -> (i32, i32) {
    %c0_i32 = arith.constant 0 : i32
    %c0_i32_0 = arith.constant 0 : i32
    %c0_i32_1 = arith.constant 0 : i32
    return %c0_i32, %c0_i32_0 : i32, i32
  }
  func.func @transform_6(%arg0: i32) -> (i32, i32) {
    %c0_i32 = arith.constant 0 : i32
    %c0_i32_0 = arith.constant 0 : i32
    %c0_i32_1 = arith.constant 0 : i32
    return %c0_i32, %c0_i32_0 : i32, i32
  }
  func.func @transform_7(%arg0: i32) -> (i32, i32) {
    %c0_i32 = arith.constant 0 : i32
    %c0_i32_0 = arith.constant 0 : i32
    %c0_i32_1 = arith.constant 0 : i32
    return %c0_i32, %c0_i32_0 : i32, i32
  }
}

module attributes {stable_mosaic.version = 11 : i64} {
  func.func @_heads_kernel(%arg0: i32, %arg1: memref<2x384xf32, #tpu.memory_space<vmem>>, %arg2: memref<384x384xbf16, #tpu.memory_space<vmem>>, %arg3: memref<1x384xf32, #tpu.memory_space<vmem>>, %arg4: memref<384x384xbf16, #tpu.memory_space<vmem>>, %arg5: memref<1x384xf32, #tpu.memory_space<vmem>>, %arg6: memref<128x128xbf16, #tpu.memory_space<vmem>>, %arg7: memref<1x128xf32, #tpu.memory_space<vmem>>, %arg8: memref<128x128xbf16, #tpu.memory_space<vmem>>, %arg9: memref<1x128xf32, #tpu.memory_space<vmem>>, %arg10: memref<640x128xbf16, #tpu.memory_space<vmem>>, %arg11: memref<1x128xf32, #tpu.memory_space<vmem>>, %arg12: memref<2x128xf32, #tpu.memory_space<vmem>>) attributes {dimension_semantics = [#tpu.dimension_semantics<arbitrary>], iteration_bounds = array<i64: 1>, scalar_prefetch = 0 : i64, scratch_operands = 0 : i64, tpu.core_type = #tpu.core_type<tc>, window_params = [{pipeline_mode = #tpu.pipeline_mode<synchronous>, transform_indices = @transform_0, window_bounds = array<i64: 2, 384>}, {pipeline_mode = #tpu.pipeline_mode<synchronous>, transform_indices = @transform_1, window_bounds = array<i64: 384, 384>}, {pipeline_mode = #tpu.pipeline_mode<synchronous>, transform_indices = @transform_2, window_bounds = array<i64: 1, 384>}, {pipeline_mode = #tpu.pipeline_mode<synchronous>, transform_indices = @transform_3, window_bounds = array<i64: 384, 384>}, {pipeline_mode = #tpu.pipeline_mode<synchronous>, transform_indices = @transform_4, window_bounds = array<i64: 1, 384>}, {pipeline_mode = #tpu.pipeline_mode<synchronous>, transform_indices = @transform_5, window_bounds = array<i64: 128, 128>}, {pipeline_mode = #tpu.pipeline_mode<synchronous>, transform_indices = @transform_6, window_bounds = array<i64: 1, 128>}, {pipeline_mode = #tpu.pipeline_mode<synchronous>, transform_indices = @transform_7, window_bounds = array<i64: 128, 128>}, {pipeline_mode = #tpu.pipeline_mode<synchronous>, transform_indices = @transform_8, window_bounds = array<i64: 1, 128>}, {pipeline_mode = #tpu.pipeline_mode<synchronous>, transform_indices = @transform_9, window_bounds = array<i64: 640, 128>}, {pipeline_mode = #tpu.pipeline_mode<synchronous>, transform_indices = @transform_10, window_bounds = array<i64: 1, 128>}, {pipeline_mode = #tpu.pipeline_mode<synchronous>, transform_indices = @transform_11, window_bounds = array<i64: 2, 128>}]} {
    %c0 = arith.constant 0 : index
    %c0_0 = arith.constant 0 : index
    %0 = vector.load %arg1[%c0, %c0_0] : memref<2x384xf32, #tpu.memory_space<vmem>>, vector<2x384xf32>
    %1 = arith.truncf %0 : vector<2x384xf32> to vector<2x384xbf16>
    %c0_1 = arith.constant 0 : index
    %c0_2 = arith.constant 0 : index
    %2 = vector.load %arg2[%c0_1, %c0_2] : memref<384x384xbf16, #tpu.memory_space<vmem>>, vector<384x384xbf16>
    %cst = arith.constant dense<0.000000e+00> : vector<2x384xf32>
    %3 = tpu.matmul %1, %2, %cst {dimension_numbers = #tpu.dot_dimension_numbers<[1], [0], [0], [1], [0, 0, 1, 1], [], []>} : vector<2x384xbf16>, vector<384x384xbf16>, vector<2x384xf32> -> vector<2x384xf32>
    %c0_3 = arith.constant 0 : index
    %c0_4 = arith.constant 0 : index
    %4 = vector.load %arg3[%c0_3, %c0_4] : memref<1x384xf32, #tpu.memory_space<vmem>>, vector<1x384xf32>
    %5 = vector.broadcast %4 : vector<1x384xf32> to vector<2x384xf32>
    %6 = arith.addf %3, %5 : vector<2x384xf32>
    %7 = math.tanh %6 : vector<2x384xf32>
    %8 = arith.truncf %7 : vector<2x384xf32> to vector<2x384xbf16>
    %c0_5 = arith.constant 0 : index
    %c0_6 = arith.constant 0 : index
    %9 = vector.load %arg4[%c0_5, %c0_6] : memref<384x384xbf16, #tpu.memory_space<vmem>>, vector<384x384xbf16>
    %cst_7 = arith.constant dense<0.000000e+00> : vector<2x384xf32>
    %10 = tpu.matmul %8, %9, %cst_7 {dimension_numbers = #tpu.dot_dimension_numbers<[1], [0], [0], [1], [0, 0, 1, 1], [], []>} : vector<2x384xbf16>, vector<384x384xbf16>, vector<2x384xf32> -> vector<2x384xf32>
    %c0_8 = arith.constant 0 : index
    %c0_9 = arith.constant 0 : index
    %11 = vector.load %arg5[%c0_8, %c0_9] : memref<1x384xf32, #tpu.memory_space<vmem>>, vector<1x384xf32>
    %12 = vector.broadcast %11 : vector<1x384xf32> to vector<2x384xf32>
    %13 = arith.addf %10, %12 : vector<2x384xf32>
    %14 = vector.extract_strided_slice %13 {offsets = [0, 256], sizes = [2, 128], strides = [1, 1]} : vector<2x384xf32> to vector<2x128xf32>
    %15 = arith.truncf %14 : vector<2x128xf32> to vector<2x128xbf16>
    %c0_10 = arith.constant 0 : index
    %c0_11 = arith.constant 0 : index
    %16 = vector.load %arg6[%c0_10, %c0_11] : memref<128x128xbf16, #tpu.memory_space<vmem>>, vector<128x128xbf16>
    %cst_12 = arith.constant dense<0.000000e+00> : vector<2x128xf32>
    %17 = tpu.matmul %15, %16, %cst_12 {dimension_numbers = #tpu.dot_dimension_numbers<[1], [0], [0], [1], [0, 0, 1, 1], [], []>} : vector<2x128xbf16>, vector<128x128xbf16>, vector<2x128xf32> -> vector<2x128xf32>
    %c0_13 = arith.constant 0 : index
    %c0_14 = arith.constant 0 : index
    %18 = vector.load %arg7[%c0_13, %c0_14] : memref<1x128xf32, #tpu.memory_space<vmem>>, vector<1x128xf32>
    %19 = vector.broadcast %18 : vector<1x128xf32> to vector<2x128xf32>
    %20 = arith.addf %17, %19 : vector<2x128xf32>
    %21 = arith.truncf %20 : vector<2x128xf32> to vector<2x128xbf16>
    %c0_15 = arith.constant 0 : index
    %c0_16 = arith.constant 0 : index
    %22 = vector.load %arg8[%c0_15, %c0_16] : memref<128x128xbf16, #tpu.memory_space<vmem>>, vector<128x128xbf16>
    %cst_17 = arith.constant dense<0.000000e+00> : vector<2x128xf32>
    %23 = tpu.matmul %21, %22, %cst_17 {dimension_numbers = #tpu.dot_dimension_numbers<[1], [0], [0], [1], [0, 0, 1, 1], [], []>} : vector<2x128xbf16>, vector<128x128xbf16>, vector<2x128xf32> -> vector<2x128xf32>
    %c0_18 = arith.constant 0 : index
    %c0_19 = arith.constant 0 : index
    %24 = vector.load %arg9[%c0_18, %c0_19] : memref<1x128xf32, #tpu.memory_space<vmem>>, vector<1x128xf32>
    %25 = vector.broadcast %24 : vector<1x128xf32> to vector<2x128xf32>
    %26 = arith.addf %23, %25 : vector<2x128xf32>
    %27 = arith.truncf %13 : vector<2x384xf32> to vector<2x384xbf16>
    %c0_20 = arith.constant 0 : index
    %c0_21 = arith.constant 0 : index
    %28 = vector.load %arg10[%c0_20, %c0_21] : memref<640x128xbf16, #tpu.memory_space<vmem>>, vector<384x128xbf16>
    %cst_22 = arith.constant dense<0.000000e+00> : vector<2x128xf32>
    %29 = tpu.matmul %27, %28, %cst_22 {dimension_numbers = #tpu.dot_dimension_numbers<[1], [0], [0], [1], [0, 0, 1, 1], [], []>} : vector<2x384xbf16>, vector<384x128xbf16>, vector<2x128xf32> -> vector<2x128xf32>
    %30 = arith.truncf %20 : vector<2x128xf32> to vector<2x128xbf16>
    %c384 = arith.constant 384 : index
    %c0_23 = arith.constant 0 : index
    %31 = vector.load %arg10[%c384, %c0_23] : memref<640x128xbf16, #tpu.memory_space<vmem>>, vector<128x128xbf16>
    %cst_24 = arith.constant dense<0.000000e+00> : vector<2x128xf32>
    %32 = tpu.matmul %30, %31, %cst_24 {dimension_numbers = #tpu.dot_dimension_numbers<[1], [0], [0], [1], [0, 0, 1, 1], [], []>} : vector<2x128xbf16>, vector<128x128xbf16>, vector<2x128xf32> -> vector<2x128xf32>
    %33 = arith.addf %29, %32 : vector<2x128xf32>
    %34 = arith.truncf %26 : vector<2x128xf32> to vector<2x128xbf16>
    %c512 = arith.constant 512 : index
    %c0_25 = arith.constant 0 : index
    %35 = vector.load %arg10[%c512, %c0_25] : memref<640x128xbf16, #tpu.memory_space<vmem>>, vector<128x128xbf16>
    %cst_26 = arith.constant dense<0.000000e+00> : vector<2x128xf32>
    %36 = tpu.matmul %34, %35, %cst_26 {dimension_numbers = #tpu.dot_dimension_numbers<[1], [0], [0], [1], [0, 0, 1, 1], [], []>} : vector<2x128xbf16>, vector<128x128xbf16>, vector<2x128xf32> -> vector<2x128xf32>
    %37 = arith.addf %33, %36 : vector<2x128xf32>
    %c0_27 = arith.constant 0 : index
    %c0_28 = arith.constant 0 : index
    %38 = vector.load %arg11[%c0_27, %c0_28] : memref<1x128xf32, #tpu.memory_space<vmem>>, vector<1x128xf32>
    %39 = vector.broadcast %38 : vector<1x128xf32> to vector<2x128xf32>
    %40 = arith.addf %37, %39 : vector<2x128xf32>
    %c0_29 = arith.constant 0 : index
    %c0_30 = arith.constant 0 : index
    %41 = vector.load %arg12[%c0_29, %c0_30] : memref<2x128xf32, #tpu.memory_space<vmem>>, vector<2x128xf32>
    tpu.vector_store %arg12[%c0_29, %c0_30], %40 {strides = array<i32>} : memref<2x128xf32, #tpu.memory_space<vmem>>, vector<2x128xf32>,
    return
  }
  func.func @transform_0(%arg0: i32) -> (i32, i32) {
    %c0_i32 = arith.constant 0 : i32
    %c0_i32_0 = arith.constant 0 : i32
    %c0_i32_1 = arith.constant 0 : i32
    return %c0_i32, %c0_i32_0 : i32, i32
  }
  func.func @transform_1(%arg0: i32) -> (i32, i32) {
    %c0_i32 = arith.constant 0 : i32
    %c0_i32_0 = arith.constant 0 : i32
    %c0_i32_1 = arith.constant 0 : i32
    return %c0_i32, %c0_i32_0 : i32, i32
  }
  func.func @transform_2(%arg0: i32) -> (i32, i32) {
    %c0_i32 = arith.constant 0 : i32
    %c0_i32_0 = arith.constant 0 : i32
    %c0_i32_1 = arith.constant 0 : i32
    return %c0_i32, %c0_i32_0 : i32, i32
  }
  func.func @transform_3(%arg0: i32) -> (i32, i32) {
    %c0_i32 = arith.constant 0 : i32
    %c0_i32_0 = arith.constant 0 : i32
    %c0_i32_1 = arith.constant 0 : i32
    return %c0_i32, %c0_i32_0 : i32, i32
  }
  func.func @transform_4(%arg0: i32) -> (i32, i32) {
    %c0_i32 = arith.constant 0 : i32
    %c0_i32_0 = arith.constant 0 : i32
    %c0_i32_1 = arith.constant 0 : i32
    return %c0_i32, %c0_i32_0 : i32, i32
  }
  func.func @transform_5(%arg0: i32) -> (i32, i32) {
    %c0_i32 = arith.constant 0 : i32
    %c0_i32_0 = arith.constant 0 : i32
    %c0_i32_1 = arith.constant 0 : i32
    return %c0_i32, %c0_i32_0 : i32, i32
  }
  func.func @transform_6(%arg0: i32) -> (i32, i32) {
    %c0_i32 = arith.constant 0 : i32
    %c0_i32_0 = arith.constant 0 : i32
    %c0_i32_1 = arith.constant 0 : i32
    return %c0_i32, %c0_i32_0 : i32, i32
  }
  func.func @transform_7(%arg0: i32) -> (i32, i32) {
    %c0_i32 = arith.constant 0 : i32
    %c0_i32_0 = arith.constant 0 : i32
    %c0_i32_1 = arith.constant 0 : i32
    return %c0_i32, %c0_i32_0 : i32, i32
  }
  func.func @transform_8(%arg0: i32) -> (i32, i32) {
    %c0_i32 = arith.constant 0 : i32
    %c0_i32_0 = arith.constant 0 : i32
    %c0_i32_1 = arith.constant 0 : i32
    return %c0_i32, %c0_i32_0 : i32, i32
  }
  func.func @transform_9(%arg0: i32) -> (i32, i32) {
    %c0_i32 = arith.constant 0 : i32
    %c0_i32_0 = arith.constant 0 : i32
    %c0_i32_1 = arith.constant 0 : i32
    return %c0_i32, %c0_i32_0 : i32, i32
  }
  func.func @transform_10(%arg0: i32) -> (i32, i32) {
    %c0_i32 = arith.constant 0 : i32
    %c0_i32_0 = arith.constant 0 : i32
    %c0_i32_1 = arith.constant 0 : i32
    return %c0_i32, %c0_i32_0 : i32, i32
  }
  func.func @transform_11(%arg0: i32) -> (i32, i32) {
    %c0_i32 = arith.constant 0 : i32
    %c0_i32_0 = arith.constant 0 : i32
    %c0_i32_1 = arith.constant 0 : i32
    return %c0_i32, %c0_i32_0 : i32, i32
  }
}

</mosaic_0001>

<bundles_post_ra>
// kernel: vuln_classifier_forward.4
= control target key start
LH: loop header
LB: loop body
LE: loop exit
PB: predicated region body
PF: predicated region fallthrough
CT: control target
= control target key end

     0   :  { %v66_v32 = vlaneseq  ;;  %s185_s0 = inlined_call_operand.vmem [shape: f32[16,384], index: 0, kind: input, shape index: {}]   ;;  %s186_s1 = inlined_call_operand.vmem [shape: f32[1,384], index: 1, kind: input, shape index: {}]   ;;  %s187_s2 = inlined_call_operand.vmem [shape: f32[1,384], index: 2, kind: input, shape index: {}]   ;;  %s188_s3 = inlined_call_operand.vmem [shape: f32[16,384], index: 3, kind: output, shape index: {}]  }
   0x1   :  { %v14_v0 = vld [vmem:[%s185_s0] sm:$0xff]  ;;  %v15_v1 = vld [vmem:[%s185_s0 + $0x8] sm:$0xff]  ;;  %v16_v2 = vld [vmem:[%s185_s0 + $0x10] sm:$0xff] }
   0x2   :  { %v22_v3 = vadd.f32 %v15_v1, %v14_v0  ;;  %v17_v4 = vld [vmem:[%s185_s0 + $0x18] sm:$0xff]  ;;  %v18_v5 = vld [vmem:[%s185_s0 + $0x20] sm:$0xff]  ;;  %v19_v6 = vld [vmem:[%s185_s0 + $0x28] sm:$0xff]  ;;  %v67_v36 = vshrl.u32 %v66_v32, 7 }
   0x3   :  { %v26_v7 = vadd.f32 %v18_v5, %v17_v4  ;;  %v20_v41 = vld [vmem:[%s186_s1] sm:$0x7] }
   0x4   :  { %v23_v8 = vadd.f32 %v22_v3, %v16_v2  ;;  %v68_v38 = vsub.s32 0, %v67_v36  ;;  %v72_v39 = vsub.s32 1, %v67_v36  ;;  %v76_v40 = vsub.s32 2, %v67_v36  ;;  %v21_v42 = vld [vmem:[%s187_s2] sm:$0x7] }
   0x5   :  { %v27_v9 = vadd.f32 %v26_v7, %v19_v6 }
   0x6   :  { %24 = vadd.xlane.f32.xlu0 %v23_v8  ;;  %v69_v43 = vrot.slane %v20_v41, %v68_v38  ;;  %v73_v44 = vrot.slane %v20_v41, %v72_v39  ;;  %v77_v45 = vrot.slane %v20_v41, %v76_v40  ;;  %v91_v47 = vrot.slane %v21_v42, %v68_v38 }
   0x7   :  { %v95_v48 = vrot.slane %v21_v42, %v72_v39  ;;  %v99_v49 = vrot.slane %v21_v42, %v76_v40 }
   0xa   :  { %28 = vadd.xlane.f32.xlu0 %v27_v9 }
  0x93   :  { %v25_v10 = vpop.xlane.xlu0 %24 }
  0x94   :  { %v31_v11 = vmul.f32 0.0026041667, %v25_v10 }
  0x96   :  { %v33_v12 = vsub.f32 %v14_v0, %v31_v11  ;;  %v34_v13 = vsub.f32 %v15_v1, %v31_v11  ;;  %v35_v14 = vsub.f32 %v16_v2, %v31_v11 }
  0x97   :  { %v29_v15 = vpop.xlane.xlu0 %28 }
  0x98   :  { %v32_v16 = vmul.f32 0.0026041667, %v29_v15  ;;  %v39_v17 = vmul.f32 %v33_v12, %v33_v12  ;;  %v40_v18 = vmul.f32 %v34_v13, %v34_v13  ;;  %v41_v19 = vmul.f32 %v35_v14, %v35_v14 }
  0x9a   :  { %v36_v20 = vsub.f32 %v17_v4, %v32_v16  ;;  %v37_v21 = vsub.f32 %v18_v5, %v32_v16  ;;  %v38_v22 = vsub.f32 %v19_v6, %v32_v16  ;;  %v45_v23 = vadd.f32 %v40_v18, %v39_v17 }
  0x9c   :  { %v46_v24 = vadd.f32 %v45_v23, %v41_v19  ;;  %v42_v25 = vmul.f32 %v36_v20, %v36_v20  ;;  %v43_v26 = vmul.f32 %v37_v21, %v37_v21  ;;  %v44_v27 = vmul.f32 %v38_v22, %v38_v22 }
  0x9e   :  { %47 = vadd.xlane.f32.xlu1 %v46_v24  ;;  %v49_v28 = vadd.f32 %v43_v26, %v42_v25 }
  0xa0   :  { %v50_v29 = vadd.f32 %v49_v28, %v44_v27 }
  0xa2   :  { %51 = vadd.xlane.f32.xlu1 %v50_v29 }
 0x12b   :  { %v48_v30 = vpop.xlane.xlu1 %47 }
 0x12c   :  { %v53_v31 = vmul.f32 0.0026041667, %v48_v30 }
 0x12e   :  { %v55_v33 = vadd.f32 1e-12, %v53_v31 }
 0x12f   :  { %v52_v34 = vpop.xlane.xlu1 %51 }
 0x130   :  { %119 = vrsqrt.f32 %v55_v33  ;;  %v54_v35 = vmul.f32 0.0026041667, %v52_v34 }
 0x132   :  { %v56_v37 = vadd.f32 1e-12, %v54_v35 }
 0x134   :  { %121 = vrsqrt.f32 %v56_v37 }
 0x13a   :  { %v120_v46 = vpop.eup %119 }
 0x13b   :  { %v59_v50 = vmul.f32 %v120_v46, %v33_v12  ;;  %v60_v51 = vmul.f32 %v120_v46, %v34_v13  ;;  %v61_v52 = vmul.f32 %v120_v46, %v35_v14 }
 0x13d   :  { %v81_v53 = vmul.f32 %v69_v43, %v59_v50  ;;  %v82_v54 = vmul.f32 %v73_v44, %v60_v51  ;;  %v83_v55 = vmul.f32 %v77_v45, %v61_v52 }
 0x13e   :  { %v122_v56 = vpop.eup %121 }
 0x13f   :  { %v103_v57 = vadd.f32 %v91_v47, %v81_v53  ;;  %v104_v58 = vadd.f32 %v95_v48, %v82_v54  ;;  %v105_v59 = vadd.f32 %v99_v49, %v83_v55  ;;  %v62_v60 = vmul.f32 %v122_v56, %v36_v20 }
 0x140   :  { %v63_v61 = vmul.f32 %v122_v56, %v37_v21  ;;  %v64_v62 = vmul.f32 %v122_v56, %v38_v22 }
 0x141   :  { %109 = vst [vmem:[%s188_s3] sm:$0xff] %v103_v57  ;;  %110 = vst [vmem:[%s188_s3 + $0x8] sm:$0xff] %v104_v58  ;;  %v84_v63 = vmul.f32 %v69_v43, %v62_v60 }
 0x142   :  { %111 = vst [vmem:[%s188_s3 + $0x10] sm:$0xff] %v105_v59  ;;  %v85_v0 = vmul.f32 %v73_v44, %v63_v61  ;;  %v86_v1 = vmul.f32 %v77_v45, %v64_v62 }
 0x143   :  { %v106_v2 = vadd.f32 %v91_v47, %v84_v63 }
 0x144   :  { %v107_v3 = vadd.f32 %v95_v48, %v85_v0  ;;  %v108_v4 = vadd.f32 %v99_v49, %v86_v1 }
 0x145   :  { %112 = vst [vmem:[%s188_s3 + $0x18] sm:$0xff] %v106_v2 }
 0x146   :  { %113 = vst [vmem:[%s188_s3 + $0x20] sm:$0xff] %v107_v3  ;;  %114 = vst [vmem:[%s188_s3 + $0x28] sm:$0xff] %v108_v4 }

// kernel: vuln_classifier_forward.7
= control target key start
LH: loop header
LB: loop body
LE: loop exit
PB: predicated region body
PF: predicated region fallthrough
CT: control target
= control target key end

     0   :  { %v2851_v22 = vmov 1983009808   ;;  %v45_v24 = vlaneseq  ;;  %v2852_v53 = vmov 0.0   ;;  %vm2853_vm0 = vmmov 0   ;;  %s3643_s1 = inlined_call_operand.vmem [shape: bf16[384,384], index: 1, kind: input, shape index: {}]   ;;  %s3644_s0 = inlined_call_operand.vmem [shape: f32[2,384], index: 0, kind: input, shape index: {}]   ;;  %s3645_s3 = inlined_call_operand.vmem [shape: bf16[384,384], index: 3, kind: input, shape index: {}]   ;;  %s3646_s2 = inlined_call_operand.vmem [shape: f32[1,384], index: 2, kind: input, shape index: {}]   ;;  %s3647_s5 = inlined_call_operand.vmem [shape: bf16[128,128], index: 5, kind: input, shape index: {}]   ;;  %s3648_s7 = inlined_call_operand.vmem [shape: bf16[128,128], index: 7, kind: input, shape index: {}]   ;;  %s3649_s9 = inlined_call_operand.vmem [shape: bf16[640,128], index: 9, kind: input, shape index: {}]   ;;  %s3650_s4 = inlined_call_operand.vmem [shape: f32[1,384], index: 4, kind: input, shape index: {}]   ;;  %s3651_s6 = inlined_call_operand.vmem [shape: f32[1,128], index: 6, kind: input, shape index: {}]   ;;  %s3652_s8 = inlined_call_operand.vmem [shape: f32[1,128], index: 8, kind: input, shape index: {}]   ;;  %s3653_s10 = inlined_call_operand.vmem [shape: f32[1,128], index: 10, kind: input, shape index: {}]   ;;  %s3654_s11 = inlined_call_operand.vmem [shape: f32[2,128], index: 11, kind: output, shape index: {}]  }
   0x1   :  { %v2596_v0 = vld [vmem:[%s3643_s1 + $0x4] ss:$12 sps:$4 sm:$0xff]   ;;  %v2598_v1 = vld [vmem:[%s3643_s1] ss:$12 sps:$4 sm:$0xff]   ;;  %v2599_v2 = vld [vmem:[%s3643_s1 + $0x1c] ss:$12 sps:$4 sm:$0xff]   ;;  %v43_v23 = vunpack.c.l.s4 %v2851_v22 }
   0x2   :  { %560 = vmatprep.subr.bf16.mxu0 %v2596_v0  ;;  %v2601_v3 = vld [vmem:[%s3643_s1 + $0x18] ss:$12 sps:$4 sm:$0xff]   ;;  %v2602_v4 = vld [vmem:[%s3643_s1 + $0x34] ss:$12 sps:$4 sm:$0xff]   ;;  %v2604_v5 = vld [vmem:[%s3643_s1 + $0x30] ss:$12 sps:$4 sm:$0xff]  }
   0x3   :  { %561 = vmatpush1.bf16.msra.mxu0 %v2598_v1  ;;  %v2605_v6 = vld [vmem:[%s3643_s1 + $0x4c] ss:$12 sps:$4 sm:$0xff]   ;;  %v2607_v7 = vld [vmem:[%s3643_s1 + $0x48] ss:$12 sps:$4 sm:$0xff]   ;;  %v2608_v8 = vld [vmem:[%s3643_s1 + $0x64] ss:$12 sps:$4 sm:$0xff]   ;;  %v44_v29 = vunpack.c.0.s8 %v43_v23 }
   0x4   :  { %562 = vmatprep.subr.bf16.mxu0 %v2599_v2  ;;  %v2610_v9 = vld [vmem:[%s3643_s1 + $0x60] ss:$12 sps:$4 sm:$0xff]   ;;  %v2626_v10 = vld [vmem:[%s3643_s1 + $0xc8] ss:$12 sps:$4 sm:$0xff]   ;;  %v2613_v15 = vld [vmem:[%s3643_s1 + $0x78] ss:$12 sps:$4 sm:$0xff]  }
   0x5   :  { %v2627_v11 = vld [vmem:[%s3643_s1 + $0x8] ss:$12 sps:$4 sm:$0xff]   ;;  %2311 = vmatprep.subr.bf16.mxu1 %v2626_v10  ;;  %v2631_v13 = vld [vmem:[%s3643_s1 + $0xe0] ss:$12 sps:$4 sm:$0xff]   ;;  %v2636_v17 = vld [vmem:[%s3643_s1 + $0xf8] ss:$12 sps:$4 sm:$0xff]  }
   0x6   :  { %v2611_v12 = vld [vmem:[%s3643_s1 + $0x7c] ss:$12 sps:$4 sm:$0xff]   ;;  %2312 = vmatpush3.bf16.msra.mxu1 %v2627_v11  ;;  %v2632_v14 = vld [vmem:[%s3643_s1 + $0x20] ss:$12 sps:$4 sm:$0xff]   ;;  %v2637_v18 = vld [vmem:[%s3643_s1 + $0x38] ss:$12 sps:$4 sm:$0xff]  }
   0x7   :  { %563 = vmatpush1.bf16.msra.mxu0 %v2601_v3  ;;  %v2614_v16 = vld [vmem:[%s3643_s1 + $0x94] ss:$12 sps:$4 sm:$0xff]   ;;  %2313 = vmatprep.subr.bf16.mxu1 %v2631_v13  ;;  %v2616_v19 = vld [vmem:[%s3643_s1 + $0x90] ss:$12 sps:$4 sm:$0xff]   ;;  %v2617_v20 = vld [vmem:[%s3643_s1 + $0xac] ss:$12 sps:$4 sm:$0xff]  }
   0x8   :  { %564 = vmatprep.subr.bf16.mxu0 %v2602_v4  ;;  %v2641_v21 = vld [vmem:[%s3643_s1 + $0x110] ss:$12 sps:$4 sm:$0xff]   ;;  %v2619_v26 = vld [vmem:[%s3643_s1 + $0xa8] ss:$12 sps:$4 sm:$0xff]   ;;  %v2993_v30 = vshrl.u32 %v45_v24, 7 }
   0x9   :  { %v2642_v25 = vld [vmem:[%s3643_s1 + $0x50] ss:$12 sps:$4 sm:$0xff]   ;;  %v2646_v27 = vld [vmem:[%s3643_s1 + $0x128] ss:$12 sps:$4 sm:$0xff]   ;;  %v2651_v32 = vld [vmem:[%s3643_s1 + $0x140] ss:$12 sps:$4 sm:$0xff]  }
   0xa   :  { %2314 = vmatpush3.bf16.msra.mxu1 %v2632_v14  ;;  %v2620_v28 = vld [vmem:[%s3643_s1 + $0xc4] ss:$12 sps:$4 sm:$0xff]   ;;  %v2647_v31 = vld [vmem:[%s3643_s1 + $0x68] ss:$12 sps:$4 sm:$0xff]   ;;  %v2622_v33 = vld [vmem:[%s3643_s1 + $0xc0] ss:$12 sps:$4 sm:$0xff]   ;;  %v3008_v35 = vsub.s32 %v44_v29, %v2993_v30 }
   0xb   :  { %565 = vmatpush1.bf16.msra.mxu0 %v2604_v5  ;;  %2315 = vmatprep.subr.bf16.mxu1 %v2636_v17  ;;  %v2623_v34 = vld [vmem:[%s3643_s1 + $0xdc] ss:$12 sps:$4 sm:$0xff]   ;;  %v2652_v36 = vld [vmem:[%s3643_s1 + $0x80] ss:$12 sps:$4 sm:$0xff]   ;;  %v2656_v37 = vld [vmem:[%s3643_s1 + $0x158] ss:$12 sps:$4 sm:$0xff]  }
   0xc   :  { %566 = vmatprep.subr.bf16.mxu0 %v2605_v6  ;;  %v2625_v38 = vld [vmem:[%s3643_s1 + $0xd8] ss:$12 sps:$4 sm:$0xff]   ;;  %v2628_v40 = vld [vmem:[%s3643_s1 + $0xf4] ss:$12 sps:$4 sm:$0xff]   ;;  %v2662_v44 = vld [vmem:[%s3643_s1 + $0x170] ss:$12 sps:$4 sm:$0xff]  }
   0xd   :  { %v3022_v39 = vld [vmem:[%s3644_s0] sm:$0x3f]  ;;  %v2630_v45 = vld [vmem:[%s3643_s1 + $0xf0] ss:$12 sps:$4 sm:$0xff]   ;;  %v2633_v46 = vld [vmem:[%s3643_s1 + $0x10c] ss:$12 sps:$4 sm:$0xff]  }
   0xe   :  { %2316 = vmatpush3.bf16.msra.mxu1 %v2637_v18  ;;  %v48_v41 = vrot.slane %v3022_v39, %v3008_v35  ;;  %v2657_v42 = vld [vmem:[%s3643_s1 + $0x98] ss:$12 sps:$4 sm:$0xff]   ;;  %v2663_v48 = vld [vmem:[%s3643_s1 + $0xb0] ss:$12 sps:$4 sm:$0xff]   ;;  %v2635_v49 = vld [vmem:[%s3643_s1 + $0x108] ss:$12 sps:$4 sm:$0xff]  }
   0xf   :  { %567 = vmatpush1.bf16.msra.mxu0 %v2607_v7  ;;  %2317 = vmatprep.subr.bf16.mxu1 %v2641_v21  ;;  %v2638_v50 = vld [vmem:[%s3643_s1 + $0x124] ss:$12 sps:$4 sm:$0xff]   ;;  %v2667_v51 = vld [vmem:[%s3643_s1 + $0x188] ss:$12 sps:$4 sm:$0xff]   ;;  %v2640_v54 = vld [vmem:[%s3643_s1 + $0x120] ss:$12 sps:$4 sm:$0xff]  }
  0x10   :  { %568 = vmatprep.subr.bf16.mxu0 %v2608_v8  ;;  %v56_v43 = vcombine.high %v48_v41, %v48_v41  ;;  %v60_v52 = vpack.c.bf16 %v48_v41, %v48_v41  ;;  %v2643_v55 = vld [vmem:[%s3643_s1 + $0x13c] ss:$12 sps:$4 sm:$0xff]   ;;  %v2671_v56 = vld [vmem:[%s3643_s1 + $0x1a0] ss:$12 sps:$4 sm:$0xff]   ;;  %v2645_v57 = vld [vmem:[%s3643_s1 + $0x138] ss:$12 sps:$4 sm:$0xff]  }
  0x11   :  { %v2648_v58 = vld [vmem:[%s3643_s1 + $0x154] ss:$12 sps:$4 sm:$0xff]   ;;  %v2675_v59 = vld [vmem:[%s3643_s1 + $0x1b8] ss:$12 sps:$4 sm:$0xff]   ;;  %v2650_v60 = vld [vmem:[%s3643_s1 + $0x150] ss:$12 sps:$4 sm:$0xff]  }
  0x12   :  { %2318 = vmatpush3.bf16.msra.mxu1 %v2642_v25  ;;  %v61_v47 = vpack.c.bf16 %v56_v43, %v56_v43  ;;  %v2653_v61 = vld [vmem:[%s3643_s1 + $0x16c] ss:$12 sps:$4 sm:$0xff]   ;;  %v2679_v62 = vld [vmem:[%s3643_s1 + $0x1d0] ss:$12 sps:$4 sm:$0xff]   ;;  %v2655_v63 = vld [vmem:[%s3643_s1 + $0x168] ss:$12 sps:$4 sm:$0xff]  }
  0x13   :  { %569 = vmatpush1.bf16.msra.mxu0 %v2610_v9  ;;  %2319 = vmatprep.subr.bf16.mxu1 %v2646_v27  ;;  %v2661_v0 = vld [vmem:[%s3643_s1 + $0x184] ss:$12 sps:$4 sm:$0xff]   ;;  %v2683_v1 = vld [vmem:[%s3643_s1 + $0x1e8] ss:$12 sps:$4 sm:$0xff]   ;;  %v2659_v2 = vld [vmem:[%s3643_s1 + $0x180] ss:$12 sps:$4 sm:$0xff]   ;;  %v41_v9 = vcombine.high %v3022_v39, %v3022_v39 }
  0x14   :  { %570 = vmatprep.subr.bf16.mxu0 %v2611_v12  ;;  %592 = vmatprep.mubr.bf16.mxu0 %v61_v47  ;;  %v2666_v3 = vld [vmem:[%s3643_s1 + $0x19c] ss:$12 sps:$4 sm:$0xff]   ;;  %v2687_v4 = vld [vmem:[%s3643_s1 + $0x200] ss:$12 sps:$4 sm:$0xff]   ;;  %v2664_v5 = vld [vmem:[%s3643_s1 + $0x198] ss:$12 sps:$4 sm:$0xff]  }
  0x15   :  { %674 = vmatprep.mubr.bf16.mxu1 %v61_v47  ;;  %v2854_v6 = vmov 0   ;;  %v2670_v7 = vld [vmem:[%s3643_s1 + $0x1b4] ss:$12 sps:$4 sm:$0xff]   ;;  %v2691_v8 = vld [vmem:[%s3643_s1 + $0x218] ss:$12 sps:$4 sm:$0xff]   ;;  %v55_v13 = vrot.slane %v41_v9, %v3008_v35 }
  0x16   :  { %2320 = vmatpush3.bf16.msra.mxu1 %v2647_v31  ;;  %v2668_v10 = vld [vmem:[%s3643_s1 + $0x1b0] ss:$12 sps:$4 sm:$0xff]   ;;  %v2674_v11 = vld [vmem:[%s3643_s1 + $0x1cc] ss:$12 sps:$4 sm:$0xff]   ;;  %v2701_v23 = vld [vmem:[%s3645_s3 + $0x34] ss:$12 sps:$4 sm:$0xff]  }
  0x17   :  { %571 = vmatpush1.bf16.msra.mxu0 %v2613_v15  ;;  %2321 = vmatprep.subr.bf16.mxu1 %v2651_v32  ;;  %v2692_v12 = vld [vmem:[%s3643_s1 + $0x230] ss:$12 sps:$4 sm:$0xff]   ;;  %v2672_v15 = vld [vmem:[%s3643_s1 + $0x1c8] ss:$12 sps:$4 sm:$0xff]   ;;  %v2676_v17 = vld [vmem:[%s3643_s1 + $0x1e0] ss:$12 sps:$4 sm:$0xff]  }
  0x18   :  { %572 = vmatprep.subr.bf16.mxu0 %v2614_v16  ;;  %v2695_v14 = vld [vmem:[%s3645_s3 + $0x4] ss:$12 sps:$4 sm:$0xff]   ;;  %v2693_v18 = vld [vmem:[%s3645_s3] ss:$12 sps:$4 sm:$0xff]   ;;  %v2698_v21 = vld [vmem:[%s3645_s3 + $0x1c] ss:$12 sps:$4 sm:$0xff]  }
  0x19   :  { %v2678_v16 = vld [vmem:[%s3643_s1 + $0x1e4] ss:$12 sps:$4 sm:$0xff]   ;;  %v2686_v25 = vld [vmem:[%s3643_s1 + $0x214] ss:$12 sps:$4 sm:$0xff]   ;;  %v2704_v27 = vld [vmem:[%s3645_s3 + $0x4c] ss:$12 sps:$4 sm:$0xff]  }
  0x1a   :  { %2322 = vmatpush3.bf16.msra.mxu1 %v2652_v36  ;;  %v2696_v22 = vld [vmem:[%s3645_s3 + $0x18] ss:$12 sps:$4 sm:$0xff]   ;;  %v2702_v31 = vld [vmem:[%s3645_s3 + $0x48] ss:$12 sps:$4 sm:$0xff]   ;;  %v2705_v35 = vld [vmem:[%s3645_s3 + $0x60] ss:$12 sps:$4 sm:$0xff]  }
  0x1b   :  { %573 = vmatpush1.bf16.msra.mxu0 %v2616_v19  ;;  %2323 = vmatprep.subr.bf16.mxu1 %v2656_v37  ;;  %v2682_v19 = vld [vmem:[%s3643_s1 + $0x1fc] ss:$12 sps:$4 sm:$0xff]   ;;  %v2680_v24 = vld [vmem:[%s3643_s1 + $0x1f8] ss:$12 sps:$4 sm:$0xff]   ;;  %v2726_v41 = vld [vmem:[%s3645_s3 + $0x20] ss:$12 sps:$4 sm:$0xff]  }
  0x1c   :  { %574 = vmatprep.subr.bf16.mxu0 %v2617_v20  ;;  %v62_v20 = vpack.c.bf16 %v55_v13, %v55_v13  ;;  %v2690_v29 = vld [vmem:[%s3643_s1 + $0x22c] ss:$12 sps:$4 sm:$0xff]   ;;  %v2707_v32 = vld [vmem:[%s3645_s3 + $0x64] ss:$12 sps:$4 sm:$0xff]   ;;  %v2710_v36 = vld [vmem:[%s3645_s3 + $0x7c] ss:$12 sps:$4 sm:$0xff]  }
  0x1d   :  { %v2721_v37 = vld [vmem:[%s3645_s3 + $0x8] ss:$12 sps:$4 sm:$0xff]   ;;  %v2708_v39 = vld [vmem:[%s3645_s3 + $0x78] ss:$12 sps:$4 sm:$0xff]   ;;  %v2711_v43 = vld [vmem:[%s3645_s3 + $0x90] ss:$12 sps:$4 sm:$0xff]  }
  0x1e   :  { %2324 = vmatpush3.bf16.msra.mxu1 %v2657_v42  ;;  %v2730_v42 = vld [vmem:[%s3645_s3 + $0xf8] ss:$12 sps:$4 sm:$0xff]   ;;  %v2714_v47 = vld [vmem:[%s3645_s3 + $0xa8] ss:$12 sps:$4 sm:$0xff]  }
  0x1f   :  { %575 = vmatpush1.bf16.msra.mxu0 %v2619_v26  ;;  %2325 = vmatprep.subr.bf16.mxu1 %v2662_v44  ;;  %v2699_v26 = vld [vmem:[%s3645_s3 + $0x30] ss:$12 sps:$4 sm:$0xff]   ;;  %v2716_v44 = vld [vmem:[%s3645_s3 + $0xac] ss:$12 sps:$4 sm:$0xff]   ;;  %v2752_v9 = vld [vmem:[%s3645_s3 + $0x168] ss:$12 sps:$4 sm:$0xff]  }
  0x20   :  { %576 = vmatprep.subr.bf16.mxu0 %v2620_v28  ;;  %v2684_v28 = vld [vmem:[%s3643_s1 + $0x210] ss:$12 sps:$4 sm:$0xff]  }
  0x22   :  { %2326 = vmatpush3.bf16.msra.mxu1 %v2663_v48  ;;  %v2719_v48 = vld [vmem:[%s3645_s3 + $0xc4] ss:$12 sps:$4 sm:$0xff]  }
  0x23   :  { %577 = vmatpush1.bf16.msra.mxu0 %v2622_v33  ;;  %2440 = vmatprep.subr.bf16.mxu1 %v2852_v53  ;;  %v2688_v33 = vld [vmem:[%s3643_s1 + $0x228] ss:$12 sps:$4 sm:$0xff]  }
  0x24   :  { %578 = vmatprep.subr.bf16.mxu0 %v2623_v34  ;;  %v2720_v34 = vld [vmem:[%s3645_s3 + $0xc8] ss:$12 sps:$4 sm:$0xff]  }
  0x25   :  { %675 = vmatmul.mubr.bf16.vlgmr.msra.gmra.mrb[0].mxu1 %v60_v52 }
  0x26   :  { %2441 = vmatpush3.bf16.msra.mxu1 %v2667_v51  ;;  %2456 = vmatprep.mubr.msk.bf16.mxu1 %vm2853_vm0, %v2852_v53  ;;  %v2724_v51 = vld [vmem:[%s3645_s3 + $0xdc] ss:$12 sps:$4 sm:$0xff]  }
  0x27   :  { %579 = vmatpush1.bf16.msra.mxu0 %v2625_v38  ;;  %2442 = vmatprep.subr.bf16.mxu1 %v2852_v53  ;;  %v2725_v38 = vld [vmem:[%s3645_s3 + $0xe0] ss:$12 sps:$4 sm:$0xff]  }
  0x28   :  { %580 = vmatprep.subr.bf16.mxu0 %v2628_v40  ;;  %v2713_v40 = vld [vmem:[%s3645_s3 + $0x94] ss:$12 sps:$4 sm:$0xff]  }
  0x2a   :  { %2443 = vmatpush3.bf16.msra.mxu1 %v2671_v56  ;;  %v2734_v56 = vld [vmem:[%s3645_s3 + $0x10c] ss:$12 sps:$4 sm:$0xff]  }
  0x2b   :  { %581 = vmatpush1.bf16.msra.mxu0 %v2630_v45  ;;  %2444 = vmatprep.subr.bf16.mxu1 %v2852_v53  ;;  %v2731_v45 = vld [vmem:[%s3645_s3 + $0x38] ss:$12 sps:$4 sm:$0xff]  }
  0x2c   :  { %582 = vmatprep.subr.bf16.mxu0 %v2633_v46  ;;  %v2735_v46 = vld [vmem:[%s3645_s3 + $0x110] ss:$12 sps:$4 sm:$0xff]  }
  0x2e   :  { %2445 = vmatpush3.bf16.msra.mxu1 %v2675_v59  ;;  %v2740_v59 = vld [vmem:[%s3645_s3 + $0x128] ss:$12 sps:$4 sm:$0xff]  }
  0x2f   :  { %583 = vmatpush1.bf16.msra.mxu0 %v2635_v49  ;;  %2446 = vmatprep.subr.bf16.mxu1 %v2852_v53  ;;  %v2736_v49 = vld [vmem:[%s3645_s3 + $0x50] ss:$12 sps:$4 sm:$0xff]  }
  0x30   :  { %584 = vmatprep.subr.bf16.mxu0 %v2638_v50  ;;  %v2717_v50 = vld [vmem:[%s3645_s3 + $0xc0] ss:$12 sps:$4 sm:$0xff]  }
  0x32   :  { %2447 = vmatpush3.bf16.msra.mxu1 %v2679_v62  ;;  %v2744_v62 = vld [vmem:[%s3645_s3 + $0x13c] ss:$12 sps:$4 sm:$0xff]  }
  0x33   :  { %585 = vmatpush1.bf16.msra.mxu0 %v2640_v54  ;;  %2448 = vmatprep.subr.bf16.mxu1 %v2852_v53  ;;  %v2729_v54 = vld [vmem:[%s3645_s3 + $0xf4] ss:$12 sps:$4 sm:$0xff]  }
  0x34   :  { %586 = vmatprep.subr.bf16.mxu0 %v2643_v55  ;;  %v2727_v55 = vld [vmem:[%s3645_s3 + $0xf0] ss:$12 sps:$4 sm:$0xff]  }
  0x36   :  { %2449 = vmatpush3.bf16.msra.mxu1 %v2683_v1  ;;  %v2746_v1 = vld [vmem:[%s3645_s3 + $0x80] ss:$12 sps:$4 sm:$0xff]  }
  0x37   :  { %587 = vmatpush1.bf16.msra.mxu0 %v2645_v57  ;;  %2450 = vmatprep.subr.bf16.mxu1 %v2852_v53  ;;  %v2732_v57 = vld [vmem:[%s3645_s3 + $0x108] ss:$12 sps:$4 sm:$0xff]  }
  0x38   :  { %588 = vmatprep.subr.bf16.mxu0 %v2648_v58  ;;  %v2739_v58 = vld [vmem:[%s3645_s3 + $0x124] ss:$12 sps:$4 sm:$0xff]  }
  0x3a   :  { %2451 = vmatpush3.bf16.msra.mxu1 %v2687_v4  ;;  %v2747_v4 = vld [vmem:[%s3645_s3 + $0x150] ss:$12 sps:$4 sm:$0xff]  }
  0x3b   :  { %589 = vmatpush1.bf16.msra.mxu0 %v2650_v60  ;;  %2452 = vmatprep.subr.bf16.mxu1 %v2852_v53  ;;  %v2737_v60 = vld [vmem:[%s3645_s3 + $0x120] ss:$12 sps:$4 sm:$0xff]  }
  0x3c   :  { %590 = vmatprep.subr.bf16.mxu0 %v2653_v61  ;;  %v2741_v61 = vld [vmem:[%s3645_s3 + $0x68] ss:$12 sps:$4 sm:$0xff]  }
  0x3e   :  { %2453 = vmatpush3.bf16.msra.mxu1 %v2691_v8  ;;  %v2755_v8 = vld [vmem:[%s3645_s3 + $0x170] ss:$12 sps:$4 sm:$0xff]  }
  0x3f   :  { %591 = vmatpush1.bf16.msra.mxu0 %v2655_v63  ;;  %2454 = vmatprep.subr.bf16.mxu1 %v2852_v53  ;;  %v2745_v63 = vld [vmem:[%s3645_s3 + $0x140] ss:$12 sps:$4 sm:$0xff]  }
  0x40   :  { %601 = vmatprep.subr.bf16.mxu0 %v2661_v0  ;;  %v2742_v0 = vld [vmem:[%s3645_s3 + $0x138] ss:$12 sps:$4 sm:$0xff]  }
  0x42   :  { %593 = vmatmul.mubr.bf16.vlgmr.msra.gmra.mrb[0].mxu0 %v60_v52  ;;  %2455 = vmatpush3.bf16.msra.mxu1 %v2692_v12  ;;  %v2722_v52 = vld [vmem:[%s3645_s3 + $0xd8] ss:$12 sps:$4 sm:$0xff]  }
  0x43   :  { %602 = vmatpush1.bf16.msra.mxu0 %v2659_v2  ;;  %633 = vmatprep.mubr.bf16.mxu0 %v2854_v6  ;;  %v2749_v2 = vld [vmem:[%s3645_s3 + $0x154] ss:$12 sps:$4 sm:$0xff]  }
  0x44   :  { %603 = vmatprep.subr.bf16.mxu0 %v2666_v3  ;;  %1225 = vmatprep.subr.bf16.mxu1 %v2695_v14  ;;  %v2750_v3 = vld [vmem:[%s3645_s3 + $0x158] ss:$12 sps:$4 sm:$0xff]  }
  0x45   :  { %2457 = vmatmul.mubr.bf16.vlgmr.msra.gmra.mrb[4].mxu1 %v62_v20 }
  0x46   :  { %1226 = vmatpush1.bf16.msra.mxu1 %v2693_v18  ;;  %v159_v18 = vld [vmem:[%s3646_s2] sm:$0x7] }
  0x47   :  { %604 = vmatpush1.bf16.msra.mxu0 %v2664_v5  ;;  %1227 = vmatprep.subr.bf16.mxu1 %v2698_v21  ;;  %v2751_v5 = vld [vmem:[%s3645_s3 + $0x98] ss:$12 sps:$4 sm:$0xff]  }
  0x48   :  { %605 = vmatprep.subr.bf16.mxu0 %v2670_v7  ;;  %v2754_v7 = vld [vmem:[%s3645_s3 + $0x16c] ss:$12 sps:$4 sm:$0xff]  }
  0x4a   :  { %1228 = vmatpush1.bf16.msra.mxu1 %v2696_v22 }
  0x4b   :  { %606 = vmatpush1.bf16.msra.mxu0 %v2668_v10  ;;  %1229 = vmatprep.subr.bf16.mxu1 %v2701_v23  ;;  %v2756_v10 = vld [vmem:[%s3645_s3 + $0xb0] ss:$12 sps:$4 sm:$0xff]  }
  0x4c   :  { %607 = vmatprep.subr.bf16.mxu0 %v2674_v11  ;;  %v2759_v11 = vld [vmem:[%s3645_s3 + $0x184] ss:$12 sps:$4 sm:$0xff]  }
  0x4e   :  { %1230 = vmatpush1.bf16.msra.mxu1 %v2699_v26  ;;  %v163_v26 = vsub.s32 0, %v2993_v30 }
  0x4f   :  { %608 = vmatpush1.bf16.msra.mxu0 %v2672_v15  ;;  %1231 = vmatprep.subr.bf16.mxu1 %v2704_v27  ;;  %v167_v27 = vsub.s32 1, %v2993_v30 }
  0x50   :  { %609 = vmatprep.subr.bf16.mxu0 %v2678_v16 }
  0x52   :  { %1232 = vmatpush1.bf16.msra.mxu1 %v2702_v31 }
  0x53   :  { %610 = vmatpush1.bf16.msra.mxu0 %v2676_v17  ;;  %1233 = vmatprep.subr.bf16.mxu1 %v2707_v32  ;;  %v171_v17 = vsub.s32 2, %v2993_v30 }
  0x54   :  { %611 = vmatprep.subr.bf16.mxu0 %v2682_v19 }
  0x55   :  { %v172_v19 = vrot.slane %v159_v18, %v171_v17 }
  0x56   :  { %1234 = vmatpush1.bf16.msra.mxu1 %v2705_v35 }
  0x57   :  { %612 = vmatpush1.bf16.msra.mxu0 %v2680_v24  ;;  %1235 = vmatprep.subr.bf16.mxu1 %v2710_v36 }
  0x58   :  { %613 = vmatprep.subr.bf16.mxu0 %v2686_v25 }
  0x5a   :  { %1236 = vmatpush1.bf16.msra.mxu1 %v2708_v39 }
  0x5b   :  { %614 = vmatpush1.bf16.msra.mxu0 %v2684_v28  ;;  %1237 = vmatprep.subr.bf16.mxu1 %v2713_v40  ;;  %v164_v28 = vrot.slane %v159_v18, %v163_v26  ;;  %v2757_v40 = vld [vmem:[%s3645_s3 + $0x180] ss:$12 sps:$4 sm:$0xff]  }
  0x5c   :  { %615 = vmatprep.subr.bf16.mxu0 %v2690_v29  ;;  %v168_v29 = vrot.slane %v159_v18, %v167_v27  ;;  %v2809_v18 = vld [vmem:[%s3648_s7 + $0x30] sm:$0xff]  }
  0x5e   :  { %1238 = vmatpush1.bf16.msra.mxu1 %v2711_v43  ;;  %v2763_v43 = vld [vmem:[%s3645_s3 + $0x19c] ss:$12 sps:$4 sm:$0xff]  }
  0x5f   :  { %616 = vmatpush1.bf16.msra.mxu0 %v2688_v33  ;;  %1239 = vmatprep.subr.bf16.mxu1 %v2716_v44  ;;  %v2761_v44 = vld [vmem:[%s3645_s3 + $0x198] ss:$12 sps:$4 sm:$0xff]  }
  0x60   :  { %2342 = vmatprep.subr.bf16.mxu0 %v2720_v34 }
  0x62   :  { %634 = vmatmul.mubr.bf16.vlgmr.msra.gmra.mrb[0].mxu0 %v62_v20  ;;  %1240 = vmatpush1.bf16.msra.mxu1 %v2714_v47  ;;  %v2765_v47 = vld [vmem:[%s3645_s3 + $0x1b0] ss:$12 sps:$4 sm:$0xff]  }
  0x63   :  { %2343 = vmatpush3.bf16.msra.mxu0 %v2721_v37  ;;  %1241 = vmatprep.subr.bf16.mxu1 %v2719_v48  ;;  %v2768_v48 = vld [vmem:[%s3645_s3 + $0x1b8] ss:$12 sps:$4 sm:$0xff]  }
  0x64   :  { %2344 = vmatprep.subr.bf16.mxu0 %v2725_v38 }
  0x66   :  { %1242 = vmatpush1.bf16.msra.mxu1 %v2717_v50  ;;  %v2772_v50 = vld [vmem:[%s3645_s3 + $0x1d0] ss:$12 sps:$4 sm:$0xff]  }
  0x67   :  { %2345 = vmatpush3.bf16.msra.mxu0 %v2726_v41  ;;  %1243 = vmatprep.subr.bf16.mxu1 %v2724_v51  ;;  %v2760_v41 = vld [vmem:[%s3645_s3 + $0x188] ss:$12 sps:$4 sm:$0xff]   ;;  %v2775_v51 = vld [vmem:[%s3645_s3 + $0x1e4] ss:$12 sps:$4 sm:$0xff]  }
  0x68   :  { %2346 = vmatprep.subr.bf16.mxu0 %v2730_v42 }
  0x6a   :  { %1244 = vmatpush1.bf16.msra.mxu1 %v2722_v52  ;;  %v2773_v52 = vld [vmem:[%s3645_s3 + $0x1e0] ss:$12 sps:$4 sm:$0xff]  }
  0x6b   :  { %2347 = vmatpush3.bf16.msra.mxu0 %v2731_v45  ;;  %1245 = vmatprep.subr.bf16.mxu1 %v2729_v54  ;;  %v2764_v45 = vld [vmem:[%s3645_s3 + $0x1a0] ss:$12 sps:$4 sm:$0xff]   ;;  %v2776_v54 = vld [vmem:[%s3645_s3 + $0x1e8] ss:$12 sps:$4 sm:$0xff]  }
  0x6c   :  { %2348 = vmatprep.subr.bf16.mxu0 %v2735_v46  ;;  %v2767_v46 = vld [vmem:[%s3645_s3 + $0x1b4] ss:$12 sps:$4 sm:$0xff]  }
  0x6e   :  { %1246 = vmatpush1.bf16.msra.mxu1 %v2727_v55  ;;  %v2779_v55 = vld [vmem:[%s3645_s3 + $0x1fc] ss:$12 sps:$4 sm:$0xff]  }
  0x6f   :  { %2349 = vmatpush3.bf16.msra.mxu0 %v2736_v49  ;;  %1247 = vmatprep.subr.bf16.mxu1 %v2734_v56  ;;  %v2769_v49 = vld [vmem:[%s3645_s3 + $0x1c8] ss:$12 sps:$4 sm:$0xff]   ;;  %v2777_v56 = vld [vmem:[%s3645_s3 + $0x1f8] ss:$12 sps:$4 sm:$0xff]  }
  0x70   :  { %2350 = vmatprep.subr.bf16.mxu0 %v2740_v59  ;;  %v2781_v59 = vld [vmem:[%s3645_s3 + $0x210] ss:$12 sps:$4 sm:$0xff]  }
  0x72   :  { %1248 = vmatpush1.bf16.msra.mxu1 %v2732_v57  ;;  %v2780_v57 = vld [vmem:[%s3645_s3 + $0x200] ss:$12 sps:$4 sm:$0xff]  }
  0x73   :  { %1249 = vmatprep.subr.bf16.mxu1 %v2739_v58  ;;  %2351 = vmatpush3.bf16.msra.mxu0 %v2741_v61  ;;  %v2783_v58 = vld [vmem:[%s3645_s3 + $0x214] ss:$12 sps:$4 sm:$0xff]   ;;  %v2787_v61 = vld [vmem:[%s3645_s3 + $0x22c] ss:$12 sps:$4 sm:$0xff]  }
  0x74   :  { %2352 = vmatprep.subr.bf16.mxu0 %v2745_v63  ;;  %v2788_v63 = vld [vmem:[%s3645_s3 + $0x230] ss:$12 sps:$4 sm:$0xff]  }
  0x76   :  { %1250 = vmatpush1.bf16.msra.mxu1 %v2737_v60  ;;  %v2784_v60 = vld [vmem:[%s3645_s3 + $0x218] ss:$12 sps:$4 sm:$0xff]  }
  0x77   :  { %1251 = vmatprep.subr.bf16.mxu1 %v2744_v62  ;;  %2353 = vmatpush3.bf16.msra.mxu0 %v2746_v1  ;;  %v2785_v62 = vld [vmem:[%s3645_s3 + $0x228] ss:$12 sps:$4 sm:$0xff]  }
  0x78   :  { %2354 = vmatprep.subr.bf16.mxu0 %v2750_v3  ;;  %v2790_v3 = vld [vmem:[%s3647_s5 + $0x8] sm:$0xff]  }
  0x7a   :  { %1252 = vmatpush1.bf16.msra.mxu1 %v2742_v0 }
  0x7b   :  { %1253 = vmatprep.subr.bf16.mxu1 %v2749_v2  ;;  %2355 = vmatpush3.bf16.msra.mxu0 %v2751_v5  ;;  %v2789_v2 = vld [vmem:[%s3647_s5] sm:$0xff]   ;;  %v2792_v5 = vld [vmem:[%s3647_s5 + $0x18] sm:$0xff]  }
  0x7c   :  { %2356 = vmatprep.subr.bf16.mxu0 %v2755_v8  ;;  %v2794_v8 = vld [vmem:[%s3647_s5 + $0x28] sm:$0xff]  }
  0x7e   :  { %1254 = vmatpush1.bf16.msra.mxu1 %v2747_v4  ;;  %v2791_v4 = vld [vmem:[%s3647_s5 + $0x10] sm:$0xff]  }
  0x7f   :  { %1255 = vmatprep.subr.bf16.mxu1 %v2754_v7  ;;  %2357 = vmatpush3.bf16.msra.mxu0 %v2756_v10  ;;  %v2793_v7 = vld [vmem:[%s3647_s5 + $0x20] sm:$0xff]   ;;  %v2796_v10 = vld [vmem:[%s3647_s5 + $0x38] sm:$0xff]  }
  0x80   :  { %2460 = vmatprep.subr.bf16.mxu0 %v2852_v53 }
  0x82   :  { %1256 = vmatpush1.bf16.msra.mxu1 %v2752_v9  ;;  %v2795_v9 = vld [vmem:[%s3647_s5 + $0x30] sm:$0xff]  }
  0x83   :  { %1266 = vmatprep.subr.bf16.mxu1 %v2759_v11  ;;  %v2797_v11 = vld [vmem:[%s3648_s7] sm:$0xff]  }
  0xf8   :  { %v2327_v12 = vpop.f32.mrb[0].mxu1 }
  0xf9   :  { %v2328_v13 = vpop.f32.mrb[1].mxu1 }
  0xfa   :  { %v2329_v14 = vadd.f32 %v2328_v13, %v2327_v12  ;;  %v2330_v15 = vpop.f32.mrb[2].mxu1  ;;  %v2799_v12 = vld [vmem:[%s3648_s7 + $0x8] sm:$0xff]   ;;  %v2801_v13 = vld [vmem:[%s3648_s7 + $0x10] sm:$0xff]  }
  0xfb   :  { %v2331_v16 = vpop.f32.mrb[3].mxu1  ;;  %v2805_v15 = vld [vmem:[%s3648_s7 + $0x20] sm:$0xff]  }
  0xfc   :  { %v677_v20 = vadd.f32 %v2329_v14, %v172_v19  ;;  %v2803_v14 = vld [vmem:[%s3648_s7 + $0x18] sm:$0xff]   ;;  %v2807_v16 = vld [vmem:[%s3648_s7 + $0x28] sm:$0xff]  }
 0x118   :  { %v716_v21 = vpop.f32.mrb[4].mxu1 }
 0x119   :  { %v717_v22 = vadd.f32 %v716_v21, %v677_v20  ;;  %v2458_v23 = vpop.f32.mrb[5].mxu1 }
 0x11a   :  { %v719_v24 = vpop.f32.mrb[6].mxu1 }
 0x11b   :  { %v2459_v25 = vpop.f32.mrb[7].mxu1  ;;  %v824_v24 = vld [vmem:[%s3650_s4] sm:$0x7] }
 0x11c   :  { %v837_v25 = vrot.slane %v824_v24, %v171_v17  ;;  %v2798_v17 = vld [vmem:[%s3649_s9 + $0xc0] sm:$0xff]  }
 0x135   :  { %v635_v31 = vpop.f32.mrb[0].mxu0 }
 0x136   :  { %v2580_v32 = vadd.f32 %v635_v31, %v164_v28  ;;  %v637_v33 = vpop.f32.mrb[1].mxu0  ;;  %v829_v28 = vrot.slane %v824_v24, %v163_v26 }
 0x137   :  { %v2581_v34 = vadd.f32 %v637_v33, %v168_v29  ;;  %v639_v35 = vpop.f32.mrb[2].mxu0  ;;  %v833_v29 = vrot.slane %v824_v24, %v167_v27  ;;  %v2800_v27 = vld [vmem:[%s3649_s9 + $0xc8] sm:$0xff]   ;;  %v2841_v24 = vld [vmem:[%s3649_s9 + $0x120] sm:$0xff]  }
 0x138   :  { %2845 = vtanh.f32 %v2580_v32  ;;  %v640_v36 = vpop.f32.mrb[3].mxu0 }
 0x139   :  { %2847 = vtanh.f32 %v2581_v34 }
 0x13a   :  { %2849 = vtanh.f32 %v717_v22 }
 0x142   :  { %v2846_v37 = vpop.eup %2845 }
 0x143   :  { %v2848_v38 = vpop.eup %2847  ;;  %v725_v42 = vpack.c.bf16 %v2846_v37, %v2846_v37 }
 0x144   :  { %v726_v39 = vpack.c.bf16 %v2848_v38, %v2848_v38  ;;  %v2850_v0 = vpop.eup %2849 }
 0x145   :  { %v727_v1 = vpack.c.bf16 %v2850_v0, %v2850_v0  ;;  %v2820_v0 = vld [vmem:[%s3649_s9 + $0x10] sm:$0xff]  }
 0x146   :  { %1257 = vmatprep.mubr.bf16.mxu1 %v726_v39  ;;  %1339 = vmatprep.mubr.bf16.mxu0 %v726_v39 }
 0x147   :  { %1258 = vmatmul.mubr.bf16.vlgmr.msra.gmra.mrb[8].mxu1 %v725_v42  ;;  %1340 = vmatmul.mubr.bf16.vlgmr.msra.gmra.mrb[4].mxu0 %v725_v42  ;;  %v2802_v42 = vld [vmem:[%s3649_s9 + $0xd0] sm:$0xff]  }
 0x148   :  { %1267 = vmatpush1.bf16.msra.mxu1 %v2757_v40  ;;  %2461 = vmatpush3.bf16.msra.mxu0 %v2760_v41 }
 0x149   :  { %1268 = vmatprep.subr.bf16.mxu1 %v2763_v43  ;;  %2462 = vmatprep.subr.bf16.mxu0 %v2852_v53  ;;  %v2804_v43 = vld [vmem:[%s3649_s9 + $0xd8] sm:$0xff]  }
 0x14a   :  { %1298 = vmatprep.mubr.bf16.mxu1 %v2854_v6  ;;  %2476 = vmatprep.mubr.msk.bf16.mxu0 %vm2853_vm0, %v2852_v53  ;;  %v2771_v6 = vld [vmem:[%s3645_s3 + $0x1cc] ss:$12 sps:$4 sm:$0xff]  }
 0x14c   :  { %1269 = vmatpush1.bf16.msra.mxu1 %v2761_v44  ;;  %2463 = vmatpush3.bf16.msra.mxu0 %v2764_v45  ;;  %v2806_v44 = vld [vmem:[%s3649_s9 + $0xe0] sm:$0xff]   ;;  %v2808_v45 = vld [vmem:[%s3649_s9 + $0xe8] sm:$0xff]  }
 0x14d   :  { %1270 = vmatprep.subr.bf16.mxu1 %v2767_v46  ;;  %2464 = vmatprep.subr.bf16.mxu0 %v2852_v53  ;;  %v2810_v46 = vld [vmem:[%s3649_s9 + $0xf0] sm:$0xff]  }
 0x150   :  { %1271 = vmatpush1.bf16.msra.mxu1 %v2765_v47  ;;  %2465 = vmatpush3.bf16.msra.mxu0 %v2768_v48  ;;  %v2811_v47 = vld [vmem:[%s3648_s7 + $0x38] sm:$0xff]  }
 0x151   :  { %1272 = vmatprep.subr.bf16.mxu1 %v2771_v6  ;;  %2466 = vmatprep.subr.bf16.mxu0 %v2852_v53  ;;  %v2812_v48 = vld [vmem:[%s3649_s9 + $0xf8] sm:$0xff]   ;;  %v2813_v6 = vld [vmem:[%s3649_s9 + $0x40] sm:$0xff]  }
 0x154   :  { %1273 = vmatpush1.bf16.msra.mxu1 %v2769_v49  ;;  %2467 = vmatpush3.bf16.msra.mxu0 %v2772_v50  ;;  %v2252_v49 = vld [vmem:[%s3651_s6] ss:$0 sm:$0xff] }
 0x155   :  { %1274 = vmatprep.subr.bf16.mxu1 %v2775_v51  ;;  %2468 = vmatprep.subr.bf16.mxu0 %v2852_v53 }
 0x158   :  { %1275 = vmatpush1.bf16.msra.mxu1 %v2773_v52  ;;  %2469 = vmatpush3.bf16.msra.mxu0 %v2776_v54 }
 0x159   :  { %1276 = vmatprep.subr.bf16.mxu1 %v2779_v55  ;;  %2470 = vmatprep.subr.bf16.mxu0 %v2852_v53  ;;  %v2814_v55 = vld [vmem:[%s3649_s9] sm:$0xff]  }
 0x15c   :  { %1277 = vmatpush1.bf16.msra.mxu1 %v2777_v56  ;;  %2471 = vmatpush3.bf16.msra.mxu0 %v2780_v57  ;;  %v2815_v56 = vld [vmem:[%s3649_s9 + $0x80] sm:$0xff]  }
 0x15d   :  { %1278 = vmatprep.subr.bf16.mxu1 %v2783_v58  ;;  %2472 = vmatprep.subr.bf16.mxu0 %v2852_v53 }
 0x160   :  { %1279 = vmatpush1.bf16.msra.mxu1 %v2781_v59  ;;  %2473 = vmatpush3.bf16.msra.mxu0 %v2784_v60  ;;  %v2816_v59 = vld [vmem:[%s3649_s9 + $0x48] sm:$0xff]  }
 0x161   :  { %1280 = vmatprep.subr.bf16.mxu1 %v2787_v61  ;;  %2474 = vmatprep.subr.bf16.mxu0 %v2852_v53  ;;  %v2817_v61 = vld [vmem:[%s3649_s9 + $0x8] sm:$0xff]  }
 0x164   :  { %1281 = vmatpush1.bf16.msra.mxu1 %v2785_v62  ;;  %2475 = vmatpush3.bf16.msra.mxu0 %v2788_v63  ;;  %v2818_v62 = vld [vmem:[%s3649_s9 + $0x88] sm:$0xff]   ;;  %v2819_v63 = vld [vmem:[%s3649_s9 + $0x50] sm:$0xff]  }
 0x165   :  { %2480 = vmatprep.subr.bf16.mxu0 %v2852_v53  ;;  %2500 = vmatprep.subr.bf16.mxu1 %v2852_v53 }
 0x167   :  { %1299 = vmatmul.mubr.bf16.vlgmr.msra.gmra.mrb[8].mxu1 %v727_v1  ;;  %2477 = vmatmul.mubr.bf16.vlgmr.msra.gmra.mrb[8].mxu0 %v727_v1  ;;  %v2821_v1 = vld [vmem:[%s3649_s9 + $0x90] sm:$0xff]  }
 0x168   :  { %2496 = vmatprep.mubr.msk.bf16.mxu0 %vm2853_vm0, %v2852_v53  ;;  %2516 = vmatprep.mubr.msk.bf16.mxu1 %vm2853_vm0, %v2852_v53 }
 0x169   :  { %2481 = vmatpush3.bf16.msra.mxu0 %v2789_v2  ;;  %2501 = vmatpush3.bf16.msra.mxu1 %v2797_v11  ;;  %v2822_v2 = vld [vmem:[%s3649_s9 + $0x58] sm:$0xff]   ;;  %v2830_v11 = vld [vmem:[%s3649_s9 + $0xa8] sm:$0xff]  }
 0x16a   :  { %2482 = vmatprep.subr.bf16.mxu0 %v2852_v53  ;;  %2502 = vmatprep.subr.bf16.mxu1 %v2852_v53 }
 0x16d   :  { %2483 = vmatpush3.bf16.msra.mxu0 %v2790_v3  ;;  %2503 = vmatpush3.bf16.msra.mxu1 %v2799_v12  ;;  %v2823_v3 = vld [vmem:[%s3649_s9 + $0x18] sm:$0xff]   ;;  %v2831_v12 = vld [vmem:[%s3649_s9 + $0x70] sm:$0xff]  }
 0x16e   :  { %2484 = vmatprep.subr.bf16.mxu0 %v2852_v53  ;;  %2504 = vmatprep.subr.bf16.mxu1 %v2852_v53 }
 0x171   :  { %2485 = vmatpush3.bf16.msra.mxu0 %v2791_v4  ;;  %2505 = vmatpush3.bf16.msra.mxu1 %v2801_v13  ;;  %v2824_v4 = vld [vmem:[%s3649_s9 + $0x98] sm:$0xff]   ;;  %v2832_v13 = vld [vmem:[%s3649_s9 + $0x30] sm:$0xff]  }
 0x172   :  { %2486 = vmatprep.subr.bf16.mxu0 %v2852_v53  ;;  %2506 = vmatprep.subr.bf16.mxu1 %v2852_v53 }
 0x175   :  { %2487 = vmatpush3.bf16.msra.mxu0 %v2792_v5  ;;  %2507 = vmatpush3.bf16.msra.mxu1 %v2803_v14  ;;  %v2825_v5 = vld [vmem:[%s3649_s9 + $0x60] sm:$0xff]   ;;  %v2833_v14 = vld [vmem:[%s3649_s9 + $0xb0] sm:$0xff]  }
 0x176   :  { %2488 = vmatprep.subr.bf16.mxu0 %v2852_v53  ;;  %2508 = vmatprep.subr.bf16.mxu1 %v2852_v53 }
 0x179   :  { %2489 = vmatpush3.bf16.msra.mxu0 %v2793_v7  ;;  %2509 = vmatpush3.bf16.msra.mxu1 %v2805_v15  ;;  %v2826_v7 = vld [vmem:[%s3649_s9 + $0x20] sm:$0xff]   ;;  %v2834_v15 = vld [vmem:[%s3649_s9 + $0x78] sm:$0xff]  }
 0x17a   :  { %2490 = vmatprep.subr.bf16.mxu0 %v2852_v53  ;;  %2510 = vmatprep.subr.bf16.mxu1 %v2852_v53 }
 0x17d   :  { %2491 = vmatpush3.bf16.msra.mxu0 %v2794_v8  ;;  %2511 = vmatpush3.bf16.msra.mxu1 %v2807_v16  ;;  %v2827_v8 = vld [vmem:[%s3649_s9 + $0xa0] sm:$0xff]   ;;  %v2835_v16 = vld [vmem:[%s3649_s9 + $0x38] sm:$0xff]  }
 0x17e   :  { %2492 = vmatprep.subr.bf16.mxu0 %v2852_v53  ;;  %2512 = vmatprep.subr.bf16.mxu1 %v2852_v53 }
 0x181   :  { %2493 = vmatpush3.bf16.msra.mxu0 %v2795_v9  ;;  %2513 = vmatpush3.bf16.msra.mxu1 %v2809_v18  ;;  %v2828_v9 = vld [vmem:[%s3649_s9 + $0x68] sm:$0xff]   ;;  %v2836_v18 = vld [vmem:[%s3649_s9 + $0xb8] sm:$0xff]  }
 0x182   :  { %2494 = vmatprep.subr.bf16.mxu0 %v2852_v53  ;;  %2514 = vmatprep.subr.bf16.mxu1 %v2852_v53 }
 0x185   :  { %2495 = vmatpush3.bf16.msra.mxu0 %v2796_v10  ;;  %2515 = vmatpush3.bf16.msra.mxu1 %v2811_v47  ;;  %v2829_v10 = vld [vmem:[%s3649_s9 + $0x28] sm:$0xff]  }
 0x186   :  { %2520 = vmatprep.subr.bf16.mxu0 %v2852_v53  ;;  %2400 = vmatprep.subr.bf16.mxu1 %v2813_v6  ;;  %v2310_v6 = vld [vmem:[%s3653_s10] ss:$0 sm:$0xff] }
 0x21a   :  { %v2358_v19 = vpop.f32.mrb[4].mxu0 }
 0x21b   :  { %v2359_v20 = vpop.f32.mrb[5].mxu0 }
 0x21c   :  { %v2360_v21 = vadd.f32 %v2359_v20, %v2358_v19  ;;  %v2361_v22 = vpop.f32.mrb[6].mxu0  ;;  %v2837_v19 = vld [vmem:[%s3649_s9 + $0x100] sm:$0xff]  }
 0x21d   :  { %v2362_v23 = vpop.f32.mrb[7].mxu0  ;;  %v2839_v22 = vld [vmem:[%s3649_s9 + $0x110] sm:$0xff]  }
 0x21e   :  { %v1342_v31 = vadd.f32 %v2360_v21, %v837_v25  ;;  %v2838_v21 = vld [vmem:[%s3649_s9 + $0x108] sm:$0xff]   ;;  %v2840_v23 = vld [vmem:[%s3649_s9 + $0x118] sm:$0xff]  }
 0x21f   :  { %v2842_v25 = vld [vmem:[%s3649_s9 + $0x128] sm:$0xff]  }
 0x23a   :  { %v1300_v32 = vpop.f32.mrb[8].mxu1  ;;  %v1381_v33 = vpop.f32.mrb[8].mxu0 }
 0x23b   :  { %v3471_v34 = vadd.f32 %v1300_v32, %v829_v28  ;;  %v1382_v35 = vadd.f32 %v1381_v33, %v1342_v31  ;;  %v1302_v36 = vpop.f32.mrb[9].mxu1  ;;  %v2478_v37 = vpop.f32.mrb[9].mxu0  ;;  %v2843_v28 = vld [vmem:[%s3649_s9 + $0x130] sm:$0xff]   ;;  %v2261_v31 = vld [vmem:[%s3652_s8] ss:$0 sm:$0xff] }
 0x23c   :  { %v2583_v38 = vadd.f32 %v1302_v36, %v833_v29  ;;  %v1304_v39 = vpop.f32.mrb[10].mxu1  ;;  %v1384_v40 = vpop.f32.mrb[10].mxu0  ;;  %v2844_v29 = vld [vmem:[%s3649_s9 + $0x138] sm:$0xff]  }
 0x23d   :  { %v3476_v41 = vpack.c.bf16 %v1382_v35, %v1382_v35  ;;  %v1305_v26 = vpop.f32.mrb[11].mxu1  ;;  %v2479_v30 = vpop.f32.mrb[11].mxu0  ;;  %v1611_v20 = vpack.c.bf16 %v3471_v34, %v3471_v34 }
 0x23e   :  { %v1612_v60 = vpack.c.bf16 %v2583_v38, %v2583_v38 }
 0x23f   :  { %2497 = vmatmul.mubr.bf16.vlgmr.msra.gmra.mrb[12].mxu0 %v3476_v41 }
 0x240   :  { %2521 = vmatpush3.bf16.msra.mxu0 %v2798_v17  ;;  %2536 = vmatprep.mubr.msk.bf16.mxu0 %vm2853_vm0, %v2852_v53 }
 0x241   :  { %2522 = vmatprep.subr.bf16.mxu0 %v2852_v53 }
 0x244   :  { %2523 = vmatpush3.bf16.msra.mxu0 %v2800_v27 }
 0x245   :  { %2524 = vmatprep.subr.bf16.mxu0 %v2852_v53 }
 0x248   :  { %2525 = vmatpush3.bf16.msra.mxu0 %v2802_v42 }
 0x249   :  { %2526 = vmatprep.subr.bf16.mxu0 %v2852_v53 }
 0x24c   :  { %2527 = vmatpush3.bf16.msra.mxu0 %v2804_v43 }
 0x24d   :  { %2528 = vmatprep.subr.bf16.mxu0 %v2852_v53 }
 0x250   :  { %2529 = vmatpush3.bf16.msra.mxu0 %v2806_v44 }
 0x251   :  { %2530 = vmatprep.subr.bf16.mxu0 %v2852_v53 }
 0x254   :  { %2531 = vmatpush3.bf16.msra.mxu0 %v2808_v45 }
 0x255   :  { %2532 = vmatprep.subr.bf16.mxu0 %v2852_v53 }
 0x258   :  { %2533 = vmatpush3.bf16.msra.mxu0 %v2810_v46 }
 0x259   :  { %2534 = vmatprep.subr.bf16.mxu0 %v2852_v53 }
 0x25c   :  { %2535 = vmatpush3.bf16.msra.mxu0 %v2812_v48 }
 0x25d   :  { %2540 = vmatprep.subr.bf16.mxu0 %v2852_v53 }
 0x312   :  { %v1493_v50 = vpop.f32.mrb[12].mxu0 }
 0x313   :  { %v1494_v51 = vadd.f32 %v2252_v49, %v1493_v50  ;;  %v2498_v52 = vpop.f32.mrb[13].mxu0 }
 0x314   :  { %v1496_v54 = vpop.f32.mrb[14].mxu0 }
 0x315   :  { %v1499_v57 = vpack.c.bf16 %v1494_v51, %v1494_v51  ;;  %v2499_v58 = vpop.f32.mrb[15].mxu0 }
 0x317   :  { %2517 = vmatmul.mubr.bf16.vlgmr.msra.gmra.mrb[12].mxu1 %v1499_v57  ;;  %2537 = vmatmul.mubr.bf16.vlgmr.msra.gmra.mrb[16].mxu0 %v1499_v57 }
 0x318   :  { %2401 = vmatpush3.bf16.msra.mxu1 %v2814_v55  ;;  %2541 = vmatpush3.bf16.msra.mxu0 %v2815_v56 }
 0x319   :  { %1941 = vmatprep.mubr.bf16.mxu1 %v1612_v60  ;;  %2402 = vmatprep.subr.bf16.mxu1 %v2816_v59 }
 0x31a   :  { %2542 = vmatprep.subr.bf16.mxu0 %v2852_v53  ;;  %2556 = vmatprep.mubr.msk.bf16.mxu0 %vm2853_vm0, %v2852_v53 }
 0x31c   :  { %2403 = vmatpush3.bf16.msra.mxu1 %v2817_v61  ;;  %2543 = vmatpush3.bf16.msra.mxu0 %v2818_v62 }
 0x31d   :  { %2404 = vmatprep.subr.bf16.mxu1 %v2819_v63  ;;  %2544 = vmatprep.subr.bf16.mxu0 %v2852_v53 }
 0x320   :  { %2405 = vmatpush3.bf16.msra.mxu1 %v2820_v0  ;;  %2545 = vmatpush3.bf16.msra.mxu0 %v2821_v1 }
 0x321   :  { %2406 = vmatprep.subr.bf16.mxu1 %v2822_v2  ;;  %2546 = vmatprep.subr.bf16.mxu0 %v2852_v53 }
 0x324   :  { %2407 = vmatpush3.bf16.msra.mxu1 %v2823_v3  ;;  %2547 = vmatpush3.bf16.msra.mxu0 %v2824_v4 }
 0x325   :  { %2408 = vmatprep.subr.bf16.mxu1 %v2825_v5  ;;  %2548 = vmatprep.subr.bf16.mxu0 %v2852_v53 }
 0x328   :  { %2409 = vmatpush3.bf16.msra.mxu1 %v2826_v7  ;;  %2549 = vmatpush3.bf16.msra.mxu0 %v2827_v8 }
 0x329   :  { %2410 = vmatprep.subr.bf16.mxu1 %v2828_v9  ;;  %2550 = vmatprep.subr.bf16.mxu0 %v2852_v53 }
 0x32c   :  { %2411 = vmatpush3.bf16.msra.mxu1 %v2829_v10  ;;  %2551 = vmatpush3.bf16.msra.mxu0 %v2830_v11 }
 0x32d   :  { %2412 = vmatprep.subr.bf16.mxu1 %v2831_v12  ;;  %2552 = vmatprep.subr.bf16.mxu0 %v2852_v53 }
 0x330   :  { %2413 = vmatpush3.bf16.msra.mxu1 %v2832_v13  ;;  %2553 = vmatpush3.bf16.msra.mxu0 %v2833_v14 }
 0x331   :  { %2414 = vmatprep.subr.bf16.mxu1 %v2834_v15  ;;  %2554 = vmatprep.subr.bf16.mxu0 %v2852_v53 }
 0x334   :  { %2415 = vmatpush3.bf16.msra.mxu1 %v2835_v16  ;;  %2555 = vmatpush3.bf16.msra.mxu0 %v2836_v18 }
 0x335   :  { %2560 = vmatprep.subr.bf16.mxu1 %v2852_v53 }
 0x337   :  { %1942 = vmatmul.mubr.bf16.vlgmr.msra.gmra.mrb[16].mxu1 %v1611_v20  ;;  %2557 = vmatmul.mubr.bf16.vlgmr.msra.gmra.mrb[20].mxu0 %v3476_v41 }
 0x338   :  { %2561 = vmatpush3.bf16.msra.mxu1 %v2837_v19  ;;  %2576 = vmatprep.mubr.msk.bf16.mxu1 %vm2853_vm0, %v2852_v53 }
 0x339   :  { %2562 = vmatprep.subr.bf16.mxu1 %v2852_v53 }
 0x33c   :  { %2563 = vmatpush3.bf16.msra.mxu1 %v2838_v21 }
 0x33d   :  { %2564 = vmatprep.subr.bf16.mxu1 %v2852_v53 }
 0x340   :  { %2565 = vmatpush3.bf16.msra.mxu1 %v2839_v22 }
 0x341   :  { %2566 = vmatprep.subr.bf16.mxu1 %v2852_v53 }
 0x344   :  { %2567 = vmatpush3.bf16.msra.mxu1 %v2840_v23 }
 0x345   :  { %2568 = vmatprep.subr.bf16.mxu1 %v2852_v53 }
 0x348   :  { %2569 = vmatpush3.bf16.msra.mxu1 %v2841_v24 }
 0x349   :  { %2570 = vmatprep.subr.bf16.mxu1 %v2852_v53 }
 0x34c   :  { %2571 = vmatpush3.bf16.msra.mxu1 %v2842_v25 }
 0x34d   :  { %2572 = vmatprep.subr.bf16.mxu1 %v2852_v53 }
 0x350   :  { %2573 = vmatpush3.bf16.msra.mxu1 %v2843_v28 }
 0x351   :  { %2574 = vmatprep.subr.bf16.mxu1 %v2852_v53 }
 0x354   :  { %2575 = vmatpush3.bf16.msra.mxu1 %v2844_v29 }
 0x3ea   :  { %v1605_v32 = vpop.f32.mrb[12].mxu1  ;;  %v1759_v33 = vpop.f32.mrb[16].mxu0 }
 0x3eb   :  { %v1606_v34 = vadd.f32 %v2261_v31, %v1605_v32  ;;  %v2518_v35 = vpop.f32.mrb[13].mxu1  ;;  %v2538_v36 = vpop.f32.mrb[17].mxu0 }
 0x3ec   :  { %v1608_v37 = vpop.f32.mrb[14].mxu1  ;;  %v1762_v38 = vpop.f32.mrb[18].mxu0 }
 0x3ed   :  { %v1989_v39 = vpack.c.bf16 %v1606_v34, %v1606_v34  ;;  %v2519_v40 = vpop.f32.mrb[15].mxu1  ;;  %v2539_v17 = vpop.f32.mrb[19].mxu0 }
 0x3ef   :  { %2577 = vmatmul.mubr.bf16.vlgmr.msra.gmra.mrb[20].mxu1 %v1989_v39 }
 0x40a   :  { %v2416_v53 = vpop.f32.mrb[16].mxu1  ;;  %v1983_v41 = vpop.f32.mrb[20].mxu0 }
 0x40b   :  { %v2417_v26 = vpop.f32.mrb[17].mxu1  ;;  %v2558_v30 = vpop.f32.mrb[21].mxu0 }
 0x40c   :  { %v2418_v27 = vadd.f32 %v2417_v26, %v2416_v53  ;;  %v2419_v42 = vpop.f32.mrb[18].mxu1  ;;  %v1986_v43 = vpop.f32.mrb[22].mxu0 }
 0x40d   :  { %v2420_v44 = vpop.f32.mrb[19].mxu1  ;;  %v2559_v45 = vpop.f32.mrb[23].mxu0 }
 0x40e   :  { %v1944_v46 = vadd.f32 %v2418_v27, %v1759_v33 }
 0x410   :  { %v1984_v47 = vadd.f32 %v1983_v41, %v1944_v46 }
 0x4c2   :  { %v2088_v48 = vpop.f32.mrb[20].mxu1 }
 0x4c3   :  { %v2094_v49 = vadd.f32 %v2088_v48, %v1984_v47  ;;  %v2578_v50 = vpop.f32.mrb[21].mxu1 }
 0x4c4   :  { %v2091_v51 = vpop.f32.mrb[22].mxu1 }
 0x4c5   :  { %v2102_v52 = vadd.f32 %v2310_v6, %v2094_v49  ;;  %v2579_v54 = vpop.f32.mrb[23].mxu1 }
 0x4c7   :  { %2103 = vst [vmem:[%s3654_s11] sm:$0x3] %v2102_v52 }

// kernel: vuln_classifier_forward.5
= control target key start
LH: loop header
LB: loop body
LE: loop exit
PB: predicated region body
PF: predicated region fallthrough
CT: control target
= control target key end

     0   :  { %13 = vsyncpa [#allocation4], 0  ;;  %s10939_s0 = inlined_call_operand.vmem [shape: f32[16,384], index: 0, kind: input, shape index: {}]   ;;  %s10940_s1 = inlined_call_operand.hbm [shape: bf16[384,2304], index: 1, kind: input, shape index: {}]   ;;  %s10941_s2 = inlined_call_operand.vmem [shape: f32[1,2304], index: 2, kind: input, shape index: {}]   ;;  %s10942_s3 = inlined_call_operand.hbm [shape: bf16[768,384], index: 3, kind: input, shape index: {}]   ;;  %s10943_s4 = inlined_call_operand.vmem [shape: f32[1,384], index: 4, kind: input, shape index: {}]   ;;  %s10944_s5 = inlined_call_operand.vmem [shape: f32[2,8], index: 5, kind: input, shape index: {}]   ;;  %s10945_s6 = inlined_call_operand.vmem [shape: f32[1,384], index: 6, kind: input, shape index: {}]   ;;  %s10946_s7 = inlined_call_operand.vmem [shape: f32[1,384], index: 7, kind: input, shape index: {}]   ;;  %s10947_s8 = inlined_call_operand.vmem [shape: f32[16,384], index: 8, kind: output, shape index: {}]  }
   0x1   :  { %14 = vsyncpa [#allocation6], 0  ;;  %s9743_s27 = smov [#allocation3]   ;;  %s9695_s9 = scalar_lea.hbm %s10940_s1, 55296 }
   0x2   :  { %s22_s28 = sshll.u32 %s9743_s27, 4  ;;  %p9696_p0 = scmp.ne.s32.totalorder %s10940_s1, %s9695_s9  ;;  %s23_s28 = int_to_ptr.vmem [resolvable:$true] %s22_s28 }
   0x3   :  { %p9699_p1 = scmp.lt.u32.totalorder %s9695_s9, %s10940_s1 }
   0x5   :  { %p9701_p2 = pnand %p9699_p1, %p9696_p0 }
   0x7   :  { %9704 = shalt.err (!%p9701_p2)
}
   0x8   :  { %s9705_s14 = scalar_lea.vmem %s23_s28, 55296  ;;  %p9710_p4 = scmp.lt.s32.totalorder %s23_s28, %s23_s28 }
   0x9   :  { %p9706_p3 = scmp.ne.s32.totalorder %s23_s28, %s9705_s14  ;;  %p9711_p5 = scmp.lt.s32.totalorder %s9705_s14, %s9705_s14 }
   0xb   :  { %p9712_p6 = por %p9711_p5, %p9710_p4 }
   0xd   :  { %p9713_p7 = pnand %p9712_p6, %p9706_p3 }
   0xf   :  { %9716 = shalt.err (!%p9713_p7)
}
  0x10   :  { %s9744_s15 = smov 1152   ;;  %s9745_s16 = smov 72  }
  0x11   :  { %28 = dma.hbm_to_vmem [thread:$0]  %s10940_s1, 55296, %s23_s28, [#allocation4], %s9744_s15, %s9744_s15, %s9745_s16  }
  0x12   :  { %s9746_s19 = smov [#allocation5]   ;;  %s9717_s23 = scalar_lea.hbm %s10942_s3, 18432 }
  0x13   :  { %s36_s20 = sshll.u32 %s9746_s19, 4  ;;  %p9718_p8 = scmp.ne.s32.totalorder %s10942_s3, %s9717_s23  ;;  %s37_s20 = int_to_ptr.vmem [resolvable:$true] %s36_s20 }
  0x14   :  { %p9721_p9 = scmp.lt.u32.totalorder %s9717_s23, %s10942_s3 }
  0x16   :  { %p9723_p10 = pnand %p9721_p9, %p9718_p8 }
  0x18   :  { %9726 = shalt.err (!%p9723_p10)
}
  0x19   :  { %s9727_s29 = scalar_lea.vmem %s37_s20, 18432  ;;  %p9732_p12 = scmp.lt.s32.totalorder %s37_s20, %s37_s20 }
  0x1a   :  { %p9728_p11 = scmp.ne.s32.totalorder %s37_s20, %s9727_s29  ;;  %p9733_p13 = scmp.lt.s32.totalorder %s9727_s29, %s9727_s29 }
  0x1c   :  { %p9734_p0 = por %p9733_p13, %p9732_p12 }
  0x1e   :  { %p9735_p1 = pnand %p9734_p0, %p9728_p11 }
  0x20   :  { %9738 = shalt.err (!%p9735_p1)
}
  0x21   :  { %s9747_s1 = smov 192   ;;  %s9748_s28 = smov 12  }
  0x22   :  { %42 = dma.hbm_to_vmem [thread:$0]  %s10942_s3, 18432, %s37_s20, [#allocation6], %s9747_s1, %s9747_s1, %s9748_s28  }
  0x23   :  { %9739 = dma.done.wait [#allocation4], 55296  }
  0x24   :  { %9740 = vsyncadd [#allocation4], 4294912000 }
  0x25   :  { %9741 = dma.done.wait [#allocation6], 18432  }
  0x26   :  { %9742 = vsyncadd [#allocation6], 4294948864  ;;  %v8745_v0 = vld [vmem:[#allocation3 + $0xc] ss:$72 sps:$4 sm:$0xff]   ;;  %v8747_v1 = vld [vmem:[#allocation3 + $0x8] ss:$72 sps:$4 sm:$0xff]  }
  0x27   :  { %1049 = vmatprep.subr.bf16.mxu1 %v8745_v0  ;;  %v8748_v2 = vld [vmem:[#allocation3 + $0x9c] ss:$72 sps:$4 sm:$0xff]   ;;  %v8750_v3 = vld [vmem:[#allocation3 + $0x98] ss:$72 sps:$4 sm:$0xff]   ;;  %v8751_v4 = vld [vmem:[#allocation3 + $0x12c] ss:$72 sps:$4 sm:$0xff]  }
  0x28   :  { %1050 = vmatpush1.bf16.msra.mxu1 %v8747_v1  ;;  %v8753_v5 = vld [vmem:[#allocation3 + $0x128] ss:$72 sps:$4 sm:$0xff]   ;;  %v8754_v6 = vld [vmem:[#allocation3 + $0x1bc] ss:$72 sps:$4 sm:$0xff]   ;;  %v8756_v7 = vld [vmem:[#allocation3 + $0x1b8] ss:$72 sps:$4 sm:$0xff]  }
  0x29   :  { %1051 = vmatprep.subr.bf16.mxu1 %v8748_v2  ;;  %v8757_v8 = vld [vmem:[#allocation3 + $0x24c] ss:$72 sps:$4 sm:$0xff]   ;;  %v8759_v9 = vld [vmem:[#allocation3 + $0x248] ss:$72 sps:$4 sm:$0xff]   ;;  %v8760_v10 = vld [vmem:[#allocation3 + $0x2dc] ss:$72 sps:$4 sm:$0xff]  }
  0x2a   :  { %v8762_v11 = vld [vmem:[#allocation3 + $0x2d8] ss:$72 sps:$4 sm:$0xff]   ;;  %v8763_v12 = vld [vmem:[#allocation3 + $0x36c] ss:$72 sps:$4 sm:$0xff]   ;;  %v8765_v16 = vld [vmem:[#allocation3 + $0x368] ss:$72 sps:$4 sm:$0xff]  }
  0x2b   :  { %v59_v13 = vld [vmem:[%s10939_s0 + $0x8] sm:$0xff]  ;;  %v62_v14 = vld [vmem:[%s10939_s0 + $0x20] sm:$0xff]  ;;  %v8802_v21 = vld [vmem:[#allocation3 + $0x94] ss:$72 sps:$4 sm:$0xff]   ;;  %v10950_v1 = vmov 0   ;;  %vm9751_vm0 = vmmov 0  }
  0x2c   :  { %1052 = vmatpush1.bf16.msra.mxu1 %v8750_v3  ;;  %v9827_v15 = vpack.c.bf16 %v62_v14, %v59_v13  ;;  %v8766_v17 = vld [vmem:[#allocation3 + $0x3fc] ss:$72 sps:$4 sm:$0xff]   ;;  %v8798_v19 = vld [vmem:[#allocation3] ss:$72 sps:$4 sm:$0xff]   ;;  %v8804_v22 = vld [vmem:[#allocation3 + $0x90] ss:$72 sps:$4 sm:$0xff]  }
  0x2d   :  { %1053 = vmatprep.subr.bf16.mxu1 %v8751_v4  ;;  %v8796_v18 = vld [vmem:[#allocation3 + $0x4] ss:$72 sps:$4 sm:$0xff]   ;;  %v8768_v20 = vld [vmem:[#allocation3 + $0x3f8] ss:$72 sps:$4 sm:$0xff]   ;;  %v8771_v24 = vld [vmem:[#allocation3 + $0x488] ss:$72 sps:$4 sm:$0xff]  }
  0x2e   :  { %1081 = vmatprep.mubr.bf16.mxu1 %v9827_v15  ;;  %995 = vmatprep.mubr.bf16.mxu0 %v9827_v15  ;;  %v8769_v23 = vld [vmem:[#allocation3 + $0x48c] ss:$72 sps:$4 sm:$0xff]   ;;  %v8772_v26 = vld [vmem:[#allocation3 + $0x51c] ss:$72 sps:$4 sm:$0xff]   ;;  %v8810_v27 = vld [vmem:[#allocation3 + $0x120] ss:$72 sps:$4 sm:$0xff]  }
  0x2f   :  { %963 = vmatprep.subr.bf16.mxu0 %v8796_v18  ;;  %v8808_v25 = vld [vmem:[#allocation3 + $0x124] ss:$72 sps:$4 sm:$0xff]   ;;  %v8814_v28 = vld [vmem:[#allocation3 + $0x1b4] ss:$72 sps:$4 sm:$0xff]   ;;  %v8774_v29 = vld [vmem:[#allocation3 + $0x518] ss:$72 sps:$4 sm:$0xff]  }
  0x30   :  { %1054 = vmatpush1.bf16.msra.mxu1 %v8753_v5  ;;  %964 = vmatpush1.bf16.msra.mxu0 %v8798_v19  ;;  %v8775_v30 = vld [vmem:[#allocation3 + $0x5ac] ss:$72 sps:$4 sm:$0xff]   ;;  %v8816_v31 = vld [vmem:[#allocation3 + $0x1b0] ss:$72 sps:$4 sm:$0xff]   ;;  %v8778_v34 = vld [vmem:[#allocation3 + $0x63c] ss:$72 sps:$4 sm:$0xff]  }
  0x31   :  { %1055 = vmatprep.subr.bf16.mxu1 %v8754_v6  ;;  %965 = vmatprep.subr.bf16.mxu0 %v8802_v21  ;;  %v8820_v32 = vld [vmem:[#allocation3 + $0x244] ss:$72 sps:$4 sm:$0xff]   ;;  %v8777_v33 = vld [vmem:[#allocation3 + $0x5a8] ss:$72 sps:$4 sm:$0xff]   ;;  %v8826_v36 = vld [vmem:[#allocation3 + $0x2d4] ss:$72 sps:$4 sm:$0xff]  }
  0x32   :  { %v8822_v35 = vld [vmem:[#allocation3 + $0x240] ss:$72 sps:$4 sm:$0xff]   ;;  %v8828_v38 = vld [vmem:[#allocation3 + $0x2d0] ss:$72 sps:$4 sm:$0xff]   ;;  %v8781_v39 = vld [vmem:[#allocation3 + $0x6cc] ss:$72 sps:$4 sm:$0xff]  }
  0x33   :  { %v8780_v37 = vld [vmem:[#allocation3 + $0x638] ss:$72 sps:$4 sm:$0xff]   ;;  %v8832_v40 = vld [vmem:[#allocation3 + $0x364] ss:$72 sps:$4 sm:$0xff]   ;;  %v8783_v41 = vld [vmem:[#allocation3 + $0x6c8] ss:$72 sps:$4 sm:$0xff]  }
  0x34   :  { %1056 = vmatpush1.bf16.msra.mxu1 %v8756_v7  ;;  %966 = vmatpush1.bf16.msra.mxu0 %v8804_v22  ;;  %v8834_v42 = vld [vmem:[#allocation3 + $0x360] ss:$72 sps:$4 sm:$0xff]   ;;  %v8784_v43 = vld [vmem:[#allocation3 + $0x75c] ss:$72 sps:$4 sm:$0xff]   ;;  %v8840_v46 = vld [vmem:[#allocation3 + $0x3f0] ss:$72 sps:$4 sm:$0xff]  }
  0x35   :  { %1057 = vmatprep.subr.bf16.mxu1 %v8757_v8  ;;  %967 = vmatprep.subr.bf16.mxu0 %v8808_v25  ;;  %v8838_v44 = vld [vmem:[#allocation3 + $0x3f4] ss:$72 sps:$4 sm:$0xff]   ;;  %v8786_v45 = vld [vmem:[#allocation3 + $0x758] ss:$72 sps:$4 sm:$0xff]   ;;  %v8844_v48 = vld [vmem:[#allocation3 + $0x484] ss:$72 sps:$4 sm:$0xff]  }
  0x36   :  { %v8787_v47 = vld [vmem:[#allocation3 + $0x7ec] ss:$72 sps:$4 sm:$0xff]   ;;  %v8789_v49 = vld [vmem:[#allocation3 + $0x7e8] ss:$72 sps:$4 sm:$0xff]   ;;  %v8790_v51 = vld [vmem:[#allocation3 + $0x87c] ss:$72 sps:$4 sm:$0xff]  }
  0x37   :  { %v8846_v50 = vld [vmem:[#allocation3 + $0x480] ss:$72 sps:$4 sm:$0xff]   ;;  %v8850_v52 = vld [vmem:[#allocation3 + $0x514] ss:$72 sps:$4 sm:$0xff]   ;;  %v8852_v56 = vld [vmem:[#allocation3 + $0x510] ss:$72 sps:$4 sm:$0xff]  }
  0x38   :  { %1058 = vmatpush1.bf16.msra.mxu1 %v8759_v9  ;;  %968 = vmatpush1.bf16.msra.mxu0 %v8810_v27  ;;  %v8792_v53 = vld [vmem:[#allocation3 + $0x878] ss:$72 sps:$4 sm:$0xff]   ;;  %v8795_v57 = vld [vmem:[#allocation3 + $0x90c] ss:$72 sps:$4 sm:$0xff]   ;;  %v8793_v60 = vld [vmem:[#allocation3 + $0x908] ss:$72 sps:$4 sm:$0xff]  }
  0x39   :  { %1059 = vmatprep.subr.bf16.mxu1 %v8760_v10  ;;  %969 = vmatprep.subr.bf16.mxu0 %v8814_v28  ;;  %v58_v54 = vld [vmem:[%s10939_s0] sm:$0xff]  ;;  %v61_v55 = vld [vmem:[%s10939_s0 + $0x18] sm:$0xff]  ;;  %v8807_v2 = vld [vmem:[#allocation3 + $0xa2c] ss:$72 sps:$4 sm:$0xff]   ;;  %vm3643_vm1 = vcmask 64512  }
  0x3a   :  { %v8856_v58 = vld [vmem:[#allocation3 + $0x5a4] ss:$72 sps:$4 sm:$0xff]   ;;  %v9837_v59 = vpack.c.bf16 %v61_v55, %v58_v54  ;;  %v8858_v62 = vld [vmem:[#allocation3 + $0x5a0] ss:$72 sps:$4 sm:$0xff]   ;;  %v8862_v63 = vld [vmem:[#allocation3 + $0x634] ss:$72 sps:$4 sm:$0xff]  }
  0x3b   :  { %v8801_v61 = vld [vmem:[#allocation3 + $0x99c] ss:$72 sps:$4 sm:$0xff]   ;;  %v8799_v0 = vld [vmem:[#allocation3 + $0x998] ss:$72 sps:$4 sm:$0xff]   ;;  %v8805_v5 = vld [vmem:[#allocation3 + $0xa28] ss:$72 sps:$4 sm:$0xff]  }
  0x3c   :  { %1060 = vmatpush1.bf16.msra.mxu1 %v8762_v11  ;;  %970 = vmatpush1.bf16.msra.mxu0 %v8816_v31  ;;  %v8864_v3 = vld [vmem:[#allocation3 + $0x630] ss:$72 sps:$4 sm:$0xff]   ;;  %v8868_v4 = vld [vmem:[#allocation3 + $0x6c4] ss:$72 sps:$4 sm:$0xff]   ;;  %v8870_v7 = vld [vmem:[#allocation3 + $0x6c0] ss:$72 sps:$4 sm:$0xff]  }
  0x3d   :  { %1061 = vmatprep.subr.bf16.mxu1 %v8763_v12  ;;  %971 = vmatprep.subr.bf16.mxu0 %v8820_v32  ;;  %v8813_v6 = vld [vmem:[#allocation3 + $0xabc] ss:$72 sps:$4 sm:$0xff]   ;;  %v8811_v9 = vld [vmem:[#allocation3 + $0xab8] ss:$72 sps:$4 sm:$0xff]   ;;  %v8819_v10 = vld [vmem:[#allocation3 + $0xb4c] ss:$72 sps:$4 sm:$0xff]  }
  0x3e   :  { %v8874_v8 = vld [vmem:[#allocation3 + $0x754] ss:$72 sps:$4 sm:$0xff]   ;;  %v8876_v11 = vld [vmem:[#allocation3 + $0x750] ss:$72 sps:$4 sm:$0xff]   ;;  %v8880_v12 = vld [vmem:[#allocation3 + $0x7e4] ss:$72 sps:$4 sm:$0xff]  }
  0x3f   :  { %v8817_v13 = vld [vmem:[#allocation3 + $0xb48] ss:$72 sps:$4 sm:$0xff]   ;;  %v8825_v14 = vld [vmem:[#allocation3 + $0xbdc] ss:$72 sps:$4 sm:$0xff]   ;;  %v8823_v18 = vld [vmem:[#allocation3 + $0xbd8] ss:$72 sps:$4 sm:$0xff]  }
  0x40   :  { %1062 = vmatpush1.bf16.msra.mxu1 %v8765_v16  ;;  %972 = vmatpush1.bf16.msra.mxu0 %v8822_v35  ;;  %v8882_v16 = vld [vmem:[#allocation3 + $0x7e0] ss:$72 sps:$4 sm:$0xff]   ;;  %v8831_v19 = vld [vmem:[#allocation3 + $0xc6c] ss:$72 sps:$4 sm:$0xff]   ;;  %v8879_v54 = vld [vmem:[#allocation3 + $0x37c] ss:$72 sps:$4 sm:$0xff]  }
  0x41   :  { %1063 = vmatprep.subr.bf16.mxu1 %v8766_v17  ;;  %973 = vmatprep.subr.bf16.mxu0 %v8826_v36  ;;  %v8886_v17 = vld [vmem:[#allocation3 + $0x874] ss:$72 sps:$4 sm:$0xff]   ;;  %v8894_v21 = vld [vmem:[#allocation3 + $0x904] ss:$72 sps:$4 sm:$0xff]   ;;  %v8829_v22 = vld [vmem:[#allocation3 + $0xc68] ss:$72 sps:$4 sm:$0xff]  }
  0x42   :  { %v8835_v25 = vld [vmem:[#allocation3 + $0xcf8] ss:$72 sps:$4 sm:$0xff]   ;;  %v60_v27 = vld [vmem:[%s10939_s0 + $0x10] sm:$0xff]  ;;  %v63_v28 = vld [vmem:[%s10939_s0 + $0x28] sm:$0xff] }
  0x43   :  { %v8906_v31 = vld [vmem:[#allocation3 + $0xa24] ss:$72 sps:$4 sm:$0xff]   ;;  %v9849_v32 = vpack.c.bf16 %v63_v28, %v60_v27  ;;  %v8904_v35 = vld [vmem:[#allocation3 + $0xa20] ss:$72 sps:$4 sm:$0xff]   ;;  %v8912_v36 = vld [vmem:[#allocation3 + $0xab4] ss:$72 sps:$4 sm:$0xff]  }
  0x44   :  { %1064 = vmatpush1.bf16.msra.mxu1 %v8768_v20  ;;  %974 = vmatpush1.bf16.msra.mxu0 %v8828_v38  ;;  %v8888_v20 = vld [vmem:[#allocation3 + $0x870] ss:$72 sps:$4 sm:$0xff]   ;;  %v8855_v38 = vld [vmem:[#allocation3 + $0x13c] ss:$72 sps:$4 sm:$0xff]   ;;  %v8960_v28 = vld [vmem:[#allocation3 + $0xd0c] ss:$72 sps:$4 sm:$0xff]  }
  0x45   :  { %1065 = vmatprep.subr.bf16.mxu1 %v8769_v23  ;;  %975 = vmatprep.subr.bf16.mxu0 %v8832_v40  ;;  %v8837_v23 = vld [vmem:[#allocation3 + $0xcfc] ss:$72 sps:$4 sm:$0xff]   ;;  %v8934_v55 = vld [vmem:[#allocation3 + $0xcf0] ss:$72 sps:$4 sm:$0xff]  }
  0x46   :  { %v8918_v40 = vld [vmem:[#allocation3 + $0xb44] ss:$72 sps:$4 sm:$0xff]   ;;  %v8955_v27 = vld [vmem:[#allocation3 + $0xc78] ss:$72 sps:$4 sm:$0xff]  }
  0x48   :  { %1066 = vmatpush1.bf16.msra.mxu1 %v8771_v24  ;;  %976 = vmatpush1.bf16.msra.mxu0 %v8834_v42  ;;  %v8892_v24 = vld [vmem:[#allocation3 + $0x900] ss:$72 sps:$4 sm:$0xff]   ;;  %v8861_v42 = vld [vmem:[#allocation3 + $0x1cc] ss:$72 sps:$4 sm:$0xff]  }
  0x49   :  { %1067 = vmatprep.subr.bf16.mxu1 %v8772_v26  ;;  %977 = vmatprep.subr.bf16.mxu0 %v8838_v44  ;;  %v8900_v26 = vld [vmem:[#allocation3 + $0x994] ss:$72 sps:$4 sm:$0xff]  }
  0x4a   :  { %v8924_v44 = vld [vmem:[#allocation3 + $0xbd4] ss:$72 sps:$4 sm:$0xff]  }
  0x4c   :  { %1068 = vmatpush1.bf16.msra.mxu1 %v8774_v29  ;;  %978 = vmatpush1.bf16.msra.mxu0 %v8840_v46  ;;  %v8843_v29 = vld [vmem:[#allocation3 + $0x1c] ss:$72 sps:$4 sm:$0xff]  }
  0x4d   :  { %1069 = vmatprep.subr.bf16.mxu1 %v8775_v30  ;;  %979 = vmatprep.subr.bf16.mxu0 %v8844_v48  ;;  %v8898_v30 = vld [vmem:[#allocation3 + $0x990] ss:$72 sps:$4 sm:$0xff]   ;;  %v8867_v46 = vld [vmem:[#allocation3 + $0x25c] ss:$72 sps:$4 sm:$0xff]  }
  0x4e   :  { %v8930_v48 = vld [vmem:[#allocation3 + $0xc64] ss:$72 sps:$4 sm:$0xff]  }
  0x50   :  { %1070 = vmatpush1.bf16.msra.mxu1 %v8777_v33  ;;  %980 = vmatpush1.bf16.msra.mxu0 %v8846_v50  ;;  %v8841_v33 = vld [vmem:[#allocation3 + $0x18] ss:$72 sps:$4 sm:$0xff]   ;;  %v8873_v50 = vld [vmem:[#allocation3 + $0x2ec] ss:$72 sps:$4 sm:$0xff]  }
  0x51   :  { %1071 = vmatprep.subr.bf16.mxu1 %v8778_v34  ;;  %981 = vmatprep.subr.bf16.mxu0 %v8850_v52  ;;  %v8849_v34 = vld [vmem:[#allocation3 + $0xac] ss:$72 sps:$4 sm:$0xff]  }
  0x52   :  { %v8936_v52 = vld [vmem:[#allocation3 + $0xcf4] ss:$72 sps:$4 sm:$0xff]  }
  0x54   :  { %1072 = vmatpush1.bf16.msra.mxu1 %v8780_v37  ;;  %982 = vmatpush1.bf16.msra.mxu0 %v8852_v56  ;;  %v8847_v37 = vld [vmem:[#allocation3 + $0xa8] ss:$72 sps:$4 sm:$0xff]   ;;  %v8877_v56 = vld [vmem:[#allocation3 + $0x378] ss:$72 sps:$4 sm:$0xff]  }
  0x55   :  { %1073 = vmatprep.subr.bf16.mxu1 %v8781_v39  ;;  %983 = vmatprep.subr.bf16.mxu0 %v8856_v58  ;;  %v8910_v39 = vld [vmem:[#allocation3 + $0xab0] ss:$72 sps:$4 sm:$0xff]  }
  0x56   :  { %v8883_v58 = vld [vmem:[#allocation3 + $0x408] ss:$72 sps:$4 sm:$0xff]  }
  0x58   :  { %1074 = vmatpush1.bf16.msra.mxu1 %v8783_v41  ;;  %984 = vmatpush1.bf16.msra.mxu0 %v8858_v62  ;;  %v8853_v41 = vld [vmem:[#allocation3 + $0x138] ss:$72 sps:$4 sm:$0xff]   ;;  %v8897_v62 = vld [vmem:[#allocation3 + $0x52c] ss:$72 sps:$4 sm:$0xff]  }
  0x59   :  { %1075 = vmatprep.subr.bf16.mxu1 %v8784_v43  ;;  %985 = vmatprep.subr.bf16.mxu0 %v8862_v63  ;;  %v8916_v43 = vld [vmem:[#allocation3 + $0xb40] ss:$72 sps:$4 sm:$0xff]  }
  0x5a   :  { %v8895_v63 = vld [vmem:[#allocation3 + $0x528] ss:$72 sps:$4 sm:$0xff]  }
  0x5c   :  { %1076 = vmatpush1.bf16.msra.mxu1 %v8786_v45  ;;  %986 = vmatpush1.bf16.msra.mxu0 %v8864_v3  ;;  %v8859_v45 = vld [vmem:[#allocation3 + $0x1c8] ss:$72 sps:$4 sm:$0xff]   ;;  %v8909_v3 = vld [vmem:[#allocation3 + $0x64c] ss:$72 sps:$4 sm:$0xff]  }
  0x5d   :  { %1077 = vmatprep.subr.bf16.mxu1 %v8787_v47  ;;  %987 = vmatprep.subr.bf16.mxu0 %v8868_v4  ;;  %v8922_v47 = vld [vmem:[#allocation3 + $0xbd0] ss:$72 sps:$4 sm:$0xff]  }
  0x5e   :  { %v8907_v4 = vld [vmem:[#allocation3 + $0x648] ss:$72 sps:$4 sm:$0xff]  }
  0x60   :  { %1078 = vmatpush1.bf16.msra.mxu1 %v8789_v49  ;;  %988 = vmatpush1.bf16.msra.mxu0 %v8870_v7  ;;  %v8865_v49 = vld [vmem:[#allocation3 + $0x258] ss:$72 sps:$4 sm:$0xff]   ;;  %v8921_v7 = vld [vmem:[#allocation3 + $0x76c] ss:$72 sps:$4 sm:$0xff]  }
  0x61   :  { %1079 = vmatprep.subr.bf16.mxu1 %v8790_v51  ;;  %989 = vmatprep.subr.bf16.mxu0 %v8874_v8  ;;  %v8928_v51 = vld [vmem:[#allocation3 + $0xc60] ss:$72 sps:$4 sm:$0xff]  }
  0x62   :  { %v8919_v8 = vld [vmem:[#allocation3 + $0x768] ss:$72 sps:$4 sm:$0xff]  }
  0x64   :  { %1080 = vmatpush1.bf16.msra.mxu1 %v8792_v53  ;;  %990 = vmatpush1.bf16.msra.mxu0 %v8876_v11  ;;  %v8871_v53 = vld [vmem:[#allocation3 + $0x2e8] ss:$72 sps:$4 sm:$0xff]   ;;  %v8933_v11 = vld [vmem:[#allocation3 + $0x88c] ss:$72 sps:$4 sm:$0xff]  }
  0x65   :  { %1092 = vmatprep.subr.bf16.mxu1 %v8795_v57  ;;  %991 = vmatprep.subr.bf16.mxu0 %v8880_v12  ;;  %v8885_v57 = vld [vmem:[#allocation3 + $0x40c] ss:$72 sps:$4 sm:$0xff]   ;;  %v8931_v12 = vld [vmem:[#allocation3 + $0x888] ss:$72 sps:$4 sm:$0xff]  }
  0x67   :  { %1082 = vmatmul.mubr.bf16.vlgmr.msra.gmra.mrb[0].mxu1 %v9837_v59 }
  0x68   :  { %1093 = vmatpush1.bf16.msra.mxu1 %v8793_v60  ;;  %1124 = vmatprep.mubr.bf16.mxu1 %v10950_v1  ;;  %v8891_v60 = vld [vmem:[#allocation3 + $0x49c] ss:$72 sps:$4 sm:$0xff]  }
  0x69   :  { %1094 = vmatprep.subr.bf16.mxu1 %v8801_v61  ;;  %992 = vmatpush1.bf16.msra.mxu0 %v8882_v16  ;;  %v8889_v61 = vld [vmem:[#allocation3 + $0x498] ss:$72 sps:$4 sm:$0xff]   ;;  %v8942_v16 = vld [vmem:[#allocation3 + $0x9ac] ss:$72 sps:$4 sm:$0xff]  }
  0x6a   :  { %993 = vmatprep.subr.bf16.mxu0 %v8886_v17  ;;  %v8940_v17 = vld [vmem:[#allocation3 + $0x9a8] ss:$72 sps:$4 sm:$0xff]  }
  0x6c   :  { %1095 = vmatpush1.bf16.msra.mxu1 %v8799_v0  ;;  %v8903_v0 = vld [vmem:[#allocation3 + $0x5bc] ss:$72 sps:$4 sm:$0xff]  }
  0x6d   :  { %1096 = vmatprep.subr.bf16.mxu1 %v8807_v2  ;;  %994 = vmatpush1.bf16.msra.mxu0 %v8888_v20  ;;  %v8901_v2 = vld [vmem:[#allocation3 + $0x5b8] ss:$72 sps:$4 sm:$0xff]   ;;  %v8948_v20 = vld [vmem:[#allocation3 + $0xacc] ss:$72 sps:$4 sm:$0xff]  }
  0x6e   :  { %1006 = vmatprep.subr.bf16.mxu0 %v8894_v21  ;;  %v8946_v21 = vld [vmem:[#allocation3 + $0xac8] ss:$72 sps:$4 sm:$0xff]  }
  0x70   :  { %1097 = vmatpush1.bf16.msra.mxu1 %v8805_v5  ;;  %996 = vmatmul.mubr.bf16.vlgmr.msra.gmra.mrb[0].mxu0 %v9837_v59  ;;  %v8915_v5 = vld [vmem:[#allocation3 + $0x6dc] ss:$72 sps:$4 sm:$0xff]  }
  0x71   :  { %1098 = vmatprep.subr.bf16.mxu1 %v8813_v6  ;;  %1007 = vmatpush1.bf16.msra.mxu0 %v8892_v24  ;;  %v8913_v6 = vld [vmem:[#allocation3 + $0x6d8] ss:$72 sps:$4 sm:$0xff]   ;;  %v8954_v24 = vld [vmem:[#allocation3 + $0xbec] ss:$72 sps:$4 sm:$0xff]  }
  0x72   :  { %1008 = vmatprep.subr.bf16.mxu0 %v8900_v26  ;;  %1038 = vmatprep.mubr.bf16.mxu0 %v10950_v1  ;;  %v8957_v26 = vld [vmem:[#allocation3 + $0xc7c] ss:$72 sps:$4 sm:$0xff]  }
  0x74   :  { %1099 = vmatpush1.bf16.msra.mxu1 %v8811_v9  ;;  %v8927_v9 = vld [vmem:[#allocation3 + $0x7fc] ss:$72 sps:$4 sm:$0xff]  }
  0x75   :  { %1100 = vmatprep.subr.bf16.mxu1 %v8819_v10  ;;  %1009 = vmatpush1.bf16.msra.mxu0 %v8898_v30  ;;  %v8925_v10 = vld [vmem:[#allocation3 + $0x7f8] ss:$72 sps:$4 sm:$0xff]   ;;  %v8963_v30 = vld [vmem:[#allocation3 + $0x2c] ss:$72 sps:$4 sm:$0xff]  }
  0x76   :  { %1010 = vmatprep.subr.bf16.mxu0 %v8906_v31  ;;  %v8961_v31 = vld [vmem:[#allocation3 + $0x28] ss:$72 sps:$4 sm:$0xff]  }
  0x78   :  { %1101 = vmatpush1.bf16.msra.mxu1 %v8817_v13  ;;  %v8939_v13 = vld [vmem:[#allocation3 + $0x91c] ss:$72 sps:$4 sm:$0xff]  }
  0x79   :  { %1102 = vmatprep.subr.bf16.mxu1 %v8825_v14  ;;  %1011 = vmatpush1.bf16.msra.mxu0 %v8904_v35  ;;  %v8937_v14 = vld [vmem:[#allocation3 + $0x918] ss:$72 sps:$4 sm:$0xff]   ;;  %v8969_v35 = vld [vmem:[#allocation3 + $0x14c] ss:$72 sps:$4 sm:$0xff]  }
  0x7a   :  { %1012 = vmatprep.subr.bf16.mxu0 %v8912_v36  ;;  %v8967_v36 = vld [vmem:[#allocation3 + $0x148] ss:$72 sps:$4 sm:$0xff]  }
  0x7c   :  { %1103 = vmatpush1.bf16.msra.mxu1 %v8823_v18  ;;  %v8945_v18 = vld [vmem:[#allocation3 + $0xa3c] ss:$72 sps:$4 sm:$0xff]  }
  0x7d   :  { %1104 = vmatprep.subr.bf16.mxu1 %v8831_v19  ;;  %1013 = vmatpush1.bf16.msra.mxu0 %v8910_v39  ;;  %v8943_v19 = vld [vmem:[#allocation3 + $0xa38] ss:$72 sps:$4 sm:$0xff]   ;;  %v8975_v39 = vld [vmem:[#allocation3 + $0x26c] ss:$72 sps:$4 sm:$0xff]  }
  0x7e   :  { %1014 = vmatprep.subr.bf16.mxu0 %v8918_v40  ;;  %v8973_v40 = vld [vmem:[#allocation3 + $0x268] ss:$72 sps:$4 sm:$0xff]  }
  0x80   :  { %1105 = vmatpush1.bf16.msra.mxu1 %v8829_v22  ;;  %v8951_v22 = vld [vmem:[#allocation3 + $0xb5c] ss:$72 sps:$4 sm:$0xff]  }
  0x81   :  { %1106 = vmatprep.subr.bf16.mxu1 %v8837_v23  ;;  %1015 = vmatpush1.bf16.msra.mxu0 %v8916_v43  ;;  %v8949_v23 = vld [vmem:[#allocation3 + $0xb58] ss:$72 sps:$4 sm:$0xff]   ;;  %v8981_v43 = vld [vmem:[#allocation3 + $0x38c] ss:$72 sps:$4 sm:$0xff]  }
  0x82   :  { %1016 = vmatprep.subr.bf16.mxu0 %v8924_v44  ;;  %v8979_v44 = vld [vmem:[#allocation3 + $0x388] ss:$72 sps:$4 sm:$0xff]  }
  0x84   :  { %1107 = vmatpush1.bf16.msra.mxu1 %v8835_v25  ;;  %v8952_v25 = vld [vmem:[#allocation3 + $0xbe8] ss:$72 sps:$4 sm:$0xff]  }
  0x85   :  { %2129 = vmatprep.subr.bf16.mxu1 %v8843_v29  ;;  %1017 = vmatpush1.bf16.msra.mxu0 %v8922_v47  ;;  %v8958_v29 = vld [vmem:[#allocation3 + $0xd08] ss:$72 sps:$4 sm:$0xff]   ;;  %v8987_v47 = vld [vmem:[#allocation3 + $0x4ac] ss:$72 sps:$4 sm:$0xff]  }
  0x86   :  { %1018 = vmatprep.subr.bf16.mxu0 %v8930_v48  ;;  %v8985_v48 = vld [vmem:[#allocation3 + $0x4a8] ss:$72 sps:$4 sm:$0xff]  }
  0x87   :  { %1125 = vmatmul.mubr.bf16.vlgmr.msra.gmra.mrb[0].mxu1 %v9849_v32 }
  0x88   :  { %2130 = vmatpush1.bf16.msra.mxu1 %v8841_v33  ;;  %2161 = vmatprep.mubr.bf16.mxu1 %v9827_v15  ;;  %v8966_v33 = vld [vmem:[#allocation3 + $0xbc] ss:$72 sps:$4 sm:$0xff]  }
  0x89   :  { %2131 = vmatprep.subr.bf16.mxu1 %v8849_v34  ;;  %1019 = vmatpush1.bf16.msra.mxu0 %v8928_v51  ;;  %v8964_v34 = vld [vmem:[#allocation3 + $0xb8] ss:$72 sps:$4 sm:$0xff]   ;;  %v8993_v51 = vld [vmem:[#allocation3 + $0x5cc] ss:$72 sps:$4 sm:$0xff]  }
  0x8a   :  { %1020 = vmatprep.subr.bf16.mxu0 %v8936_v52  ;;  %v8991_v52 = vld [vmem:[#allocation3 + $0x5c8] ss:$72 sps:$4 sm:$0xff]  }
  0x8c   :  { %2132 = vmatpush1.bf16.msra.mxu1 %v8847_v37  ;;  %v8972_v37 = vld [vmem:[#allocation3 + $0x1dc] ss:$72 sps:$4 sm:$0xff]  }
  0x8d   :  { %2133 = vmatprep.subr.bf16.mxu1 %v8855_v38  ;;  %1021 = vmatpush1.bf16.msra.mxu0 %v8934_v55  ;;  %v8970_v38 = vld [vmem:[#allocation3 + $0x1d8] ss:$72 sps:$4 sm:$0xff]   ;;  %v8999_v55 = vld [vmem:[#allocation3 + $0x6ec] ss:$72 sps:$4 sm:$0xff]  }
  0x90   :  { %2134 = vmatpush1.bf16.msra.mxu1 %v8853_v41  ;;  %1039 = vmatmul.mubr.bf16.vlgmr.msra.gmra.mrb[0].mxu0 %v9849_v32  ;;  %v8978_v41 = vld [vmem:[#allocation3 + $0x2fc] ss:$72 sps:$4 sm:$0xff]  }
  0x91   :  { %2135 = vmatprep.subr.bf16.mxu1 %v8861_v42  ;;  %1167 = vmatprep.mubr.bf16.mxu0 %v9827_v15  ;;  %v8976_v42 = vld [vmem:[#allocation3 + $0x2f8] ss:$72 sps:$4 sm:$0xff]  }
  0x94   :  { %2136 = vmatpush1.bf16.msra.mxu1 %v8859_v45  ;;  %v8984_v45 = vld [vmem:[#allocation3 + $0x41c] ss:$72 sps:$4 sm:$0xff]  }
  0x95   :  { %2137 = vmatprep.subr.bf16.mxu1 %v8867_v46  ;;  %v8982_v46 = vld [vmem:[#allocation3 + $0x418] ss:$72 sps:$4 sm:$0xff]  }
  0x98   :  { %2138 = vmatpush1.bf16.msra.mxu1 %v8865_v49  ;;  %v8990_v49 = vld [vmem:[#allocation3 + $0x53c] ss:$72 sps:$4 sm:$0xff]  }
  0x99   :  { %2139 = vmatprep.subr.bf16.mxu1 %v8873_v50  ;;  %v8988_v50 = vld [vmem:[#allocation3 + $0x538] ss:$72 sps:$4 sm:$0xff]  }
  0x9c   :  { %2140 = vmatpush1.bf16.msra.mxu1 %v8871_v53  ;;  %v8996_v53 = vld [vmem:[#allocation3 + $0x65c] ss:$72 sps:$4 sm:$0xff]  }
  0x9d   :  { %2141 = vmatprep.subr.bf16.mxu1 %v8879_v54  ;;  %v8994_v54 = vld [vmem:[#allocation3 + $0x658] ss:$72 sps:$4 sm:$0xff]  }
  0xa0   :  { %2142 = vmatpush1.bf16.msra.mxu1 %v8877_v56  ;;  %v8997_v56 = vld [vmem:[#allocation3 + $0x6e8] ss:$72 sps:$4 sm:$0xff]  }
  0xa1   :  { %2143 = vmatprep.subr.bf16.mxu1 %v8885_v57  ;;  %v9002_v57 = vld [vmem:[#allocation3 + $0x77c] ss:$72 sps:$4 sm:$0xff]  }
  0xa4   :  { %2144 = vmatpush1.bf16.msra.mxu1 %v8883_v58  ;;  %v9000_v58 = vld [vmem:[#allocation3 + $0x778] ss:$72 sps:$4 sm:$0xff]  }
  0xa5   :  { %2145 = vmatprep.subr.bf16.mxu1 %v8891_v60  ;;  %v9005_v60 = vld [vmem:[#allocation3 + $0x80c] ss:$72 sps:$4 sm:$0xff]  }
  0xa8   :  { %2146 = vmatpush1.bf16.msra.mxu1 %v8889_v61  ;;  %v9003_v61 = vld [vmem:[#allocation3 + $0x808] ss:$72 sps:$4 sm:$0xff]  }
  0xa9   :  { %2147 = vmatprep.subr.bf16.mxu1 %v8897_v62  ;;  %v9008_v62 = vld [vmem:[#allocation3 + $0x89c] ss:$72 sps:$4 sm:$0xff]  }
  0xac   :  { %2148 = vmatpush1.bf16.msra.mxu1 %v8895_v63  ;;  %v9006_v63 = vld [vmem:[#allocation3 + $0x898] ss:$72 sps:$4 sm:$0xff]  }
  0xad   :  { %2149 = vmatprep.subr.bf16.mxu1 %v8903_v0  ;;  %v9011_v0 = vld [vmem:[#allocation3 + $0x92c] ss:$72 sps:$4 sm:$0xff]  }
  0xb0   :  { %2150 = vmatpush1.bf16.msra.mxu1 %v8901_v2  ;;  %v9009_v2 = vld [vmem:[#allocation3 + $0x928] ss:$72 sps:$4 sm:$0xff]  }
  0xb1   :  { %2151 = vmatprep.subr.bf16.mxu1 %v8909_v3  ;;  %v9014_v3 = vld [vmem:[#allocation3 + $0x9bc] ss:$72 sps:$4 sm:$0xff]  }
  0xb4   :  { %2152 = vmatpush1.bf16.msra.mxu1 %v8907_v4  ;;  %v9012_v4 = vld [vmem:[#allocation3 + $0x9b8] ss:$72 sps:$4 sm:$0xff]  }
  0xb5   :  { %2153 = vmatprep.subr.bf16.mxu1 %v8915_v5  ;;  %v9105_v5 = vld [vmem:[#allocation3 + $0x10] ss:$72 sps:$4 sm:$0xff]  }
  0xb8   :  { %2154 = vmatpush1.bf16.msra.mxu1 %v8913_v6  ;;  %v9107_v6 = vld [vmem:[#allocation3 + $0x14] ss:$72 sps:$4 sm:$0xff]  }
  0xb9   :  { %2155 = vmatprep.subr.bf16.mxu1 %v8921_v7  ;;  %v9017_v7 = vld [vmem:[#allocation3 + $0xa4c] ss:$72 sps:$4 sm:$0xff]   ;;  %1135 = vmatprep.subr.bf16.mxu0 %v9107_v6 }
  0xba   :  { %1136 = vmatpush1.bf16.msra.mxu0 %v9105_v5  ;;  %v9143_v5 = vld [vmem:[#allocation3 + $0x6d4] ss:$72 sps:$4 sm:$0xff]  }
  0xbc   :  { %2156 = vmatpush1.bf16.msra.mxu1 %v8919_v8  ;;  %v9108_v8 = vld [vmem:[#allocation3 + $0xa0] ss:$72 sps:$4 sm:$0xff]  }
  0xbd   :  { %2157 = vmatprep.subr.bf16.mxu1 %v8927_v9  ;;  %v9110_v9 = vld [vmem:[#allocation3 + $0xa4] ss:$72 sps:$4 sm:$0xff]  }
  0xbe   :  { %1137 = vmatprep.subr.bf16.mxu0 %v9110_v9 }
  0xbf   :  { %1138 = vmatpush1.bf16.msra.mxu0 %v9108_v8  ;;  %v9056_v8 = vld [vmem:[#allocation3 + $0x42c] ss:$72 sps:$4 sm:$0xff]  }
  0xc0   :  { %2158 = vmatpush1.bf16.msra.mxu1 %v8925_v10  ;;  %v9113_v10 = vld [vmem:[#allocation3 + $0x134] ss:$72 sps:$4 sm:$0xff]  }
  0xc1   :  { %2159 = vmatprep.subr.bf16.mxu1 %v8933_v11  ;;  %v9015_v11 = vld [vmem:[#allocation3 + $0xa48] ss:$72 sps:$4 sm:$0xff]   ;;  %1139 = vmatprep.subr.bf16.mxu0 %v9113_v10 }
  0xc2   :  { %v9141_v10 = vld [vmem:[#allocation3 + $0x6d0] ss:$72 sps:$4 sm:$0xff]  }
  0xc4   :  { %2160 = vmatpush1.bf16.msra.mxu1 %v8931_v12  ;;  %v9020_v12 = vld [vmem:[#allocation3 + $0xadc] ss:$72 sps:$4 sm:$0xff]  }
  0xc5   :  { %2172 = vmatprep.subr.bf16.mxu1 %v8939_v13  ;;  %v9111_v13 = vld [vmem:[#allocation3 + $0x130] ss:$72 sps:$4 sm:$0xff]  }
  0xc6   :  { %1140 = vmatpush1.bf16.msra.mxu0 %v9111_v13  ;;  %v9059_v13 = vld [vmem:[#allocation3 + $0x4bc] ss:$72 sps:$4 sm:$0xff]  }
  0xc7   :  { %2162 = vmatmul.mubr.bf16.vlgmr.msra.gmra.mrb[4].mxu1 %v9837_v59 }
  0xc8   :  { %2173 = vmatpush1.bf16.msra.mxu1 %v8937_v14  ;;  %2204 = vmatprep.mubr.bf16.mxu1 %v10950_v1  ;;  %v9018_v14 = vld [vmem:[#allocation3 + $0xad8] ss:$72 sps:$4 sm:$0xff]  }
  0xc9   :  { %2174 = vmatprep.subr.bf16.mxu1 %v8942_v16  ;;  %v9023_v16 = vld [vmem:[#allocation3 + $0xb6c] ss:$72 sps:$4 sm:$0xff]  }
  0xcc   :  { %2175 = vmatpush1.bf16.msra.mxu1 %v8940_v17  ;;  %v9021_v17 = vld [vmem:[#allocation3 + $0xb68] ss:$72 sps:$4 sm:$0xff]  }
  0xcd   :  { %2176 = vmatprep.subr.bf16.mxu1 %v8945_v18  ;;  %v9026_v18 = vld [vmem:[#allocation3 + $0xbfc] ss:$72 sps:$4 sm:$0xff]  }
  0xd0   :  { %2177 = vmatpush1.bf16.msra.mxu1 %v8943_v19  ;;  %v9024_v19 = vld [vmem:[#allocation3 + $0xbf8] ss:$72 sps:$4 sm:$0xff]  }
  0xd1   :  { %2178 = vmatprep.subr.bf16.mxu1 %v8948_v20  ;;  %v9029_v20 = vld [vmem:[#allocation3 + $0xc8c] ss:$72 sps:$4 sm:$0xff]  }
  0xd4   :  { %2179 = vmatpush1.bf16.msra.mxu1 %v8946_v21  ;;  %v9027_v21 = vld [vmem:[#allocation3 + $0xc88] ss:$72 sps:$4 sm:$0xff]  }
  0xd5   :  { %2180 = vmatprep.subr.bf16.mxu1 %v8951_v22  ;;  %v9032_v22 = vld [vmem:[#allocation3 + $0xd1c] ss:$72 sps:$4 sm:$0xff]  }
  0xd8   :  { %2181 = vmatpush1.bf16.msra.mxu1 %v8949_v23  ;;  %v9116_v23 = vld [vmem:[#allocation3 + $0x1c4] ss:$72 sps:$4 sm:$0xff]  }
  0xd9   :  { %2182 = vmatprep.subr.bf16.mxu1 %v8954_v24  ;;  %v9114_v24 = vld [vmem:[#allocation3 + $0x1c0] ss:$72 sps:$4 sm:$0xff]   ;;  %1141 = vmatprep.subr.bf16.mxu0 %v9116_v23 }
  0xda   :  { %1142 = vmatpush1.bf16.msra.mxu0 %v9114_v24  ;;  %v9150_v23 = vld [vmem:[#allocation3 + $0x880] ss:$72 sps:$4 sm:$0xff]  }
  0xdb   :  { %v9063_v24 = vld [vmem:[#allocation3 + $0x5d8] ss:$72 sps:$4 sm:$0xff]  }
  0xdc   :  { %2183 = vmatpush1.bf16.msra.mxu1 %v8952_v25  ;;  %v9030_v25 = vld [vmem:[#allocation3 + $0xd18] ss:$72 sps:$4 sm:$0xff]  }
  0xdd   :  { %2184 = vmatprep.subr.bf16.mxu1 %v8957_v26  ;;  %v9117_v26 = vld [vmem:[#allocation3 + $0x250] ss:$72 sps:$4 sm:$0xff]  }
  0xe0   :  { %2185 = vmatpush1.bf16.msra.mxu1 %v8955_v27  ;;  %v9119_v27 = vld [vmem:[#allocation3 + $0x254] ss:$72 sps:$4 sm:$0xff]  }
  0xe1   :  { %2186 = vmatprep.subr.bf16.mxu1 %v8960_v28  ;;  %v9035_v28 = vld [vmem:[#allocation3 + $0x3c] ss:$72 sps:$4 sm:$0xff]   ;;  %1143 = vmatprep.subr.bf16.mxu0 %v9119_v27 }
  0xe2   :  { %1144 = vmatpush1.bf16.msra.mxu0 %v9117_v26  ;;  %v9068_v26 = vld [vmem:[#allocation3 + $0x66c] ss:$72 sps:$4 sm:$0xff]  }
  0xe4   :  { %2187 = vmatpush1.bf16.msra.mxu1 %v8958_v29  ;;  %v9122_v29 = vld [vmem:[#allocation3 + $0x2e4] ss:$72 sps:$4 sm:$0xff]  }
  0xe5   :  { %2301 = vmatprep.subr.bf16.mxu1 %v8963_v30  ;;  %v9120_v30 = vld [vmem:[#allocation3 + $0x2e0] ss:$72 sps:$4 sm:$0xff]   ;;  %1145 = vmatprep.subr.bf16.mxu0 %v9122_v29  ;;  %v9153_v29 = vld [vmem:[#allocation3 + $0x910] ss:$72 sps:$4 sm:$0xff]  }
  0xe6   :  { %1146 = vmatpush1.bf16.msra.mxu0 %v9120_v30  ;;  %v9066_v30 = vld [vmem:[#allocation3 + $0x668] ss:$72 sps:$4 sm:$0xff]  }
  0xe7   :  { %2205 = vmatmul.mubr.bf16.vlgmr.msra.gmra.mrb[4].mxu1 %v9849_v32 }
  0xe8   :  { %2302 = vmatpush1.bf16.msra.mxu1 %v8961_v31  ;;  %2333 = vmatprep.mubr.bf16.mxu1 %v9827_v15  ;;  %v9033_v31 = vld [vmem:[#allocation3 + $0x38] ss:$72 sps:$4 sm:$0xff]  }
  0xe9   :  { %2303 = vmatprep.subr.bf16.mxu1 %v8966_v33  ;;  %v9038_v33 = vld [vmem:[#allocation3 + $0xcc] ss:$72 sps:$4 sm:$0xff]  }
  0xec   :  { %2304 = vmatpush1.bf16.msra.mxu1 %v8964_v34  ;;  %v9125_v34 = vld [vmem:[#allocation3 + $0x374] ss:$72 sps:$4 sm:$0xff]  }
  0xed   :  { %2305 = vmatprep.subr.bf16.mxu1 %v8969_v35  ;;  %v9123_v35 = vld [vmem:[#allocation3 + $0x370] ss:$72 sps:$4 sm:$0xff]   ;;  %1147 = vmatprep.subr.bf16.mxu0 %v9125_v34 }
  0xee   :  { %1148 = vmatpush1.bf16.msra.mxu0 %v9123_v35 }
  0xf0   :  { %2306 = vmatpush1.bf16.msra.mxu1 %v8967_v36  ;;  %v9036_v36 = vld [vmem:[#allocation3 + $0xc8] ss:$72 sps:$4 sm:$0xff]  }
  0xf1   :  { %2307 = vmatprep.subr.bf16.mxu1 %v8972_v37  ;;  %v9128_v37 = vld [vmem:[#allocation3 + $0x404] ss:$72 sps:$4 sm:$0xff]  }
  0xf2   :  { %1149 = vmatprep.subr.bf16.mxu0 %v9128_v37  ;;  %v9156_v37 = vld [vmem:[#allocation3 + $0x9a0] ss:$72 sps:$4 sm:$0xff]  }
  0xf4   :  { %2308 = vmatpush1.bf16.msra.mxu1 %v8970_v38  ;;  %v9041_v38 = vld [vmem:[#allocation3 + $0x15c] ss:$72 sps:$4 sm:$0xff]  }
  0xf5   :  { %2309 = vmatprep.subr.bf16.mxu1 %v8975_v39  ;;  %v9126_v39 = vld [vmem:[#allocation3 + $0x400] ss:$72 sps:$4 sm:$0xff]  }
  0xf6   :  { %1150 = vmatpush1.bf16.msra.mxu0 %v9126_v39 }
  0xf8   :  { %2310 = vmatpush1.bf16.msra.mxu1 %v8973_v40  ;;  %v9039_v40 = vld [vmem:[#allocation3 + $0x158] ss:$72 sps:$4 sm:$0xff]  }
  0xf9   :  { %2311 = vmatprep.subr.bf16.mxu1 %v8978_v41  ;;  %v9131_v41 = vld [vmem:[#allocation3 + $0x494] ss:$72 sps:$4 sm:$0xff]  }
  0xfa   :  { %1151 = vmatprep.subr.bf16.mxu0 %v9131_v41  ;;  %v9074_v41 = vld [vmem:[#allocation3 + $0x78c] ss:$72 sps:$4 sm:$0xff]  }
  0xfc   :  { %2312 = vmatpush1.bf16.msra.mxu1 %v8976_v42  ;;  %v9044_v42 = vld [vmem:[#allocation3 + $0x1ec] ss:$72 sps:$4 sm:$0xff]  }
  0xfd   :  { %2313 = vmatprep.subr.bf16.mxu1 %v8981_v43  ;;  %v9042_v43 = vld [vmem:[#allocation3 + $0x1e8] ss:$72 sps:$4 sm:$0xff]  }
 0x100   :  { %2314 = vmatpush1.bf16.msra.mxu1 %v8979_v44  ;;  %v9129_v44 = vld [vmem:[#allocation3 + $0x490] ss:$72 sps:$4 sm:$0xff]  }
 0x101   :  { %2315 = vmatprep.subr.bf16.mxu1 %v8984_v45  ;;  %v9047_v45 = vld [vmem:[#allocation3 + $0x27c] ss:$72 sps:$4 sm:$0xff]   ;;  %1152 = vmatpush1.bf16.msra.mxu0 %v9129_v44 }
 0x104   :  { %2316 = vmatpush1.bf16.msra.mxu1 %v8982_v46  ;;  %v213_v46 = vlaneseq }
 0x105   :  { %2317 = vmatprep.subr.bf16.mxu1 %v8987_v47  ;;  %v9134_v47 = vld [vmem:[#allocation3 + $0x524] ss:$72 sps:$4 sm:$0xff]  }
 0x106   :  { %1153 = vmatprep.subr.bf16.mxu0 %v9134_v47  ;;  %v9072_v47 = vld [vmem:[#allocation3 + $0x788] ss:$72 sps:$4 sm:$0xff]  }
 0x108   :  { %2318 = vmatpush1.bf16.msra.mxu1 %v8985_v48  ;;  %v9132_v48 = vld [vmem:[#allocation3 + $0x520] ss:$72 sps:$4 sm:$0xff]  }
 0x109   :  { %2319 = vmatprep.subr.bf16.mxu1 %v8990_v49  ;;  %v9045_v49 = vld [vmem:[#allocation3 + $0x278] ss:$72 sps:$4 sm:$0xff]   ;;  %1154 = vmatpush1.bf16.msra.mxu0 %v9132_v48  ;;  %v9164_v48 = vld [vmem:[#allocation3 + $0xac4] ss:$72 sps:$4 sm:$0xff]  }
 0x10c   :  { %2320 = vmatpush1.bf16.msra.mxu1 %v8988_v50  ;;  %v9137_v50 = vld [vmem:[#allocation3 + $0x5b4] ss:$72 sps:$4 sm:$0xff]  }
 0x10d   :  { %2321 = vmatprep.subr.bf16.mxu1 %v8993_v51  ;;  %v9863_v51 = vshrl.u32 %v213_v46, 7  ;;  %1155 = vmatprep.subr.bf16.mxu0 %v9137_v50  ;;  %v9159_v46 = vld [vmem:[#allocation3 + $0xa30] ss:$72 sps:$4 sm:$0xff]   ;;  %v9162_v50 = vld [vmem:[#allocation3 + $0xac0] ss:$72 sps:$4 sm:$0xff]  }
 0x10f   :  { %v9895_v27 = vsub.s32 0, %v9863_v51 }
 0x110   :  { %2322 = vmatpush1.bf16.msra.mxu1 %v8991_v52  ;;  %v9050_v52 = vld [vmem:[#allocation3 + $0x30c] ss:$72 sps:$4 sm:$0xff]  }
 0x111   :  { %2323 = vmatprep.subr.bf16.mxu1 %v8996_v53  ;;  %v9135_v53 = vld [vmem:[#allocation3 + $0x5b0] ss:$72 sps:$4 sm:$0xff]   ;;  %11007 = vst [vmem:[#allocation11_spill] sm:$0xff] %v9895_v27 }
 0x112   :  { %1156 = vmatpush1.bf16.msra.mxu0 %v9135_v53  ;;  %v9167_v53 = vld [vmem:[#allocation3 + $0xb54] ss:$72 sps:$4 sm:$0xff]  }
 0x114   :  { %2324 = vmatpush1.bf16.msra.mxu1 %v8994_v54  ;;  %v9868_v54 = vld [vmem:[%s10941_s2] sm:$0x3f] }
 0x115   :  { %2325 = vmatprep.subr.bf16.mxu1 %v8999_v55  ;;  %v9048_v55 = vld [vmem:[#allocation3 + $0x308] ss:$72 sps:$4 sm:$0xff]   ;;  %v9902_v34 = vrot.slane %v9868_v54, %v9895_v27 }
 0x118   :  { %2326 = vmatpush1.bf16.msra.mxu1 %v8997_v56  ;;  %v9140_v56 = vld [vmem:[#allocation3 + $0x644] ss:$72 sps:$4 sm:$0xff]  }
 0x119   :  { %2327 = vmatprep.subr.bf16.mxu1 %v9002_v57  ;;  %v9871_v57 = vsub.s32 2, %v9863_v51  ;;  %1157 = vmatprep.subr.bf16.mxu0 %v9140_v56  ;;  %v9165_v56 = vld [vmem:[#allocation3 + $0xb50] ss:$72 sps:$4 sm:$0xff]  }
 0x11b   :  { %11005 = vst [vmem:[#allocation9_spill] sm:$0xff] %v9871_v57 }
 0x11c   :  { %2328 = vmatpush1.bf16.msra.mxu1 %v9000_v58  ;;  %v9874_v58 = vsub.s32 3, %v9863_v51 }
 0x11d   :  { %2329 = vmatprep.subr.bf16.mxu1 %v9005_v60  ;;  %v9053_v60 = vld [vmem:[#allocation3 + $0x39c] ss:$72 sps:$4 sm:$0xff]  }
 0x120   :  { %2330 = vmatpush1.bf16.msra.mxu1 %v9003_v61 }
 0x121   :  { %2331 = vmatprep.subr.bf16.mxu1 %v9008_v62  ;;  %v9880_v62 = vrot.slane %v9868_v54, %v9871_v57 }
 0x124   :  { %2332 = vmatpush1.bf16.msra.mxu1 %v9006_v63 }
 0x125   :  { %2344 = vmatprep.subr.bf16.mxu1 %v9011_v0  ;;  %v9138_v0 = vld [vmem:[#allocation3 + $0x640] ss:$72 sps:$4 sm:$0xff]  }
 0x126   :  { %1158 = vmatpush1.bf16.msra.mxu0 %v9138_v0  ;;  %v9170_v0 = vld [vmem:[#allocation3 + $0xbe4] ss:$72 sps:$4 sm:$0xff]  }
 0x127   :  { %2334 = vmatmul.mubr.bf16.vlgmr.msra.gmra.mrb[8].mxu1 %v9837_v59  ;;  %1159 = vmatprep.subr.bf16.mxu0 %v9143_v5  ;;  %v9081_v5 = vld [vmem:[#allocation3 + $0x938] ss:$72 sps:$4 sm:$0xff]  }
 0x128   :  { %2345 = vmatpush1.bf16.msra.mxu1 %v9009_v2  ;;  %2376 = vmatprep.mubr.bf16.mxu1 %v10950_v1  ;;  %v9886_v2 = vrot.slane %v9868_v54, %v9874_v58 }
 0x129   :  { %2346 = vmatprep.subr.bf16.mxu1 %v9014_v3 }
 0x12a   :  { %1160 = vmatpush1.bf16.msra.mxu0 %v9141_v10  ;;  %v9171_v10 = vld [vmem:[#allocation3 + $0xc70] ss:$72 sps:$4 sm:$0xff]  }
 0x12c   :  { %2347 = vmatpush1.bf16.msra.mxu1 %v9012_v4  ;;  %v9051_v4 = vld [vmem:[#allocation3 + $0x398] ss:$72 sps:$4 sm:$0xff]  }
 0x12d   :  { %2348 = vmatprep.subr.bf16.mxu1 %v9017_v7 }
 0x130   :  { %2349 = vmatpush1.bf16.msra.mxu1 %v9015_v11  ;;  %v9054_v11 = vld [vmem:[#allocation3 + $0x428] ss:$72 sps:$4 sm:$0xff]  }
 0x131   :  { %2350 = vmatprep.subr.bf16.mxu1 %v9020_v12  ;;  %v9146_v12 = vld [vmem:[#allocation3 + $0x764] ss:$72 sps:$4 sm:$0xff]  }
 0x132   :  { %1161 = vmatprep.subr.bf16.mxu0 %v9146_v12  ;;  %v9176_v12 = vld [vmem:[#allocation3 + $0xd04] ss:$72 sps:$4 sm:$0xff]  }
 0x134   :  { %2351 = vmatpush1.bf16.msra.mxu1 %v9018_v14  ;;  %v9144_v14 = vld [vmem:[#allocation3 + $0x760] ss:$72 sps:$4 sm:$0xff]  }
 0x135   :  { %2352 = vmatprep.subr.bf16.mxu1 %v9023_v16  ;;  %v9057_v16 = vld [vmem:[#allocation3 + $0x4b8] ss:$72 sps:$4 sm:$0xff]   ;;  %1162 = vmatpush1.bf16.msra.mxu0 %v9144_v14 }
 0x136   :  { %v9174_v14 = vld [vmem:[#allocation3 + $0xd00] ss:$72 sps:$4 sm:$0xff]  }
 0x138   :  { %2353 = vmatpush1.bf16.msra.mxu1 %v9021_v17  ;;  %v9149_v17 = vld [vmem:[#allocation3 + $0x7f4] ss:$72 sps:$4 sm:$0xff]  }
 0x139   :  { %2354 = vmatprep.subr.bf16.mxu1 %v9026_v18  ;;  %v9062_v18 = vld [vmem:[#allocation3 + $0x54c] ss:$72 sps:$4 sm:$0xff]   ;;  %1163 = vmatprep.subr.bf16.mxu0 %v9149_v17 }
 0x13a   :  { %v9179_v17 = vld [vmem:[#allocation3 + $0x24] ss:$72 sps:$4 sm:$0xff]  }
 0x13c   :  { %2355 = vmatpush1.bf16.msra.mxu1 %v9024_v19  ;;  %v9147_v19 = vld [vmem:[#allocation3 + $0x7f0] ss:$72 sps:$4 sm:$0xff]  }
 0x13d   :  { %2356 = vmatprep.subr.bf16.mxu1 %v9029_v20  ;;  %v9060_v20 = vld [vmem:[#allocation3 + $0x548] ss:$72 sps:$4 sm:$0xff]   ;;  %1164 = vmatpush1.bf16.msra.mxu0 %v9147_v19 }
 0x13e   :  { %v9177_v19 = vld [vmem:[#allocation3 + $0x20] ss:$72 sps:$4 sm:$0xff]  }
 0x140   :  { %2357 = vmatpush1.bf16.msra.mxu1 %v9027_v21  ;;  %v9152_v21 = vld [vmem:[#allocation3 + $0x884] ss:$72 sps:$4 sm:$0xff]  }
 0x141   :  { %2358 = vmatprep.subr.bf16.mxu1 %v9032_v22  ;;  %v9065_v22 = vld [vmem:[#allocation3 + $0x5dc] ss:$72 sps:$4 sm:$0xff]   ;;  %1165 = vmatprep.subr.bf16.mxu0 %v9152_v21 }
 0x142   :  { %1166 = vmatpush1.bf16.msra.mxu0 %v9150_v23  ;;  %v9182_v21 = vld [vmem:[#allocation3 + $0xb4] ss:$72 sps:$4 sm:$0xff]   ;;  %v9180_v23 = vld [vmem:[#allocation3 + $0xb0] ss:$72 sps:$4 sm:$0xff]  }
 0x144   :  { %2359 = vmatpush1.bf16.msra.mxu1 %v9030_v25  ;;  %v9155_v25 = vld [vmem:[#allocation3 + $0x914] ss:$72 sps:$4 sm:$0xff]  }
 0x145   :  { %3381 = vmatprep.subr.bf16.mxu1 %v9035_v28  ;;  %v9898_v28 = vsub.s32 1, %v9863_v51  ;;  %1178 = vmatprep.subr.bf16.mxu0 %v9155_v25  ;;  %v9185_v25 = vld [vmem:[#allocation3 + $0x144] ss:$72 sps:$4 sm:$0xff]  }
 0x146   :  { %1168 = vmatmul.mubr.bf16.vlgmr.msra.gmra.mrb[4].mxu0 %v9837_v59 }
 0x147   :  { %2377 = vmatmul.mubr.bf16.vlgmr.msra.gmra.mrb[8].mxu1 %v9849_v32  ;;  %11008 = vst [vmem:[#allocation12_spill] sm:$0xff] %v9898_v28  ;;  %1179 = vmatpush1.bf16.msra.mxu0 %v9153_v29  ;;  %v9183_v29 = vld [vmem:[#allocation3 + $0x140] ss:$72 sps:$4 sm:$0xff]  }
 0x148   :  { %3382 = vmatpush1.bf16.msra.mxu1 %v9033_v31  ;;  %3413 = vmatprep.mubr.bf16.mxu1 %v9827_v15  ;;  %v9158_v31 = vld [vmem:[#allocation3 + $0x9a4] ss:$72 sps:$4 sm:$0xff]  }
 0x149   :  { %3383 = vmatprep.subr.bf16.mxu1 %v9038_v33  ;;  %v9071_v33 = vld [vmem:[#allocation3 + $0x6fc] ss:$72 sps:$4 sm:$0xff]   ;;  %1210 = vmatprep.mubr.bf16.mxu0 %v10950_v1 }
 0x14a   :  { %1180 = vmatprep.subr.bf16.mxu0 %v9158_v31  ;;  %v9101_v31 = vld [vmem:[#allocation3 + $0xc9c] ss:$72 sps:$4 sm:$0xff]  }
 0x14b   :  { %1181 = vmatpush1.bf16.msra.mxu0 %v9156_v37  ;;  %v9188_v37 = vld [vmem:[#allocation3 + $0x1d4] ss:$72 sps:$4 sm:$0xff]  }
 0x14c   :  { %3384 = vmatpush1.bf16.msra.mxu1 %v9036_v36  ;;  %v9909_v36 = vrot.slane %v9868_v54, %v9898_v28 }
 0x14d   :  { %3385 = vmatprep.subr.bf16.mxu1 %v9041_v38  ;;  %v9069_v38 = vld [vmem:[#allocation3 + $0x6f8] ss:$72 sps:$4 sm:$0xff]  }
 0x150   :  { %3386 = vmatpush1.bf16.msra.mxu1 %v9039_v40  ;;  %v9161_v40 = vld [vmem:[#allocation3 + $0xa34] ss:$72 sps:$4 sm:$0xff]  }
 0x151   :  { %3387 = vmatprep.subr.bf16.mxu1 %v9044_v42  ;;  %1182 = vmatprep.subr.bf16.mxu0 %v9161_v40  ;;  %v9186_v40 = vld [vmem:[#allocation3 + $0x1d0] ss:$72 sps:$4 sm:$0xff]  }
 0x152   :  { %1183 = vmatpush1.bf16.msra.mxu0 %v9159_v46  ;;  %v9194_v46 = vld [vmem:[#allocation3 + $0x2f4] ss:$72 sps:$4 sm:$0xff]  }
 0x153   :  { %1184 = vmatprep.subr.bf16.mxu0 %v9164_v48  ;;  %v9197_v48 = vld [vmem:[#allocation3 + $0x384] ss:$72 sps:$4 sm:$0xff]  }
 0x154   :  { %3388 = vmatpush1.bf16.msra.mxu1 %v9042_v43 }
 0x155   :  { %3389 = vmatprep.subr.bf16.mxu1 %v9047_v45 }
 0x156   :  { %1185 = vmatpush1.bf16.msra.mxu0 %v9162_v50  ;;  %v9195_v50 = vld [vmem:[#allocation3 + $0x380] ss:$72 sps:$4 sm:$0xff]  }
 0x157   :  { %1186 = vmatprep.subr.bf16.mxu0 %v9167_v53  ;;  %v9198_v53 = vld [vmem:[#allocation3 + $0x410] ss:$72 sps:$4 sm:$0xff]  }
 0x158   :  { %3390 = vmatpush1.bf16.msra.mxu1 %v9045_v49  ;;  %v9077_v49 = vld [vmem:[#allocation3 + $0x81c] ss:$72 sps:$4 sm:$0xff]  }
 0x159   :  { %3391 = vmatprep.subr.bf16.mxu1 %v9050_v52  ;;  %v9075_v52 = vld [vmem:[#allocation3 + $0x818] ss:$72 sps:$4 sm:$0xff]  }
 0x15a   :  { %v9876_v61 = vpop.f32.mrb[0].mxu1  ;;  %1187 = vmatpush1.bf16.msra.mxu0 %v9165_v56  ;;  %v9201_v56 = vld [vmem:[#allocation3 + $0x4a0] ss:$72 sps:$4 sm:$0xff]  }
 0x15b   :  { %v9882_v63 = vpop.f32.mrb[1].mxu1  ;;  %1188 = vmatprep.subr.bf16.mxu0 %v9170_v0  ;;  %v9204_v0 = vld [vmem:[#allocation3 + $0x530] ss:$72 sps:$4 sm:$0xff]  }
 0x15c   :  { %v1130_v3 = vpop.f32.mrb[2].mxu1  ;;  %3392 = vmatpush1.bf16.msra.mxu1 %v9048_v55  ;;  %v9080_v55 = vld [vmem:[#allocation3 + $0x8ac] ss:$72 sps:$4 sm:$0xff]  }
 0x15d   :  { %v9889_v6 = vadd.f32 %v1130_v3, %v9880_v62  ;;  %v1132_v7 = vpop.f32.mrb[3].mxu1  ;;  %3393 = vmatprep.subr.bf16.mxu1 %v9053_v60  ;;  %v9078_v60 = vld [vmem:[#allocation3 + $0x8a8] ss:$72 sps:$4 sm:$0xff]   ;;  %v9083_v3 = vld [vmem:[#allocation3 + $0x93c] ss:$72 sps:$4 sm:$0xff]  }
 0x15e   :  { %v9892_v9 = vadd.f32 %v1132_v7, %v9886_v2  ;;  %v9086_v7 = vld [vmem:[#allocation3 + $0x9cc] ss:$72 sps:$4 sm:$0xff]  }
 0x160   :  { %11006 = vst [vmem:[#allocation10_spill] sm:$0xff] %v9892_v9  ;;  %3394 = vmatpush1.bf16.msra.mxu1 %v9051_v4  ;;  %v9168_v4 = vld [vmem:[#allocation3 + $0xbe0] ss:$72 sps:$4 sm:$0xff]   ;;  %v9475_v9 = vld [vmem:[#allocation5 + $0x1d0] ss:$12 sps:$4 sm:$0xff]  }
 0x161   :  { %3395 = vmatprep.subr.bf16.mxu1 %v9056_v8  ;;  %v9173_v8 = vld [vmem:[#allocation3 + $0xc74] ss:$72 sps:$4 sm:$0xff]   ;;  %1189 = vmatpush1.bf16.msra.mxu0 %v9168_v4  ;;  %v9209_v4 = vld [vmem:[#allocation3 + $0x5c4] ss:$72 sps:$4 sm:$0xff]  }
 0x162   :  { %1190 = vmatprep.subr.bf16.mxu0 %v9173_v8  ;;  %v9212_v8 = vld [vmem:[#allocation3 + $0x654] ss:$72 sps:$4 sm:$0xff]  }
 0x163   :  { %v9905_v35 = vpop.f32.mrb[0].mxu0 }
 0x164   :  { %3396 = vmatpush1.bf16.msra.mxu1 %v9054_v11  ;;  %v9912_v39 = vpop.f32.mrb[1].mxu0  ;;  %v9084_v11 = vld [vmem:[#allocation3 + $0x9c8] ss:$72 sps:$4 sm:$0xff]  }
 0x165   :  { %3397 = vmatprep.subr.bf16.mxu1 %v9059_v13  ;;  %v1044_v42 = vpop.f32.mrb[2].mxu0  ;;  %v9089_v13 = vld [vmem:[#allocation3 + $0xa5c] ss:$72 sps:$4 sm:$0xff]   ;;  %1191 = vmatpush1.bf16.msra.mxu0 %v9171_v10 }
 0x166   :  { %v9915_v43 = vadd.f32 %v1044_v42, %v9902_v34  ;;  %v1046_v44 = vpop.f32.mrb[3].mxu0  ;;  %1192 = vmatprep.subr.bf16.mxu0 %v9176_v12  ;;  %v9189_v42 = vld [vmem:[#allocation3 + $0x260] ss:$72 sps:$4 sm:$0xff]  }
 0x167   :  { %v9918_v45 = vadd.f32 %v1046_v44, %v9909_v36  ;;  %v9102_v44 = vld [vmem:[#allocation3 + $0xd28] ss:$72 sps:$4 sm:$0xff]  }
 0x168   :  { %3398 = vmatpush1.bf16.msra.mxu1 %v9057_v16  ;;  %v9087_v16 = vld [vmem:[#allocation3 + $0xa58] ss:$72 sps:$4 sm:$0xff]  }
 0x169   :  { %3399 = vmatprep.subr.bf16.mxu1 %v9062_v18  ;;  %v9092_v18 = vld [vmem:[#allocation3 + $0xaec] ss:$72 sps:$4 sm:$0xff]   ;;  %1193 = vmatpush1.bf16.msra.mxu0 %v9174_v14 }
 0x16a   :  { %2215 = vmatprep.subr.bf16.mxu0 %v9179_v17  ;;  %v9215_v17 = vld [vmem:[#allocation3 + $0x6e4] ss:$72 sps:$4 sm:$0xff]  }
 0x16c   :  { %3400 = vmatpush1.bf16.msra.mxu1 %v9060_v20  ;;  %v9090_v20 = vld [vmem:[#allocation3 + $0xae8] ss:$72 sps:$4 sm:$0xff]   ;;  %1211 = vmatmul.mubr.bf16.vlgmr.msra.gmra.mrb[4].mxu0 %v9849_v32 }
 0x16d   :  { %3401 = vmatprep.subr.bf16.mxu1 %v9065_v22  ;;  %v9095_v22 = vld [vmem:[#allocation3 + $0xb7c] ss:$72 sps:$4 sm:$0xff]   ;;  %2216 = vmatpush1.bf16.msra.mxu0 %v9177_v19 }
 0x16e   :  { %2247 = vmatprep.mubr.bf16.mxu0 %v9827_v15  ;;  %2217 = vmatprep.subr.bf16.mxu0 %v9182_v21 }
 0x170   :  { %3402 = vmatpush1.bf16.msra.mxu1 %v9063_v24  ;;  %v9093_v24 = vld [vmem:[#allocation3 + $0xb78] ss:$72 sps:$4 sm:$0xff]  }
 0x171   :  { %3403 = vmatprep.subr.bf16.mxu1 %v9068_v26  ;;  %v9098_v26 = vld [vmem:[#allocation3 + $0xc0c] ss:$72 sps:$4 sm:$0xff]   ;;  %2218 = vmatpush1.bf16.msra.mxu0 %v9180_v23 }
 0x172   :  { %2219 = vmatprep.subr.bf16.mxu0 %v9185_v25  ;;  %v9218_v23 = vld [vmem:[#allocation3 + $0x774] ss:$72 sps:$4 sm:$0xff]   ;;  %v9221_v25 = vld [vmem:[#allocation3 + $0x804] ss:$72 sps:$4 sm:$0xff]  }
 0x174   :  { %3404 = vmatpush1.bf16.msra.mxu1 %v9066_v30  ;;  %v9096_v30 = vld [vmem:[#allocation3 + $0xc08] ss:$72 sps:$4 sm:$0xff]  }
 0x175   :  { %3405 = vmatprep.subr.bf16.mxu1 %v9071_v33  ;;  %2220 = vmatpush1.bf16.msra.mxu0 %v9183_v29  ;;  %v9099_v33 = vld [vmem:[#allocation3 + $0xc98] ss:$72 sps:$4 sm:$0xff]   ;;  %v9227_v29 = vld [vmem:[#allocation3 + $0x924] ss:$72 sps:$4 sm:$0xff]  }
 0x176   :  { %2221 = vmatprep.subr.bf16.mxu0 %v9188_v37  ;;  %v9233_v37 = vld [vmem:[#allocation3 + $0xa44] ss:$72 sps:$4 sm:$0xff]  }
 0x178   :  { %3406 = vmatpush1.bf16.msra.mxu1 %v9069_v38  ;;  %v9104_v38 = vld [vmem:[#allocation3 + $0xd2c] ss:$72 sps:$4 sm:$0xff]  }
 0x179   :  { %3407 = vmatprep.subr.bf16.mxu1 %v9074_v41  ;;  %v9191_v41 = vld [vmem:[#allocation3 + $0x264] ss:$72 sps:$4 sm:$0xff]   ;;  %2222 = vmatpush1.bf16.msra.mxu0 %v9186_v40  ;;  %v9236_v40 = vld [vmem:[#allocation3 + $0xad4] ss:$72 sps:$4 sm:$0xff]  }
 0x17a   :  { %2223 = vmatprep.subr.bf16.mxu0 %v9191_v41  ;;  %v9234_v41 = vld [vmem:[#allocation3 + $0xad0] ss:$72 sps:$4 sm:$0xff]  }
 0x17c   :  { %3408 = vmatpush1.bf16.msra.mxu1 %v9072_v47  ;;  %v9192_v47 = vld [vmem:[#allocation3 + $0x2f0] ss:$72 sps:$4 sm:$0xff]  }
 0x17d   :  { %3409 = vmatprep.subr.bf16.mxu1 %v9077_v49  ;;  %2224 = vmatpush1.bf16.msra.mxu0 %v9189_v42  ;;  %v10948_v49 = vmov 0.0   ;;  %v9239_v42 = vld [vmem:[#allocation3 + $0xb64] ss:$72 sps:$4 sm:$0xff]  }
 0x17e   :  { %2225 = vmatprep.subr.bf16.mxu0 %v9194_v46  ;;  %v9242_v46 = vld [vmem:[#allocation3 + $0xbf4] ss:$72 sps:$4 sm:$0xff]  }
 0x180   :  { %3410 = vmatpush1.bf16.msra.mxu1 %v9075_v52  ;;  %v9200_v52 = vld [vmem:[#allocation3 + $0x414] ss:$72 sps:$4 sm:$0xff]  }
 0x181   :  { %3411 = vmatprep.subr.bf16.mxu1 %v9080_v55  ;;  %2226 = vmatpush1.bf16.msra.mxu0 %v9192_v47  ;;  %v9203_v55 = vld [vmem:[#allocation3 + $0x4a4] ss:$72 sps:$4 sm:$0xff]   ;;  %v9240_v47 = vld [vmem:[#allocation3 + $0xbf0] ss:$72 sps:$4 sm:$0xff]  }
 0x182   :  { %2227 = vmatprep.subr.bf16.mxu0 %v9197_v48  ;;  %v9245_v48 = vld [vmem:[#allocation3 + $0xc84] ss:$72 sps:$4 sm:$0xff]  }
 0x184   :  { %3412 = vmatpush1.bf16.msra.mxu1 %v9078_v60  ;;  %v9206_v60 = vld [vmem:[#allocation3 + $0x534] ss:$72 sps:$4 sm:$0xff]  }
 0x185   :  { %3424 = vmatprep.subr.bf16.mxu1 %v9083_v3  ;;  %2228 = vmatpush1.bf16.msra.mxu0 %v9195_v50  ;;  %v9931_v3 = vld [vmem:[%s10941_s2 + $0x6] sm:$0x3f] }
 0x186   :  { %2229 = vmatprep.subr.bf16.mxu0 %v9200_v52  ;;  %v9939_v14 = vrot.slane %v9931_v3, %v9898_v28  ;;  %v9243_v50 = vld [vmem:[#allocation3 + $0xc80] ss:$72 sps:$4 sm:$0xff]   ;;  %v9248_v52 = vld [vmem:[#allocation3 + $0xd14] ss:$72 sps:$4 sm:$0xff]  }
 0x187   :  { %3414 = vmatmul.mubr.bf16.vlgmr.msra.gmra.mrb[12].mxu1 %v9837_v59 }
 0x188   :  { %3425 = vmatpush1.bf16.msra.mxu1 %v9081_v5  ;;  %3456 = vmatprep.mubr.bf16.mxu1 %v10950_v1  ;;  %v1382_v5 = vrot.slane %v9931_v3, %v9895_v27 }
 0x189   :  { %3426 = vmatprep.subr.bf16.mxu1 %v9086_v7  ;;  %2230 = vmatpush1.bf16.msra.mxu0 %v9198_v53  ;;  %v9207_v7 = vld [vmem:[#allocation3 + $0x5c0] ss:$72 sps:$4 sm:$0xff]   ;;  %v9246_v53 = vld [vmem:[#allocation3 + $0xd10] ss:$72 sps:$4 sm:$0xff]  }
 0x18a   :  { %2231 = vmatprep.subr.bf16.mxu0 %v9203_v55  ;;  %v9251_v55 = vld [vmem:[#allocation3 + $0x34] ss:$72 sps:$4 sm:$0xff]  }
 0x18c   :  { %3427 = vmatpush1.bf16.msra.mxu1 %v9084_v11 }
 0x18d   :  { %3428 = vmatprep.subr.bf16.mxu1 %v9089_v13  ;;  %2232 = vmatpush1.bf16.msra.mxu0 %v9201_v56  ;;  %v9210_v13 = vld [vmem:[#allocation3 + $0x650] ss:$72 sps:$4 sm:$0xff]  }
 0x18e   :  { %2233 = vmatprep.subr.bf16.mxu0 %v9206_v60  ;;  %v9249_v56 = vld [vmem:[#allocation3 + $0x30] ss:$72 sps:$4 sm:$0xff]   ;;  %v9254_v60 = vld [vmem:[#allocation3 + $0xc4] ss:$72 sps:$4 sm:$0xff]  }
 0x190   :  { %3429 = vmatpush1.bf16.msra.mxu1 %v9087_v16 }
 0x191   :  { %3430 = vmatprep.subr.bf16.mxu1 %v9092_v18  ;;  %2234 = vmatpush1.bf16.msra.mxu0 %v9204_v0  ;;  %v9252_v0 = vld [vmem:[#allocation3 + $0xc0] ss:$72 sps:$4 sm:$0xff]  }
 0x192   :  { %2235 = vmatprep.subr.bf16.mxu0 %v9209_v4  ;;  %v9257_v4 = vld [vmem:[#allocation3 + $0x154] ss:$72 sps:$4 sm:$0xff]  }
 0x194   :  { %3431 = vmatpush1.bf16.msra.mxu1 %v9090_v20  ;;  %v8664_v20 = vadd.f32 %v9905_v35, %v9902_v34  ;;  %v9224_v34 = vld [vmem:[#allocation3 + $0x894] ss:$72 sps:$4 sm:$0xff]   ;;  %v9222_v35 = vld [vmem:[#allocation3 + $0x890] ss:$72 sps:$4 sm:$0xff]  }
 0x195   :  { %3432 = vmatprep.subr.bf16.mxu1 %v9095_v22  ;;  %2236 = vmatpush1.bf16.msra.mxu0 %v9207_v7  ;;  %v9213_v22 = vld [vmem:[#allocation3 + $0x6e0] ss:$72 sps:$4 sm:$0xff]   ;;  %v9260_v7 = vld [vmem:[#allocation3 + $0x1e4] ss:$72 sps:$4 sm:$0xff]  }
 0x196   :  { %2237 = vmatprep.subr.bf16.mxu0 %v9212_v8  ;;  %v9258_v8 = vld [vmem:[#allocation3 + $0x1e0] ss:$72 sps:$4 sm:$0xff]  }
 0x198   :  { %3433 = vmatpush1.bf16.msra.mxu1 %v9093_v24  ;;  %v9216_v24 = vld [vmem:[#allocation3 + $0x770] ss:$72 sps:$4 sm:$0xff]  }
 0x199   :  { %3434 = vmatprep.subr.bf16.mxu1 %v9098_v26  ;;  %2238 = vmatpush1.bf16.msra.mxu0 %v9210_v13  ;;  %v9219_v26 = vld [vmem:[#allocation3 + $0x800] ss:$72 sps:$4 sm:$0xff]   ;;  %v9266_v13 = vld [vmem:[#allocation3 + $0x304] ss:$72 sps:$4 sm:$0xff]  }
 0x19a   :  { %2239 = vmatprep.subr.bf16.mxu0 %v9215_v17  ;;  %v9269_v17 = vld [vmem:[#allocation3 + $0x394] ss:$72 sps:$4 sm:$0xff]  }
 0x19c   :  { %3435 = vmatpush1.bf16.msra.mxu1 %v9096_v30  ;;  %v9225_v30 = vld [vmem:[#allocation3 + $0x920] ss:$72 sps:$4 sm:$0xff]  }
 0x19d   :  { %3436 = vmatprep.subr.bf16.mxu1 %v9101_v31  ;;  %2240 = vmatpush1.bf16.msra.mxu0 %v9213_v22  ;;  %v9230_v31 = vld [vmem:[#allocation3 + $0x9b4] ss:$72 sps:$4 sm:$0xff]   ;;  %v9270_v22 = vld [vmem:[#allocation3 + $0x420] ss:$72 sps:$4 sm:$0xff]  }
 0x19e   :  { %2241 = vmatprep.subr.bf16.mxu0 %v9218_v23  ;;  %v9275_v23 = vld [vmem:[#allocation3 + $0x4b4] ss:$72 sps:$4 sm:$0xff]  }
 0x1a0   :  { %3437 = vmatpush1.bf16.msra.mxu1 %v9099_v33  ;;  %v9228_v33 = vld [vmem:[#allocation3 + $0x9b0] ss:$72 sps:$4 sm:$0xff]  }
 0x1a1   :  { %3438 = vmatprep.subr.bf16.mxu1 %v9104_v38  ;;  %2242 = vmatpush1.bf16.msra.mxu0 %v9216_v24  ;;  %v9231_v38 = vld [vmem:[#allocation3 + $0xa40] ss:$72 sps:$4 sm:$0xff]   ;;  %v9273_v24 = vld [vmem:[#allocation3 + $0x4b0] ss:$72 sps:$4 sm:$0xff]  }
 0x1a2   :  { %2243 = vmatprep.subr.bf16.mxu0 %v9221_v25  ;;  %v9276_v25 = vld [vmem:[#allocation3 + $0x540] ss:$72 sps:$4 sm:$0xff]  }
 0x1a4   :  { %3439 = vmatpush1.bf16.msra.mxu1 %v9102_v44  ;;  %v9237_v44 = vld [vmem:[#allocation3 + $0xb60] ss:$72 sps:$4 sm:$0xff]  }
 0x1a5   :  { %8304 = vmatprep.subr.mxu1 %v10948_v49  ;;  %2244 = vmatpush1.bf16.msra.mxu0 %v9219_v26  ;;  %v9278_v26 = vld [vmem:[#allocation3 + $0x544] ss:$72 sps:$4 sm:$0xff]  }
 0x1a6   :  { %2245 = vmatprep.subr.bf16.mxu0 %v9224_v34  ;;  %v9956_v34 = vsub.s32 4, %v9863_v51 }
 0x1a7   :  { %3457 = vmatmul.mubr.bf16.vlgmr.msra.gmra.mrb[12].mxu1 %v9849_v32 }
 0x1a8   :  { %8306 = vmatprep.mubr.msk.f32.mxu1 %vm9751_vm0, %v10948_v49 }
 0x1a9   :  { %2246 = vmatpush1.bf16.msra.mxu0 %v9222_v35  ;;  %v9279_v35 = vld [vmem:[#allocation3 + $0x5d0] ss:$72 sps:$4 sm:$0xff]  }
 0x1aa   :  { %2258 = vmatprep.subr.bf16.mxu0 %v9227_v29  ;;  %v9281_v29 = vld [vmem:[#allocation3 + $0x5d4] ss:$72 sps:$4 sm:$0xff]  }
 0x1ac   :  { %2248 = vmatmul.mubr.bf16.vlgmr.msra.gmra.mrb[8].mxu0 %v9837_v59 }
 0x1ad   :  { %2259 = vmatpush1.bf16.msra.mxu0 %v9225_v30  ;;  %2290 = vmatprep.mubr.bf16.mxu0 %v10950_v1  ;;  %v9959_v30 = vsub.s32 5, %v9863_v51  ;;  %v9287_v51 = vld [vmem:[#allocation3 + $0x6f4] ss:$72 sps:$4 sm:$0xff]  }
 0x1ae   :  { %2260 = vmatprep.subr.bf16.mxu0 %v9230_v31  ;;  %v9284_v31 = vld [vmem:[#allocation3 + $0x664] ss:$72 sps:$4 sm:$0xff]  }
 0x1b1   :  { %2261 = vmatpush1.bf16.msra.mxu0 %v9228_v33 }
 0x1b2   :  { %2262 = vmatprep.subr.bf16.mxu0 %v9233_v37  ;;  %v9965_v37 = vrot.slane %v9931_v3, %v9956_v34 }
 0x1b5   :  { %2263 = vmatpush1.bf16.msra.mxu0 %v9231_v38 }
 0x1b6   :  { %2264 = vmatprep.subr.bf16.mxu0 %v9236_v40  ;;  %v9282_v40 = vld [vmem:[#allocation3 + $0x660] ss:$72 sps:$4 sm:$0xff]  }
 0x1b9   :  { %2265 = vmatpush1.bf16.msra.mxu0 %v9234_v41  ;;  %v9971_v41 = vrot.slane %v9931_v3, %v9959_v30 }
 0x1ba   :  { %v2206_v10 = vpop.f32.mrb[4].mxu1  ;;  %2266 = vmatprep.subr.bf16.mxu0 %v9239_v42 }
 0x1bb   :  { %v8676_v11 = vadd.f32 %v2206_v10, %v1382_v5  ;;  %v9935_v12 = vpop.f32.mrb[5].mxu1  ;;  %v9263_v10 = vld [vmem:[#allocation3 + $0x274] ss:$72 sps:$4 sm:$0xff]  }
 0x1bc   :  { %v2210_v16 = vpop.f32.mrb[6].mxu1 }
 0x1bd   :  { %v9941_v18 = vadd.f32 %v2210_v16, %v1382_v5  ;;  %v2212_v19 = vpop.f32.mrb[7].mxu1  ;;  %8305 = vmatpush3.xpose.msra.mxu1 %v8676_v11  ;;  %2267 = vmatpush1.bf16.msra.mxu0 %v9237_v44  ;;  %v9255_v5 = vld [vmem:[#allocation3 + $0x150] ss:$72 sps:$4 sm:$0xff]   ;;  %v9264_v16 = vld [vmem:[#allocation3 + $0x300] ss:$72 sps:$4 sm:$0xff]  }
 0x1be   :  { %v9946_v21 = vadd.f32 %v2212_v19, %v9939_v14  ;;  %8309 = vmatprep.subr.mxu1 %v10948_v49  ;;  %2268 = vmatprep.subr.bf16.mxu0 %v9242_v46  ;;  %v9261_v11 = vld [vmem:[#allocation3 + $0x270] ss:$72 sps:$4 sm:$0xff]  }
 0x1bf   :  { %v9267_v19 = vld [vmem:[#allocation3 + $0x390] ss:$72 sps:$4 sm:$0xff]  }
 0x1c0   :  { %8307 = vmatmul.mubr.f32.vlgmr.msra.gmra.mrb[16].mxu1 %v8664_v20  ;;  %v9272_v20 = vld [vmem:[#allocation3 + $0x424] ss:$72 sps:$4 sm:$0xff]  }
 0x1c1   :  { %8311 = vmatprep.mubr.msk.f32.mxu1 %vm9751_vm0, %v10948_v49  ;;  %2269 = vmatpush1.bf16.msra.mxu0 %v9240_v47 }
 0x1c2   :  { %2270 = vmatprep.subr.bf16.mxu0 %v9245_v48  ;;  %v9285_v48 = vld [vmem:[#allocation3 + $0x6f0] ss:$72 sps:$4 sm:$0xff]  }
 0x1c5   :  { %2271 = vmatpush1.bf16.msra.mxu0 %v9243_v50  ;;  %v9290_v50 = vld [vmem:[#allocation3 + $0x784] ss:$72 sps:$4 sm:$0xff]  }
 0x1c6   :  { %2272 = vmatprep.subr.bf16.mxu0 %v9248_v52  ;;  %v9288_v52 = vld [vmem:[#allocation3 + $0x780] ss:$72 sps:$4 sm:$0xff]  }
 0x1c9   :  { %2273 = vmatpush1.bf16.msra.mxu0 %v9246_v53  ;;  %v9293_v53 = vld [vmem:[#allocation3 + $0x814] ss:$72 sps:$4 sm:$0xff]  }
 0x1ca   :  { %3295 = vmatprep.subr.bf16.mxu0 %v9251_v55  ;;  %v9291_v55 = vld [vmem:[#allocation3 + $0x810] ss:$72 sps:$4 sm:$0xff]  }
 0x1cc   :  { %2291 = vmatmul.mubr.bf16.vlgmr.msra.gmra.mrb[8].mxu0 %v9849_v32 }
 0x1cd   :  { %3296 = vmatpush1.bf16.msra.mxu0 %v9249_v56  ;;  %3327 = vmatprep.mubr.bf16.mxu0 %v9827_v15  ;;  %v9296_v56 = vld [vmem:[#allocation3 + $0x8a4] ss:$72 sps:$4 sm:$0xff]  }
 0x1ce   :  { %3297 = vmatprep.subr.bf16.mxu0 %v9254_v60  ;;  %v9294_v60 = vld [vmem:[#allocation3 + $0x8a0] ss:$72 sps:$4 sm:$0xff]  }
 0x1d1   :  { %3298 = vmatpush1.bf16.msra.mxu0 %v9252_v0  ;;  %v9299_v0 = vld [vmem:[#allocation3 + $0x934] ss:$72 sps:$4 sm:$0xff]  }
 0x1d2   :  { %3299 = vmatprep.subr.bf16.mxu0 %v9257_v4  ;;  %v9297_v4 = vld [vmem:[#allocation3 + $0x930] ss:$72 sps:$4 sm:$0xff]  }
 0x1d5   :  { %3300 = vmatpush1.bf16.msra.mxu0 %v9255_v5  ;;  %v9302_v5 = vld [vmem:[#allocation3 + $0x9c4] ss:$72 sps:$4 sm:$0xff]  }
 0x1d6   :  { %3301 = vmatprep.subr.bf16.mxu0 %v9260_v7  ;;  %v9300_v7 = vld [vmem:[#allocation3 + $0x9c0] ss:$72 sps:$4 sm:$0xff]  }
 0x1d9   :  { %3302 = vmatpush1.bf16.msra.mxu0 %v9258_v8  ;;  %v9305_v8 = vld [vmem:[#allocation3 + $0xa54] ss:$72 sps:$4 sm:$0xff]  }
 0x1da   :  { %3303 = vmatprep.subr.bf16.mxu0 %v9263_v10  ;;  %v9303_v10 = vld [vmem:[#allocation3 + $0xa50] ss:$72 sps:$4 sm:$0xff]  }
 0x1dd   :  { %3304 = vmatpush1.bf16.msra.mxu0 %v9261_v11  ;;  %v9308_v11 = vld [vmem:[#allocation3 + $0xae4] ss:$72 sps:$4 sm:$0xff]  }
 0x1de   :  { %3305 = vmatprep.subr.bf16.mxu0 %v9266_v13  ;;  %v9306_v13 = vld [vmem:[#allocation3 + $0xae0] ss:$72 sps:$4 sm:$0xff]  }
 0x1e1   :  { %3306 = vmatpush1.bf16.msra.mxu0 %v9264_v16  ;;  %v9311_v16 = vld [vmem:[#allocation3 + $0xb74] ss:$72 sps:$4 sm:$0xff]  }
 0x1e2   :  { %3307 = vmatprep.subr.bf16.mxu0 %v9269_v17  ;;  %v9309_v17 = vld [vmem:[#allocation3 + $0xb70] ss:$72 sps:$4 sm:$0xff]  }
 0x1e5   :  { %3308 = vmatpush1.bf16.msra.mxu0 %v9267_v19  ;;  %v9314_v19 = vld [vmem:[#allocation3 + $0xc04] ss:$72 sps:$4 sm:$0xff]  }
 0x1e6   :  { %3309 = vmatprep.subr.bf16.mxu0 %v9272_v20  ;;  %v9312_v20 = vld [vmem:[#allocation3 + $0xc00] ss:$72 sps:$4 sm:$0xff]  }
 0x1e9   :  { %3310 = vmatpush1.bf16.msra.mxu0 %v9270_v22  ;;  %v9317_v22 = vld [vmem:[#allocation3 + $0xc94] ss:$72 sps:$4 sm:$0xff]  }
 0x1ea   :  { %3311 = vmatprep.subr.bf16.mxu0 %v9275_v23  ;;  %v9315_v23 = vld [vmem:[#allocation3 + $0xc90] ss:$72 sps:$4 sm:$0xff]  }
 0x1ed   :  { %3312 = vmatpush1.bf16.msra.mxu0 %v9273_v24  ;;  %v9320_v24 = vld [vmem:[#allocation3 + $0xd24] ss:$72 sps:$4 sm:$0xff]  }
 0x1ee   :  { %3313 = vmatprep.subr.bf16.mxu0 %v9278_v26  ;;  %v9985_v26 = vrot.slane %v9868_v54, %v9956_v34 }
 0x1f1   :  { %3314 = vmatpush1.bf16.msra.mxu0 %v9276_v25  ;;  %v9318_v25 = vld [vmem:[#allocation3 + $0xd20] ss:$72 sps:$4 sm:$0xff]  }
 0x1f2   :  { %3315 = vmatprep.subr.bf16.mxu0 %v9281_v29  ;;  %v9991_v29 = vrot.slane %v9868_v54, %v9959_v30 }
 0x1f5   :  { %3316 = vmatpush1.bf16.msra.mxu0 %v9279_v35 }
 0x1f6   :  { %3317 = vmatprep.subr.bf16.mxu0 %v9284_v31 }
 0x1f9   :  { %3318 = vmatpush1.bf16.msra.mxu0 %v9282_v40 }
 0x1fa   :  { %3319 = vmatprep.subr.bf16.mxu0 %v9287_v51 }
 0x1fd   :  { %3320 = vmatpush1.bf16.msra.mxu0 %v9285_v48 }
 0x1fe   :  { %3321 = vmatprep.subr.bf16.mxu0 %v9290_v50 }
 0x201   :  { %3322 = vmatpush1.bf16.msra.mxu0 %v9288_v52 }
 0x202   :  { %3323 = vmatprep.subr.bf16.mxu0 %v9293_v53 }
 0x205   :  { %3324 = vmatpush1.bf16.msra.mxu0 %v9291_v55 }
 0x206   :  { %3325 = vmatprep.subr.bf16.mxu0 %v9296_v56 }
 0x209   :  { %3326 = vmatpush1.bf16.msra.mxu0 %v9294_v60 }
 0x20a   :  { %3338 = vmatprep.subr.bf16.mxu0 %v9299_v0  ;;  %v10027_v0 = vld [vmem:[%s10944_s5] ss:$0 sm:$0xff] }
 0x20c   :  { %3328 = vmatmul.mubr.bf16.vlgmr.msra.gmra.mrb[12].mxu0 %v9837_v59 }
 0x20d   :  { %3339 = vmatpush1.bf16.msra.mxu0 %v9297_v4  ;;  %3370 = vmatprep.mubr.bf16.mxu0 %v10950_v1  ;;  %v9336_v1 = vld [vmem:[#allocation3 + $0x310] ss:$72 sps:$4 sm:$0xff]  }
 0x20e   :  { %3340 = vmatprep.subr.bf16.mxu0 %v9302_v5 }
 0x211   :  { %3341 = vmatpush1.bf16.msra.mxu0 %v9300_v7 }
 0x212   :  { %3342 = vmatprep.subr.bf16.mxu0 %v9305_v8 }
 0x215   :  { %3343 = vmatpush1.bf16.msra.mxu0 %v9303_v10  ;;  %v10033_v10 = vrot.slane %v9931_v3, %v9871_v57 }
 0x216   :  { %3344 = vmatprep.subr.bf16.mxu0 %v9308_v11 }
 0x219   :  { %3345 = vmatpush1.bf16.msra.mxu0 %v9306_v13  ;;  %v10039_v13 = vrot.slane %v9931_v3, %v9874_v58 }
 0x21a   :  { %v9961_v33 = vpop.f32.mrb[8].mxu1  ;;  %3346 = vmatprep.subr.bf16.mxu0 %v9311_v16 }
 0x21b   :  { %v9967_v38 = vpop.f32.mrb[9].mxu1 }
 0x21c   :  { %v2382_v42 = vpop.f32.mrb[10].mxu1 }
 0x21d   :  { %v9974_v44 = vadd.f32 %v2382_v42, %v9965_v37  ;;  %v2384_v46 = vpop.f32.mrb[11].mxu1  ;;  %3347 = vmatpush1.bf16.msra.mxu0 %v9309_v17 }
 0x21e   :  { %v9977_v47 = vadd.f32 %v2384_v46, %v9971_v41  ;;  %3348 = vmatprep.subr.bf16.mxu0 %v9314_v19 }
 0x21f   :  { %11009 = vst [vmem:[#allocation13_spill] sm:$0xff] %v9974_v44  ;;  %v9451_v44 = vld [vmem:[#allocation5 + $0x90] ss:$12 sps:$4 sm:$0xff]  }
 0x220   :  { %11010 = vst [vmem:[#allocation14_spill] sm:$0xff] %v9977_v47  ;;  %v9442_v47 = vld [vmem:[#allocation5 + $0x48] ss:$12 sps:$4 sm:$0xff]  }
 0x221   :  { %3349 = vmatpush1.bf16.msra.mxu0 %v9312_v20 }
 0x222   :  { %3350 = vmatprep.subr.bf16.mxu0 %v9317_v22 }
 0x225   :  { %3351 = vmatpush1.bf16.msra.mxu0 %v9315_v23 }
 0x226   :  { %3352 = vmatprep.subr.bf16.mxu0 %v9320_v24 }
 0x229   :  { %3353 = vmatpush1.bf16.msra.mxu0 %v9318_v25 }
 0x22c   :  { %3371 = vmatmul.mubr.bf16.vlgmr.msra.gmra.mrb[12].mxu0 %v9849_v32 }
 0x22d   :  { %3499 = vmatprep.mubr.bf16.mxu0 %v9827_v15  ;;  %v10004_v15 = vld [vmem:[%s10941_s2 + $0xc] sm:$0x3f] }
 0x22e   :  { %v10010_v54 = vrot.slane %v10004_v15, %v9871_v57  ;;  %v10016_v52 = vrot.slane %v10004_v15, %v9874_v58  ;;  %v2548_v23 = vrot.slane %v10004_v15, %v9895_v27  ;;  %v10053_v58 = vrot.slane %v10004_v15, %v9898_v28  ;;  %v9406_v57 = vld [vmem:[#allocation5 + $0xdc] ss:$12 sps:$4 sm:$0xff]   ;;  %v9427_v28 = vld [vmem:[#allocation5 + $0xf8] ss:$12 sps:$4 sm:$0xff]  }
 0x22f   :  { %v9428_v27 = vld [vmem:[#allocation5 + $0x110] ss:$12 sps:$4 sm:$0xff]  }
 0x23f   :  { %v9987_v35 = vpop.f32.mrb[4].mxu0 }
 0x240   :  { %v9993_v31 = vpop.f32.mrb[5].mxu0 }
 0x241   :  { %v1216_v40 = vpop.f32.mrb[6].mxu0 }
 0x242   :  { %v9996_v42 = vadd.f32 %v1216_v40, %v9985_v26  ;;  %v1218_v51 = vpop.f32.mrb[7].mxu0 }
 0x243   :  { %v9999_v46 = vadd.f32 %v1218_v51, %v9991_v29 }
 0x244   :  { %11011 = vst [vmem:[#allocation15_spill] sm:$0xff] %v9996_v42  ;;  %v9447_v42 = vld [vmem:[#allocation5 + $0x64] ss:$12 sps:$4 sm:$0xff]  }
 0x245   :  { %11012 = vst [vmem:[#allocation16_spill] sm:$0xff] %v9999_v46  ;;  %v9429_v46 = vld [vmem:[#allocation5 + $0x128] ss:$12 sps:$4 sm:$0xff]  }
 0x27a   :  { %v10006_v48 = vpop.f32.mrb[12].mxu1 }
 0x27b   :  { %v10012_v50 = vpop.f32.mrb[13].mxu1 }
 0x27c   :  { %v3462_v53 = vpop.f32.mrb[14].mxu1 }
 0x27d   :  { %v10019_v55 = vadd.f32 %v3462_v53, %v10010_v54  ;;  %v3464_v56 = vpop.f32.mrb[15].mxu1 }
 0x27e   :  { %v10022_v60 = vadd.f32 %v3464_v56, %v10016_v52 }
 0x280   :  { %11013 = vst [vmem:[#allocation17_spill] sm:$0xff] %v10022_v60 }
 0x293   :  { %v3639_v4 = vpop.f32.mrb[16].mxu1 }
 0x294   :  { %v3640_v5 = vadd.f32 %v10027_v0, %v3639_v4  ;;  %v8308_v7 = vpop.f32.mrb[17].mxu1 }
 0x296   :  { %v3644_v8 = vsel %vm3643_vm1, %v3640_v5, -inf }
 0x297   :  { %3645 = vmax.xlane.f32.xlu0 %v3644_v8 }
 0x29f   :  { %v10035_v11 = vpop.f32.mrb[8].mxu0 }
 0x2a0   :  { %v10041_v16 = vpop.f32.mrb[9].mxu0 }
 0x2a1   :  { %v2296_v17 = vpop.f32.mrb[10].mxu0 }
 0x2a2   :  { %v10044_v19 = vadd.f32 %v2296_v17, %v10033_v10  ;;  %v2298_v20 = vpop.f32.mrb[11].mxu0 }
 0x2a3   :  { %v10047_v22 = vadd.f32 %v2298_v20, %v10039_v13  ;;  %v9321_v20 = vld [vmem:[#allocation3 + $0x40] ss:$72 sps:$4 sm:$0xff]  }
 0x2ff   :  { %v3372_v40 = vpop.f32.mrb[12].mxu0 }
 0x300   :  { %v8688_v3 = vadd.f32 %v3372_v40, %v2548_v23  ;;  %v10055_v51 = vpop.f32.mrb[13].mxu0  ;;  %v9329_v40 = vld [vmem:[#allocation3 + $0x164] ss:$72 sps:$4 sm:$0xff]  }
 0x301   :  { %v3376_v56 = vpop.f32.mrb[14].mxu0 }
 0x302   :  { %v10057_v4 = vadd.f32 %v3376_v56, %v2548_v23  ;;  %v3378_v7 = vpop.f32.mrb[15].mxu0  ;;  %8310 = vmatpush3.msra.mxu1 %v8688_v3  ;;  %v9324_v23 = vld [vmem:[#allocation3 + $0xd0] ss:$72 sps:$4 sm:$0xff]   ;;  %v9327_v3 = vld [vmem:[#allocation3 + $0x160] ss:$72 sps:$4 sm:$0xff]  }
 0x303   :  { %v10060_v8 = vadd.f32 %v3378_v7, %v10053_v58  ;;  %8314 = vmatprep.subr.mxu1 %v10948_v49  ;;  %v9330_v56 = vld [vmem:[#allocation3 + $0x1f0] ss:$72 sps:$4 sm:$0xff]   ;;  %v9335_v7 = vld [vmem:[#allocation3 + $0x284] ss:$72 sps:$4 sm:$0xff]   ;;  %v9333_v49 = vld [vmem:[#allocation3 + $0x280] ss:$72 sps:$4 sm:$0xff]  }
 0x324   :  { %v3646_v24 = vpop.xlane.xlu0 %3645 }
 0x325   :  { %v3647_v25 = vsub.f32 %v3640_v5, %v3646_v24  ;;  %v9323_v24 = vld [vmem:[#allocation3 + $0x44] ss:$72 sps:$4 sm:$0xff]  }
 0x326   :  { %3467 = vmatprep.subr.bf16.mxu0 %v9323_v24  ;;  %v9341_v24 = vld [vmem:[#allocation3 + $0x3a4] ss:$72 sps:$4 sm:$0xff]  }
 0x327   :  { %v3648_v53 = vmul.f32 1.442695, %v3647_v25  ;;  %v9326_v25 = vld [vmem:[#allocation3 + $0xd4] ss:$72 sps:$4 sm:$0xff]   ;;  %3468 = vmatpush1.bf16.msra.mxu0 %v9321_v20  ;;  %v9339_v20 = vld [vmem:[#allocation3 + $0x3a0] ss:$72 sps:$4 sm:$0xff]  }
 0x328   :  { %3469 = vmatprep.subr.bf16.mxu0 %v9326_v25  ;;  %v9344_v25 = vld [vmem:[#allocation3 + $0x434] ss:$72 sps:$4 sm:$0xff]  }
 0x329   :  { %9585 = vpow2.f32 %v3648_v53  ;;  %v9332_v53 = vld [vmem:[#allocation3 + $0x1f4] ss:$72 sps:$4 sm:$0xff]  }
 0x32b   :  { %3470 = vmatpush1.bf16.msra.mxu0 %v9324_v23  ;;  %v9342_v23 = vld [vmem:[#allocation3 + $0x430] ss:$72 sps:$4 sm:$0xff]  }
 0x32c   :  { %3471 = vmatprep.subr.bf16.mxu0 %v9329_v40  ;;  %v9347_v40 = vld [vmem:[#allocation3 + $0x4c4] ss:$72 sps:$4 sm:$0xff]  }
 0x32f   :  { %3472 = vmatpush1.bf16.msra.mxu0 %v9327_v3  ;;  %v9345_v3 = vld [vmem:[#allocation3 + $0x4c0] ss:$72 sps:$4 sm:$0xff]  }
 0x330   :  { %3473 = vmatprep.subr.bf16.mxu0 %v9332_v53  ;;  %v9350_v53 = vld [vmem:[#allocation3 + $0x554] ss:$72 sps:$4 sm:$0xff]  }
 0x333   :  { %v10063_v5 = vpop.eup %9585  ;;  %3474 = vmatpush1.bf16.msra.mxu0 %v9330_v56  ;;  %v9348_v56 = vld [vmem:[#allocation3 + $0x550] ss:$72 sps:$4 sm:$0xff]  }
 0x334   :  { %v3650_v17 = vsel %vm3643_vm1, %v10063_v5, 0.0  ;;  %3475 = vmatprep.subr.bf16.mxu0 %v9335_v7  ;;  %v9353_v7 = vld [vmem:[#allocation3 + $0x5e4] ss:$72 sps:$4 sm:$0xff]  }
 0x335   :  { %3651 = vadd.xlane.f32.xlu0 %v3650_v17  ;;  %v9338_v17 = vld [vmem:[#allocation3 + $0x314] ss:$72 sps:$4 sm:$0xff]  }
 0x337   :  { %3476 = vmatpush1.bf16.msra.mxu0 %v9333_v49  ;;  %v9351_v49 = vld [vmem:[#allocation3 + $0x5e0] ss:$72 sps:$4 sm:$0xff]  }
 0x338   :  { %3477 = vmatprep.subr.bf16.mxu0 %v9338_v17  ;;  %v9356_v17 = vld [vmem:[#allocation3 + $0x674] ss:$72 sps:$4 sm:$0xff]  }
 0x33b   :  { %3478 = vmatpush1.bf16.msra.mxu0 %v9336_v1  ;;  %v9354_v1 = vld [vmem:[#allocation3 + $0x670] ss:$72 sps:$4 sm:$0xff]  }
 0x33c   :  { %3479 = vmatprep.subr.bf16.mxu0 %v9341_v24  ;;  %v9359_v24 = vld [vmem:[#allocation3 + $0x704] ss:$72 sps:$4 sm:$0xff]  }
 0x33f   :  { %3480 = vmatpush1.bf16.msra.mxu0 %v9339_v20  ;;  %v9357_v20 = vld [vmem:[#allocation3 + $0x700] ss:$72 sps:$4 sm:$0xff]  }
 0x340   :  { %3481 = vmatprep.subr.bf16.mxu0 %v9344_v25  ;;  %v9362_v25 = vld [vmem:[#allocation3 + $0x794] ss:$72 sps:$4 sm:$0xff]  }
 0x343   :  { %3482 = vmatpush1.bf16.msra.mxu0 %v9342_v23  ;;  %v9360_v23 = vld [vmem:[#allocation3 + $0x790] ss:$72 sps:$4 sm:$0xff]  }
 0x344   :  { %3483 = vmatprep.subr.bf16.mxu0 %v9347_v40  ;;  %v9365_v40 = vld [vmem:[#allocation3 + $0x824] ss:$72 sps:$4 sm:$0xff]  }
 0x347   :  { %3484 = vmatpush1.bf16.msra.mxu0 %v9345_v3  ;;  %v9363_v3 = vld [vmem:[#allocation3 + $0x820] ss:$72 sps:$4 sm:$0xff]  }
 0x348   :  { %3485 = vmatprep.subr.bf16.mxu0 %v9350_v53  ;;  %v9368_v53 = vld [vmem:[#allocation3 + $0x8b4] ss:$72 sps:$4 sm:$0xff]  }
 0x34b   :  { %3486 = vmatpush1.bf16.msra.mxu0 %v9348_v56  ;;  %v9366_v56 = vld [vmem:[#allocation3 + $0x8b0] ss:$72 sps:$4 sm:$0xff]  }
 0x34c   :  { %3487 = vmatprep.subr.bf16.mxu0 %v9353_v7  ;;  %v9371_v7 = vld [vmem:[#allocation3 + $0x944] ss:$72 sps:$4 sm:$0xff]  }
 0x34f   :  { %3488 = vmatpush1.bf16.msra.mxu0 %v9351_v49  ;;  %v9369_v49 = vld [vmem:[#allocation3 + $0x940] ss:$72 sps:$4 sm:$0xff]  }
 0x350   :  { %3489 = vmatprep.subr.bf16.mxu0 %v9356_v17  ;;  %v9374_v17 = vld [vmem:[#allocation3 + $0x9d4] ss:$72 sps:$4 sm:$0xff]  }
 0x353   :  { %3490 = vmatpush1.bf16.msra.mxu0 %v9354_v1  ;;  %v9372_v1 = vld [vmem:[#allocation3 + $0x9d0] ss:$72 sps:$4 sm:$0xff]  }
 0x354   :  { %3491 = vmatprep.subr.bf16.mxu0 %v9359_v24  ;;  %v11014_v24 = vmov 0  }
 0x357   :  { %3492 = vmatpush1.bf16.msra.mxu0 %v9357_v20  ;;  %v9377_v20 = vld [vmem:[#allocation3 + $0xa64] ss:$72 sps:$4 sm:$0xff]  }
 0x358   :  { %3493 = vmatprep.subr.bf16.mxu0 %v9362_v25  ;;  %v9375_v25 = vld [vmem:[#allocation3 + $0xa60] ss:$72 sps:$4 sm:$0xff]  }
 0x35b   :  { %3494 = vmatpush1.bf16.msra.mxu0 %v9360_v23  ;;  %v9380_v23 = vld [vmem:[#allocation3 + $0xaf4] ss:$72 sps:$4 sm:$0xff]  }
 0x35c   :  { %3495 = vmatprep.subr.bf16.mxu0 %v9365_v40  ;;  %v9378_v40 = vld [vmem:[#allocation3 + $0xaf0] ss:$72 sps:$4 sm:$0xff]  }
 0x35f   :  { %3496 = vmatpush1.bf16.msra.mxu0 %v9363_v3  ;;  %v9383_v3 = vld [vmem:[#allocation3 + $0xb84] ss:$72 sps:$4 sm:$0xff]  }
 0x360   :  { %3497 = vmatprep.subr.bf16.mxu0 %v9368_v53  ;;  %v9381_v53 = vld [vmem:[#allocation3 + $0xb80] ss:$72 sps:$4 sm:$0xff]  }
 0x363   :  { %3498 = vmatpush1.bf16.msra.mxu0 %v9366_v56  ;;  %v9386_v56 = vld [vmem:[#allocation3 + $0xc14] ss:$72 sps:$4 sm:$0xff]  }
 0x364   :  { %3510 = vmatprep.subr.bf16.mxu0 %v9371_v7  ;;  %v9389_v7 = vld [vmem:[#allocation3 + $0xca4] ss:$72 sps:$4 sm:$0xff]  }
 0x366   :  { %3500 = vmatmul.mubr.bf16.vlgmr.msra.gmra.mrb[16].mxu0 %v9837_v59  ;;  %v9384_v59 = vld [vmem:[#allocation3 + $0xc10] ss:$72 sps:$4 sm:$0xff]  }
 0x367   :  { %3511 = vmatpush1.bf16.msra.mxu0 %v9369_v49  ;;  %3542 = vmatprep.mubr.bf16.mxu0 %v11014_v24  ;;  %v9387_v49 = vld [vmem:[#allocation3 + $0xca0] ss:$72 sps:$4 sm:$0xff]  }
 0x368   :  { %3512 = vmatprep.subr.bf16.mxu0 %v9374_v17  ;;  %v9392_v17 = vld [vmem:[#allocation3 + $0xd34] ss:$72 sps:$4 sm:$0xff]  }
 0x36b   :  { %3513 = vmatpush1.bf16.msra.mxu0 %v9372_v1  ;;  %v9390_v1 = vld [vmem:[#allocation3 + $0xd30] ss:$72 sps:$4 sm:$0xff]  }
 0x36c   :  { %3514 = vmatprep.subr.bf16.mxu0 %v9377_v20  ;;  %v9393_v20 = vld [vmem:[#allocation5 + $0x8] ss:$12 sps:$4 sm:$0xff]  }
 0x36f   :  { %3515 = vmatpush1.bf16.msra.mxu0 %v9375_v25  ;;  %v11015_v25 = vmov 0.0  }
 0x370   :  { %3516 = vmatprep.subr.bf16.mxu0 %v9380_v23  ;;  %v9394_v23 = vld [vmem:[#allocation5 + $0x20] ss:$12 sps:$4 sm:$0xff]  }
 0x373   :  { %3517 = vmatpush1.bf16.msra.mxu0 %v9378_v40  ;;  %v9395_v40 = vld [vmem:[#allocation5 + $0x38] ss:$12 sps:$4 sm:$0xff]  }
 0x374   :  { %3518 = vmatprep.subr.bf16.mxu0 %v9383_v3  ;;  %v9396_v3 = vld [vmem:[#allocation5 + $0x50] ss:$12 sps:$4 sm:$0xff]  }
 0x377   :  { %3519 = vmatpush1.bf16.msra.mxu0 %v9381_v53 }
 0x378   :  { %3520 = vmatprep.subr.bf16.mxu0 %v9386_v56  ;;  %v9397_v56 = vld [vmem:[#allocation5 + $0x68] ss:$12 sps:$4 sm:$0xff]  }
 0x37b   :  { %3521 = vmatpush1.bf16.msra.mxu0 %v9384_v59  ;;  %v9399_v59 = vld [vmem:[#allocation5 + $0x98] ss:$12 sps:$4 sm:$0xff]  }
 0x37c   :  { %3522 = vmatprep.subr.bf16.mxu0 %v9389_v7 }
 0x37f   :  { %3523 = vmatpush1.bf16.msra.mxu0 %v9387_v49 }
 0x380   :  { %3524 = vmatprep.subr.bf16.mxu0 %v9392_v17  ;;  %v8677_v17 = vadd.f32 %v9935_v12, %v9939_v14  ;;  %v9400_v12 = vld [vmem:[#allocation5 + $0xb0] ss:$12 sps:$4 sm:$0xff]  }
 0x383   :  { %3525 = vmatpush1.bf16.msra.mxu0 %v9390_v1  ;;  %v8665_v1 = vadd.f32 %v9912_v39, %v9909_v36 }
 0x384   :  { %8344 = vmatprep.subr.bf16.mxu0 %v11015_v25 }
 0x386   :  { %3543 = vmatmul.mubr.bf16.vlgmr.msra.gmra.mrb[16].mxu0 %v9849_v32  ;;  %v9398_v32 = vld [vmem:[#allocation5 + $0x80] ss:$12 sps:$4 sm:$0xff]  }
 0x387   :  { %8345 = vmatpush3.bf16.msra.mxu0 %v9393_v20  ;;  %8360 = vmatprep.mubr.msk.bf16.mxu0 %vm9751_vm0, %v11015_v25 }
 0x388   :  { %8346 = vmatprep.subr.bf16.mxu0 %v11015_v25 }
 0x38b   :  { %8347 = vmatpush3.bf16.msra.mxu0 %v9394_v23 }
 0x38c   :  { %8348 = vmatprep.subr.bf16.mxu0 %v11015_v25 }
 0x38f   :  { %8349 = vmatpush3.bf16.msra.mxu0 %v9395_v40 }
 0x390   :  { %8350 = vmatprep.subr.bf16.mxu0 %v11015_v25 }
 0x393   :  { %8351 = vmatpush3.bf16.msra.mxu0 %v9396_v3 }
 0x394   :  { %8352 = vmatprep.subr.bf16.mxu0 %v11015_v25 }
 0x397   :  { %8353 = vmatpush3.bf16.msra.mxu0 %v9397_v56 }
 0x398   :  { %8354 = vmatprep.subr.bf16.mxu0 %v11015_v25 }
 0x39b   :  { %8355 = vmatpush3.bf16.msra.mxu0 %v9398_v32 }
 0x39c   :  { %8356 = vmatprep.subr.bf16.mxu0 %v11015_v25 }
 0x39f   :  { %8357 = vmatpush3.bf16.msra.mxu0 %v9399_v59 }
 0x3a0   :  { %8358 = vmatprep.subr.bf16.mxu0 %v11015_v25 }
 0x3a3   :  { %8359 = vmatpush3.bf16.msra.mxu0 %v9400_v12 }
 0x3c2   :  { %v3652_v53 = vpop.xlane.xlu0 %3651 }
 0x3c3   :  { %9587 = vrcp.f32 %v3652_v53  ;;  %v10107_v53 = vrot.slane %v10004_v15, %v9959_v30  ;;  %v9403_v30 = vld [vmem:[#allocation5 + $0xc4] ss:$12 sps:$4 sm:$0xff]  }
 0x3cd   :  { %v9588_v7 = vpop.eup %9587 }
 0x3ce   :  { %v3654_v49 = vmul.f32 %v9588_v7, %v10063_v5  ;;  %v8689_v5 = vadd.f32 %v10055_v51, %v10053_v58  ;;  %v10101_v51 = vrot.slane %v10004_v15, %v9956_v34 }
 0x3d0   :  { %8312 = vmatmul.mubr.msk.f32.vlgmr.msra.gmra.mrb[18].mxu1 %vm3643_vm1, %v3654_v49 }
 0x3d1   :  { %8315 = vmatpush3.xpose.msra.mxu1 %v8677_v17  ;;  %8316 = vmatprep.mubr.msk.f32.mxu1 %vm9751_vm0, %v11015_v25 }
 0x3d2   :  { %8319 = vmatprep.subr.mxu1 %v11015_v25 }
 0x3d4   :  { %8317 = vmatmul.mubr.f32.vlgmr.msra.gmra.mrb[20].mxu1 %v8665_v1 }
 0x3d5   :  { %8320 = vmatpush3.msra.mxu1 %v8689_v5  ;;  %8321 = vmatprep.mubr.msk.f32.mxu1 %vm9751_vm0, %v11015_v25 }
 0x3d6   :  { %4079 = vmatprep.subr.bf16.mxu1 %v9403_v30  ;;  %v10130_v30 = vld [vmem:[#allocation5 + $0x120] ss:$12 sps:$4 sm:$0xff]  }
 0x459   :  { %v10103_v3 = vpop.f32.mrb[16].mxu0 }
 0x45a   :  { %v10109_v56 = vpop.f32.mrb[17].mxu0 }
 0x45b   :  { %v3548_v32 = vpop.f32.mrb[18].mxu0 }
 0x45c   :  { %v10112_v59 = vadd.f32 %v3548_v32, %v10101_v51  ;;  %v3550_v7 = vpop.f32.mrb[19].mxu0  ;;  %v9401_v32 = vld [vmem:[#allocation5 + $0xc0] ss:$12 sps:$4 sm:$0xff]  }
 0x45d   :  { %v10115_v49 = vadd.f32 %v3550_v7, %v10107_v53 }
 0x45e   :  { %11016 = vst [vmem:[#allocation18_spill] sm:$0xff] %v10112_v59  ;;  %v9450_v59 = vld [vmem:[#allocation5 + $0x7c] ss:$12 sps:$4 sm:$0xff]  }
 0x45f   :  { %11017 = vst [vmem:[#allocation19_spill] sm:$0xff] %v10115_v49  ;;  %v9439_v49 = vld [vmem:[#allocation5 + $0x30] ss:$12 sps:$4 sm:$0xff]  }
 0x4a3   :  { %v3724_v14 = vpop.f32.mrb[18].mxu1 }
 0x4a4   :  { %v10093_v20 = vpack.c.bf16 %v3724_v14, %v3724_v14  ;;  %v8313_v23 = vpop.f32.mrb[19].mxu1 }
 0x4a6   :  { %8361 = vmatmul.mubr.bf16.vlgmr.msra.gmra.mrb[20].mxu0 %v10093_v20 }
 0x4a7   :  { %v3830_v36 = vpop.f32.mrb[20].mxu1  ;;  %4719 = vmatprep.mubr.bf16.mxu0 %v11014_v24 }
 0x4a8   :  { %v3831_v39 = vadd.f32 %v10027_v0, %v3830_v36  ;;  %v8318_v40 = vpop.f32.mrb[21].mxu1 }
 0x4aa   :  { %v3834_v58 = vsel %vm3643_vm1, %v3831_v39, -inf }
 0x4ab   :  { %3835 = vmax.xlane.f32.xlu1 %v3834_v58 }
 0x538   :  { %v3836_v17 = vpop.xlane.xlu1 %3835 }
 0x539   :  { %v3837_v1 = vsub.f32 %v3831_v39, %v3836_v17  ;;  %v9404_v39 = vld [vmem:[#allocation5 + $0xd8] ss:$12 sps:$4 sm:$0xff]   ;;  %v9409_v17 = vld [vmem:[#allocation5 + $0xf4] ss:$12 sps:$4 sm:$0xff]  }
 0x53b   :  { %v3838_v34 = vmul.f32 1.442695, %v3837_v1  ;;  %v9407_v1 = vld [vmem:[#allocation5 + $0xf0] ss:$12 sps:$4 sm:$0xff]  }
 0x53d   :  { %9589 = vpow2.f32 %v3838_v34  ;;  %v10122_v34 = vld [vmem:[#allocation5 + $0x10c] ss:$12 sps:$4 sm:$0xff]  }
 0x547   :  { %v9590_v5 = vpop.eup %9589 }
 0x548   :  { %v3840_v12 = vsel %vm3643_vm1, %v9590_v5, 0.0 }
 0x549   :  { %3841 = vadd.xlane.f32.xlu1 %v3840_v12  ;;  %v10124_v12 = vld [vmem:[#allocation5 + $0x108] ss:$12 sps:$4 sm:$0xff]  }
 0x579   :  { %v10118_v15 = vpop.f32.mrb[20].mxu0 }
 0x57a   :  { %v8362_v14 = vpop.f32.mrb[21].mxu0 }
 0x57b   :  { %v4366_v23 = vpop.f32.mrb[22].mxu0  ;;  %v10136_v14 = vld [vmem:[#allocation5 + $0x138] ss:$12 sps:$4 sm:$0xff]  }
 0x57c   :  { %v8363_v36 = vpop.f32.mrb[23].mxu0  ;;  %v10139_v23 = vld [vmem:[#allocation5 + $0x154] ss:$12 sps:$4 sm:$0xff]  }
 0x57d   :  { %v10142_v36 = vld [vmem:[#allocation5 + $0x150] ss:$12 sps:$4 sm:$0xff]  }
 0x5d6   :  { %v3842_v40 = vpop.xlane.xlu1 %3841 }
 0x5d7   :  { %9591 = vrcp.f32 %v3842_v40  ;;  %v10145_v40 = vld [vmem:[#allocation5 + $0x16c] ss:$12 sps:$4 sm:$0xff]  }
 0x5e1   :  { %v9592_v58 = vpop.eup %9591 }
 0x5e2   :  { %v3844_v7 = vmul.f32 %v9592_v58, %v9590_v5  ;;  %v10127_v5 = vld [vmem:[#allocation5 + $0x124] ss:$12 sps:$4 sm:$0xff]   ;;  %v10148_v58 = vld [vmem:[#allocation5 + $0x168] ss:$12 sps:$4 sm:$0xff]  }
 0x5e4   :  { %8322 = vmatmul.mubr.msk.f32.vlgmr.msra.gmra.mrb[22].mxu1 %vm3643_vm1, %v3844_v7  ;;  %v9425_v7 = vld [vmem:[#allocation5 + $0xc8] ss:$12 sps:$4 sm:$0xff]  }
 0x5e5   :  { %4080 = vmatpush1.bf16.msra.mxu1 %v9401_v32  ;;  %4111 = vmatprep.mubr.bf16.mxu1 %v11014_v24 }
 0x5e6   :  { %4081 = vmatprep.subr.bf16.mxu1 %v9406_v57  ;;  %v10133_v57 = vld [vmem:[#allocation5 + $0x13c] ss:$12 sps:$4 sm:$0xff]  }
 0x5e9   :  { %4082 = vmatpush1.bf16.msra.mxu1 %v9404_v39 }
 0x5ea   :  { %4083 = vmatprep.subr.bf16.mxu1 %v9409_v17 }
 0x5ed   :  { %4084 = vmatpush1.bf16.msra.mxu1 %v9407_v1  ;;  %v9426_v1 = vld [vmem:[#allocation5 + $0xe0] ss:$12 sps:$4 sm:$0xff]  }
 0x5ee   :  { %4085 = vmatprep.subr.bf16.mxu1 %v10122_v34 }
 0x5f1   :  { %4086 = vmatpush1.bf16.msra.mxu1 %v10124_v12 }
 0x5f2   :  { %4087 = vmatprep.subr.bf16.mxu1 %v10127_v5 }
 0x5f5   :  { %4088 = vmatpush1.bf16.msra.mxu1 %v10130_v30 }
 0x5f6   :  { %4089 = vmatprep.subr.bf16.mxu1 %v10133_v57 }
 0x5f9   :  { %4090 = vmatpush1.bf16.msra.mxu1 %v10136_v14 }
 0x5fa   :  { %4091 = vmatprep.subr.bf16.mxu1 %v10139_v23 }
 0x5fd   :  { %4092 = vmatpush1.bf16.msra.mxu1 %v10142_v36 }
 0x5fe   :  { %4093 = vmatprep.subr.bf16.mxu1 %v10145_v40 }
 0x601   :  { %4094 = vmatpush1.bf16.msra.mxu1 %v10148_v58 }
 0x602   :  { %8324 = vmatprep.subr.bf16.mxu1 %v11015_v25 }
 0x6b7   :  { %v3914_v32 = vpop.f32.mrb[22].mxu1 }
 0x6b8   :  { %v3918_v39 = vpack.c.bf16 %v3914_v32, %v3914_v32  ;;  %v8323_v17 = vpop.f32.mrb[23].mxu1  ;;  %v9430_v32 = vld [vmem:[#allocation5 + $0x140] ss:$12 sps:$4 sm:$0xff]  }
 0x6b9   :  { %v9432_v17 = vld [vmem:[#allocation5 + $0x170] ss:$12 sps:$4 sm:$0xff]  }
 0x6ba   :  { %4112 = vmatmul.mubr.bf16.vlgmr.msra.gmra.mrb[24].mxu1 %v3918_v39 }
 0x6bb   :  { %8325 = vmatpush3.bf16.msra.mxu1 %v9425_v7  ;;  %8340 = vmatprep.mubr.msk.bf16.mxu1 %vm9751_vm0, %v11015_v25  ;;  %v9431_v7 = vld [vmem:[#allocation5 + $0x158] ss:$12 sps:$4 sm:$0xff]  }
 0x6bc   :  { %8326 = vmatprep.subr.bf16.mxu1 %v11015_v25 }
 0x6bf   :  { %8327 = vmatpush3.bf16.msra.mxu1 %v9426_v1  ;;  %v9433_v1 = vld [vmem:[#allocation5] ss:$12 sps:$4 sm:$0xff]  }
 0x6c0   :  { %8328 = vmatprep.subr.bf16.mxu1 %v11015_v25 }
 0x6c3   :  { %8329 = vmatpush3.bf16.msra.mxu1 %v9427_v28  ;;  %v10162_v28 = vld [vmem:[#allocation5 + $0x4] ss:$12 sps:$4 sm:$0xff]  }
 0x6c4   :  { %8330 = vmatprep.subr.bf16.mxu1 %v11015_v25 }
 0x6c7   :  { %8331 = vmatpush3.bf16.msra.mxu1 %v9428_v27  ;;  %v9438_v27 = vld [vmem:[#allocation5 + $0x1c] ss:$12 sps:$4 sm:$0xff]  }
 0x6c8   :  { %8332 = vmatprep.subr.bf16.mxu1 %v11015_v25 }
 0x6cb   :  { %8333 = vmatpush3.bf16.msra.mxu1 %v9429_v46  ;;  %v9436_v46 = vld [vmem:[#allocation5 + $0x18] ss:$12 sps:$4 sm:$0xff]  }
 0x6cc   :  { %8334 = vmatprep.subr.bf16.mxu1 %v11015_v25 }
 0x6cf   :  { %8335 = vmatpush3.bf16.msra.mxu1 %v9430_v32  ;;  %v9441_v32 = vld [vmem:[#allocation5 + $0x34] ss:$12 sps:$4 sm:$0xff]  }
 0x6d0   :  { %8336 = vmatprep.subr.bf16.mxu1 %v11015_v25 }
 0x6d3   :  { %8337 = vmatpush3.bf16.msra.mxu1 %v9431_v7  ;;  %v9444_v7 = vld [vmem:[#allocation5 + $0x4c] ss:$12 sps:$4 sm:$0xff]  }
 0x6d4   :  { %8338 = vmatprep.subr.bf16.mxu1 %v11015_v25 }
 0x6d7   :  { %8339 = vmatpush3.bf16.msra.mxu1 %v9432_v17  ;;  %v9445_v17 = vld [vmem:[#allocation5 + $0x60] ss:$12 sps:$4 sm:$0xff]  }
 0x6d8   :  { %4288 = vmatprep.subr.bf16.mxu1 %v10162_v28 }
 0x6da   :  { %8341 = vmatmul.mubr.bf16.vlgmr.msra.gmra.mrb[28].mxu1 %v3918_v39  ;;  %v9448_v39 = vld [vmem:[#allocation5 + $0x78] ss:$12 sps:$4 sm:$0xff]  }
 0x6db   :  { %4289 = vmatpush1.bf16.msra.mxu1 %v9433_v1  ;;  %4320 = vmatprep.mubr.bf16.mxu1 %v11014_v24  ;;  %v9453_v1 = vld [vmem:[#allocation5 + $0x94] ss:$12 sps:$4 sm:$0xff]  }
 0x6dc   :  { %4290 = vmatprep.subr.bf16.mxu1 %v9438_v27  ;;  %v9456_v27 = vld [vmem:[#allocation5 + $0xac] ss:$12 sps:$4 sm:$0xff]  }
 0x6df   :  { %4291 = vmatpush1.bf16.msra.mxu1 %v9436_v46  ;;  %v9454_v46 = vld [vmem:[#allocation5 + $0xa8] ss:$12 sps:$4 sm:$0xff]  }
 0x6e0   :  { %4292 = vmatprep.subr.bf16.mxu1 %v9441_v32 }
 0x6e3   :  { %4293 = vmatpush1.bf16.msra.mxu1 %v9439_v49 }
 0x6e4   :  { %4294 = vmatprep.subr.bf16.mxu1 %v9444_v7 }
 0x6e7   :  { %4295 = vmatpush1.bf16.msra.mxu1 %v9442_v47  ;;  %v8680_v47 = vadd.f32 %v10035_v11, %v10033_v10 }
 0x6e8   :  { %4296 = vmatprep.subr.bf16.mxu1 %v9447_v42  ;;  %v8668_v42 = vadd.f32 %v9876_v61, %v9880_v62 }
 0x6eb   :  { %4297 = vmatpush1.bf16.msra.mxu1 %v9445_v17 }
 0x6ec   :  { %4298 = vmatprep.subr.bf16.mxu1 %v9450_v59 }
 0x6ef   :  { %4299 = vmatpush1.bf16.msra.mxu1 %v9448_v39 }
 0x6f0   :  { %4300 = vmatprep.subr.bf16.mxu1 %v9453_v1 }
 0x6f3   :  { %4301 = vmatpush1.bf16.msra.mxu1 %v9451_v44  ;;  %v8692_v44 = vadd.f32 %v10006_v48, %v10010_v54 }
 0x6f4   :  { %4302 = vmatprep.subr.bf16.mxu1 %v9456_v27 }
 0x6f7   :  { %4303 = vmatpush1.bf16.msra.mxu1 %v9454_v46 }
 0x6f8   :  { %8364 = vmatprep.subr.mxu1 %v11015_v25 }
 0x6fa   :  { %4321 = vmatmul.mubr.bf16.vlgmr.msra.gmra.mrb[32].mxu1 %v10093_v20 }
 0x6fb   :  { %8366 = vmatprep.mubr.msk.f32.mxu1 %vm9751_vm0, %v11015_v25 }
 0x700   :  { %8365 = vmatpush3.xpose.msra.mxu1 %v8680_v47 }
 0x701   :  { %8369 = vmatprep.subr.mxu1 %v11015_v25 }
 0x703   :  { %8367 = vmatmul.mubr.f32.vlgmr.msra.gmra.mrb[36].mxu1 %v8668_v42 }
 0x704   :  { %8370 = vmatpush3.msra.mxu1 %v8692_v44  ;;  %8371 = vmatprep.mubr.msk.f32.mxu1 %vm9751_vm0, %v11015_v25 }
 0x705   :  { %8374 = vmatprep.subr.bf16.mxu1 %v11015_v25 }
 0x78d   :  { %v4113_v20 = vpop.f32.mrb[24].mxu1 }
 0x78e   :  { %v4115_v59 = vpop.f32.mrb[25].mxu1 }
 0x78f   :  { %v4117_v49 = vpop.f32.mrb[26].mxu1 }
 0x790   :  { %v4118_v10 = vpop.f32.mrb[27].mxu1 }
 0x7ad   :  { %v4154_v11 = vpop.f32.mrb[28].mxu1 }
 0x7ae   :  { %v10181_v32 = vadd.f32 %v10118_v15, %v4154_v11  ;;  %v8342_v61 = vpop.f32.mrb[29].mxu1 }
 0x7af   :  { %v4157_v62 = vpop.f32.mrb[30].mxu1  ;;  %v9457_v61 = vld [vmem:[#allocation5 + $0x180] ss:$12 sps:$4 sm:$0xff]  }
 0x7b0   :  { %v8343_v7 = vpop.f32.mrb[31].mxu1  ;;  %v9462_v62 = vld [vmem:[#allocation5 + $0x19c] ss:$12 sps:$4 sm:$0xff]  }
 0x7b1   :  { %v9460_v7 = vld [vmem:[#allocation5 + $0x198] ss:$12 sps:$4 sm:$0xff]  }
 0x7cd   :  { %v4322_v17 = vpop.f32.mrb[32].mxu1 }
 0x7ce   :  { %v10183_v48 = vadd.f32 %v4322_v17, %v4113_v20  ;;  %v4324_v54 = vpop.f32.mrb[33].mxu1  ;;  %v9466_v17 = vld [vmem:[#allocation5 + $0x1b4] ss:$12 sps:$4 sm:$0xff]  }
 0x7cf   :  { %v10185_v39 = vadd.f32 %v4324_v54, %v4115_v59  ;;  %v4326_v1 = vpop.f32.mrb[34].mxu1  ;;  %v9459_v59 = vld [vmem:[#allocation5 + $0x184] ss:$12 sps:$4 sm:$0xff]  }
 0x7d0   :  { %v4327_v27 = vpop.f32.mrb[35].mxu1  ;;  %4687 = vmatprep.subr.bf16.mxu0 %v9459_v59  ;;  %v9464_v54 = vld [vmem:[#allocation5 + $0x1b0] ss:$12 sps:$4 sm:$0xff]   ;;  %v10190_v1 = vld [vmem:[#allocation5 + $0x1cc] ss:$12 sps:$4 sm:$0xff]  }
 0x7d1   :  { %4688 = vmatpush1.bf16.msra.mxu0 %v9457_v61  ;;  %v10192_v27 = vld [vmem:[#allocation5 + $0x1c8] ss:$12 sps:$4 sm:$0xff]  }
 0x7d2   :  { %4689 = vmatprep.subr.bf16.mxu0 %v9462_v62  ;;  %v9463_v62 = vld [vmem:[#allocation5 + $0x188] ss:$12 sps:$4 sm:$0xff]  }
 0x7d5   :  { %4690 = vmatpush1.bf16.msra.mxu0 %v9460_v7 }
 0x7d6   :  { %v4438_v46 = vpop.f32.mrb[36].mxu1  ;;  %4691 = vmatprep.subr.bf16.mxu0 %v9466_v17  ;;  %v9467_v17 = vld [vmem:[#allocation5 + $0x1a0] ss:$12 sps:$4 sm:$0xff]  }
 0x7d7   :  { %v4439_v47 = vadd.f32 %v10027_v0, %v4438_v46  ;;  %v8368_v42 = vpop.f32.mrb[37].mxu1  ;;  %v10195_v46 = vld [vmem:[#allocation5 + $0x1e4] ss:$12 sps:$4 sm:$0xff]  }
 0x7d8   :  { %v10201_v42 = vld [vmem:[#allocation5 + $0x1fc] ss:$12 sps:$4 sm:$0xff]  }
 0x7d9   :  { %v4442_v44 = vsel %vm3643_vm1, %v4439_v47, -inf  ;;  %4692 = vmatpush1.bf16.msra.mxu0 %v9464_v54  ;;  %v9471_v54 = vld [vmem:[#allocation5 + $0x1b8] ss:$12 sps:$4 sm:$0xff]  }
 0x7da   :  { %4443 = vmax.xlane.f32.xlu0 %v4442_v44  ;;  %4693 = vmatprep.subr.bf16.mxu0 %v10190_v1  ;;  %v10204_v44 = vld [vmem:[#allocation5 + $0x1f8] ss:$12 sps:$4 sm:$0xff]  }
 0x7dd   :  { %4694 = vmatpush1.bf16.msra.mxu0 %v10192_v27 }
 0x7de   :  { %4695 = vmatprep.subr.bf16.mxu0 %v10195_v46 }
 0x867   :  { %v4444_v15 = vpop.xlane.xlu0 %4443 }
 0x868   :  { %v4445_v49 = vsub.f32 %v4439_v47, %v4444_v15  ;;  %v10198_v47 = vld [vmem:[#allocation5 + $0x1e0] ss:$12 sps:$4 sm:$0xff]  }
 0x869   :  { %4696 = vmatpush1.bf16.msra.mxu0 %v10198_v47  ;;  %v10207_v15 = vld [vmem:[#allocation5 + $0x214] ss:$12 sps:$4 sm:$0xff]  }
 0x86a   :  { %v4446_v10 = vmul.f32 1.442695, %v4445_v49  ;;  %4697 = vmatprep.subr.bf16.mxu0 %v10201_v42  ;;  %v10210_v49 = vld [vmem:[#allocation5 + $0x210] ss:$12 sps:$4 sm:$0xff]  }
 0x86c   :  { %9593 = vpow2.f32 %v4446_v10  ;;  %v10213_v10 = vld [vmem:[#allocation5 + $0x22c] ss:$12 sps:$4 sm:$0xff]  }
 0x86d   :  { %4698 = vmatpush1.bf16.msra.mxu0 %v10204_v44 }
 0x86e   :  { %4699 = vmatprep.subr.bf16.mxu0 %v10207_v15 }
 0x871   :  { %4700 = vmatpush1.bf16.msra.mxu0 %v10210_v49 }
 0x872   :  { %4701 = vmatprep.subr.bf16.mxu0 %v10213_v10 }
 0x876   :  { %v9594_v11 = vpop.eup %9593 }
 0x877   :  { %v4448_v20 = vsel %vm3643_vm1, %v9594_v11, 0.0 }
 0x878   :  { %4449 = vadd.xlane.f32.xlu1 %v4448_v20  ;;  %v10216_v20 = vld [vmem:[#allocation5 + $0x228] ss:$12 sps:$4 sm:$0xff]  }
 0x879   :  { %4702 = vmatpush1.bf16.msra.mxu0 %v10216_v20 }
 0x87a   :  { %8394 = vmatprep.subr.mxu0 %v11015_v25 }
 0x905   :  { %v4450_v61 = vpop.xlane.xlu1 %4449 }
 0x906   :  { %9595 = vrcp.f32 %v4450_v61  ;;  %v9479_v61 = vld [vmem:[#allocation5 + $0x1e8] ss:$12 sps:$4 sm:$0xff]  }
 0x910   :  { %v9596_v59 = vpop.eup %9595 }
 0x911   :  { %v4452_v7 = vmul.f32 %v9596_v59, %v9594_v11  ;;  %v9483_v11 = vld [vmem:[#allocation5 + $0x200] ss:$12 sps:$4 sm:$0xff]   ;;  %v9487_v59 = vld [vmem:[#allocation5 + $0x218] ss:$12 sps:$4 sm:$0xff]  }
 0x913   :  { %8372 = vmatmul.mubr.msk.f32.vlgmr.msra.gmra.mrb[38].mxu1 %vm3643_vm1, %v4452_v7 }
 0x914   :  { %8375 = vmatpush3.bf16.msra.mxu1 %v9463_v62  ;;  %8390 = vmatprep.mubr.msk.bf16.mxu1 %vm9751_vm0, %v11015_v25  ;;  %v9488_v62 = vld [vmem:[#allocation5 + $0x230] ss:$12 sps:$4 sm:$0xff]  }
 0x915   :  { %8376 = vmatprep.subr.bf16.mxu1 %v11015_v25 }
 0x918   :  { %8377 = vmatpush3.bf16.msra.mxu1 %v9467_v17 }
 0x919   :  { %8378 = vmatprep.subr.bf16.mxu1 %v11015_v25 }
 0x91c   :  { %8379 = vmatpush3.bf16.msra.mxu1 %v9471_v54  ;;  %v8693_v54 = vadd.f32 %v10012_v50, %v10016_v52 }
 0x91d   :  { %8380 = vmatprep.subr.bf16.mxu1 %v11015_v25 }
 0x920   :  { %8381 = vmatpush3.bf16.msra.mxu1 %v9475_v9 }
 0x921   :  { %8382 = vmatprep.subr.bf16.mxu1 %v11015_v25 }
 0x924   :  { %8383 = vmatpush3.bf16.msra.mxu1 %v9479_v61  ;;  %v8681_v61 = vadd.f32 %v10041_v16, %v10039_v13 }
 0x925   :  { %8384 = vmatprep.subr.bf16.mxu1 %v11015_v25 }
 0x928   :  { %8385 = vmatpush3.bf16.msra.mxu1 %v9483_v11  ;;  %v8669_v11 = vadd.f32 %v9882_v63, %v9886_v2 }
 0x929   :  { %8386 = vmatprep.subr.bf16.mxu1 %v11015_v25 }
 0x92c   :  { %8387 = vmatpush3.bf16.msra.mxu1 %v9487_v59 }
 0x92d   :  { %8388 = vmatprep.subr.bf16.mxu1 %v11015_v25 }
 0x930   :  { %8389 = vmatpush3.bf16.msra.mxu1 %v9488_v62 }
 0x931   :  { %8399 = vmatprep.subr.mxu1 %v11015_v25 }
 0x9e6   :  { %v4522_v7 = vpop.f32.mrb[38].mxu1 }
 0x9e7   :  { %v4526_v9 = vpack.c.bf16 %v4522_v7, %v4522_v7  ;;  %v8373_v17 = vpop.f32.mrb[39].mxu1 }
 0x9e9   :  { %4720 = vmatmul.mubr.bf16.vlgmr.msra.gmra.mrb[24].mxu0 %v4526_v9  ;;  %8391 = vmatmul.mubr.bf16.vlgmr.msra.gmra.mrb[40].mxu1 %v4526_v9 }
 0x9ea   :  { %8395 = vmatpush3.xpose.msra.mxu0 %v8681_v61  ;;  %8400 = vmatpush3.msra.mxu1 %v8693_v54 }
 0x9eb   :  { %8396 = vmatprep.mubr.msk.f32.mxu0 %vm9751_vm0, %v11015_v25  ;;  %8401 = vmatprep.mubr.msk.f32.mxu1 %vm9751_vm0, %v11015_v25 }
 0x9ec   :  { %8404 = vmatprep.subr.bf16.mxu1 %v11015_v25 }
 0x9f1   :  { %8397 = vmatmul.mubr.f32.vlgmr.msra.gmra.mrb[28].mxu0 %v8669_v11 }
 0x9f2   :  { %5121 = vmatprep.mubr.bf16.mxu0 %v11014_v24 }
 0xabc   :  { %v4721_v50 = vpop.f32.mrb[24].mxu0  ;;  %v4762_v52 = vpop.f32.mrb[40].mxu1 }
 0xabd   :  { %v10245_v13 = vadd.f32 %v4721_v50, %v10183_v48  ;;  %v10248_v16 = vadd.f32 %v4762_v52, %v10181_v32  ;;  %v4723_v59 = vpop.f32.mrb[25].mxu0  ;;  %v8392_v62 = vpop.f32.mrb[41].mxu1 }
 0xabe   :  { %v10251_v7 = vadd.f32 %v4723_v59, %v10185_v39  ;;  %v4725_v9 = vpop.f32.mrb[26].mxu0  ;;  %v4765_v17 = vpop.f32.mrb[42].mxu1  ;;  %v10256_v39 = vld [vmem:[#allocation5 + $0x240] ss:$12 sps:$4 sm:$0xff]   ;;  %v10258_v59 = vld [vmem:[#allocation5 + $0x244] ss:$12 sps:$4 sm:$0xff]  }
 0xabf   :  { %v4726_v54 = vpop.f32.mrb[27].mxu0  ;;  %v8393_v63 = vpop.f32.mrb[43].mxu1  ;;  %v10260_v9 = vld [vmem:[#allocation5 + $0x25c] ss:$12 sps:$4 sm:$0xff]   ;;  %5089 = vmatprep.subr.bf16.mxu0 %v10258_v59 }
 0xac0   :  { %5090 = vmatpush1.bf16.msra.mxu0 %v10256_v39  ;;  %v10270_v17 = vld [vmem:[#allocation5 + $0x270] ss:$12 sps:$4 sm:$0xff]   ;;  %v10273_v54 = vld [vmem:[#allocation5 + $0x28c] ss:$12 sps:$4 sm:$0xff]   ;;  %v10276_v63 = vld [vmem:[#allocation5 + $0x288] ss:$12 sps:$4 sm:$0xff]  }
 0xac1   :  { %5091 = vmatprep.subr.bf16.mxu0 %v10260_v9  ;;  %11018 = vst [vmem:[#allocation20_spill] sm:$0xff] %v10276_v63 }
 0xac4   :  { %v4840_v2 = vpop.f32.mrb[28].mxu0 }
 0xac5   :  { %v4841_v61 = vadd.f32 %v10027_v0, %v4840_v2  ;;  %v8398_v11 = vpop.f32.mrb[29].mxu0  ;;  %v10264_v0 = vld [vmem:[#allocation5 + $0x258] ss:$12 sps:$4 sm:$0xff]  }
 0xac6   :  { %5092 = vmatpush1.bf16.msra.mxu0 %v10264_v0  ;;  %v10279_v2 = vld [vmem:[#allocation5 + $0x2a4] ss:$12 sps:$4 sm:$0xff]   ;;  %v10285_v11 = vld [vmem:[#allocation5 + $0x2bc] ss:$12 sps:$4 sm:$0xff]  }
 0xac7   :  { %v4844_v60 = vsel %vm3643_vm1, %v4841_v61, -inf  ;;  %11019 = vst [vmem:[#allocation21_spill] sm:$0xff] %v10279_v2  ;;  %11021 = vst [vmem:[#allocation23_spill] sm:$0xff] %v10285_v11 }
 0xac8   :  { %4845 = vmax.xlane.f32.xlu0 %v4844_v60  ;;  %v10267_v60 = vld [vmem:[#allocation5 + $0x274] ss:$12 sps:$4 sm:$0xff]  }
 0xac9   :  { %5093 = vmatprep.subr.bf16.mxu0 %v10267_v60 }
 0xaca   :  { %5094 = vmatpush1.bf16.msra.mxu0 %v10270_v17 }
 0xacb   :  { %5095 = vmatprep.subr.bf16.mxu0 %v10273_v54 }
 0xace   :  { %5096 = vmatpush1.bf16.msra.mxu0 %v10276_v63 }
 0xacf   :  { %5097 = vmatprep.subr.bf16.mxu0 %v10279_v2  ;;  %v10300_v2 = vld [vmem:[#allocation5 + $0x2e8] ss:$12 sps:$4 sm:$0xff]  }
 0xad0   :  { %11024 = vst [vmem:[#allocation26_spill] sm:$0xff] %v10300_v2 }
 0xb55   :  { %v4846_v48 = vpop.xlane.xlu0 %4845 }
 0xb56   :  { %v4847_v50 = vsub.f32 %v4841_v61, %v4846_v48  ;;  %v10282_v61 = vld [vmem:[#allocation5 + $0x2a0] ss:$12 sps:$4 sm:$0xff]   ;;  %v10288_v48 = vld [vmem:[#allocation5 + $0x2b8] ss:$12 sps:$4 sm:$0xff]  }
 0xb57   :  { %11020 = vst [vmem:[#allocation22_spill] sm:$0xff] %v10282_v61  ;;  %5098 = vmatpush1.bf16.msra.mxu0 %v10282_v61  ;;  %11022 = vst [vmem:[#allocation24_spill] sm:$0xff] %v10288_v48 }
 0xb58   :  { %v4848_v32 = vmul.f32 1.442695, %v4847_v50  ;;  %5099 = vmatprep.subr.bf16.mxu0 %v10285_v11  ;;  %v10291_v50 = vld [vmem:[#allocation5 + $0x2d4] ss:$12 sps:$4 sm:$0xff]  }
 0xb59   :  { %11023 = vst [vmem:[#allocation25_spill] sm:$0xff] %v10291_v50 }
 0xb5a   :  { %9597 = vpow2.f32 %v4848_v32  ;;  %v10294_v32 = vld [vmem:[#allocation5 + $0x2d0] ss:$12 sps:$4 sm:$0xff]  }
 0xb5b   :  { %5100 = vmatpush1.bf16.msra.mxu0 %v10288_v48  ;;  %v10305_v48 = vld [vmem:[#allocation5 + $0x248] ss:$12 sps:$4 sm:$0xff]  }
 0xb5c   :  { %5101 = vmatprep.subr.bf16.mxu0 %v10291_v50  ;;  %11025 = vst [vmem:[#allocation27_spill] sm:$0xff] %v10305_v48  ;;  %v10309_v50 = vld [vmem:[#allocation5 + $0x260] ss:$12 sps:$4 sm:$0xff]  }
 0xb5d   :  { %11026 = vst [vmem:[#allocation28_spill] sm:$0xff] %v10309_v50 }
 0xb5f   :  { %5102 = vmatpush1.bf16.msra.mxu0 %v10294_v32 }
 0xb64   :  { %v9598_v52 = vpop.eup %9597 }
 0xb65   :  { %v4850_v62 = vsel %vm3643_vm1, %v9598_v52, 0.0 }
 0xb66   :  { %4851 = vadd.xlane.f32.xlu1 %v4850_v62  ;;  %v10297_v62 = vld [vmem:[#allocation5 + $0x2ec] ss:$12 sps:$4 sm:$0xff]  }
 0xb67   :  { %5103 = vmatprep.subr.bf16.mxu0 %v10297_v62 }
 0xb68   :  { %5104 = vmatpush1.bf16.msra.mxu0 %v10300_v2  ;;  %v10315_v2 = vld [vmem:[#allocation5 + $0x278] ss:$12 sps:$4 sm:$0xff]  }
 0xb69   :  { %8424 = vmatprep.subr.mxu0 %v11015_v25  ;;  %11027 = vst [vmem:[#allocation29_spill] sm:$0xff] %v10315_v2 }
 0xbf3   :  { %v4852_v11 = vpop.xlane.xlu1 %4851 }
 0xbf4   :  { %9599 = vrcp.f32 %v4852_v11  ;;  %v10331_v11 = vld [vmem:[#allocation5 + $0x2d8] ss:$12 sps:$4 sm:$0xff]  }
 0xbf5   :  { %11031 = vst [vmem:[#allocation33_spill] sm:$0xff] %v10331_v11 }
 0xbfe   :  { %v9600_v61 = vpop.eup %9599 }
 0xbff   :  { %v4854_v63 = vmul.f32 %v9600_v61, %v9598_v52  ;;  %v10319_v52 = vld [vmem:[#allocation5 + $0x290] ss:$12 sps:$4 sm:$0xff]   ;;  %v10327_v61 = vld [vmem:[#allocation5 + $0x2c0] ss:$12 sps:$4 sm:$0xff]  }
 0xc00   :  { %11028 = vst [vmem:[#allocation30_spill] sm:$0xff] %v10319_v52  ;;  %11030 = vst [vmem:[#allocation32_spill] sm:$0xff] %v10327_v61 }
 0xc01   :  { %8402 = vmatmul.mubr.msk.f32.vlgmr.msra.gmra.mrb[44].mxu1 %vm3643_vm1, %v4854_v63  ;;  %v10323_v63 = vld [vmem:[#allocation5 + $0x2a8] ss:$12 sps:$4 sm:$0xff]  }
 0xc02   :  { %8405 = vmatpush3.bf16.msra.mxu1 %v10305_v48  ;;  %8420 = vmatprep.mubr.msk.bf16.mxu1 %vm9751_vm0, %v11015_v25  ;;  %11029 = vst [vmem:[#allocation31_spill] sm:$0xff] %v10323_v63  ;;  %v8696_v48 = vadd.f32 %v10103_v3, %v10101_v51 }
 0xc03   :  { %8406 = vmatprep.subr.bf16.mxu1 %v11015_v25 }
 0xc06   :  { %8407 = vmatpush3.bf16.msra.mxu1 %v10309_v50 }
 0xc07   :  { %8408 = vmatprep.subr.bf16.mxu1 %v11015_v25 }
 0xc0a   :  { %8409 = vmatpush3.bf16.msra.mxu1 %v10315_v2  ;;  %v10335_v2 = vld [vmem:[#allocation5 + $0x2f0] ss:$12 sps:$4 sm:$0xff]  }
 0xc0b   :  { %8410 = vmatprep.subr.bf16.mxu1 %v11015_v25  ;;  %11032 = vst [vmem:[#allocation34_spill] sm:$0xff] %v10335_v2 }
 0xc0e   :  { %8411 = vmatpush3.bf16.msra.mxu1 %v10319_v52 }
 0xc0f   :  { %8412 = vmatprep.subr.bf16.mxu1 %v11015_v25 }
 0xc12   :  { %8413 = vmatpush3.bf16.msra.mxu1 %v10323_v63 }
 0xc13   :  { %8414 = vmatprep.subr.bf16.mxu1 %v11015_v25 }
 0xc16   :  { %8415 = vmatpush3.bf16.msra.mxu1 %v10327_v61  ;;  %v8684_v61 = vadd.f32 %v9961_v33, %v9965_v37 }
 0xc17   :  { %8416 = vmatprep.subr.bf16.mxu1 %v11015_v25 }
 0xc1a   :  { %8417 = vmatpush3.bf16.msra.mxu1 %v10331_v11 }
 0xc1b   :  { %8418 = vmatprep.subr.bf16.mxu1 %v11015_v25 }
 0xc1e   :  { %8419 = vmatpush3.bf16.msra.mxu1 %v10335_v2 }
 0xc1f   :  { %8429 = vmatprep.subr.mxu1 %v11015_v25 }
 0xcd4   :  { %v4924_v63 = vpop.f32.mrb[44].mxu1 }
 0xcd5   :  { %v4928_v52 = vpack.c.bf16 %v4924_v63, %v4924_v63  ;;  %v8403_v50 = vpop.f32.mrb[45].mxu1 }
 0xcd6   :  { %v8672_v50 = vadd.f32 %v9987_v35, %v9985_v26 }
 0xcd7   :  { %5122 = vmatmul.mubr.bf16.vlgmr.msra.gmra.mrb[32].mxu0 %v4928_v52  ;;  %8421 = vmatmul.mubr.bf16.vlgmr.msra.gmra.mrb[48].mxu1 %v4928_v52 }
 0xcd8   :  { %8425 = vmatpush3.xpose.msra.mxu0 %v8684_v61  ;;  %8430 = vmatpush3.msra.mxu1 %v8696_v48 }
 0xcd9   :  { %8426 = vmatprep.mubr.msk.f32.mxu0 %vm9751_vm0, %v11015_v25  ;;  %8431 = vmatprep.mubr.msk.f32.mxu1 %vm9751_vm0, %v11015_v25 }
 0xcda   :  { %8434 = vmatprep.subr.bf16.mxu1 %v11015_v25 }
 0xcdf   :  { %8427 = vmatmul.mubr.f32.vlgmr.msra.gmra.mrb[30].mxu0 %v8672_v50  ;;  %v10364_v50 = vld [vmem:[%s10944_s5] ss:$0 sm:$0xff] }
 0xce0   :  { %5523 = vmatprep.mubr.bf16.mxu0 %v11014_v24 }
 0xdaa   :  { %v5123_v33 = vpop.f32.mrb[32].mxu0  ;;  %v5164_v37 = vpop.f32.mrb[48].mxu1 }
 0xdab   :  { %v10353_v51 = vadd.f32 %v5123_v33, %v10245_v13  ;;  %v10356_v3 = vadd.f32 %v5164_v37, %v10248_v16  ;;  %v5125_v48 = vpop.f32.mrb[33].mxu0  ;;  %v8422_v52 = vpop.f32.mrb[49].mxu1 }
 0xdac   :  { %v10359_v63 = vadd.f32 %v5125_v48, %v10251_v7  ;;  %v5127_v61 = vpop.f32.mrb[34].mxu0  ;;  %v5167_v2 = vpop.f32.mrb[50].mxu1 }
 0xdad   :  { %v5128_v11 = vpop.f32.mrb[35].mxu0  ;;  %v8423_v26 = vpop.f32.mrb[51].mxu1  ;;  %v10371_v61 = vld [vmem:[#allocation5 + $0x304] ss:$12 sps:$4 sm:$0xff]  }
 0xdae   :  { %v10369_v11 = vld [vmem:[#allocation5 + $0x300] ss:$12 sps:$4 sm:$0xff]   ;;  %v10373_v26 = vld [vmem:[#allocation5 + $0x31c] ss:$12 sps:$4 sm:$0xff]   ;;  %5491 = vmatprep.subr.bf16.mxu0 %v10371_v61 }
 0xdaf   :  { %5492 = vmatpush1.bf16.msra.mxu0 %v10369_v11 }
 0xdb0   :  { %5493 = vmatprep.subr.bf16.mxu0 %v10373_v26 }
 0xdb2   :  { %v5242_v35 = vpop.f32.mrb[30].mxu0 }
 0xdb3   :  { %v5243_v13 = vadd.f32 %v10364_v50, %v5242_v35  ;;  %v8428_v33 = vpop.f32.mrb[31].mxu0  ;;  %v10377_v35 = vld [vmem:[#allocation5 + $0x318] ss:$12 sps:$4 sm:$0xff]  }
 0xdb4   :  { %11033 = vst [vmem:[#allocation35_spill] sm:$0xff] %v10377_v35  ;;  %5494 = vmatpush1.bf16.msra.mxu0 %v10377_v35  ;;  %v10383_v33 = vld [vmem:[#allocation5 + $0x330] ss:$12 sps:$4 sm:$0xff]  }
 0xdb5   :  { %v5246_v16 = vsel %vm3643_vm1, %v5243_v13, -inf  ;;  %11035 = vst [vmem:[#allocation37_spill] sm:$0xff] %v10383_v33 }
 0xdb6   :  { %5247 = vmax.xlane.f32.xlu0 %v5246_v16  ;;  %v10386_v16 = vld [vmem:[#allocation5 + $0x34c] ss:$12 sps:$4 sm:$0xff]  }
 0xdb7   :  { %11036 = vst [vmem:[#allocation38_spill] sm:$0xff] %v10386_v16 }
 0xe43   :  { %v5248_v37 = vpop.xlane.xlu0 %5247 }
 0xe44   :  { %v5249_v52 = vsub.f32 %v5243_v13, %v5248_v37  ;;  %v10380_v13 = vld [vmem:[#allocation5 + $0x334] ss:$12 sps:$4 sm:$0xff]  }
 0xe45   :  { %11034 = vst [vmem:[#allocation36_spill] sm:$0xff] %v10380_v13  ;;  %5495 = vmatprep.subr.bf16.mxu0 %v10380_v13  ;;  %v10389_v37 = vld [vmem:[#allocation5 + $0x348] ss:$12 sps:$4 sm:$0xff]   ;;  %v10401_v13 = vld [vmem:[#allocation5 + $0x378] ss:$12 sps:$4 sm:$0xff]  }
 0xe46   :  { %v5250_v7 = vmul.f32 1.442695, %v5249_v52  ;;  %5496 = vmatpush1.bf16.msra.mxu0 %v10383_v33  ;;  %11037 = vst [vmem:[#allocation39_spill] sm:$0xff] %v10389_v37  ;;  %v10392_v52 = vld [vmem:[#allocation5 + $0x364] ss:$12 sps:$4 sm:$0xff]   ;;  %11041 = vst [vmem:[#allocation43_spill] sm:$0xff] %v10401_v13 }
 0xe47   :  { %5497 = vmatprep.subr.bf16.mxu0 %v10386_v16  ;;  %11038 = vst [vmem:[#allocation40_spill] sm:$0xff] %v10392_v52  ;;  %v10404_v33 = vld [vmem:[#allocation5 + $0x394] ss:$12 sps:$4 sm:$0xff]   ;;  %v10407_v16 = vld [vmem:[#allocation5 + $0x390] ss:$12 sps:$4 sm:$0xff]  }
 0xe48   :  { %9601 = vpow2.f32 %v5250_v7  ;;  %v10395_v7 = vld [vmem:[#allocation5 + $0x360] ss:$12 sps:$4 sm:$0xff]   ;;  %11042 = vst [vmem:[#allocation44_spill] sm:$0xff] %v10404_v33  ;;  %11043 = vst [vmem:[#allocation45_spill] sm:$0xff] %v10407_v16 }
 0xe49   :  { %11039 = vst [vmem:[#allocation41_spill] sm:$0xff] %v10395_v7 }
 0xe4a   :  { %5498 = vmatpush1.bf16.msra.mxu0 %v10389_v37  ;;  %v10410_v37 = vld [vmem:[#allocation5 + $0x3ac] ss:$12 sps:$4 sm:$0xff]  }
 0xe4b   :  { %5499 = vmatprep.subr.bf16.mxu0 %v10392_v52  ;;  %11044 = vst [vmem:[#allocation46_spill] sm:$0xff] %v10410_v37  ;;  %v10413_v52 = vld [vmem:[#allocation5 + $0x3a8] ss:$12 sps:$4 sm:$0xff]  }
 0xe4c   :  { %11045 = vst [vmem:[#allocation47_spill] sm:$0xff] %v10413_v52 }
 0xe4e   :  { %5500 = vmatpush1.bf16.msra.mxu0 %v10395_v7 }
 0xe52   :  { %v9602_v48 = vpop.eup %9601 }
 0xe53   :  { %v5252_v2 = vsel %vm3643_vm1, %v9602_v48, 0.0 }
 0xe54   :  { %5253 = vadd.xlane.f32.xlu1 %v5252_v2  ;;  %v10398_v2 = vld [vmem:[#allocation5 + $0x37c] ss:$12 sps:$4 sm:$0xff]  }
 0xe55   :  { %11040 = vst [vmem:[#allocation42_spill] sm:$0xff] %v10398_v2  ;;  %5501 = vmatprep.subr.bf16.mxu0 %v10398_v2 }
 0xe56   :  { %5502 = vmatpush1.bf16.msra.mxu0 %v10401_v13  ;;  %v10418_v13 = vld [vmem:[#allocation5 + $0x308] ss:$12 sps:$4 sm:$0xff]  }
 0xe57   :  { %5503 = vmatprep.subr.bf16.mxu0 %v10404_v33  ;;  %11046 = vst [vmem:[#allocation48_spill] sm:$0xff] %v10418_v13  ;;  %v10422_v33 = vld [vmem:[#allocation5 + $0x320] ss:$12 sps:$4 sm:$0xff]  }
 0xe58   :  { %11047 = vst [vmem:[#allocation49_spill] sm:$0xff] %v10422_v33 }
 0xe5a   :  { %5504 = vmatpush1.bf16.msra.mxu0 %v10407_v16 }
 0xe5b   :  { %5505 = vmatprep.subr.bf16.mxu0 %v10410_v37 }
 0xe5e   :  { %5506 = vmatpush1.bf16.msra.mxu0 %v10413_v52  ;;  %v10428_v52 = vld [vmem:[#allocation5 + $0x338] ss:$12 sps:$4 sm:$0xff]  }
 0xe5f   :  { %8454 = vmatprep.subr.mxu0 %v11015_v25  ;;  %11048 = vst [vmem:[#allocation50_spill] sm:$0xff] %v10428_v52 }
 0xee1   :  { %v5254_v2 = vpop.xlane.xlu1 %5253 }
 0xee2   :  { %9603 = vrcp.f32 %v5254_v2  ;;  %v10444_v2 = vld [vmem:[#allocation5 + $0x398] ss:$12 sps:$4 sm:$0xff]  }
 0xee3   :  { %11052 = vst [vmem:[#allocation54_spill] sm:$0xff] %v10444_v2 }
 0xeec   :  { %v9604_v7 = vpop.eup %9603 }
 0xeed   :  { %v5256_v35 = vmul.f32 %v9604_v7, %v9602_v48  ;;  %v10432_v48 = vld [vmem:[#allocation5 + $0x350] ss:$12 sps:$4 sm:$0xff]   ;;  %v10440_v7 = vld [vmem:[#allocation5 + $0x380] ss:$12 sps:$4 sm:$0xff]  }
 0xeee   :  { %11049 = vst [vmem:[#allocation51_spill] sm:$0xff] %v10432_v48  ;;  %11051 = vst [vmem:[#allocation53_spill] sm:$0xff] %v10440_v7 }
 0xeef   :  { %8432 = vmatmul.mubr.msk.f32.vlgmr.msra.gmra.mrb[46].mxu1 %vm3643_vm1, %v5256_v35  ;;  %v10436_v35 = vld [vmem:[#allocation5 + $0x368] ss:$12 sps:$4 sm:$0xff]  }
 0xef0   :  { %8435 = vmatpush3.bf16.msra.mxu1 %v10418_v13  ;;  %8450 = vmatprep.mubr.msk.bf16.mxu1 %vm9751_vm0, %v11015_v25  ;;  %11050 = vst [vmem:[#allocation52_spill] sm:$0xff] %v10436_v35  ;;  %v8697_v13 = vadd.f32 %v10109_v56, %v10107_v53 }
 0xef1   :  { %8436 = vmatprep.subr.bf16.mxu1 %v11015_v25 }
 0xef4   :  { %8437 = vmatpush3.bf16.msra.mxu1 %v10422_v33 }
 0xef5   :  { %8438 = vmatprep.subr.bf16.mxu1 %v11015_v25 }
 0xef8   :  { %8439 = vmatpush3.bf16.msra.mxu1 %v10428_v52  ;;  %v10448_v52 = vld [vmem:[#allocation5 + $0x3b0] ss:$12 sps:$4 sm:$0xff]  }
 0xef9   :  { %8440 = vmatprep.subr.bf16.mxu1 %v11015_v25  ;;  %11053 = vst [vmem:[#allocation55_spill] sm:$0xff] %v10448_v52 }
 0xefc   :  { %8441 = vmatpush3.bf16.msra.mxu1 %v10432_v48 }
 0xefd   :  { %8442 = vmatprep.subr.bf16.mxu1 %v11015_v25 }
 0xf00   :  { %8443 = vmatpush3.bf16.msra.mxu1 %v10436_v35 }
 0xf01   :  { %8444 = vmatprep.subr.bf16.mxu1 %v11015_v25 }
 0xf04   :  { %8445 = vmatpush3.bf16.msra.mxu1 %v10440_v7  ;;  %v8685_v7 = vadd.f32 %v9967_v38, %v9971_v41 }
 0xf05   :  { %8446 = vmatprep.subr.bf16.mxu1 %v11015_v25 }
 0xf08   :  { %8447 = vmatpush3.bf16.msra.mxu1 %v10444_v2 }
 0xf09   :  { %8448 = vmatprep.subr.bf16.mxu1 %v11015_v25 }
 0xf0c   :  { %8449 = vmatpush3.bf16.msra.mxu1 %v10448_v52 }
 0xf0d   :  { %8459 = vmatprep.subr.mxu1 %v11015_v25 }
 0xfc2   :  { %v5326_v35 = vpop.f32.mrb[46].mxu1 }
 0xfc3   :  { %v5330_v48 = vpack.c.bf16 %v5326_v35, %v5326_v35  ;;  %v8433_v33 = vpop.f32.mrb[47].mxu1 }
 0xfc4   :  { %v8673_v33 = vadd.f32 %v9993_v31, %v9991_v29 }
 0xfc5   :  { %5524 = vmatmul.mubr.bf16.vlgmr.msra.gmra.mrb[36].mxu0 %v5330_v48  ;;  %8451 = vmatmul.mubr.bf16.vlgmr.msra.gmra.mrb[52].mxu1 %v5330_v48 }
 0xfc6   :  { %8455 = vmatpush3.xpose.msra.mxu0 %v8685_v7  ;;  %8460 = vmatpush3.msra.mxu1 %v8697_v13 }
 0xfc7   :  { %8456 = vmatprep.mubr.msk.f32.mxu0 %vm9751_vm0, %v11015_v25  ;;  %8461 = vmatprep.mubr.msk.f32.mxu1 %vm9751_vm0, %v11015_v25 }
 0xfc8   :  { %8464 = vmatprep.subr.bf16.mxu1 %v11015_v25 }
 0xfcd   :  { %8457 = vmatmul.mubr.f32.vlgmr.msra.gmra.mrb[40].mxu0 %v8673_v33 }
 0xfce   :  { %5925 = vmatprep.mubr.bf16.mxu0 %v11014_v24 }
0x1098   :  { %v5525_v38 = vpop.f32.mrb[36].mxu0  ;;  %v5566_v41 = vpop.f32.mrb[52].mxu1 }
0x1099   :  { %v10466_v53 = vadd.f32 %v5525_v38, %v10353_v51  ;;  %v10469_v56 = vadd.f32 %v5566_v41, %v10356_v3  ;;  %v5527_v13 = vpop.f32.mrb[37].mxu0  ;;  %v8452_v48 = vpop.f32.mrb[53].mxu1 }
0x109a   :  { %v10472_v35 = vadd.f32 %v5527_v13, %v10359_v63  ;;  %v5529_v7 = vpop.f32.mrb[38].mxu0  ;;  %v5569_v52 = vpop.f32.mrb[54].mxu1  ;;  %v10477_v63 = vld [vmem:[#allocation5 + $0x3c0] ss:$12 sps:$4 sm:$0xff]  }
0x109b   :  { %v5530_v2 = vpop.f32.mrb[39].mxu0  ;;  %v8453_v29 = vpop.f32.mrb[55].mxu1  ;;  %v10479_v52 = vld [vmem:[#allocation5 + $0x3c4] ss:$12 sps:$4 sm:$0xff]   ;;  %v10494_v13 = vld [vmem:[#allocation5 + $0x40c] ss:$12 sps:$4 sm:$0xff]  }
0x109c   :  { %v10481_v2 = vld [vmem:[#allocation5 + $0x3dc] ss:$12 sps:$4 sm:$0xff]   ;;  %5893 = vmatprep.subr.bf16.mxu0 %v10479_v52  ;;  %v10500_v29 = vld [vmem:[#allocation5 + $0x424] ss:$12 sps:$4 sm:$0xff]  }
0x109d   :  { %5894 = vmatpush1.bf16.msra.mxu0 %v10477_v63  ;;  %v10497_v7 = vld [vmem:[#allocation5 + $0x408] ss:$12 sps:$4 sm:$0xff]   ;;  %11055 = vst [vmem:[#allocation57_spill] sm:$0xff] %v10500_v29 }
0x109e   :  { %5895 = vmatprep.subr.bf16.mxu0 %v10481_v2  ;;  %11054 = vst [vmem:[#allocation56_spill] sm:$0xff] %v10497_v7 }
0x10a0   :  { %v5644_v31 = vpop.f32.mrb[40].mxu0 }
0x10a1   :  { %v5645_v33 = vadd.f32 %v10364_v50, %v5644_v31  ;;  %v8458_v37 = vpop.f32.mrb[41].mxu0  ;;  %v10485_v50 = vld [vmem:[#allocation5 + $0x3d8] ss:$12 sps:$4 sm:$0xff]   ;;  %v10503_v31 = vld [vmem:[#allocation5 + $0x420] ss:$12 sps:$4 sm:$0xff]  }
0x10a2   :  { %5896 = vmatpush1.bf16.msra.mxu0 %v10485_v50  ;;  %v10491_v37 = vld [vmem:[#allocation5 + $0x3f0] ss:$12 sps:$4 sm:$0xff]   ;;  %11056 = vst [vmem:[#allocation58_spill] sm:$0xff] %v10503_v31 }
0x10a3   :  { %v5648_v16 = vsel %vm3643_vm1, %v5645_v33, -inf }
0x10a4   :  { %5649 = vmax.xlane.f32.xlu0 %v5648_v16  ;;  %v10488_v16 = vld [vmem:[#allocation5 + $0x3f4] ss:$12 sps:$4 sm:$0xff]  }
0x10a5   :  { %5897 = vmatprep.subr.bf16.mxu0 %v10488_v16 }
0x10a6   :  { %5898 = vmatpush1.bf16.msra.mxu0 %v10491_v37 }
0x10a7   :  { %5899 = vmatprep.subr.bf16.mxu0 %v10494_v13 }
0x10aa   :  { %5900 = vmatpush1.bf16.msra.mxu0 %v10497_v7 }
0x10ab   :  { %5901 = vmatprep.subr.bf16.mxu0 %v10500_v29  ;;  %v10521_v29 = vld [vmem:[#allocation5 + $0x468] ss:$12 sps:$4 sm:$0xff]  }
0x10ac   :  { %11060 = vst [vmem:[#allocation62_spill] sm:$0xff] %v10521_v29 }
0x10ae   :  { %5902 = vmatpush1.bf16.msra.mxu0 %v10503_v31 }
0x1131   :  { %v5650_v51 = vpop.xlane.xlu0 %5649 }
0x1132   :  { %v5651_v38 = vsub.f32 %v5645_v33, %v5650_v51  ;;  %v10506_v33 = vld [vmem:[#allocation5 + $0x43c] ss:$12 sps:$4 sm:$0xff]   ;;  %v10509_v51 = vld [vmem:[#allocation5 + $0x438] ss:$12 sps:$4 sm:$0xff]  }
0x1133   :  { %11057 = vst [vmem:[#allocation59_spill] sm:$0xff] %v10506_v33  ;;  %11058 = vst [vmem:[#allocation60_spill] sm:$0xff] %v10509_v51  ;;  %5903 = vmatprep.subr.bf16.mxu0 %v10506_v33 }
0x1134   :  { %v5652_v3 = vmul.f32 1.442695, %v5651_v38  ;;  %v10512_v38 = vld [vmem:[#allocation5 + $0x454] ss:$12 sps:$4 sm:$0xff]   ;;  %5904 = vmatpush1.bf16.msra.mxu0 %v10509_v51 }
0x1135   :  { %11059 = vst [vmem:[#allocation61_spill] sm:$0xff] %v10512_v38  ;;  %5905 = vmatprep.subr.bf16.mxu0 %v10512_v38  ;;  %v10526_v51 = vld [vmem:[#allocation5 + $0x3c8] ss:$12 sps:$4 sm:$0xff]   ;;  %v10530_v38 = vld [vmem:[#allocation5 + $0x3e0] ss:$12 sps:$4 sm:$0xff]  }
0x1136   :  { %9605 = vpow2.f32 %v5652_v3  ;;  %v10515_v3 = vld [vmem:[#allocation5 + $0x450] ss:$12 sps:$4 sm:$0xff]   ;;  %11061 = vst [vmem:[#allocation63_spill] sm:$0xff] %v10530_v38 }
0x1138   :  { %5906 = vmatpush1.bf16.msra.mxu0 %v10515_v3 }
0x1140   :  { %v9606_v41 = vpop.eup %9605 }
0x1141   :  { %v5654_v48 = vsel %vm3643_vm1, %v9606_v41, 0.0 }
0x1142   :  { %5655 = vadd.xlane.f32.xlu1 %v5654_v48  ;;  %v10518_v48 = vld [vmem:[#allocation5 + $0x46c] ss:$12 sps:$4 sm:$0xff]  }
0x1143   :  { %5907 = vmatprep.subr.bf16.mxu0 %v10518_v48 }
0x1144   :  { %5908 = vmatpush1.bf16.msra.mxu0 %v10521_v29  ;;  %v10536_v29 = vld [vmem:[#allocation5 + $0x3f8] ss:$12 sps:$4 sm:$0xff]  }
0x1145   :  { %8484 = vmatprep.subr.mxu0 %v11015_v25  ;;  %11062 = vst [vmem:[#allocation64_spill] sm:$0xff] %v10536_v29 }
0x11cf   :  { %v5656_v33 = vpop.xlane.xlu1 %5655 }
0x11d0   :  { %9607 = vrcp.f32 %v5656_v33  ;;  %v10552_v33 = vld [vmem:[#allocation5 + $0x458] ss:$12 sps:$4 sm:$0xff]  }
0x11da   :  { %v9608_v31 = vpop.eup %9607 }
0x11db   :  { %v5658_v7 = vmul.f32 %v9608_v31, %v9606_v41  ;;  %v10540_v41 = vld [vmem:[#allocation5 + $0x410] ss:$12 sps:$4 sm:$0xff]   ;;  %v10548_v31 = vld [vmem:[#allocation5 + $0x440] ss:$12 sps:$4 sm:$0xff]  }
0x11dc   :  { %11063 = vst [vmem:[#allocation65_spill] sm:$0xff] %v10540_v41 }
0x11dd   :  { %8462 = vmatmul.mubr.msk.f32.vlgmr.msra.gmra.mrb[56].mxu1 %vm3643_vm1, %v5658_v7  ;;  %v10544_v7 = vld [vmem:[#allocation5 + $0x428] ss:$12 sps:$4 sm:$0xff]  }
0x11de   :  { %8465 = vmatpush3.bf16.msra.mxu1 %v10526_v51  ;;  %8480 = vmatprep.mubr.msk.bf16.mxu1 %vm9751_vm0, %v11015_v25  ;;  %11064 = vst [vmem:[#allocation66_spill] sm:$0xff] %v10544_v7 }
0x11df   :  { %8466 = vmatprep.subr.bf16.mxu1 %v11015_v25 }
0x11e2   :  { %8467 = vmatpush3.bf16.msra.mxu1 %v10530_v38 }
0x11e3   :  { %8468 = vmatprep.subr.bf16.mxu1 %v11015_v25 }
0x11e6   :  { %8469 = vmatpush3.bf16.msra.mxu1 %v10536_v29  ;;  %v10556_v29 = vld [vmem:[#allocation5 + $0x470] ss:$12 sps:$4 sm:$0xff]  }
0x11e7   :  { %8470 = vmatprep.subr.bf16.mxu1 %v11015_v25 }
0x11ea   :  { %8471 = vmatpush3.bf16.msra.mxu1 %v10540_v41 }
0x11eb   :  { %8472 = vmatprep.subr.bf16.mxu1 %v11015_v25 }
0x11ee   :  { %8473 = vmatpush3.bf16.msra.mxu1 %v10544_v7 }
0x11ef   :  { %8474 = vmatprep.subr.bf16.mxu1 %v11015_v25 }
0x11f2   :  { %8475 = vmatpush3.bf16.msra.mxu1 %v10548_v31 }
0x11f3   :  { %8476 = vmatprep.subr.bf16.mxu1 %v11015_v25 }
0x11f6   :  { %8477 = vmatpush3.bf16.msra.mxu1 %v10552_v33 }
0x11f7   :  { %8478 = vmatprep.subr.bf16.mxu1 %v11015_v25 }
0x11fa   :  { %8479 = vmatpush3.bf16.msra.mxu1 %v10556_v29 }
0x11fb   :  { %8489 = vmatprep.subr.mxu1 %v11015_v25 }
0x12b0   :  { %v5728_v7 = vpop.f32.mrb[56].mxu1 }
0x12b1   :  { %v5732_v41 = vpack.c.bf16 %v5728_v7, %v5728_v7  ;;  %v8463_v38 = vpop.f32.mrb[57].mxu1  ;;  %v9642_v7 = vld [vmem:[#allocation5 + $0xf4] ss:$12 sps:$4 sm:$0xff]  }
0x12b2   :  { %v9640_v38 = vld [vmem:[#allocation5 + $0xdc] ss:$12 sps:$4 sm:$0xff]  }
0x12b3   :  { %5926 = vmatmul.mubr.bf16.vlgmr.msra.gmra.mrb[44].mxu0 %v5732_v41  ;;  %8481 = vmatmul.mubr.bf16.vlgmr.msra.gmra.mrb[60].mxu1 %v5732_v41  ;;  %v9641_v41 = vld [vmem:[#allocation5 + $0xd8] ss:$12 sps:$4 sm:$0xff]  }
0x12b4   :  { %8485 = vmatpush3.xpose.msra.mxu0 %v9941_v18  ;;  %8490 = vmatpush3.msra.mxu1 %v10057_v4  ;;  %v9638_v18 = vld [vmem:[#allocation5 + $0xc4] ss:$12 sps:$4 sm:$0xff]   ;;  %v9639_v4 = vld [vmem:[#allocation5 + $0xc0] ss:$12 sps:$4 sm:$0xff]  }
0x12b5   :  { %8486 = vmatprep.mubr.msk.f32.mxu0 %vm9751_vm0, %v11015_v25  ;;  %8494 = vmatprep.subr.mxu0 %v11015_v25 }
0x12b6   :  { %8491 = vmatprep.mubr.msk.f32.mxu1 %vm9751_vm0, %v11015_v25  ;;  %8499 = vmatprep.subr.mxu1 %v11015_v25 }
0x12bb   :  { %8487 = vmatmul.mubr.f32.vlgmr.msra.gmra.mrb[42].mxu0 %v9915_v43  ;;  %v9643_v43 = vld [vmem:[#allocation5 + $0xf0] ss:$12 sps:$4 sm:$0xff]  }
0x12bc   :  { %8495 = vmatpush3.xpose.msra.mxu0 %v9946_v21  ;;  %8496 = vmatprep.mubr.msk.f32.mxu0 %vm9751_vm0, %v11015_v25 }
0x12bd   :  { %6298 = vmatprep.subr.bf16.mxu0 %v9638_v18 }
0x12bf   :  { %8497 = vmatmul.mubr.f32.vlgmr.msra.gmra.mrb[48].mxu0 %v9918_v45 }
0x12c0   :  { %6299 = vmatpush1.bf16.msra.mxu0 %v9639_v4  ;;  %6330 = vmatprep.mubr.bf16.mxu0 %v11014_v24 }
0x12c1   :  { %6300 = vmatprep.subr.bf16.mxu0 %v9640_v38 }
0x12c4   :  { %6301 = vmatpush1.bf16.msra.mxu0 %v9641_v41 }
0x12c5   :  { %6302 = vmatprep.subr.bf16.mxu0 %v9642_v7 }
0x12c8   :  { %6303 = vmatpush1.bf16.msra.mxu0 %v9643_v43 }
0x12c9   :  { %6304 = vmatprep.subr.bf16.mxu0 %v10122_v34 }
0x12cc   :  { %6305 = vmatpush1.bf16.msra.mxu0 %v10124_v12 }
0x12cd   :  { %6306 = vmatprep.subr.bf16.mxu0 %v10127_v5 }
0x12d0   :  { %6307 = vmatpush1.bf16.msra.mxu0 %v10130_v30 }
0x12d1   :  { %6308 = vmatprep.subr.bf16.mxu0 %v10133_v57 }
0x12d4   :  { %6309 = vmatpush1.bf16.msra.mxu0 %v10136_v14 }
0x12d5   :  { %6310 = vmatprep.subr.bf16.mxu0 %v10139_v23 }
0x12d8   :  { %6311 = vmatpush1.bf16.msra.mxu0 %v10142_v36 }
0x12d9   :  { %6312 = vmatprep.subr.bf16.mxu0 %v10145_v40 }
0x12dc   :  { %6313 = vmatpush1.bf16.msra.mxu0 %v10148_v58  ;;  %v10598_v58 = vld [vmem:[%s10944_s5 + $0x1] ss:$0 sm:$0xff] }
0x12dd   :  { %6379 = vmatprep.subr.bf16.mxu0 %v10162_v28 }
0x1386   :  { %v5927_v45 = vpop.f32.mrb[44].mxu0  ;;  %v5968_v21 = vpop.f32.mrb[60].mxu1 }
0x1387   :  { %v10587_v34 = vadd.f32 %v5927_v45, %v10466_v53  ;;  %v10590_v12 = vadd.f32 %v5968_v21, %v10469_v56  ;;  %v5929_v5 = vpop.f32.mrb[45].mxu0  ;;  %v8482_v30 = vpop.f32.mrb[61].mxu1 }
0x1388   :  { %v10593_v57 = vadd.f32 %v5929_v5, %v10472_v35  ;;  %v5931_v14 = vpop.f32.mrb[46].mxu0  ;;  %v5971_v23 = vpop.f32.mrb[62].mxu1 }
0x1389   :  { %v5932_v36 = vpop.f32.mrb[47].mxu0  ;;  %v8483_v40 = vpop.f32.mrb[63].mxu1 }
0x138e   :  { %v6051_v28 = vpop.f32.mrb[42].mxu0 }
0x138f   :  { %v6052_v53 = vadd.f32 %v10598_v58, %v6051_v28  ;;  %v8488_v18 = vpop.f32.mrb[43].mxu0 }
0x1391   :  { %v6055_v56 = vsel %vm3643_vm1, %v6052_v53, -inf }
0x1392   :  { %6056 = vmax.xlane.f32.xlu0 %v6055_v56  ;;  %v6209_v4 = vpop.f32.mrb[48].mxu0 }
0x1393   :  { %v6210_v35 = vadd.f32 %v10598_v58, %v6209_v4  ;;  %v8498_v38 = vpop.f32.mrb[49].mxu0 }
0x1394   :  { %v9644_v38 = vld [vmem:[#allocation5 + $0xc8] ss:$12 sps:$4 sm:$0xff]  }
0x1395   :  { %v6213_v41 = vsel %vm3643_vm1, %v6210_v35, -inf }
0x1396   :  { %6214 = vmax.xlane.f32.xlu1 %v6213_v41  ;;  %v9645_v41 = vld [vmem:[#allocation5 + $0xe0] ss:$12 sps:$4 sm:$0xff]  }
0x141f   :  { %v6057_v7 = vpop.xlane.xlu0 %6056 }
0x1420   :  { %v6058_v43 = vsub.f32 %v6052_v53, %v6057_v7  ;;  %v9647_v7 = vld [vmem:[#allocation5 + $0x110] ss:$12 sps:$4 sm:$0xff]  }
0x1422   :  { %v6059_v45 = vmul.f32 1.442695, %v6058_v43  ;;  %v9648_v43 = vld [vmem:[#allocation5 + $0x128] ss:$12 sps:$4 sm:$0xff]  }
0x1423   :  { %v6215_v21 = vpop.xlane.xlu1 %6214 }
0x1424   :  { %9609 = vpow2.f32 %v6059_v45  ;;  %v6216_v5 = vsub.f32 %v6210_v35, %v6215_v21  ;;  %v9649_v45 = vld [vmem:[#allocation5 + $0x140] ss:$12 sps:$4 sm:$0xff]   ;;  %v9650_v21 = vld [vmem:[#allocation5 + $0x158] ss:$12 sps:$4 sm:$0xff]  }
0x1426   :  { %v6217_v30 = vmul.f32 1.442695, %v6216_v5  ;;  %v9651_v5 = vld [vmem:[#allocation5 + $0x170] ss:$12 sps:$4 sm:$0xff]  }
0x1428   :  { %9611 = vpow2.f32 %v6217_v30 }
0x142e   :  { %v9610_v14 = vpop.eup %9609 }
0x142f   :  { %v6061_v23 = vsel %vm3643_vm1, %v9610_v14, 0.0 }
0x1430   :  { %6062 = vadd.xlane.f32.xlu0 %v6061_v23 }
0x1432   :  { %v9612_v36 = vpop.eup %9611 }
0x1433   :  { %v6219_v40 = vsel %vm3643_vm1, %v9612_v36, 0.0 }
0x1434   :  { %6220 = vadd.xlane.f32.xlu1 %v6219_v40 }
0x14bd   :  { %v6063_v28 = vpop.xlane.xlu0 %6062 }
0x14be   :  { %9613 = vrcp.f32 %v6063_v28  ;;  %v9652_v28 = vld [vmem:[#allocation5] ss:$12 sps:$4 sm:$0xff]  }
0x14c1   :  { %v6221_v18 = vpop.xlane.xlu1 %6220 }
0x14c2   :  { %9615 = vrcp.f32 %v6221_v18  ;;  %v9653_v18 = vld [vmem:[#allocation5 + $0x8] ss:$12 sps:$4 sm:$0xff]  }
0x14c8   :  { %v9614_v56 = vpop.eup %9613 }
0x14c9   :  { %v6065_v53 = vmul.f32 %v9614_v56, %v9610_v14  ;;  %v9654_v56 = vld [vmem:[#allocation5 + $0x1c] ss:$12 sps:$4 sm:$0xff]  }
0x14cb   :  { %8492 = vmatmul.mubr.msk.f32.vlgmr.msra.gmra.mrb[58].mxu1 %vm3643_vm1, %v6065_v53  ;;  %v9655_v53 = vld [vmem:[#allocation5 + $0x18] ss:$12 sps:$4 sm:$0xff]  }
0x14cc   :  { %v9616_v4 = vpop.eup %9615  ;;  %8500 = vmatpush3.msra.mxu1 %v10060_v8  ;;  %8501 = vmatprep.mubr.msk.f32.mxu1 %vm9751_vm0, %v11015_v25  ;;  %v9646_v8 = vld [vmem:[#allocation5 + $0xf8] ss:$12 sps:$4 sm:$0xff]  }
0x14cd   :  { %v6223_v35 = vmul.f32 %v9616_v4, %v9612_v36  ;;  %8504 = vmatprep.subr.bf16.mxu1 %v11015_v25  ;;  %v9656_v4 = vld [vmem:[#allocation5 + $0x20] ss:$12 sps:$4 sm:$0xff]  }
0x14cf   :  { %8502 = vmatmul.mubr.msk.f32.vlgmr.msra.gmra.mrb[64].mxu1 %vm3643_vm1, %v6223_v35  ;;  %v9657_v35 = vld [vmem:[#allocation5 + $0x34] ss:$12 sps:$4 sm:$0xff]  }
0x14d0   :  { %8505 = vmatpush3.bf16.msra.mxu1 %v9644_v38  ;;  %8520 = vmatprep.mubr.msk.bf16.mxu1 %vm9751_vm0, %v11015_v25  ;;  %v9658_v38 = vld [vmem:[#allocation5 + $0x30] ss:$12 sps:$4 sm:$0xff]  }
0x14d1   :  { %8506 = vmatprep.subr.bf16.mxu1 %v11015_v25 }
0x14d4   :  { %8507 = vmatpush3.bf16.msra.mxu1 %v9645_v41  ;;  %v9659_v41 = vld [vmem:[#allocation5 + $0x38] ss:$12 sps:$4 sm:$0xff]  }
0x14d5   :  { %8508 = vmatprep.subr.bf16.mxu1 %v11015_v25 }
0x14d8   :  { %8509 = vmatpush3.bf16.msra.mxu1 %v9646_v8  ;;  %v9660_v8 = vld [vmem:[#allocation5 + $0x4c] ss:$12 sps:$4 sm:$0xff]  }
0x14d9   :  { %8510 = vmatprep.subr.bf16.mxu1 %v11015_v25 }
0x14dc   :  { %8511 = vmatpush3.bf16.msra.mxu1 %v9647_v7  ;;  %v9661_v7 = vld [vmem:[#allocation5 + $0x48] ss:$12 sps:$4 sm:$0xff]  }
0x14dd   :  { %8512 = vmatprep.subr.bf16.mxu1 %v11015_v25 }
0x14e0   :  { %8513 = vmatpush3.bf16.msra.mxu1 %v9648_v43  ;;  %v9662_v43 = vld [vmem:[#allocation5 + $0x50] ss:$12 sps:$4 sm:$0xff]  }
0x14e1   :  { %8514 = vmatprep.subr.bf16.mxu1 %v11015_v25 }
0x14e4   :  { %8515 = vmatpush3.bf16.msra.mxu1 %v9649_v45  ;;  %v9663_v45 = vld [vmem:[#allocation5 + $0x64] ss:$12 sps:$4 sm:$0xff]  }
0x14e5   :  { %8516 = vmatprep.subr.bf16.mxu1 %v11015_v25 }
0x14e8   :  { %8517 = vmatpush3.bf16.msra.mxu1 %v9650_v21  ;;  %v9664_v21 = vld [vmem:[#allocation5 + $0x60] ss:$12 sps:$4 sm:$0xff]  }
0x14e9   :  { %8518 = vmatprep.subr.bf16.mxu1 %v11015_v25 }
0x14ec   :  { %8519 = vmatpush3.bf16.msra.mxu1 %v9651_v5  ;;  %v9665_v5 = vld [vmem:[#allocation5 + $0x68] ss:$12 sps:$4 sm:$0xff]  }
0x14ed   :  { %8524 = vmatprep.subr.bf16.mxu1 %v11015_v25 }
0x159e   :  { %v6135_v30 = vpop.f32.mrb[58].mxu1 }
0x159f   :  { %v8493_v14 = vpop.f32.mrb[59].mxu1 }
0x15a0   :  { %v9666_v14 = vld [vmem:[#allocation5 + $0x7c] ss:$12 sps:$4 sm:$0xff]  }
0x15a2   :  { %v6293_v23 = vpop.f32.mrb[64].mxu1 }
0x15a3   :  { %v6297_v36 = vpack.c.bf16 %v6293_v23, %v6293_v23  ;;  %v8503_v40 = vpop.f32.mrb[65].mxu1  ;;  %v9667_v23 = vld [vmem:[#allocation5 + $0x78] ss:$12 sps:$4 sm:$0xff]  }
0x15a4   :  { %v9669_v40 = vld [vmem:[#allocation5 + $0x94] ss:$12 sps:$4 sm:$0xff]  }
0x15a5   :  { %6331 = vmatmul.mubr.bf16.vlgmr.msra.gmra.mrb[52].mxu0 %v6297_v36  ;;  %8521 = vmatmul.mubr.bf16.vlgmr.msra.gmra.mrb[68].mxu1 %v6297_v36  ;;  %v9668_v36 = vld [vmem:[#allocation5 + $0x80] ss:$12 sps:$4 sm:$0xff]  }
0x15a6   :  { %6380 = vmatpush1.bf16.msra.mxu0 %v9652_v28  ;;  %8525 = vmatpush3.bf16.msra.mxu1 %v9653_v18  ;;  %v9670_v28 = vld [vmem:[#allocation5 + $0x90] ss:$12 sps:$4 sm:$0xff]   ;;  %v9671_v18 = vld [vmem:[#allocation5 + $0x98] ss:$12 sps:$4 sm:$0xff]  }
0x15a7   :  { %6381 = vmatprep.subr.bf16.mxu0 %v9654_v56  ;;  %8526 = vmatprep.subr.bf16.mxu1 %v11015_v25  ;;  %v9672_v56 = vld [vmem:[#allocation5 + $0xac] ss:$12 sps:$4 sm:$0xff]  }
0x15a8   :  { %6411 = vmatprep.mubr.bf16.mxu0 %v11014_v24  ;;  %8540 = vmatprep.mubr.msk.bf16.mxu1 %vm9751_vm0, %v11015_v25 }
0x15aa   :  { %6382 = vmatpush1.bf16.msra.mxu0 %v9655_v53  ;;  %8527 = vmatpush3.bf16.msra.mxu1 %v9656_v4  ;;  %v9673_v53 = vld [vmem:[#allocation5 + $0xa8] ss:$12 sps:$4 sm:$0xff]   ;;  %v9674_v4 = vld [vmem:[#allocation5 + $0xb0] ss:$12 sps:$4 sm:$0xff]  }
0x15ab   :  { %6383 = vmatprep.subr.bf16.mxu0 %v9657_v35  ;;  %8528 = vmatprep.subr.bf16.mxu1 %v11015_v25  ;;  %v6139_v35 = vpack.c.bf16 %v6135_v30, %v6135_v30  ;;  %v9676_v30 = vld [vmem:[#allocation5 + $0x180] ss:$12 sps:$4 sm:$0xff]  }
0x15ae   :  { %6384 = vmatpush1.bf16.msra.mxu0 %v9658_v38  ;;  %8529 = vmatpush3.bf16.msra.mxu1 %v9659_v41  ;;  %v9675_v38 = vld [vmem:[#allocation5 + $0x184] ss:$12 sps:$4 sm:$0xff]   ;;  %v9677_v41 = vld [vmem:[#allocation5 + $0x19c] ss:$12 sps:$4 sm:$0xff]  }
0x15af   :  { %6385 = vmatprep.subr.bf16.mxu0 %v9660_v8  ;;  %8530 = vmatprep.subr.bf16.mxu1 %v11015_v25  ;;  %v9679_v8 = vld [vmem:[#allocation5 + $0x1b4] ss:$12 sps:$4 sm:$0xff]  }
0x15b2   :  { %6386 = vmatpush1.bf16.msra.mxu0 %v9661_v7  ;;  %8531 = vmatpush3.bf16.msra.mxu1 %v9662_v43  ;;  %v9680_v7 = vld [vmem:[#allocation5 + $0x1b0] ss:$12 sps:$4 sm:$0xff]  }
0x15b3   :  { %6387 = vmatprep.subr.bf16.mxu0 %v9663_v45  ;;  %8532 = vmatprep.subr.bf16.mxu1 %v11015_v25 }
0x15b6   :  { %6388 = vmatpush1.bf16.msra.mxu0 %v9664_v21  ;;  %8533 = vmatpush3.bf16.msra.mxu1 %v9665_v5 }
0x15b7   :  { %6389 = vmatprep.subr.bf16.mxu0 %v9666_v14  ;;  %8534 = vmatprep.subr.bf16.mxu1 %v11015_v25 }
0x15ba   :  { %6390 = vmatpush1.bf16.msra.mxu0 %v9667_v23  ;;  %8535 = vmatpush3.bf16.msra.mxu1 %v9668_v36 }
0x15bb   :  { %6391 = vmatprep.subr.bf16.mxu0 %v9669_v40  ;;  %8536 = vmatprep.subr.bf16.mxu1 %v11015_v25 }
0x15be   :  { %6392 = vmatpush1.bf16.msra.mxu0 %v9670_v28  ;;  %8537 = vmatpush3.bf16.msra.mxu1 %v9671_v18 }
0x15bf   :  { %6393 = vmatprep.subr.bf16.mxu0 %v9672_v56  ;;  %8538 = vmatprep.subr.bf16.mxu1 %v11015_v25 }
0x15c2   :  { %6394 = vmatpush1.bf16.msra.mxu0 %v9673_v53  ;;  %8539 = vmatpush3.bf16.msra.mxu1 %v9674_v4 }
0x15c3   :  { %8549 = vmatprep.subr.mxu1 %v11015_v25  ;;  %8544 = vmatprep.subr.mxu0 %v11015_v25 }
0x15c5   :  { %6412 = vmatmul.mubr.bf16.vlgmr.msra.gmra.mrb[56].mxu0 %v6139_v35  ;;  %8541 = vmatmul.mubr.bf16.vlgmr.msra.gmra.mrb[72].mxu1 %v6139_v35 }
0x15c6   :  { %8550 = vmatpush3.msra.mxu1 %v10019_v55  ;;  %8546 = vmatprep.mubr.msk.f32.mxu0 %vm9751_vm0, %v11015_v25  ;;  %v9678_v55 = vld [vmem:[#allocation5 + $0x198] ss:$12 sps:$4 sm:$0xff]  }
0x15c7   :  { %8551 = vmatprep.mubr.msk.f32.mxu1 %vm9751_vm0, %v11015_v25  ;;  %8554 = vmatprep.subr.bf16.mxu1 %v11015_v25 }
0x15cb   :  { %8545 = vmatpush3.xpose.msra.mxu0 %v10044_v19 }
0x15cc   :  { %6618 = vmatprep.subr.bf16.mxu0 %v9675_v38 }
0x15ce   :  { %8547 = vmatmul.mubr.f32.vlgmr.msra.gmra.mrb[50].mxu0 %v9889_v6 }
0x15cf   :  { %6619 = vmatpush1.bf16.msra.mxu0 %v9676_v30  ;;  %6650 = vmatprep.mubr.bf16.mxu0 %v11014_v24 }
0x15d0   :  { %6620 = vmatprep.subr.bf16.mxu0 %v9677_v41 }
0x15d3   :  { %6621 = vmatpush1.bf16.msra.mxu0 %v9678_v55 }
0x15d4   :  { %6622 = vmatprep.subr.bf16.mxu0 %v9679_v8 }
0x15d7   :  { %6623 = vmatpush1.bf16.msra.mxu0 %v9680_v7  ;;  %v9681_v7 = vld [vmem:[#allocation5 + $0x188] ss:$12 sps:$4 sm:$0xff]  }
0x15d8   :  { %6624 = vmatprep.subr.bf16.mxu0 %v10190_v1 }
0x15db   :  { %6625 = vmatpush1.bf16.msra.mxu0 %v10192_v27 }
0x15dc   :  { %6626 = vmatprep.subr.bf16.mxu0 %v10195_v46 }
0x15df   :  { %6627 = vmatpush1.bf16.msra.mxu0 %v10198_v47 }
0x15e0   :  { %6628 = vmatprep.subr.bf16.mxu0 %v10201_v42 }
0x15e3   :  { %6629 = vmatpush1.bf16.msra.mxu0 %v10204_v44 }
0x15e4   :  { %6630 = vmatprep.subr.bf16.mxu0 %v10207_v15 }
0x15e7   :  { %6631 = vmatpush1.bf16.msra.mxu0 %v10210_v49 }
0x15e8   :  { %6632 = vmatprep.subr.bf16.mxu0 %v10213_v10 }
0x15eb   :  { %6633 = vmatpush1.bf16.msra.mxu0 %v10216_v20 }
0x15ec   :  { %8574 = vmatprep.subr.mxu0 %v11015_v25 }
0x1678   :  { %v6332_v6 = vpop.f32.mrb[52].mxu0  ;;  %v6373_v19 = vpop.f32.mrb[68].mxu1 }
0x1679   :  { %v6334_v1 = vpop.f32.mrb[53].mxu0  ;;  %v8522_v27 = vpop.f32.mrb[69].mxu1 }
0x167a   :  { %v6336_v46 = vpop.f32.mrb[54].mxu0  ;;  %v6376_v47 = vpop.f32.mrb[70].mxu1  ;;  %v9685_v27 = vld [vmem:[#allocation5 + $0x1e8] ss:$12 sps:$4 sm:$0xff]  }
0x167b   :  { %v6337_v43 = vpop.f32.mrb[55].mxu0  ;;  %v8523_v42 = vpop.f32.mrb[71].mxu1  ;;  %v9686_v46 = vld [vmem:[#allocation5 + $0x200] ss:$12 sps:$4 sm:$0xff]   ;;  %v9687_v47 = vld [vmem:[#allocation5 + $0x218] ss:$12 sps:$4 sm:$0xff]  }
0x167c   :  { %v9688_v43 = vld [vmem:[#allocation5 + $0x230] ss:$12 sps:$4 sm:$0xff]  }
0x1698   :  { %v6413_v45 = vpop.f32.mrb[56].mxu0  ;;  %v6454_v44 = vpop.f32.mrb[72].mxu1 }
0x1699   :  { %v10654_v21 = vadd.f32 %v6413_v45, %v6332_v6  ;;  %v10656_v15 = vadd.f32 %v6454_v44, %v6373_v19  ;;  %v6415_v49 = vpop.f32.mrb[57].mxu0  ;;  %v8542_v10 = vpop.f32.mrb[73].mxu1  ;;  %v9682_v6 = vld [vmem:[#allocation5 + $0x1a0] ss:$12 sps:$4 sm:$0xff]   ;;  %v9683_v19 = vld [vmem:[#allocation5 + $0x1b8] ss:$12 sps:$4 sm:$0xff]  }
0x169a   :  { %v10658_v5 = vadd.f32 %v6415_v49, %v6334_v1  ;;  %v6417_v20 = vpop.f32.mrb[58].mxu0  ;;  %v6457_v14 = vpop.f32.mrb[74].mxu1  ;;  %v9684_v1 = vld [vmem:[#allocation5 + $0x1d0] ss:$12 sps:$4 sm:$0xff]   ;;  %v11065_v49 = vld [vmem:[#allocation17_spill] sm:$0xff]  ;;  %v11066_v10 = vld [vmem:[#allocation10_spill] sm:$0xff] }
0x169b   :  { %v6418_v23 = vpop.f32.mrb[59].mxu0  ;;  %v8543_v36 = vpop.f32.mrb[75].mxu1  ;;  %v11069_v20 = vld [vmem:[#allocation22_spill] sm:$0xff]  ;;  %v11070_v14 = vld [vmem:[#allocation23_spill] sm:$0xff] }
0x169c   :  { %v11072_v23 = vld [vmem:[#allocation25_spill] sm:$0xff] }
0x16a1   :  { %v6529_v40 = vpop.f32.mrb[50].mxu0 }
0x16a2   :  { %v6530_v28 = vadd.f32 %v10598_v58, %v6529_v40  ;;  %v8548_v18 = vpop.f32.mrb[51].mxu0 }
0x16a4   :  { %v6533_v56 = vsel %vm3643_vm1, %v6530_v28, -inf }
0x16a5   :  { %6534 = vmax.xlane.f32.xlu0 %v6533_v56 }
0x1732   :  { %v6535_v53 = vpop.xlane.xlu0 %6534 }
0x1733   :  { %v6536_v4 = vsub.f32 %v6530_v28, %v6535_v53 }
0x1735   :  { %v6537_v35 = vmul.f32 1.442695, %v6536_v4 }
0x1737   :  { %9617 = vpow2.f32 %v6537_v35 }
0x1741   :  { %v9618_v38 = vpop.eup %9617 }
0x1742   :  { %v6539_v30 = vsel %vm3643_vm1, %v9618_v38, 0.0 }
0x1743   :  { %6540 = vadd.xlane.f32.xlu1 %v6539_v30 }
0x17d0   :  { %v6541_v41 = vpop.xlane.xlu1 %6540 }
0x17d1   :  { %9619 = vrcp.f32 %v6541_v41 }
0x17db   :  { %v9620_v55 = vpop.eup %9619 }
0x17dc   :  { %v6543_v8 = vmul.f32 %v9620_v55, %v9618_v38 }
0x17de   :  { %8552 = vmatmul.mubr.msk.f32.vlgmr.msra.gmra.mrb[66].mxu1 %vm3643_vm1, %v6543_v8 }
0x17df   :  { %8555 = vmatpush3.bf16.msra.mxu1 %v9681_v7  ;;  %8570 = vmatprep.mubr.msk.bf16.mxu1 %vm9751_vm0, %v11015_v25 }
0x17e0   :  { %8556 = vmatprep.subr.bf16.mxu1 %v11015_v25 }
0x17e3   :  { %8557 = vmatpush3.bf16.msra.mxu1 %v9682_v6  ;;  %v11074_v6 = vld [vmem:[#allocation27_spill] sm:$0xff] }
0x17e4   :  { %8558 = vmatprep.subr.bf16.mxu1 %v11015_v25 }
0x17e7   :  { %8559 = vmatpush3.bf16.msra.mxu1 %v9683_v19  ;;  %v11075_v19 = vld [vmem:[#allocation28_spill] sm:$0xff] }
0x17e8   :  { %8560 = vmatprep.subr.bf16.mxu1 %v11015_v25 }
0x17eb   :  { %8561 = vmatpush3.bf16.msra.mxu1 %v9684_v1  ;;  %v11076_v1 = vld [vmem:[#allocation29_spill] sm:$0xff] }
0x17ec   :  { %8562 = vmatprep.subr.bf16.mxu1 %v11015_v25 }
0x17ef   :  { %8563 = vmatpush3.bf16.msra.mxu1 %v9685_v27  ;;  %v11077_v27 = vld [vmem:[#allocation30_spill] sm:$0xff] }
0x17f0   :  { %8564 = vmatprep.subr.bf16.mxu1 %v11015_v25 }
0x17f3   :  { %8565 = vmatpush3.bf16.msra.mxu1 %v9686_v46  ;;  %v11078_v46 = vld [vmem:[#allocation31_spill] sm:$0xff] }
0x17f4   :  { %8566 = vmatprep.subr.bf16.mxu1 %v11015_v25 }
0x17f7   :  { %8567 = vmatpush3.bf16.msra.mxu1 %v9687_v47  ;;  %v11079_v47 = vld [vmem:[#allocation32_spill] sm:$0xff] }
0x17f8   :  { %8568 = vmatprep.subr.bf16.mxu1 %v11015_v25 }
0x17fb   :  { %8569 = vmatpush3.bf16.msra.mxu1 %v9688_v43  ;;  %v11080_v43 = vld [vmem:[#allocation33_spill] sm:$0xff] }
0x17fc   :  { %8579 = vmatprep.subr.mxu1 %v11015_v25 }
0x18b1   :  { %v6613_v42 = vpop.f32.mrb[66].mxu1 }
0x18b2   :  { %v6617_v45 = vpack.c.bf16 %v6613_v42, %v6613_v42  ;;  %v8553_v44 = vpop.f32.mrb[67].mxu1  ;;  %v11081_v42 = vld [vmem:[#allocation34_spill] sm:$0xff] }
0x18b4   :  { %6651 = vmatmul.mubr.bf16.vlgmr.msra.gmra.mrb[60].mxu0 %v6617_v45  ;;  %8571 = vmatmul.mubr.bf16.vlgmr.msra.gmra.mrb[76].mxu1 %v6617_v45 }
0x18b5   :  { %8575 = vmatpush3.xpose.msra.mxu0 %v10047_v22  ;;  %8580 = vmatpush3.msra.mxu1 %v11065_v49  ;;  %v11067_v22 = vld [vmem:[#allocation20_spill] sm:$0xff] }
0x18b6   :  { %8576 = vmatprep.mubr.msk.f32.mxu0 %vm9751_vm0, %v11015_v25  ;;  %8581 = vmatprep.mubr.msk.f32.mxu1 %vm9751_vm0, %v11015_v25 }
0x18b7   :  { %6860 = vmatprep.subr.bf16.mxu0 %v10258_v59  ;;  %8584 = vmatprep.subr.bf16.mxu1 %v11015_v25  ;;  %v11068_v59 = vld [vmem:[#allocation21_spill] sm:$0xff] }
0x18bc   :  { %8577 = vmatmul.mubr.f32.vlgmr.msra.gmra.mrb[64].mxu0 %v11066_v10  ;;  %v11082_v10 = vld [vmem:[#allocation13_spill] sm:$0xff] }
0x18bd   :  { %6861 = vmatpush1.bf16.msra.mxu0 %v10256_v39  ;;  %6892 = vmatprep.mubr.bf16.mxu0 %v11014_v24  ;;  %v11071_v39 = vld [vmem:[#allocation24_spill] sm:$0xff] }
0x18be   :  { %6862 = vmatprep.subr.bf16.mxu0 %v10260_v9  ;;  %v11073_v9 = vld [vmem:[#allocation26_spill] sm:$0xff] }
0x18c1   :  { %6863 = vmatpush1.bf16.msra.mxu0 %v10264_v0 }
0x18c2   :  { %6864 = vmatprep.subr.bf16.mxu0 %v10267_v60 }
0x18c5   :  { %6865 = vmatpush1.bf16.msra.mxu0 %v10270_v17 }
0x18c6   :  { %6866 = vmatprep.subr.bf16.mxu0 %v10273_v54 }
0x18c9   :  { %6867 = vmatpush1.bf16.msra.mxu0 %v11067_v22  ;;  %v11083_v22 = vld [vmem:[#allocation18_spill] sm:$0xff] }
0x18ca   :  { %6868 = vmatprep.subr.bf16.mxu0 %v11068_v59  ;;  %v11084_v59 = vld [vmem:[#allocation15_spill] sm:$0xff] }
0x18cd   :  { %6869 = vmatpush1.bf16.msra.mxu0 %v11069_v20  ;;  %v11085_v20 = vld [vmem:[#allocation35_spill] sm:$0xff] }
0x18ce   :  { %6870 = vmatprep.subr.bf16.mxu0 %v11070_v14  ;;  %v11086_v14 = vld [vmem:[#allocation36_spill] sm:$0xff] }
0x18d1   :  { %6871 = vmatpush1.bf16.msra.mxu0 %v11071_v39  ;;  %v11087_v39 = vld [vmem:[#allocation37_spill] sm:$0xff] }
0x18d2   :  { %6872 = vmatprep.subr.bf16.mxu0 %v11072_v23  ;;  %v11088_v23 = vld [vmem:[#allocation38_spill] sm:$0xff] }
0x18d5   :  { %6873 = vmatpush1.bf16.msra.mxu0 %v10294_v32 }
0x18d6   :  { %6874 = vmatprep.subr.bf16.mxu0 %v10297_v62 }
0x18d9   :  { %6875 = vmatpush1.bf16.msra.mxu0 %v11073_v9  ;;  %v11089_v9 = vld [vmem:[#allocation39_spill] sm:$0xff] }
0x18da   :  { %8604 = vmatprep.subr.mxu0 %v11015_v25 }
0x1987   :  { %v6652_v0 = vpop.f32.mrb[60].mxu0  ;;  %v6693_v60 = vpop.f32.mrb[76].mxu1 }
0x1988   :  { %v10701_v17 = vadd.f32 %v6652_v0, %v10654_v21  ;;  %v10704_v54 = vadd.f32 %v6693_v60, %v10656_v15  ;;  %v6654_v36 = vpop.f32.mrb[61].mxu0  ;;  %v8572_v40 = vpop.f32.mrb[77].mxu1  ;;  %v11091_v0 = vld [vmem:[#allocation41_spill] sm:$0xff]  ;;  %v11092_v60 = vld [vmem:[#allocation42_spill] sm:$0xff] }
0x1989   :  { %v10707_v28 = vadd.f32 %v6654_v36, %v10658_v5  ;;  %v6656_v32 = vpop.f32.mrb[62].mxu0  ;;  %v6696_v18 = vpop.f32.mrb[78].mxu1  ;;  %v11094_v36 = vld [vmem:[#allocation44_spill] sm:$0xff]  ;;  %v11096_v40 = vld [vmem:[#allocation46_spill] sm:$0xff] }
0x198a   :  { %v6657_v62 = vpop.f32.mrb[63].mxu0  ;;  %v8573_v56 = vpop.f32.mrb[79].mxu1  ;;  %v11097_v32 = vld [vmem:[#allocation47_spill] sm:$0xff] }
0x198f   :  { %v6771_v53 = vpop.f32.mrb[64].mxu0 }
0x1990   :  { %v6772_v4 = vadd.f32 %v10598_v58, %v6771_v53  ;;  %v8578_v35 = vpop.f32.mrb[65].mxu0 }
0x1992   :  { %v6775_v38 = vsel %vm3643_vm1, %v6772_v4, -inf }
0x1993   :  { %6776 = vmax.xlane.f32.xlu0 %v6775_v38 }
0x1a20   :  { %v6777_v21 = vpop.xlane.xlu0 %6776 }
0x1a21   :  { %v6778_v30 = vsub.f32 %v6772_v4, %v6777_v21 }
0x1a23   :  { %v6779_v15 = vmul.f32 1.442695, %v6778_v30 }
0x1a25   :  { %9621 = vpow2.f32 %v6779_v15 }
0x1a2f   :  { %v9622_v41 = vpop.eup %9621 }
0x1a30   :  { %v6781_v55 = vsel %vm3643_vm1, %v9622_v41, 0.0 }
0x1a31   :  { %6782 = vadd.xlane.f32.xlu1 %v6781_v55 }
0x1abe   :  { %v6783_v5 = vpop.xlane.xlu1 %6782 }
0x1abf   :  { %9623 = vrcp.f32 %v6783_v5 }
0x1ac9   :  { %v9624_v8 = vpop.eup %9623 }
0x1aca   :  { %v6785_v7 = vmul.f32 %v9624_v8, %v9622_v41 }
0x1acc   :  { %8582 = vmatmul.mubr.msk.f32.vlgmr.msra.gmra.mrb[80].mxu1 %vm3643_vm1, %v6785_v7 }
0x1acd   :  { %8585 = vmatpush3.bf16.msra.mxu1 %v11074_v6  ;;  %8600 = vmatprep.mubr.msk.bf16.mxu1 %vm9751_vm0, %v11015_v25 }
0x1ace   :  { %8586 = vmatprep.subr.bf16.mxu1 %v11015_v25 }
0x1ad1   :  { %8587 = vmatpush3.bf16.msra.mxu1 %v11075_v19 }
0x1ad2   :  { %8588 = vmatprep.subr.bf16.mxu1 %v11015_v25 }
0x1ad5   :  { %8589 = vmatpush3.bf16.msra.mxu1 %v11076_v1 }
0x1ad6   :  { %8590 = vmatprep.subr.bf16.mxu1 %v11015_v25 }
0x1ad9   :  { %8591 = vmatpush3.bf16.msra.mxu1 %v11077_v27 }
0x1ada   :  { %8592 = vmatprep.subr.bf16.mxu1 %v11015_v25 }
0x1add   :  { %8593 = vmatpush3.bf16.msra.mxu1 %v11078_v46 }
0x1ade   :  { %8594 = vmatprep.subr.bf16.mxu1 %v11015_v25 }
0x1ae1   :  { %8595 = vmatpush3.bf16.msra.mxu1 %v11079_v47  ;;  %v11098_v47 = vld [vmem:[#allocation48_spill] sm:$0xff] }
0x1ae2   :  { %8596 = vmatprep.subr.bf16.mxu1 %v11015_v25 }
0x1ae5   :  { %8597 = vmatpush3.bf16.msra.mxu1 %v11080_v43  ;;  %v11099_v43 = vld [vmem:[#allocation49_spill] sm:$0xff] }
0x1ae6   :  { %8598 = vmatprep.subr.bf16.mxu1 %v11015_v25 }
0x1ae9   :  { %8599 = vmatpush3.bf16.msra.mxu1 %v11081_v42  ;;  %v11100_v42 = vld [vmem:[#allocation50_spill] sm:$0xff] }
0x1aea   :  { %8609 = vmatprep.subr.mxu1 %v11015_v25 }
0x1b9f   :  { %v6855_v45 = vpop.f32.mrb[80].mxu1 }
0x1ba0   :  { %v6859_v44 = vpack.c.bf16 %v6855_v45, %v6855_v45  ;;  %v8583_v49 = vpop.f32.mrb[81].mxu1  ;;  %v11101_v45 = vld [vmem:[#allocation51_spill] sm:$0xff] }
0x1ba1   :  { %v11103_v49 = vld [vmem:[#allocation53_spill] sm:$0xff] }
0x1ba2   :  { %6893 = vmatmul.mubr.bf16.vlgmr.msra.gmra.mrb[68].mxu0 %v6859_v44  ;;  %8601 = vmatmul.mubr.bf16.vlgmr.msra.gmra.mrb[84].mxu1 %v6859_v44  ;;  %v11102_v44 = vld [vmem:[#allocation52_spill] sm:$0xff] }
0x1ba3   :  { %8605 = vmatpush3.xpose.msra.mxu0 %v11082_v10  ;;  %8610 = vmatpush3.msra.mxu1 %v11083_v22  ;;  %v11104_v10 = vld [vmem:[#allocation54_spill] sm:$0xff]  ;;  %v11105_v22 = vld [vmem:[#allocation55_spill] sm:$0xff] }
0x1ba4   :  { %8606 = vmatprep.mubr.msk.f32.mxu0 %vm9751_vm0, %v11015_v25  ;;  %8611 = vmatprep.mubr.msk.f32.mxu1 %vm9751_vm0, %v11015_v25 }
0x1ba5   :  { %7102 = vmatprep.subr.bf16.mxu0 %v10371_v61  ;;  %8614 = vmatprep.subr.bf16.mxu1 %v11015_v25  ;;  %v11090_v61 = vld [vmem:[#allocation40_spill] sm:$0xff] }
0x1baa   :  { %8607 = vmatmul.mubr.f32.vlgmr.msra.gmra.mrb[66].mxu0 %v11084_v59 }
0x1bab   :  { %7103 = vmatpush1.bf16.msra.mxu0 %v10369_v11  ;;  %7134 = vmatprep.mubr.bf16.mxu0 %v11014_v24  ;;  %v11093_v11 = vld [vmem:[#allocation43_spill] sm:$0xff] }
0x1bac   :  { %7104 = vmatprep.subr.bf16.mxu0 %v10373_v26  ;;  %v11095_v26 = vld [vmem:[#allocation45_spill] sm:$0xff] }
0x1baf   :  { %7105 = vmatpush1.bf16.msra.mxu0 %v11085_v20 }
0x1bb0   :  { %7106 = vmatprep.subr.bf16.mxu0 %v11086_v14 }
0x1bb3   :  { %7107 = vmatpush1.bf16.msra.mxu0 %v11087_v39  ;;  %v11106_v39 = vld [vmem:[#allocation14_spill] sm:$0xff] }
0x1bb4   :  { %7108 = vmatprep.subr.bf16.mxu0 %v11088_v23  ;;  %v11107_v23 = vld [vmem:[#allocation19_spill] sm:$0xff] }
0x1bb7   :  { %7109 = vmatpush1.bf16.msra.mxu0 %v11089_v9  ;;  %v11108_v9 = vld [vmem:[#allocation16_spill] sm:$0xff] }
0x1bb8   :  { %7110 = vmatprep.subr.bf16.mxu0 %v11090_v61  ;;  %v11109_v61 = vld [vmem:[#allocation56_spill] sm:$0xff] }
0x1bbb   :  { %7111 = vmatpush1.bf16.msra.mxu0 %v11091_v0  ;;  %v11111_v0 = vld [vmem:[#allocation58_spill] sm:$0xff] }
0x1bbc   :  { %7112 = vmatprep.subr.bf16.mxu0 %v11092_v60  ;;  %v11112_v60 = vld [vmem:[#allocation59_spill] sm:$0xff] }
0x1bbf   :  { %7113 = vmatpush1.bf16.msra.mxu0 %v11093_v11 }
0x1bc0   :  { %7114 = vmatprep.subr.bf16.mxu0 %v11094_v36 }
0x1bc3   :  { %7115 = vmatpush1.bf16.msra.mxu0 %v11095_v26 }
0x1bc4   :  { %7116 = vmatprep.subr.bf16.mxu0 %v11096_v40 }
0x1bc7   :  { %7117 = vmatpush1.bf16.msra.mxu0 %v11097_v32 }
0x1bc8   :  { %8634 = vmatprep.subr.mxu0 %v11015_v25 }
0x1c75   :  { %v6894_v18 = vpop.f32.mrb[68].mxu0  ;;  %v6935_v62 = vpop.f32.mrb[84].mxu1 }
0x1c76   :  { %v10758_v56 = vadd.f32 %v6894_v18, %v10701_v17  ;;  %v10761_v53 = vadd.f32 %v6935_v62, %v10704_v54  ;;  %v6896_v4 = vpop.f32.mrb[69].mxu0  ;;  %v8602_v35 = vpop.f32.mrb[85].mxu1 }
0x1c77   :  { %v10764_v38 = vadd.f32 %v6896_v4, %v10707_v28  ;;  %v6898_v21 = vpop.f32.mrb[70].mxu0  ;;  %v6938_v30 = vpop.f32.mrb[86].mxu1 }
0x1c78   :  { %v6899_v15 = vpop.f32.mrb[71].mxu0  ;;  %v8603_v41 = vpop.f32.mrb[87].mxu1 }
0x1c7d   :  { %v7013_v55 = vpop.f32.mrb[66].mxu0 }
0x1c7e   :  { %v7014_v5 = vadd.f32 %v10598_v58, %v7013_v55  ;;  %v8608_v8 = vpop.f32.mrb[67].mxu0 }
0x1c80   :  { %v7017_v7 = vsel %vm3643_vm1, %v7014_v5, -inf }
0x1c81   :  { %7018 = vmax.xlane.f32.xlu0 %v7017_v7 }
0x1d0e   :  { %v7019_v17 = vpop.xlane.xlu0 %7018 }
0x1d0f   :  { %v7020_v6 = vsub.f32 %v7014_v5, %v7019_v17 }
0x1d11   :  { %v7021_v54 = vmul.f32 1.442695, %v7020_v6 }
0x1d13   :  { %9625 = vpow2.f32 %v7021_v54  ;;  %v9691_v54 = vld [vmem:[%s10939_s0 + $0x10] sm:$0xff] }
0x1d1d   :  { %v9626_v19 = vpop.eup %9625 }
0x1d1e   :  { %v7023_v1 = vsel %vm3643_vm1, %v9626_v19, 0.0 }
0x1d1f   :  { %7024 = vadd.xlane.f32.xlu1 %v7023_v1 }
0x1dac   :  { %v7025_v28 = vpop.xlane.xlu1 %7024 }
0x1dad   :  { %9627 = vrcp.f32 %v7025_v28 }
0x1db7   :  { %v9628_v27 = vpop.eup %9627 }
0x1db8   :  { %v7027_v46 = vmul.f32 %v9628_v27, %v9626_v19 }
0x1dba   :  { %8612 = vmatmul.mubr.msk.f32.vlgmr.msra.gmra.mrb[82].mxu1 %vm3643_vm1, %v7027_v46 }
0x1dbb   :  { %8615 = vmatpush3.bf16.msra.mxu1 %v11098_v47  ;;  %8630 = vmatprep.mubr.msk.bf16.mxu1 %vm9751_vm0, %v11015_v25 }
0x1dbc   :  { %8616 = vmatprep.subr.bf16.mxu1 %v11015_v25 }
0x1dbf   :  { %8617 = vmatpush3.bf16.msra.mxu1 %v11099_v43 }
0x1dc0   :  { %8618 = vmatprep.subr.bf16.mxu1 %v11015_v25 }
0x1dc3   :  { %8619 = vmatpush3.bf16.msra.mxu1 %v11100_v42 }
0x1dc4   :  { %8620 = vmatprep.subr.bf16.mxu1 %v11015_v25 }
0x1dc7   :  { %8621 = vmatpush3.bf16.msra.mxu1 %v11101_v45 }
0x1dc8   :  { %8622 = vmatprep.subr.bf16.mxu1 %v11015_v25 }
0x1dcb   :  { %8623 = vmatpush3.bf16.msra.mxu1 %v11102_v44 }
0x1dcc   :  { %8624 = vmatprep.subr.bf16.mxu1 %v11015_v25 }
0x1dcf   :  { %8625 = vmatpush3.bf16.msra.mxu1 %v11103_v49 }
0x1dd0   :  { %8626 = vmatprep.subr.bf16.mxu1 %v11015_v25 }
0x1dd3   :  { %8627 = vmatpush3.bf16.msra.mxu1 %v11104_v10 }
0x1dd4   :  { %8628 = vmatprep.subr.bf16.mxu1 %v11015_v25 }
0x1dd7   :  { %8629 = vmatpush3.bf16.msra.mxu1 %v11105_v22 }
0x1dd8   :  { %8639 = vmatprep.subr.mxu1 %v11015_v25 }
0x1e8d   :  { %v7097_v59 = vpop.f32.mrb[82].mxu1 }
0x1e8e   :  { %v7101_v20 = vpack.c.bf16 %v7097_v59, %v7097_v59  ;;  %v8613_v14 = vpop.f32.mrb[83].mxu1 }
0x1e90   :  { %7135 = vmatmul.mubr.bf16.vlgmr.msra.gmra.mrb[72].mxu0 %v7101_v20  ;;  %8631 = vmatmul.mubr.bf16.vlgmr.msra.gmra.mrb[88].mxu1 %v7101_v20 }
0x1e91   :  { %8635 = vmatpush3.xpose.msra.mxu0 %v11106_v39  ;;  %8640 = vmatpush3.msra.mxu1 %v11107_v23 }
0x1e92   :  { %8636 = vmatprep.mubr.msk.f32.mxu0 %vm9751_vm0, %v11015_v25  ;;  %8641 = vmatprep.mubr.msk.f32.mxu1 %vm9751_vm0, %v11015_v25 }
0x1e93   :  { %7344 = vmatprep.subr.bf16.mxu0 %v10479_v52  ;;  %8644 = vmatprep.subr.bf16.mxu1 %v11015_v25  ;;  %v11110_v52 = vld [vmem:[#allocation57_spill] sm:$0xff] }
0x1e98   :  { %8637 = vmatmul.mubr.f32.vlgmr.msra.gmra.mrb[76].mxu0 %v11108_v9 }
0x1e99   :  { %7345 = vmatpush1.bf16.msra.mxu0 %v10477_v63  ;;  %7376 = vmatprep.mubr.bf16.mxu0 %v11014_v24  ;;  %v11113_v63 = vld [vmem:[#allocation60_spill] sm:$0xff]  ;;  %v11114_v24 = vld [vmem:[#allocation61_spill] sm:$0xff] }
0x1e9a   :  { %7346 = vmatprep.subr.bf16.mxu0 %v10481_v2  ;;  %v11115_v2 = vld [vmem:[#allocation62_spill] sm:$0xff] }
0x1e9d   :  { %7347 = vmatpush1.bf16.msra.mxu0 %v10485_v50  ;;  %v7428_v50 = vld [vmem:[%s10943_s4] sm:$0x7] }
0x1e9e   :  { %7348 = vmatprep.subr.bf16.mxu0 %v10488_v16  ;;  %v11116_v16 = vld [vmem:[#allocation11_spill] sm:$0xff] }
0x1ea1   :  { %7349 = vmatpush1.bf16.msra.mxu0 %v10491_v37  ;;  %v10817_v37 = vrot.slane %v7428_v50, %v11116_v16 }
0x1ea2   :  { %7350 = vmatprep.subr.bf16.mxu0 %v10494_v13  ;;  %v11117_v13 = vld [vmem:[#allocation12_spill] sm:$0xff] }
0x1ea3   :  { %v10820_v11 = vrot.slane %v7428_v50, %v11117_v13  ;;  %v7445_v18 = vadd.f32 %v10817_v37, %v10587_v34  ;;  %v9690_v34 = vld [vmem:[%s10939_s0 + $0x8] sm:$0xff] }
0x1ea5   :  { %7351 = vmatpush1.bf16.msra.mxu0 %v11109_v61  ;;  %v7446_v62 = vadd.f32 %v10820_v11, %v10593_v57  ;;  %v7457_v61 = vld [vmem:[%s10945_s6] sm:$0x7] }
0x1ea6   :  { %7352 = vmatprep.subr.bf16.mxu0 %v11110_v52  ;;  %v7458_v52 = vld [vmem:[%s10946_s7] sm:$0x7] }
0x1ea7   :  { %v7452_v57 = vadd.f32 %v9690_v34, %v7446_v62 }
0x1ea9   :  { %7353 = vmatpush1.bf16.msra.mxu0 %v11111_v0 }
0x1eaa   :  { %7354 = vmatprep.subr.bf16.mxu0 %v11112_v60  ;;  %v10859_v60 = vrot.slane %v7457_v61, %v11116_v16 }
0x1ead   :  { %7355 = vmatpush1.bf16.msra.mxu0 %v11113_v63  ;;  %v10862_v63 = vrot.slane %v7457_v61, %v11117_v13 }
0x1eae   :  { %7356 = vmatprep.subr.bf16.mxu0 %v11114_v24 }
0x1eb1   :  { %7357 = vmatpush1.bf16.msra.mxu0 %v10515_v3 }
0x1eb2   :  { %7358 = vmatprep.subr.bf16.mxu0 %v10518_v48 }
0x1eb5   :  { %7359 = vmatpush1.bf16.msra.mxu0 %v11115_v2 }
0x1f63   :  { %v7136_v36 = vpop.f32.mrb[72].mxu0  ;;  %v7177_v26 = vpop.f32.mrb[88].mxu1 }
0x1f64   :  { %v10823_v40 = vadd.f32 %v7136_v36, %v10758_v56  ;;  %v10826_v3 = vadd.f32 %v7177_v26, %v10761_v53  ;;  %v7138_v48 = vpop.f32.mrb[73].mxu0  ;;  %v8632_v32 = vpop.f32.mrb[89].mxu1  ;;  %v11118_v56 = vld [vmem:[#allocation9_spill] sm:$0xff]  ;;  %v10868_v36 = vrot.slane %v7458_v52, %v11116_v16  ;;  %v10871_v26 = vrot.slane %v7458_v52, %v11117_v13 }
0x1f65   :  { %v10833_v4 = vadd.f32 %v7138_v48, %v10764_v38  ;;  %v7140_v35 = vpop.f32.mrb[74].mxu0  ;;  %v7180_v21 = vpop.f32.mrb[90].mxu1  ;;  %v10836_v41 = vrot.slane %v7428_v50, %v11118_v56  ;;  %v9689_v53 = vld [vmem:[%s10939_s0] sm:$0xff]  ;;  %v10865_v24 = vrot.slane %v7457_v61, %v11118_v56  ;;  %v10874_v48 = vrot.slane %v7458_v52, %v11118_v56  ;;  %v11119_v56 = vld [vmem:[#allocation63_spill] sm:$0xff] }
0x1f66   :  { %v7141_v30 = vpop.f32.mrb[75].mxu0  ;;  %v8633_v15 = vpop.f32.mrb[91].mxu1  ;;  %v7451_v55 = vadd.f32 %v9689_v53, %v7445_v18  ;;  %v11121_v53 = vld [vmem:[#allocation65_spill] sm:$0xff] }
0x1f67   :  { %v7447_v38 = vadd.f32 %v10836_v41, %v10590_v12 }
0x1f68   :  { %v7459_v17 = vadd.f32 %v7452_v57, %v7451_v55 }
0x1f69   :  { %v7453_v19 = vadd.f32 %v9691_v54, %v7447_v38 }
0x1f6b   :  { %v7255_v5 = vpop.f32.mrb[76].mxu0  ;;  %v7460_v1 = vadd.f32 %v7459_v17, %v7453_v19 }
0x1f6c   :  { %v7256_v8 = vadd.f32 %v10598_v58, %v7255_v5  ;;  %v8638_v7 = vpop.f32.mrb[77].mxu0 }
0x1f6e   :  { %v7259_v6 = vsel %vm3643_vm1, %v7256_v8, -inf }
0x1f6f   :  { %7260 = vmax.xlane.f32.xlu0 %v7259_v6 }
0x1f73   :  { %7461 = vadd.xlane.f32.xlu0 %v7460_v1 }
0x1ffc   :  { %v7261_v28 = vpop.xlane.xlu0 %7260 }
0x1ffd   :  { %v7262_v27 = vsub.f32 %v7256_v8, %v7261_v28 }
0x1fff   :  { %v7263_v46 = vmul.f32 1.442695, %v7262_v27 }
0x2000   :  { %v7462_v47 = vpop.xlane.xlu0 %7461 }
0x2001   :  { %9629 = vpow2.f32 %v7263_v46  ;;  %v7468_v12 = vmul.f32 0.0026041667, %v7462_v47 }
0x2003   :  { %v7470_v43 = vsub.f32 %v7451_v55, %v7468_v12  ;;  %v7471_v58 = vsub.f32 %v7452_v57, %v7468_v12  ;;  %v7472_v42 = vsub.f32 %v7453_v19, %v7468_v12  ;;  %v11122_v55 = vld [vmem:[#allocation66_spill] sm:$0xff] }
0x2005   :  { %v7476_v45 = vmul.f32 %v7470_v43, %v7470_v43  ;;  %v7477_v44 = vmul.f32 %v7471_v58, %v7471_v58  ;;  %v7478_v49 = vmul.f32 %v7472_v42, %v7472_v42 }
0x2007   :  { %v7482_v10 = vadd.f32 %v7477_v44, %v7476_v45 }
0x2009   :  { %v7483_v22 = vadd.f32 %v7482_v10, %v7478_v49 }
0x200b   :  { %v9630_v59 = vpop.eup %9629  ;;  %7484 = vadd.xlane.f32.xlu0 %v7483_v22 }
0x200c   :  { %v7265_v20 = vsel %vm3643_vm1, %v9630_v59, 0.0 }
0x200d   :  { %7266 = vadd.xlane.f32.xlu1 %v7265_v20 }
0x2098   :  { %v7485_v14 = vpop.xlane.xlu0 %7484 }
0x2099   :  { %v7490_v39 = vmul.f32 0.0026041667, %v7485_v14 }
0x209a   :  { %v7267_v23 = vpop.xlane.xlu1 %7266 }
0x209b   :  { %v7492_v9 = vadd.f32 1e-12, %v7490_v39  ;;  %9631 = vrcp.f32 %v7267_v23 }
0x209d   :  { %9633 = vrsqrt.f32 %v7492_v9 }
0x20a5   :  { %v9632_v0 = vpop.eup %9631 }
0x20a6   :  { %v7269_v2 = vmul.f32 %v9632_v0, %v9630_v59 }
0x20a7   :  { %v9634_v50 = vpop.eup %9633 }
0x20a8   :  { %v7496_v32 = vmul.f32 %v9634_v50, %v7470_v43  ;;  %v7497_v18 = vmul.f32 %v9634_v50, %v7471_v58  ;;  %v7498_v62 = vmul.f32 %v9634_v50, %v7472_v42  ;;  %8642 = vmatmul.mubr.msk.f32.vlgmr.msra.gmra.mrb[92].mxu1 %vm3643_vm1, %v7269_v2 }
0x20a9   :  { %8645 = vmatpush3.bf16.msra.mxu1 %v10526_v51  ;;  %8660 = vmatprep.mubr.msk.bf16.mxu1 %vm9751_vm0, %v11015_v25  ;;  %v11120_v51 = vld [vmem:[#allocation64_spill] sm:$0xff] }
0x20aa   :  { %v7518_v35 = vmul.f32 %v10859_v60, %v7496_v32  ;;  %v7519_v16 = vmul.f32 %v10862_v63, %v7497_v18  ;;  %v7520_v13 = vmul.f32 %v10865_v24, %v7498_v62  ;;  %8646 = vmatprep.subr.bf16.mxu1 %v11015_v25 }
0x20ac   :  { %v7540_v21 = vadd.f32 %v10868_v36, %v7518_v35  ;;  %v7541_v30 = vadd.f32 %v10871_v26, %v7519_v16  ;;  %v7542_v15 = vadd.f32 %v10874_v48, %v7520_v13 }
0x20ad   :  { %8647 = vmatpush3.bf16.msra.mxu1 %v11119_v56 }
0x20ae   :  { %7546 = vst [vmem:[%s10947_s8] sm:$0xff] %v7540_v21  ;;  %7547 = vst [vmem:[%s10947_s8 + $0x8] sm:$0xff] %v7541_v30  ;;  %8648 = vmatprep.subr.bf16.mxu1 %v11015_v25 }
0x20af   :  { %7548 = vst [vmem:[%s10947_s8 + $0x10] sm:$0xff] %v7542_v15 }
0x20b1   :  { %8649 = vmatpush3.bf16.msra.mxu1 %v11120_v51 }
0x20b2   :  { %8650 = vmatprep.subr.bf16.mxu1 %v11015_v25 }
0x20b5   :  { %8651 = vmatpush3.bf16.msra.mxu1 %v11121_v53 }
0x20b6   :  { %8652 = vmatprep.subr.bf16.mxu1 %v11015_v25 }
0x20b9   :  { %8653 = vmatpush3.bf16.msra.mxu1 %v11122_v55 }
0x20ba   :  { %8654 = vmatprep.subr.bf16.mxu1 %v11015_v25 }
0x20bd   :  { %8655 = vmatpush3.bf16.msra.mxu1 %v10548_v31 }
0x20be   :  { %8656 = vmatprep.subr.bf16.mxu1 %v11015_v25 }
0x20c1   :  { %8657 = vmatpush3.bf16.msra.mxu1 %v10552_v33 }
0x20c2   :  { %8658 = vmatprep.subr.bf16.mxu1 %v11015_v25 }
0x20c5   :  { %8659 = vmatpush3.bf16.msra.mxu1 %v10556_v29 }
0x217b   :  { %v7339_v34 = vpop.f32.mrb[92].mxu1 }
0x217c   :  { %v7343_v57 = vpack.c.bf16 %v7339_v34, %v7339_v34  ;;  %v8643_v38 = vpop.f32.mrb[93].mxu1 }
0x217e   :  { %7377 = vmatmul.mubr.bf16.vlgmr.msra.gmra.mrb[80].mxu0 %v7343_v57  ;;  %8661 = vmatmul.mubr.bf16.vlgmr.msra.gmra.mrb[96].mxu1 %v7343_v57 }
0x2251   :  { %v7378_v5 = vpop.f32.mrb[80].mxu0  ;;  %v7419_v8 = vpop.f32.mrb[96].mxu1 }
0x2252   :  { %v7425_v7 = vadd.f32 %v7378_v5, %v10823_v40  ;;  %v7427_v17 = vadd.f32 %v7419_v8, %v10826_v3  ;;  %v7380_v31 = vpop.f32.mrb[81].mxu0  ;;  %v8662_v6 = vpop.f32.mrb[97].mxu1  ;;  %v9692_v40 = vld [vmem:[%s10939_s0 + $0x18] sm:$0xff]  ;;  %v9693_v3 = vld [vmem:[%s10939_s0 + $0x20] sm:$0xff] }
0x2253   :  { %v7426_v54 = vadd.f32 %v7380_v31, %v10833_v4  ;;  %v7382_v33 = vpop.f32.mrb[82].mxu0  ;;  %v7422_v19 = vpop.f32.mrb[98].mxu1 }
0x2254   :  { %v7448_v25 = vadd.f32 %v10817_v37, %v7425_v7  ;;  %v7383_v29 = vpop.f32.mrb[83].mxu0  ;;  %v8663_v1 = vpop.f32.mrb[99].mxu1  ;;  %v7450_v28 = vadd.f32 %v10836_v41, %v7427_v17  ;;  %v9694_v37 = vld [vmem:[%s10939_s0 + $0x28] sm:$0xff] }
0x2255   :  { %v7449_v27 = vadd.f32 %v10820_v11, %v7426_v54 }
0x2256   :  { %v7454_v46 = vadd.f32 %v9692_v40, %v7448_v25  ;;  %v7456_v47 = vadd.f32 %v9694_v37, %v7450_v28 }
0x2257   :  { %v7455_v4 = vadd.f32 %v9693_v3, %v7449_v27 }
0x2259   :  { %v7463_v12 = vadd.f32 %v7455_v4, %v7454_v46 }
0x225b   :  { %v7464_v43 = vadd.f32 %v7463_v12, %v7456_v47 }
0x225d   :  { %7465 = vadd.xlane.f32.xlu1 %v7464_v43 }
0x22ea   :  { %v7466_v41 = vpop.xlane.xlu1 %7465 }
0x22eb   :  { %v7469_v11 = vmul.f32 0.0026041667, %v7466_v41 }
0x22ed   :  { %v7473_v58 = vsub.f32 %v7454_v46, %v7469_v11  ;;  %v7474_v42 = vsub.f32 %v7455_v4, %v7469_v11  ;;  %v7475_v45 = vsub.f32 %v7456_v47, %v7469_v11 }
0x22ef   :  { %v7479_v44 = vmul.f32 %v7473_v58, %v7473_v58  ;;  %v7480_v49 = vmul.f32 %v7474_v42, %v7474_v42  ;;  %v7481_v10 = vmul.f32 %v7475_v45, %v7475_v45 }
0x22f1   :  { %v7486_v22 = vadd.f32 %v7480_v49, %v7479_v44 }
0x22f3   :  { %v7487_v59 = vadd.f32 %v7486_v22, %v7481_v10 }
0x22f5   :  { %7488 = vadd.xlane.f32.xlu1 %v7487_v59 }
0x2382   :  { %v7489_v20 = vpop.xlane.xlu1 %7488 }
0x2383   :  { %v7491_v14 = vmul.f32 0.0026041667, %v7489_v20 }
0x2385   :  { %v7493_v39 = vadd.f32 1e-12, %v7491_v14 }
0x2387   :  { %9635 = vrsqrt.f32 %v7493_v39 }
0x2391   :  { %v9636_v23 = vpop.eup %9635 }
0x2392   :  { %v7499_v9 = vmul.f32 %v9636_v23, %v7473_v58  ;;  %v7500_v61 = vmul.f32 %v9636_v23, %v7474_v42  ;;  %v7501_v52 = vmul.f32 %v9636_v23, %v7475_v45 }
0x2394   :  { %v7521_v0 = vmul.f32 %v10859_v60, %v7499_v9  ;;  %v7522_v2 = vmul.f32 %v10862_v63, %v7500_v61  ;;  %v7523_v50 = vmul.f32 %v10865_v24, %v7501_v52 }
0x2396   :  { %v7543_v32 = vadd.f32 %v10868_v36, %v7521_v0  ;;  %v7544_v18 = vadd.f32 %v10871_v26, %v7522_v2  ;;  %v7545_v62 = vadd.f32 %v10874_v48, %v7523_v50 }
0x2398   :  { %7549 = vst [vmem:[%s10947_s8 + $0x18] sm:$0xff] %v7543_v32  ;;  %7550 = vst [vmem:[%s10947_s8 + $0x20] sm:$0xff] %v7544_v18 }
0x2399   :  { %7551 = vst [vmem:[%s10947_s8 + $0x28] sm:$0xff] %v7545_v62 }
0x239a   :  { %7556 = vsyncpa [#allocation4], 1 }
0x239b   :  { %7557 = vsyncpa [#allocation6], 1 }

// kernel: vuln_classifier_forward.6
= control target key start
LH: loop header
LB: loop body
LE: loop exit
PB: predicated region body
PF: predicated region fallthrough
CT: control target
= control target key end

     0   :  { %s9641_s1 = inlined_call_operand.vmem [shape: bf16[384,1536], index: 1, kind: input, shape index: {}]   ;;  %s9642_s0 = inlined_call_operand.vmem [shape: f32[16,384], index: 0, kind: input, shape index: {}]   ;;  %s9643_s3 = inlined_call_operand.vmem [shape: bf16[1536,384], index: 3, kind: input, shape index: {}]   ;;  %s9644_s2 = inlined_call_operand.vmem [shape: f32[1,1536], index: 2, kind: input, shape index: {}]   ;;  %s9645_s4 = inlined_call_operand.vmem [shape: f32[1,384], index: 4, kind: input, shape index: {}]   ;;  %s9646_s5 = inlined_call_operand.vmem [shape: f32[1,384], index: 5, kind: input, shape index: {}]   ;;  %s9647_s6 = inlined_call_operand.vmem [shape: f32[1,384], index: 6, kind: input, shape index: {}]   ;;  %s9648_s7 = inlined_call_operand.vmem [shape: f32[16,384], index: 7, kind: output, shape index: {}]  }
   0x1   :  { %v6331_v0 = vld [vmem:[%s9641_s1 + $0x4] ss:$48 sps:$4 sm:$0xff]   ;;  %v6333_v1 = vld [vmem:[%s9641_s1] ss:$48 sps:$4 sm:$0xff]   ;;  %v28_v16 = vld [vmem:[%s9642_s0 + $0x8] sm:$0xff] }
   0x2   :  { %1828 = vmatprep.subr.bf16.mxu1 %v6331_v0  ;;  %v6334_v2 = vld [vmem:[%s9641_s1 + $0x64] ss:$48 sps:$4 sm:$0xff]   ;;  %v6336_v3 = vld [vmem:[%s9641_s1 + $0x60] ss:$48 sps:$4 sm:$0xff]   ;;  %v30_v57 = vld [vmem:[%s9642_s0 + $0x18] sm:$0xff] }
   0x3   :  { %1829 = vmatpush1.bf16.msra.mxu1 %v6333_v1  ;;  %v6337_v4 = vld [vmem:[%s9641_s1 + $0xc4] ss:$48 sps:$4 sm:$0xff]   ;;  %v6339_v5 = vld [vmem:[%s9641_s1 + $0xc0] ss:$48 sps:$4 sm:$0xff]  }
   0x4   :  { %1830 = vmatprep.subr.bf16.mxu1 %v6334_v2  ;;  %v6340_v6 = vld [vmem:[%s9641_s1 + $0x124] ss:$48 sps:$4 sm:$0xff]   ;;  %v6342_v7 = vld [vmem:[%s9641_s1 + $0x120] ss:$48 sps:$4 sm:$0xff]  }
   0x5   :  { %v6343_v8 = vld [vmem:[%s9641_s1 + $0x184] ss:$48 sps:$4 sm:$0xff]   ;;  %v6345_v9 = vld [vmem:[%s9641_s1 + $0x180] ss:$48 sps:$4 sm:$0xff]  }
   0x6   :  { %v6346_v10 = vld [vmem:[%s9641_s1 + $0x1e4] ss:$48 sps:$4 sm:$0xff]   ;;  %v6348_v11 = vld [vmem:[%s9641_s1 + $0x1e0] ss:$48 sps:$4 sm:$0xff]  }
   0x7   :  { %1831 = vmatpush1.bf16.msra.mxu1 %v6336_v3  ;;  %v6349_v12 = vld [vmem:[%s9641_s1 + $0x244] ss:$48 sps:$4 sm:$0xff]   ;;  %v6351_v13 = vld [vmem:[%s9641_s1 + $0x240] ss:$48 sps:$4 sm:$0xff]   ;;  %v7255_v3 = vmov 0  }
   0x8   :  { %1832 = vmatprep.subr.bf16.mxu1 %v6337_v4  ;;  %v6379_v14 = vld [vmem:[%s9641_s1 + $0x14] ss:$48 sps:$4 sm:$0xff]   ;;  %v6381_v15 = vld [vmem:[%s9641_s1 + $0x10] ss:$48 sps:$4 sm:$0xff]  }
   0x9   :  { %v31_v17 = vld [vmem:[%s9642_s0 + $0x20] sm:$0xff]  ;;  %2000 = vmatprep.subr.bf16.mxu0 %v6379_v14 }
   0xa   :  { %v6352_v18 = vld [vmem:[%s9641_s1 + $0x2a4] ss:$48 sps:$4 sm:$0xff]   ;;  %v7353_v19 = vpack.c.bf16 %v31_v17, %v28_v16  ;;  %2001 = vmatpush1.bf16.msra.mxu0 %v6381_v15  ;;  %v6387_v21 = vld [vmem:[%s9641_s1 + $0x70] ss:$48 sps:$4 sm:$0xff]  }
   0xb   :  { %1833 = vmatpush1.bf16.msra.mxu1 %v6339_v5  ;;  %v6385_v20 = vld [vmem:[%s9641_s1 + $0x74] ss:$48 sps:$4 sm:$0xff]   ;;  %v6354_v22 = vld [vmem:[%s9641_s1 + $0x2a0] ss:$48 sps:$4 sm:$0xff]  }
   0xc   :  { %1834 = vmatprep.subr.bf16.mxu1 %v6340_v6  ;;  %1860 = vmatprep.mubr.bf16.mxu1 %v7353_v19  ;;  %v6355_v23 = vld [vmem:[%s9641_s1 + $0x304] ss:$48 sps:$4 sm:$0xff]   ;;  %v6393_v25 = vld [vmem:[%s9641_s1 + $0xd0] ss:$48 sps:$4 sm:$0xff]  }
   0xd   :  { %2032 = vmatprep.mubr.bf16.mxu0 %v7353_v19  ;;  %2002 = vmatprep.subr.bf16.mxu0 %v6385_v20  ;;  %v6391_v24 = vld [vmem:[%s9641_s1 + $0xd4] ss:$48 sps:$4 sm:$0xff]   ;;  %v6357_v26 = vld [vmem:[%s9641_s1 + $0x300] ss:$48 sps:$4 sm:$0xff]  }
   0xe   :  { %2003 = vmatpush1.bf16.msra.mxu0 %v6387_v21  ;;  %v6397_v27 = vld [vmem:[%s9641_s1 + $0x134] ss:$48 sps:$4 sm:$0xff]   ;;  %v6399_v29 = vld [vmem:[%s9641_s1 + $0x130] ss:$48 sps:$4 sm:$0xff]  }
   0xf   :  { %1835 = vmatpush1.bf16.msra.mxu1 %v6342_v7  ;;  %2004 = vmatprep.subr.bf16.mxu0 %v6391_v24  ;;  %v6358_v28 = vld [vmem:[%s9641_s1 + $0x364] ss:$48 sps:$4 sm:$0xff]   ;;  %v6360_v31 = vld [vmem:[%s9641_s1 + $0x360] ss:$48 sps:$4 sm:$0xff]  }
  0x10   :  { %1836 = vmatprep.subr.bf16.mxu1 %v6343_v8  ;;  %v6403_v30 = vld [vmem:[%s9641_s1 + $0x194] ss:$48 sps:$4 sm:$0xff]   ;;  %v6405_v33 = vld [vmem:[%s9641_s1 + $0x190] ss:$48 sps:$4 sm:$0xff]  }
  0x11   :  { %v6361_v32 = vld [vmem:[%s9641_s1 + $0x3c4] ss:$48 sps:$4 sm:$0xff]   ;;  %v6363_v35 = vld [vmem:[%s9641_s1 + $0x3c0] ss:$48 sps:$4 sm:$0xff]  }
  0x12   :  { %2005 = vmatpush1.bf16.msra.mxu0 %v6393_v25  ;;  %v6409_v34 = vld [vmem:[%s9641_s1 + $0x1f4] ss:$48 sps:$4 sm:$0xff]   ;;  %v6411_v37 = vld [vmem:[%s9641_s1 + $0x1f0] ss:$48 sps:$4 sm:$0xff]  }
  0x13   :  { %1837 = vmatpush1.bf16.msra.mxu1 %v6345_v9  ;;  %2006 = vmatprep.subr.bf16.mxu0 %v6397_v27  ;;  %v6364_v36 = vld [vmem:[%s9641_s1 + $0x424] ss:$48 sps:$4 sm:$0xff]   ;;  %v6366_v39 = vld [vmem:[%s9641_s1 + $0x420] ss:$48 sps:$4 sm:$0xff]  }
  0x14   :  { %1838 = vmatprep.subr.bf16.mxu1 %v6346_v10  ;;  %v6415_v38 = vld [vmem:[%s9641_s1 + $0x254] ss:$48 sps:$4 sm:$0xff]   ;;  %v6417_v41 = vld [vmem:[%s9641_s1 + $0x250] ss:$48 sps:$4 sm:$0xff]  }
  0x15   :  { %v6367_v40 = vld [vmem:[%s9641_s1 + $0x484] ss:$48 sps:$4 sm:$0xff]   ;;  %v6369_v43 = vld [vmem:[%s9641_s1 + $0x480] ss:$48 sps:$4 sm:$0xff]  }
  0x16   :  { %2007 = vmatpush1.bf16.msra.mxu0 %v6399_v29  ;;  %v6421_v42 = vld [vmem:[%s9641_s1 + $0x2b4] ss:$48 sps:$4 sm:$0xff]   ;;  %v6423_v45 = vld [vmem:[%s9641_s1 + $0x2b0] ss:$48 sps:$4 sm:$0xff]  }
  0x17   :  { %1839 = vmatpush1.bf16.msra.mxu1 %v6348_v11  ;;  %2008 = vmatprep.subr.bf16.mxu0 %v6403_v30  ;;  %v6370_v44 = vld [vmem:[%s9641_s1 + $0x4e4] ss:$48 sps:$4 sm:$0xff]   ;;  %v6372_v47 = vld [vmem:[%s9641_s1 + $0x4e0] ss:$48 sps:$4 sm:$0xff]   ;;  %v32_v30 = vld [vmem:[%s9642_s0 + $0x28] sm:$0xff] }
  0x18   :  { %1840 = vmatprep.subr.bf16.mxu1 %v6349_v12  ;;  %v6427_v46 = vld [vmem:[%s9641_s1 + $0x314] ss:$48 sps:$4 sm:$0xff]   ;;  %v6429_v49 = vld [vmem:[%s9641_s1 + $0x310] ss:$48 sps:$4 sm:$0xff]  }
  0x19   :  { %v6373_v48 = vld [vmem:[%s9641_s1 + $0x544] ss:$48 sps:$4 sm:$0xff]   ;;  %v6375_v51 = vld [vmem:[%s9641_s1 + $0x540] ss:$48 sps:$4 sm:$0xff]  }
  0x1a   :  { %2009 = vmatpush1.bf16.msra.mxu0 %v6405_v33  ;;  %v6433_v50 = vld [vmem:[%s9641_s1 + $0x374] ss:$48 sps:$4 sm:$0xff]   ;;  %v6378_v53 = vld [vmem:[%s9641_s1 + $0x5a0] ss:$48 sps:$4 sm:$0xff]  }
  0x1b   :  { %1841 = vmatpush1.bf16.msra.mxu1 %v6351_v13  ;;  %2010 = vmatprep.subr.bf16.mxu0 %v6409_v34  ;;  %v6376_v52 = vld [vmem:[%s9641_s1 + $0x5a4] ss:$48 sps:$4 sm:$0xff]   ;;  %v6435_v55 = vld [vmem:[%s9641_s1 + $0x370] ss:$48 sps:$4 sm:$0xff]  }
  0x1c   :  { %1842 = vmatprep.subr.bf16.mxu1 %v6352_v18  ;;  %v27_v54 = vld [vmem:[%s9642_s0] sm:$0xff]  ;;  %v29_v27 = vld [vmem:[%s9642_s0 + $0x10] sm:$0xff] }
  0x1d   :  { %v6439_v56 = vld [vmem:[%s9641_s1 + $0x3d4] ss:$48 sps:$4 sm:$0xff]   ;;  %v6441_v59 = vld [vmem:[%s9641_s1 + $0x3d0] ss:$48 sps:$4 sm:$0xff]   ;;  %v7477_v60 = vpack.c.bf16 %v30_v57, %v27_v54  ;;  %v7585_v33 = vpack.c.bf16 %v32_v30, %v29_v27  ;;  %v6516_v27 = vld [vmem:[%s9641_s1 + $0x54c] ss:$48 sps:$4 sm:$0xff]  }
  0x1e   :  { %2011 = vmatpush1.bf16.msra.mxu0 %v6411_v37  ;;  %v6384_v58 = vld [vmem:[%s9641_s1 + $0x604] ss:$48 sps:$4 sm:$0xff]   ;;  %v6382_v62 = vld [vmem:[%s9641_s1 + $0x600] ss:$48 sps:$4 sm:$0xff]   ;;  %v6514_v30 = vld [vmem:[%s9641_s1 + $0x548] ss:$48 sps:$4 sm:$0xff]  }
  0x1f   :  { %1843 = vmatpush1.bf16.msra.mxu1 %v6354_v22  ;;  %2012 = vmatprep.subr.bf16.mxu0 %v6415_v38  ;;  %v6445_v61 = vld [vmem:[%s9641_s1 + $0x434] ss:$48 sps:$4 sm:$0xff]   ;;  %v6447_v0 = vld [vmem:[%s9641_s1 + $0x430] ss:$48 sps:$4 sm:$0xff]  }
  0x20   :  { %1844 = vmatprep.subr.bf16.mxu1 %v6355_v23  ;;  %v6390_v63 = vld [vmem:[%s9641_s1 + $0x664] ss:$48 sps:$4 sm:$0xff]   ;;  %v6388_v2 = vld [vmem:[%s9641_s1 + $0x660] ss:$48 sps:$4 sm:$0xff]  }
  0x21   :  { %v6451_v1 = vld [vmem:[%s9641_s1 + $0x494] ss:$48 sps:$4 sm:$0xff]   ;;  %v6453_v5 = vld [vmem:[%s9641_s1 + $0x490] ss:$48 sps:$4 sm:$0xff]  }
  0x22   :  { %2013 = vmatpush1.bf16.msra.mxu0 %v6417_v41  ;;  %v6396_v4 = vld [vmem:[%s9641_s1 + $0x6c4] ss:$48 sps:$4 sm:$0xff]   ;;  %v6394_v7 = vld [vmem:[%s9641_s1 + $0x6c0] ss:$48 sps:$4 sm:$0xff]  }
  0x23   :  { %1845 = vmatpush1.bf16.msra.mxu1 %v6357_v26  ;;  %2014 = vmatprep.subr.bf16.mxu0 %v6421_v42  ;;  %v6457_v6 = vld [vmem:[%s9641_s1 + $0x4f4] ss:$48 sps:$4 sm:$0xff]   ;;  %v6459_v9 = vld [vmem:[%s9641_s1 + $0x4f0] ss:$48 sps:$4 sm:$0xff]  }
  0x24   :  { %1846 = vmatprep.subr.bf16.mxu1 %v6358_v28  ;;  %v6402_v8 = vld [vmem:[%s9641_s1 + $0x724] ss:$48 sps:$4 sm:$0xff]   ;;  %v6400_v11 = vld [vmem:[%s9641_s1 + $0x720] ss:$48 sps:$4 sm:$0xff]  }
  0x25   :  { %v6463_v10 = vld [vmem:[%s9641_s1 + $0x554] ss:$48 sps:$4 sm:$0xff]   ;;  %v6465_v13 = vld [vmem:[%s9641_s1 + $0x550] ss:$48 sps:$4 sm:$0xff]  }
  0x26   :  { %2015 = vmatpush1.bf16.msra.mxu0 %v6423_v45  ;;  %v6408_v12 = vld [vmem:[%s9641_s1 + $0x784] ss:$48 sps:$4 sm:$0xff]   ;;  %v6406_v15 = vld [vmem:[%s9641_s1 + $0x780] ss:$48 sps:$4 sm:$0xff]  }
  0x27   :  { %1847 = vmatpush1.bf16.msra.mxu1 %v6360_v31  ;;  %2016 = vmatprep.subr.bf16.mxu0 %v6427_v46  ;;  %v6469_v14 = vld [vmem:[%s9641_s1 + $0x5b4] ss:$48 sps:$4 sm:$0xff]   ;;  %v6471_v17 = vld [vmem:[%s9641_s1 + $0x5b0] ss:$48 sps:$4 sm:$0xff]   ;;  %v6432_v31 = vld [vmem:[%s9641_s1 + $0xc] ss:$48 sps:$4 sm:$0xff]  }
  0x28   :  { %1848 = vmatprep.subr.bf16.mxu1 %v6361_v32  ;;  %v6414_v16 = vld [vmem:[%s9641_s1 + $0x7e4] ss:$48 sps:$4 sm:$0xff]   ;;  %v6412_v20 = vld [vmem:[%s9641_s1 + $0x7e0] ss:$48 sps:$4 sm:$0xff]  }
  0x29   :  { %v6477_v18 = vld [vmem:[%s9641_s1 + $0x614] ss:$48 sps:$4 sm:$0xff]   ;;  %v6475_v22 = vld [vmem:[%s9641_s1 + $0x610] ss:$48 sps:$4 sm:$0xff]  }
  0x2a   :  { %2017 = vmatpush1.bf16.msra.mxu0 %v6429_v49  ;;  %v6420_v21 = vld [vmem:[%s9641_s1 + $0x844] ss:$48 sps:$4 sm:$0xff]   ;;  %v6418_v24 = vld [vmem:[%s9641_s1 + $0x840] ss:$48 sps:$4 sm:$0xff]  }
  0x2b   :  { %1849 = vmatpush1.bf16.msra.mxu1 %v6363_v35  ;;  %2018 = vmatprep.subr.bf16.mxu0 %v6433_v50  ;;  %v6483_v23 = vld [vmem:[%s9641_s1 + $0x674] ss:$48 sps:$4 sm:$0xff]   ;;  %v6424_v26 = vld [vmem:[%s9641_s1 + $0x8a0] ss:$48 sps:$4 sm:$0xff]   ;;  %v6430_v35 = vld [vmem:[%s9641_s1 + $0x8] ss:$48 sps:$4 sm:$0xff]  }
  0x2c   :  { %1850 = vmatprep.subr.bf16.mxu1 %v6364_v36  ;;  %v6426_v25 = vld [vmem:[%s9641_s1 + $0x8a4] ss:$48 sps:$4 sm:$0xff]   ;;  %v6481_v28 = vld [vmem:[%s9641_s1 + $0x670] ss:$48 sps:$4 sm:$0xff]   ;;  %v6438_v36 = vld [vmem:[%s9641_s1 + $0x6c] ss:$48 sps:$4 sm:$0xff]  }
  0x2d   :  { %v6489_v29 = vld [vmem:[%s9641_s1 + $0x6d4] ss:$48 sps:$4 sm:$0xff]   ;;  %v6487_v32 = vld [vmem:[%s9641_s1 + $0x6d0] ss:$48 sps:$4 sm:$0xff]  }
  0x2e   :  { %2019 = vmatpush1.bf16.msra.mxu0 %v6435_v55  ;;  %v6495_v34 = vld [vmem:[%s9641_s1 + $0x734] ss:$48 sps:$4 sm:$0xff]   ;;  %v6493_v37 = vld [vmem:[%s9641_s1 + $0x730] ss:$48 sps:$4 sm:$0xff]   ;;  %v6460_v55 = vld [vmem:[%s9641_s1 + $0x1e8] ss:$48 sps:$4 sm:$0xff]  }
  0x2f   :  { %1851 = vmatpush1.bf16.msra.mxu1 %v6366_v39  ;;  %2020 = vmatprep.subr.bf16.mxu0 %v6439_v56  ;;  %v6501_v38 = vld [vmem:[%s9641_s1 + $0x794] ss:$48 sps:$4 sm:$0xff]   ;;  %v6436_v39 = vld [vmem:[%s9641_s1 + $0x68] ss:$48 sps:$4 sm:$0xff]   ;;  %v6499_v41 = vld [vmem:[%s9641_s1 + $0x790] ss:$48 sps:$4 sm:$0xff]  }
  0x30   :  { %1852 = vmatprep.subr.bf16.mxu1 %v6367_v40  ;;  %v6444_v40 = vld [vmem:[%s9641_s1 + $0xcc] ss:$48 sps:$4 sm:$0xff]   ;;  %v6507_v42 = vld [vmem:[%s9641_s1 + $0x7f4] ss:$48 sps:$4 sm:$0xff]   ;;  %v6505_v45 = vld [vmem:[%s9641_s1 + $0x7f0] ss:$48 sps:$4 sm:$0xff]  }
  0x31   :  { %v6513_v46 = vld [vmem:[%s9641_s1 + $0x854] ss:$48 sps:$4 sm:$0xff]   ;;  %v6511_v49 = vld [vmem:[%s9641_s1 + $0x850] ss:$48 sps:$4 sm:$0xff]   ;;  %v6468_v56 = vld [vmem:[%s9641_s1 + $0x24c] ss:$48 sps:$4 sm:$0xff]  }
  0x32   :  { %2021 = vmatpush1.bf16.msra.mxu0 %v6441_v59  ;;  %v6519_v50 = vld [vmem:[%s9641_s1 + $0x8b4] ss:$48 sps:$4 sm:$0xff]   ;;  %v6523_v57 = vld [vmem:[%s9641_s1 + $0x20] ss:$48 sps:$4 sm:$0xff]   ;;  %v6466_v59 = vld [vmem:[%s9641_s1 + $0x248] ss:$48 sps:$4 sm:$0xff]  }
  0x33   :  { %1853 = vmatpush1.bf16.msra.mxu1 %v6369_v43  ;;  %2022 = vmatprep.subr.bf16.mxu0 %v6445_v61  ;;  %v6442_v43 = vld [vmem:[%s9641_s1 + $0xc8] ss:$48 sps:$4 sm:$0xff]   ;;  %v6525_v54 = vld [vmem:[%s9641_s1 + $0x24] ss:$48 sps:$4 sm:$0xff]   ;;  %v6474_v61 = vld [vmem:[%s9641_s1 + $0x2ac] ss:$48 sps:$4 sm:$0xff]  }
  0x34   :  { %1854 = vmatprep.subr.bf16.mxu1 %v6370_v44  ;;  %v6450_v44 = vld [vmem:[%s9641_s1 + $0x12c] ss:$48 sps:$4 sm:$0xff]  }
  0x36   :  { %2023 = vmatpush1.bf16.msra.mxu0 %v6447_v0  ;;  %v6472_v0 = vld [vmem:[%s9641_s1 + $0x2a8] ss:$48 sps:$4 sm:$0xff]  }
  0x37   :  { %1855 = vmatpush1.bf16.msra.mxu1 %v6372_v47  ;;  %2024 = vmatprep.subr.bf16.mxu0 %v6451_v1  ;;  %v6448_v47 = vld [vmem:[%s9641_s1 + $0x128] ss:$48 sps:$4 sm:$0xff]   ;;  %v6480_v1 = vld [vmem:[%s9641_s1 + $0x30c] ss:$48 sps:$4 sm:$0xff]  }
  0x38   :  { %1856 = vmatprep.subr.bf16.mxu1 %v6373_v48  ;;  %v6456_v48 = vld [vmem:[%s9641_s1 + $0x18c] ss:$48 sps:$4 sm:$0xff]  }
  0x3a   :  { %2025 = vmatpush1.bf16.msra.mxu0 %v6453_v5  ;;  %v6478_v5 = vld [vmem:[%s9641_s1 + $0x308] ss:$48 sps:$4 sm:$0xff]  }
  0x3b   :  { %1857 = vmatpush1.bf16.msra.mxu1 %v6375_v51  ;;  %2026 = vmatprep.subr.bf16.mxu0 %v6457_v6  ;;  %v6454_v51 = vld [vmem:[%s9641_s1 + $0x188] ss:$48 sps:$4 sm:$0xff]   ;;  %v6486_v6 = vld [vmem:[%s9641_s1 + $0x36c] ss:$48 sps:$4 sm:$0xff]  }
  0x3c   :  { %1858 = vmatprep.subr.bf16.mxu1 %v6376_v52  ;;  %v6462_v52 = vld [vmem:[%s9641_s1 + $0x1ec] ss:$48 sps:$4 sm:$0xff]  }
  0x3e   :  { %2027 = vmatpush1.bf16.msra.mxu0 %v6459_v9  ;;  %v6484_v9 = vld [vmem:[%s9641_s1 + $0x368] ss:$48 sps:$4 sm:$0xff]  }
  0x3f   :  { %1859 = vmatpush1.bf16.msra.mxu1 %v6378_v53  ;;  %2028 = vmatprep.subr.bf16.mxu0 %v6463_v10  ;;  %v6517_v53 = vld [vmem:[%s9641_s1 + $0x8b0] ss:$48 sps:$4 sm:$0xff]   ;;  %v6492_v10 = vld [vmem:[%s9641_s1 + $0x3cc] ss:$48 sps:$4 sm:$0xff]  }
  0x40   :  { %1871 = vmatprep.subr.bf16.mxu1 %v6384_v58  ;;  %v6531_v58 = vld [vmem:[%s9641_s1 + $0x84] ss:$48 sps:$4 sm:$0xff]  }
  0x42   :  { %1861 = vmatmul.mubr.bf16.vlgmr.msra.gmra.mrb[0].mxu1 %v7477_v60  ;;  %2029 = vmatpush1.bf16.msra.mxu0 %v6465_v13  ;;  %v6490_v13 = vld [vmem:[%s9641_s1 + $0x3c8] ss:$48 sps:$4 sm:$0xff]  }
  0x43   :  { %1872 = vmatpush1.bf16.msra.mxu1 %v6382_v62  ;;  %1903 = vmatprep.mubr.bf16.mxu1 %v7255_v3  ;;  %v6529_v62 = vld [vmem:[%s9641_s1 + $0x80] ss:$48 sps:$4 sm:$0xff]  }
  0x44   :  { %1873 = vmatprep.subr.bf16.mxu1 %v6390_v63  ;;  %2030 = vmatprep.subr.bf16.mxu0 %v6469_v14  ;;  %v6537_v63 = vld [vmem:[%s9641_s1 + $0xe4] ss:$48 sps:$4 sm:$0xff]   ;;  %v6498_v14 = vld [vmem:[%s9641_s1 + $0x42c] ss:$48 sps:$4 sm:$0xff]  }
  0x46   :  { %2031 = vmatpush1.bf16.msra.mxu0 %v6471_v17  ;;  %v6496_v17 = vld [vmem:[%s9641_s1 + $0x428] ss:$48 sps:$4 sm:$0xff]  }
  0x47   :  { %1874 = vmatpush1.bf16.msra.mxu1 %v6388_v2  ;;  %2043 = vmatprep.subr.bf16.mxu0 %v6477_v18  ;;  %v6535_v2 = vld [vmem:[%s9641_s1 + $0xe0] ss:$48 sps:$4 sm:$0xff]   ;;  %v6504_v18 = vld [vmem:[%s9641_s1 + $0x48c] ss:$48 sps:$4 sm:$0xff]  }
  0x48   :  { %1875 = vmatprep.subr.bf16.mxu1 %v6396_v4  ;;  %v6543_v4 = vld [vmem:[%s9641_s1 + $0x144] ss:$48 sps:$4 sm:$0xff]  }
  0x49   :  { %2033 = vmatmul.mubr.bf16.vlgmr.msra.gmra.mrb[0].mxu0 %v7477_v60 }
  0x4a   :  { %2044 = vmatpush1.bf16.msra.mxu0 %v6475_v22  ;;  %2075 = vmatprep.mubr.bf16.mxu0 %v7255_v3  ;;  %v6502_v22 = vld [vmem:[%s9641_s1 + $0x488] ss:$48 sps:$4 sm:$0xff]  }
  0x4b   :  { %1876 = vmatpush1.bf16.msra.mxu1 %v6394_v7  ;;  %2045 = vmatprep.subr.bf16.mxu0 %v6483_v23  ;;  %v6541_v7 = vld [vmem:[%s9641_s1 + $0x140] ss:$48 sps:$4 sm:$0xff]   ;;  %v6510_v23 = vld [vmem:[%s9641_s1 + $0x4ec] ss:$48 sps:$4 sm:$0xff]  }
  0x4c   :  { %1877 = vmatprep.subr.bf16.mxu1 %v6402_v8  ;;  %v6549_v8 = vld [vmem:[%s9641_s1 + $0x1a4] ss:$48 sps:$4 sm:$0xff]  }
  0x4e   :  { %2046 = vmatpush1.bf16.msra.mxu0 %v6481_v28  ;;  %v6571_v28 = vld [vmem:[%s9641_s1 + $0x320] ss:$48 sps:$4 sm:$0xff]  }
  0x4f   :  { %1878 = vmatpush1.bf16.msra.mxu1 %v6400_v11  ;;  %2047 = vmatprep.subr.bf16.mxu0 %v6489_v29  ;;  %v6547_v11 = vld [vmem:[%s9641_s1 + $0x1a0] ss:$48 sps:$4 sm:$0xff]   ;;  %v6579_v29 = vld [vmem:[%s9641_s1 + $0x384] ss:$48 sps:$4 sm:$0xff]  }
  0x50   :  { %1879 = vmatprep.subr.bf16.mxu1 %v6408_v12  ;;  %v6555_v12 = vld [vmem:[%s9641_s1 + $0x204] ss:$48 sps:$4 sm:$0xff]  }
  0x52   :  { %2048 = vmatpush1.bf16.msra.mxu0 %v6487_v32  ;;  %v6577_v32 = vld [vmem:[%s9641_s1 + $0x380] ss:$48 sps:$4 sm:$0xff]  }
  0x53   :  { %1880 = vmatpush1.bf16.msra.mxu1 %v6406_v15  ;;  %2049 = vmatprep.subr.bf16.mxu0 %v6495_v34  ;;  %v6553_v15 = vld [vmem:[%s9641_s1 + $0x200] ss:$48 sps:$4 sm:$0xff]   ;;  %v6585_v34 = vld [vmem:[%s9641_s1 + $0x3e4] ss:$48 sps:$4 sm:$0xff]  }
  0x54   :  { %1881 = vmatprep.subr.bf16.mxu1 %v6414_v16  ;;  %v6561_v16 = vld [vmem:[%s9641_s1 + $0x264] ss:$48 sps:$4 sm:$0xff]  }
  0x56   :  { %2050 = vmatpush1.bf16.msra.mxu0 %v6493_v37  ;;  %v6583_v37 = vld [vmem:[%s9641_s1 + $0x3e0] ss:$48 sps:$4 sm:$0xff]  }
  0x57   :  { %1882 = vmatpush1.bf16.msra.mxu1 %v6412_v20  ;;  %2051 = vmatprep.subr.bf16.mxu0 %v6501_v38  ;;  %v6559_v20 = vld [vmem:[%s9641_s1 + $0x260] ss:$48 sps:$4 sm:$0xff]   ;;  %v6591_v38 = vld [vmem:[%s9641_s1 + $0x444] ss:$48 sps:$4 sm:$0xff]  }
  0x58   :  { %1883 = vmatprep.subr.bf16.mxu1 %v6420_v21  ;;  %v6567_v21 = vld [vmem:[%s9641_s1 + $0x2c4] ss:$48 sps:$4 sm:$0xff]  }
  0x5a   :  { %2052 = vmatpush1.bf16.msra.mxu0 %v6499_v41  ;;  %v6532_v41 = vld [vmem:[%s9641_s1 + $0x668] ss:$48 sps:$4 sm:$0xff]  }
  0x5b   :  { %1884 = vmatpush1.bf16.msra.mxu1 %v6418_v24  ;;  %2053 = vmatprep.subr.bf16.mxu0 %v6507_v42  ;;  %v6565_v24 = vld [vmem:[%s9641_s1 + $0x2c0] ss:$48 sps:$4 sm:$0xff]  }
  0x5c   :  { %1885 = vmatprep.subr.bf16.mxu1 %v6426_v25  ;;  %v6573_v25 = vld [vmem:[%s9641_s1 + $0x324] ss:$48 sps:$4 sm:$0xff]   ;;  %v6589_v42 = vld [vmem:[%s9641_s1 + $0x440] ss:$48 sps:$4 sm:$0xff]  }
  0x5e   :  { %2054 = vmatpush1.bf16.msra.mxu0 %v6505_v45  ;;  %v6595_v45 = vld [vmem:[%s9641_s1 + $0x4a0] ss:$48 sps:$4 sm:$0xff]  }
  0x5f   :  { %1886 = vmatpush1.bf16.msra.mxu1 %v6424_v26  ;;  %2055 = vmatprep.subr.bf16.mxu0 %v6513_v46  ;;  %v6508_v26 = vld [vmem:[%s9641_s1 + $0x4e8] ss:$48 sps:$4 sm:$0xff]   ;;  %v6603_v46 = vld [vmem:[%s9641_s1 + $0x504] ss:$48 sps:$4 sm:$0xff]  }
  0x60   :  { %1914 = vmatprep.subr.bf16.mxu1 %v6432_v31  ;;  %v6522_v31 = vld [vmem:[%s9641_s1 + $0x5ac] ss:$48 sps:$4 sm:$0xff]  }
  0x62   :  { %1904 = vmatmul.mubr.bf16.vlgmr.msra.gmra.mrb[0].mxu1 %v7585_v33  ;;  %2056 = vmatpush1.bf16.msra.mxu0 %v6511_v49  ;;  %v6601_v49 = vld [vmem:[%s9641_s1 + $0x500] ss:$48 sps:$4 sm:$0xff]  }
  0x63   :  { %1915 = vmatpush1.bf16.msra.mxu1 %v6430_v35  ;;  %1946 = vmatprep.mubr.bf16.mxu1 %v7353_v19  ;;  %v6520_v35 = vld [vmem:[%s9641_s1 + $0x5a8] ss:$48 sps:$4 sm:$0xff]  }
  0x64   :  { %1916 = vmatprep.subr.bf16.mxu1 %v6438_v36  ;;  %2057 = vmatprep.subr.bf16.mxu0 %v6519_v50  ;;  %v6528_v36 = vld [vmem:[%s9641_s1 + $0x60c] ss:$48 sps:$4 sm:$0xff]   ;;  %v6609_v50 = vld [vmem:[%s9641_s1 + $0x564] ss:$48 sps:$4 sm:$0xff]  }
  0x66   :  { %2058 = vmatpush1.bf16.msra.mxu0 %v6517_v53  ;;  %v6607_v53 = vld [vmem:[%s9641_s1 + $0x560] ss:$48 sps:$4 sm:$0xff]  }
  0x67   :  { %1917 = vmatpush1.bf16.msra.mxu1 %v6436_v39  ;;  %2172 = vmatprep.subr.bf16.mxu0 %v6525_v54  ;;  %v6526_v39 = vld [vmem:[%s9641_s1 + $0x608] ss:$48 sps:$4 sm:$0xff]   ;;  %v6615_v54 = vld [vmem:[%s9641_s1 + $0x5c4] ss:$48 sps:$4 sm:$0xff]  }
  0x68   :  { %1918 = vmatprep.subr.bf16.mxu1 %v6444_v40  ;;  %v6534_v40 = vld [vmem:[%s9641_s1 + $0x66c] ss:$48 sps:$4 sm:$0xff]  }
  0x69   :  { %2076 = vmatmul.mubr.bf16.vlgmr.msra.gmra.mrb[0].mxu0 %v7585_v33 }
  0x6a   :  { %2173 = vmatpush1.bf16.msra.mxu0 %v6523_v57  ;;  %2204 = vmatprep.mubr.bf16.mxu0 %v7353_v19  ;;  %v6613_v57 = vld [vmem:[%s9641_s1 + $0x5c0] ss:$48 sps:$4 sm:$0xff]  }
  0x6b   :  { %1919 = vmatpush1.bf16.msra.mxu1 %v6442_v43  ;;  %2174 = vmatprep.subr.bf16.mxu0 %v6531_v58  ;;  %v6597_v43 = vld [vmem:[%s9641_s1 + $0x4a4] ss:$48 sps:$4 sm:$0xff]  }
  0x6c   :  { %1920 = vmatprep.subr.bf16.mxu1 %v6450_v44  ;;  %v6540_v44 = vld [vmem:[%s9641_s1 + $0x6cc] ss:$48 sps:$4 sm:$0xff]   ;;  %v6621_v58 = vld [vmem:[%s9641_s1 + $0x624] ss:$48 sps:$4 sm:$0xff]  }
  0x6e   :  { %2175 = vmatpush1.bf16.msra.mxu0 %v6529_v62  ;;  %v6562_v62 = vld [vmem:[%s9641_s1 + $0x848] ss:$48 sps:$4 sm:$0xff]  }
  0x6f   :  { %1921 = vmatpush1.bf16.msra.mxu1 %v6448_v47  ;;  %2176 = vmatprep.subr.bf16.mxu0 %v6537_v63  ;;  %v6538_v47 = vld [vmem:[%s9641_s1 + $0x6c8] ss:$48 sps:$4 sm:$0xff]   ;;  %v6619_v63 = vld [vmem:[%s9641_s1 + $0x620] ss:$48 sps:$4 sm:$0xff]  }
  0x70   :  { %1922 = vmatprep.subr.bf16.mxu1 %v6456_v48  ;;  %v6546_v48 = vld [vmem:[%s9641_s1 + $0x72c] ss:$48 sps:$4 sm:$0xff]  }
  0x72   :  { %2177 = vmatpush1.bf16.msra.mxu0 %v6535_v2  ;;  %v6625_v2 = vld [vmem:[%s9641_s1 + $0x680] ss:$48 sps:$4 sm:$0xff]  }
  0x73   :  { %1923 = vmatpush1.bf16.msra.mxu1 %v6454_v51  ;;  %2178 = vmatprep.subr.bf16.mxu0 %v6543_v4  ;;  %v6544_v51 = vld [vmem:[%s9641_s1 + $0x728] ss:$48 sps:$4 sm:$0xff]   ;;  %v6633_v4 = vld [vmem:[%s9641_s1 + $0x6e4] ss:$48 sps:$4 sm:$0xff]  }
  0x74   :  { %1924 = vmatprep.subr.bf16.mxu1 %v6462_v52  ;;  %v6552_v52 = vld [vmem:[%s9641_s1 + $0x78c] ss:$48 sps:$4 sm:$0xff]  }
  0x76   :  { %2179 = vmatpush1.bf16.msra.mxu0 %v6541_v7  ;;  %v6631_v7 = vld [vmem:[%s9641_s1 + $0x6e0] ss:$48 sps:$4 sm:$0xff]  }
  0x77   :  { %1925 = vmatpush1.bf16.msra.mxu1 %v6460_v55  ;;  %2180 = vmatprep.subr.bf16.mxu0 %v6549_v8  ;;  %v6550_v55 = vld [vmem:[%s9641_s1 + $0x788] ss:$48 sps:$4 sm:$0xff]   ;;  %v6639_v8 = vld [vmem:[%s9641_s1 + $0x744] ss:$48 sps:$4 sm:$0xff]  }
  0x78   :  { %1926 = vmatprep.subr.bf16.mxu1 %v6468_v56  ;;  %v6558_v56 = vld [vmem:[%s9641_s1 + $0x7ec] ss:$48 sps:$4 sm:$0xff]  }
  0x7a   :  { %2181 = vmatpush1.bf16.msra.mxu0 %v6547_v11  ;;  %v6637_v11 = vld [vmem:[%s9641_s1 + $0x740] ss:$48 sps:$4 sm:$0xff]  }
  0x7b   :  { %1927 = vmatpush1.bf16.msra.mxu1 %v6466_v59  ;;  %2182 = vmatprep.subr.bf16.mxu0 %v6555_v12  ;;  %v6556_v59 = vld [vmem:[%s9641_s1 + $0x7e8] ss:$48 sps:$4 sm:$0xff]   ;;  %v6645_v12 = vld [vmem:[%s9641_s1 + $0x7a4] ss:$48 sps:$4 sm:$0xff]  }
  0x7c   :  { %1928 = vmatprep.subr.bf16.mxu1 %v6474_v61  ;;  %v6564_v61 = vld [vmem:[%s9641_s1 + $0x84c] ss:$48 sps:$4 sm:$0xff]  }
  0x7e   :  { %2183 = vmatpush1.bf16.msra.mxu0 %v6553_v15  ;;  %v6643_v15 = vld [vmem:[%s9641_s1 + $0x7a0] ss:$48 sps:$4 sm:$0xff]  }
  0x7f   :  { %1929 = vmatpush1.bf16.msra.mxu1 %v6472_v0  ;;  %2184 = vmatprep.subr.bf16.mxu0 %v6561_v16  ;;  %v6627_v0 = vld [vmem:[%s9641_s1 + $0x684] ss:$48 sps:$4 sm:$0xff]  }
  0x80   :  { %1930 = vmatprep.subr.bf16.mxu1 %v6480_v1  ;;  %v6570_v1 = vld [vmem:[%s9641_s1 + $0x8ac] ss:$48 sps:$4 sm:$0xff]   ;;  %v6651_v16 = vld [vmem:[%s9641_s1 + $0x804] ss:$48 sps:$4 sm:$0xff]  }
  0x82   :  { %2185 = vmatpush1.bf16.msra.mxu0 %v6559_v20  ;;  %v6649_v20 = vld [vmem:[%s9641_s1 + $0x800] ss:$48 sps:$4 sm:$0xff]  }
  0x83   :  { %1931 = vmatpush1.bf16.msra.mxu1 %v6478_v5  ;;  %2186 = vmatprep.subr.bf16.mxu0 %v6567_v21  ;;  %v6568_v5 = vld [vmem:[%s9641_s1 + $0x8a8] ss:$48 sps:$4 sm:$0xff]   ;;  %v6657_v21 = vld [vmem:[%s9641_s1 + $0x864] ss:$48 sps:$4 sm:$0xff]  }
  0x84   :  { %1932 = vmatprep.subr.bf16.mxu1 %v6486_v6  ;;  %v6576_v6 = vld [vmem:[%s9641_s1 + $0x1c] ss:$48 sps:$4 sm:$0xff]  }
  0x86   :  { %2187 = vmatpush1.bf16.msra.mxu0 %v6565_v24  ;;  %v6655_v24 = vld [vmem:[%s9641_s1 + $0x860] ss:$48 sps:$4 sm:$0xff]  }
  0x87   :  { %1933 = vmatpush1.bf16.msra.mxu1 %v6484_v9  ;;  %2188 = vmatprep.subr.bf16.mxu0 %v6573_v25  ;;  %v6574_v9 = vld [vmem:[%s9641_s1 + $0x18] ss:$48 sps:$4 sm:$0xff]   ;;  %v6663_v25 = vld [vmem:[%s9641_s1 + $0x8c4] ss:$48 sps:$4 sm:$0xff]  }
  0x88   :  { %1934 = vmatprep.subr.bf16.mxu1 %v6492_v10  ;;  %v6582_v10 = vld [vmem:[%s9641_s1 + $0x7c] ss:$48 sps:$4 sm:$0xff]  }
  0x8a   :  { %2189 = vmatpush1.bf16.msra.mxu0 %v6571_v28  ;;  %v6661_v28 = vld [vmem:[%s9641_s1 + $0x8c0] ss:$48 sps:$4 sm:$0xff]  }
  0x8b   :  { %1935 = vmatpush1.bf16.msra.mxu1 %v6490_v13  ;;  %2190 = vmatprep.subr.bf16.mxu0 %v6579_v29  ;;  %v6580_v13 = vld [vmem:[%s9641_s1 + $0x78] ss:$48 sps:$4 sm:$0xff]   ;;  %v6705_v29 = vld [vmem:[%s9643_s3 + $0x4] ss:$12 sps:$4 sm:$0xff]  }
  0x8c   :  { %1936 = vmatprep.subr.bf16.mxu1 %v6498_v14  ;;  %v6588_v14 = vld [vmem:[%s9641_s1 + $0xdc] ss:$48 sps:$4 sm:$0xff]  }
  0x8e   :  { %2191 = vmatpush1.bf16.msra.mxu0 %v6577_v32  ;;  %v6703_v32 = vld [vmem:[%s9643_s3] ss:$12 sps:$4 sm:$0xff]  }
  0x8f   :  { %1937 = vmatpush1.bf16.msra.mxu1 %v6496_v17  ;;  %2192 = vmatprep.subr.bf16.mxu0 %v6585_v34  ;;  %v6586_v17 = vld [vmem:[%s9641_s1 + $0xd8] ss:$48 sps:$4 sm:$0xff]  }
  0x90   :  { %1938 = vmatprep.subr.bf16.mxu1 %v6504_v18  ;;  %v6594_v18 = vld [vmem:[%s9641_s1 + $0x13c] ss:$48 sps:$4 sm:$0xff]  }
  0x91   :  { %v6711_v34 = vld [vmem:[%s9643_s3 + $0x1c] ss:$12 sps:$4 sm:$0xff]  }
  0x92   :  { %2193 = vmatpush1.bf16.msra.mxu0 %v6583_v37  ;;  %v6709_v37 = vld [vmem:[%s9643_s3 + $0x18] ss:$12 sps:$4 sm:$0xff]  }
  0x93   :  { %1939 = vmatpush1.bf16.msra.mxu1 %v6502_v22  ;;  %2194 = vmatprep.subr.bf16.mxu0 %v6591_v38  ;;  %v6592_v22 = vld [vmem:[%s9641_s1 + $0x138] ss:$48 sps:$4 sm:$0xff]   ;;  %v6717_v38 = vld [vmem:[%s9643_s3 + $0x34] ss:$12 sps:$4 sm:$0xff]  }
  0x94   :  { %1940 = vmatprep.subr.bf16.mxu1 %v6510_v23  ;;  %v6600_v23 = vld [vmem:[%s9641_s1 + $0x19c] ss:$48 sps:$4 sm:$0xff]  }
  0x96   :  { %2195 = vmatpush1.bf16.msra.mxu0 %v6589_v42  ;;  %v6723_v42 = vld [vmem:[%s9643_s3 + $0x4c] ss:$12 sps:$4 sm:$0xff]  }
  0x97   :  { %1941 = vmatpush1.bf16.msra.mxu1 %v6508_v26  ;;  %2196 = vmatprep.subr.bf16.mxu0 %v6597_v43  ;;  %v6598_v26 = vld [vmem:[%s9641_s1 + $0x198] ss:$48 sps:$4 sm:$0xff]  }
  0x98   :  { %1942 = vmatprep.subr.bf16.mxu1 %v6516_v27  ;;  %v6606_v27 = vld [vmem:[%s9641_s1 + $0x1fc] ss:$48 sps:$4 sm:$0xff]   ;;  %v6622_v43 = vld [vmem:[%s9641_s1 + $0x318] ss:$48 sps:$4 sm:$0xff]  }
  0x9a   :  { %2197 = vmatpush1.bf16.msra.mxu0 %v6595_v45  ;;  %v6721_v45 = vld [vmem:[%s9643_s3 + $0x48] ss:$12 sps:$4 sm:$0xff]  }
  0x9b   :  { %1943 = vmatpush1.bf16.msra.mxu1 %v6514_v30  ;;  %2198 = vmatprep.subr.bf16.mxu0 %v6603_v46  ;;  %v6604_v30 = vld [vmem:[%s9641_s1 + $0x1f8] ss:$48 sps:$4 sm:$0xff]   ;;  %v6729_v46 = vld [vmem:[%s9643_s3 + $0x64] ss:$12 sps:$4 sm:$0xff]  }
  0x9c   :  { %1944 = vmatprep.subr.bf16.mxu1 %v6522_v31  ;;  %v6612_v31 = vld [vmem:[%s9641_s1 + $0x25c] ss:$48 sps:$4 sm:$0xff]  }
  0x9e   :  { %2199 = vmatpush1.bf16.msra.mxu0 %v6601_v49  ;;  %v6727_v49 = vld [vmem:[%s9643_s3 + $0x60] ss:$12 sps:$4 sm:$0xff]  }
  0x9f   :  { %1945 = vmatpush1.bf16.msra.mxu1 %v6520_v35  ;;  %2200 = vmatprep.subr.bf16.mxu0 %v6609_v50  ;;  %v6610_v35 = vld [vmem:[%s9641_s1 + $0x258] ss:$48 sps:$4 sm:$0xff]  }
  0xa0   :  { %1957 = vmatprep.subr.bf16.mxu1 %v6528_v36  ;;  %v6618_v36 = vld [vmem:[%s9641_s1 + $0x2bc] ss:$48 sps:$4 sm:$0xff]  }
  0xa1   :  { %v6735_v50 = vld [vmem:[%s9643_s3 + $0x7c] ss:$12 sps:$4 sm:$0xff]  }
  0xa2   :  { %1947 = vmatmul.mubr.bf16.vlgmr.msra.gmra.mrb[4].mxu1 %v7477_v60  ;;  %2201 = vmatpush1.bf16.msra.mxu0 %v6607_v53  ;;  %v6733_v53 = vld [vmem:[%s9643_s3 + $0x78] ss:$12 sps:$4 sm:$0xff]  }
  0xa3   :  { %1958 = vmatpush1.bf16.msra.mxu1 %v6526_v39  ;;  %1989 = vmatprep.mubr.bf16.mxu1 %v7255_v3  ;;  %v6616_v39 = vld [vmem:[%s9641_s1 + $0x2b8] ss:$48 sps:$4 sm:$0xff]  }
  0xa4   :  { %1959 = vmatprep.subr.bf16.mxu1 %v6534_v40  ;;  %2202 = vmatprep.subr.bf16.mxu0 %v6615_v54  ;;  %v6624_v40 = vld [vmem:[%s9641_s1 + $0x31c] ss:$48 sps:$4 sm:$0xff]   ;;  %v6741_v54 = vld [vmem:[%s9643_s3 + $0x94] ss:$12 sps:$4 sm:$0xff]  }
  0xa6   :  { %2203 = vmatpush1.bf16.msra.mxu0 %v6613_v57  ;;  %v6739_v57 = vld [vmem:[%s9643_s3 + $0x90] ss:$12 sps:$4 sm:$0xff]  }
  0xa7   :  { %1960 = vmatpush1.bf16.msra.mxu1 %v6532_v41  ;;  %2215 = vmatprep.subr.bf16.mxu0 %v6621_v58  ;;  %v6715_v41 = vld [vmem:[%s9643_s3 + $0x30] ss:$12 sps:$4 sm:$0xff]   ;;  %v6747_v58 = vld [vmem:[%s9643_s3 + $0xac] ss:$12 sps:$4 sm:$0xff]  }
  0xa8   :  { %1961 = vmatprep.subr.bf16.mxu1 %v6540_v44  ;;  %v6630_v44 = vld [vmem:[%s9641_s1 + $0x37c] ss:$48 sps:$4 sm:$0xff]  }
  0xa9   :  { %2205 = vmatmul.mubr.bf16.vlgmr.msra.gmra.mrb[4].mxu0 %v7477_v60 }
  0xaa   :  { %2216 = vmatpush1.bf16.msra.mxu0 %v6619_v63  ;;  %2247 = vmatprep.mubr.bf16.mxu0 %v7255_v3  ;;  %v6753_v63 = vld [vmem:[%s9643_s3 + $0xc4] ss:$12 sps:$4 sm:$0xff]  }
  0xab   :  { %1962 = vmatpush1.bf16.msra.mxu1 %v6538_v47  ;;  %2217 = vmatprep.subr.bf16.mxu0 %v6627_v0  ;;  %v6628_v47 = vld [vmem:[%s9641_s1 + $0x378] ss:$48 sps:$4 sm:$0xff]  }
  0xac   :  { %1963 = vmatprep.subr.bf16.mxu1 %v6546_v48  ;;  %v6636_v48 = vld [vmem:[%s9641_s1 + $0x3dc] ss:$48 sps:$4 sm:$0xff]   ;;  %v6652_v0 = vld [vmem:[%s9641_s1 + $0x4f8] ss:$48 sps:$4 sm:$0xff]  }
  0xae   :  { %2218 = vmatpush1.bf16.msra.mxu0 %v6625_v2  ;;  %v6751_v2 = vld [vmem:[%s9643_s3 + $0xc0] ss:$12 sps:$4 sm:$0xff]  }
  0xaf   :  { %1964 = vmatpush1.bf16.msra.mxu1 %v6544_v51  ;;  %2219 = vmatprep.subr.bf16.mxu0 %v6633_v4  ;;  %v6634_v51 = vld [vmem:[%s9641_s1 + $0x3d8] ss:$48 sps:$4 sm:$0xff]  }
  0xb0   :  { %1965 = vmatprep.subr.bf16.mxu1 %v6552_v52  ;;  %v6642_v52 = vld [vmem:[%s9641_s1 + $0x43c] ss:$48 sps:$4 sm:$0xff]  }
  0xb1   :  { %v6759_v4 = vld [vmem:[%s9643_s3 + $0xdc] ss:$12 sps:$4 sm:$0xff]  }
  0xb2   :  { %2220 = vmatpush1.bf16.msra.mxu0 %v6631_v7  ;;  %v6757_v7 = vld [vmem:[%s9643_s3 + $0xd8] ss:$12 sps:$4 sm:$0xff]  }
  0xb3   :  { %1966 = vmatpush1.bf16.msra.mxu1 %v6550_v55  ;;  %2221 = vmatprep.subr.bf16.mxu0 %v6639_v8  ;;  %v6640_v55 = vld [vmem:[%s9641_s1 + $0x438] ss:$48 sps:$4 sm:$0xff]   ;;  %v6765_v8 = vld [vmem:[%s9643_s3 + $0xf4] ss:$12 sps:$4 sm:$0xff]  }
  0xb4   :  { %1967 = vmatprep.subr.bf16.mxu1 %v6558_v56  ;;  %v6648_v56 = vld [vmem:[%s9641_s1 + $0x49c] ss:$48 sps:$4 sm:$0xff]  }
  0xb6   :  { %2222 = vmatpush1.bf16.msra.mxu0 %v6637_v11  ;;  %v6763_v11 = vld [vmem:[%s9643_s3 + $0xf0] ss:$12 sps:$4 sm:$0xff]  }
  0xb7   :  { %1968 = vmatpush1.bf16.msra.mxu1 %v6556_v59  ;;  %2223 = vmatprep.subr.bf16.mxu0 %v6645_v12  ;;  %v6646_v59 = vld [vmem:[%s9641_s1 + $0x498] ss:$48 sps:$4 sm:$0xff]  }
  0xb8   :  { %1969 = vmatprep.subr.bf16.mxu1 %v6564_v61  ;;  %v6654_v61 = vld [vmem:[%s9641_s1 + $0x4fc] ss:$48 sps:$4 sm:$0xff]  }
  0xb9   :  { %v6771_v12 = vld [vmem:[%s9643_s3 + $0x10c] ss:$12 sps:$4 sm:$0xff]  }
  0xba   :  { %2224 = vmatpush1.bf16.msra.mxu0 %v6643_v15  ;;  %v6769_v15 = vld [vmem:[%s9643_s3 + $0x108] ss:$12 sps:$4 sm:$0xff]  }
  0xbb   :  { %1970 = vmatpush1.bf16.msra.mxu1 %v6562_v62  ;;  %2225 = vmatprep.subr.bf16.mxu0 %v6651_v16  ;;  %v6745_v62 = vld [vmem:[%s9643_s3 + $0xa8] ss:$12 sps:$4 sm:$0xff]   ;;  %v6777_v16 = vld [vmem:[%s9643_s3 + $0x124] ss:$12 sps:$4 sm:$0xff]  }
  0xbc   :  { %1971 = vmatprep.subr.bf16.mxu1 %v6570_v1  ;;  %v6660_v1 = vld [vmem:[%s9641_s1 + $0x55c] ss:$48 sps:$4 sm:$0xff]  }
  0xbe   :  { %2226 = vmatpush1.bf16.msra.mxu0 %v6649_v20  ;;  %v6775_v20 = vld [vmem:[%s9643_s3 + $0x120] ss:$12 sps:$4 sm:$0xff]  }
  0xbf   :  { %1972 = vmatpush1.bf16.msra.mxu1 %v6568_v5  ;;  %2227 = vmatprep.subr.bf16.mxu0 %v6657_v21  ;;  %v6658_v5 = vld [vmem:[%s9641_s1 + $0x558] ss:$48 sps:$4 sm:$0xff]  }
  0xc0   :  { %2086 = vmatprep.subr.bf16.mxu1 %v6576_v6  ;;  %v6666_v6 = vld [vmem:[%s9641_s1 + $0x5bc] ss:$48 sps:$4 sm:$0xff]  }
  0xc1   :  { %v6783_v21 = vld [vmem:[%s9643_s3 + $0x13c] ss:$12 sps:$4 sm:$0xff]  }
  0xc2   :  { %1990 = vmatmul.mubr.bf16.vlgmr.msra.gmra.mrb[4].mxu1 %v7585_v33  ;;  %2228 = vmatpush1.bf16.msra.mxu0 %v6655_v24  ;;  %v6781_v24 = vld [vmem:[%s9643_s3 + $0x138] ss:$12 sps:$4 sm:$0xff]  }
  0xc3   :  { %2087 = vmatpush1.bf16.msra.mxu1 %v6574_v9  ;;  %2118 = vmatprep.mubr.bf16.mxu1 %v7353_v19  ;;  %v6664_v9 = vld [vmem:[%s9641_s1 + $0x5b8] ss:$48 sps:$4 sm:$0xff]  }
  0xc4   :  { %2088 = vmatprep.subr.bf16.mxu1 %v6582_v10  ;;  %2229 = vmatprep.subr.bf16.mxu0 %v6663_v25  ;;  %v6669_v10 = vld [vmem:[%s9641_s1 + $0x61c] ss:$48 sps:$4 sm:$0xff]   ;;  %v6789_v25 = vld [vmem:[%s9643_s3 + $0x154] ss:$12 sps:$4 sm:$0xff]  }
  0xc6   :  { %2230 = vmatpush1.bf16.msra.mxu0 %v6661_v28  ;;  %v6787_v28 = vld [vmem:[%s9643_s3 + $0x150] ss:$12 sps:$4 sm:$0xff]  }
  0xc7   :  { %2089 = vmatpush1.bf16.msra.mxu1 %v6580_v13  ;;  %4941 = vmatprep.subr.bf16.mxu0 %v6705_v29  ;;  %v6667_v13 = vld [vmem:[%s9641_s1 + $0x618] ss:$48 sps:$4 sm:$0xff]  }
  0xc8   :  { %2090 = vmatprep.subr.bf16.mxu1 %v6588_v14  ;;  %v6672_v14 = vld [vmem:[%s9641_s1 + $0x67c] ss:$48 sps:$4 sm:$0xff]  }
  0xc9   :  { %2248 = vmatmul.mubr.bf16.vlgmr.msra.gmra.mrb[4].mxu0 %v7585_v33  ;;  %v6795_v29 = vld [vmem:[%s9643_s3 + $0x16c] ss:$12 sps:$4 sm:$0xff]  }
  0xca   :  { %4942 = vmatpush1.bf16.msra.mxu0 %v6703_v32  ;;  %v6793_v32 = vld [vmem:[%s9643_s3 + $0x168] ss:$12 sps:$4 sm:$0xff]  }
  0xcb   :  { %2091 = vmatpush1.bf16.msra.mxu1 %v6586_v17  ;;  %4943 = vmatprep.subr.bf16.mxu0 %v6711_v34  ;;  %v6670_v17 = vld [vmem:[%s9641_s1 + $0x678] ss:$48 sps:$4 sm:$0xff]   ;;  %v6819_v34 = vld [vmem:[%s9643_s3 + $0x184] ss:$12 sps:$4 sm:$0xff]  }
  0xcc   :  { %2092 = vmatprep.subr.bf16.mxu1 %v6594_v18  ;;  %v6675_v18 = vld [vmem:[%s9641_s1 + $0x6dc] ss:$48 sps:$4 sm:$0xff]  }
  0xce   :  { %4944 = vmatpush1.bf16.msra.mxu0 %v6709_v37  ;;  %v6685_v37 = vld [vmem:[%s9641_s1 + $0x858] ss:$48 sps:$4 sm:$0xff]  }
  0xcf   :  { %2093 = vmatpush1.bf16.msra.mxu1 %v6592_v22  ;;  %4945 = vmatprep.subr.bf16.mxu0 %v6717_v38  ;;  %v6673_v22 = vld [vmem:[%s9641_s1 + $0x6d8] ss:$48 sps:$4 sm:$0xff]   ;;  %v6690_v38 = vld [vmem:[%s9641_s1 + $0x8bc] ss:$48 sps:$4 sm:$0xff]  }
  0xd0   :  { %2094 = vmatprep.subr.bf16.mxu1 %v6600_v23  ;;  %v6678_v23 = vld [vmem:[%s9641_s1 + $0x73c] ss:$48 sps:$4 sm:$0xff]  }
  0xd2   :  { %4946 = vmatpush1.bf16.msra.mxu0 %v6715_v41  ;;  %v6691_v41 = vld [vmem:[%s9641_s1 + $0x28] ss:$48 sps:$4 sm:$0xff]  }
  0xd3   :  { %2095 = vmatpush1.bf16.msra.mxu1 %v6598_v26  ;;  %4947 = vmatprep.subr.bf16.mxu0 %v6723_v42  ;;  %v6676_v26 = vld [vmem:[%s9641_s1 + $0x738] ss:$48 sps:$4 sm:$0xff]   ;;  %v6696_v42 = vld [vmem:[%s9641_s1 + $0x8c] ss:$48 sps:$4 sm:$0xff]  }
  0xd4   :  { %2096 = vmatprep.subr.bf16.mxu1 %v6606_v27  ;;  %v6681_v27 = vld [vmem:[%s9641_s1 + $0x79c] ss:$48 sps:$4 sm:$0xff]  }
  0xd6   :  { %4948 = vmatpush1.bf16.msra.mxu0 %v6721_v45  ;;  %v6697_v45 = vld [vmem:[%s9641_s1 + $0xe8] ss:$48 sps:$4 sm:$0xff]  }
  0xd7   :  { %2097 = vmatpush1.bf16.msra.mxu1 %v6604_v30  ;;  %4949 = vmatprep.subr.bf16.mxu0 %v6729_v46  ;;  %v6679_v30 = vld [vmem:[%s9641_s1 + $0x798] ss:$48 sps:$4 sm:$0xff]   ;;  %v328_v46 = vlaneseq }
  0xd8   :  { %2098 = vmatprep.subr.bf16.mxu1 %v6612_v31  ;;  %v6684_v31 = vld [vmem:[%s9641_s1 + $0x7fc] ss:$48 sps:$4 sm:$0xff]  }
  0xda   :  { %4950 = vmatpush1.bf16.msra.mxu0 %v6727_v49  ;;  %v8184_v49 = vshrl.u32 %v328_v46, 7 }
  0xdb   :  { %2099 = vmatpush1.bf16.msra.mxu1 %v6610_v35  ;;  %4951 = vmatprep.subr.bf16.mxu0 %v6735_v50  ;;  %v6682_v35 = vld [vmem:[%s9641_s1 + $0x7f8] ss:$48 sps:$4 sm:$0xff]  }
  0xdc   :  { %2100 = vmatprep.subr.bf16.mxu1 %v6618_v36  ;;  %v6687_v36 = vld [vmem:[%s9641_s1 + $0x85c] ss:$48 sps:$4 sm:$0xff]   ;;  %v6706_v50 = vld [vmem:[%s9641_s1 + $0x1a8] ss:$48 sps:$4 sm:$0xff]  }
  0xde   :  { %4952 = vmatpush1.bf16.msra.mxu0 %v6733_v53  ;;  %v8201_v53 = vsub.s32 1, %v8184_v49 }
  0xdf   :  { %2101 = vmatpush1.bf16.msra.mxu1 %v6616_v39  ;;  %4953 = vmatprep.subr.bf16.mxu0 %v6741_v54  ;;  %v6688_v39 = vld [vmem:[%s9641_s1 + $0x8b8] ss:$48 sps:$4 sm:$0xff]   ;;  %v6714_v54 = vld [vmem:[%s9641_s1 + $0x20c] ss:$48 sps:$4 sm:$0xff]  }
  0xe0   :  { %2102 = vmatprep.subr.bf16.mxu1 %v6624_v40  ;;  %v6693_v40 = vld [vmem:[%s9641_s1 + $0x2c] ss:$48 sps:$4 sm:$0xff]  }
  0xe2   :  { %4954 = vmatpush1.bf16.msra.mxu0 %v6739_v57  ;;  %v6712_v57 = vld [vmem:[%s9641_s1 + $0x208] ss:$48 sps:$4 sm:$0xff]  }
  0xe3   :  { %2103 = vmatpush1.bf16.msra.mxu1 %v6622_v43  ;;  %4955 = vmatprep.subr.bf16.mxu0 %v6747_v58  ;;  %v6694_v43 = vld [vmem:[%s9641_s1 + $0x88] ss:$48 sps:$4 sm:$0xff]   ;;  %v6720_v58 = vld [vmem:[%s9641_s1 + $0x26c] ss:$48 sps:$4 sm:$0xff]  }
  0xe4   :  { %2104 = vmatprep.subr.bf16.mxu1 %v6630_v44  ;;  %v6699_v44 = vld [vmem:[%s9641_s1 + $0xec] ss:$48 sps:$4 sm:$0xff]  }
  0xe6   :  { %4956 = vmatpush1.bf16.msra.mxu0 %v6745_v62 }
  0xe7   :  { %2105 = vmatpush1.bf16.msra.mxu1 %v6628_v47  ;;  %4957 = vmatprep.subr.bf16.mxu0 %v6753_v63  ;;  %v6702_v47 = vld [vmem:[%s9641_s1 + $0x14c] ss:$48 sps:$4 sm:$0xff]  }
  0xe8   :  { %2106 = vmatprep.subr.bf16.mxu1 %v6636_v48  ;;  %v6700_v48 = vld [vmem:[%s9641_s1 + $0x148] ss:$48 sps:$4 sm:$0xff]  }
  0xea   :  { %4958 = vmatpush1.bf16.msra.mxu0 %v6751_v2  ;;  %v6726_v2 = vld [vmem:[%s9641_s1 + $0x2cc] ss:$48 sps:$4 sm:$0xff]  }
  0xeb   :  { %2107 = vmatpush1.bf16.msra.mxu1 %v6634_v51  ;;  %4959 = vmatprep.subr.bf16.mxu0 %v6759_v4  ;;  %v8193_v51 = vsub.s32 0, %v8184_v49 }
  0xec   :  { %2108 = vmatprep.subr.bf16.mxu1 %v6642_v52  ;;  %v8198_v52 = vld [vmem:[%s9644_s2] sm:$0xff] }
  0xee   :  { %4960 = vmatpush1.bf16.msra.mxu0 %v6757_v7 }
  0xef   :  { %2109 = vmatpush1.bf16.msra.mxu1 %v6640_v55  ;;  %4961 = vmatprep.subr.bf16.mxu0 %v6765_v8  ;;  %v331_v55 = vrot.slane %v8198_v52, %v8193_v51 }
  0xf0   :  { %2110 = vmatprep.subr.bf16.mxu1 %v6648_v56  ;;  %v335_v56 = vrot.slane %v8198_v52, %v8201_v53 }
  0xf2   :  { %4962 = vmatpush1.bf16.msra.mxu0 %v6763_v11 }
  0xf3   :  { %2111 = vmatpush1.bf16.msra.mxu1 %v6646_v59  ;;  %4963 = vmatprep.subr.bf16.mxu0 %v6771_v12 }
  0xf4   :  { %2112 = vmatprep.subr.bf16.mxu1 %v6654_v61 }
  0xf6   :  { %4964 = vmatpush1.bf16.msra.mxu0 %v6769_v15 }
  0xf7   :  { %2113 = vmatpush1.bf16.msra.mxu1 %v6652_v0  ;;  %4965 = vmatprep.subr.bf16.mxu0 %v6777_v16  ;;  %v6732_v16 = vld [vmem:[%s9641_s1 + $0x32c] ss:$48 sps:$4 sm:$0xff]  }
  0xf8   :  { %2114 = vmatprep.subr.bf16.mxu1 %v6660_v1  ;;  %v6718_v1 = vld [vmem:[%s9641_s1 + $0x268] ss:$48 sps:$4 sm:$0xff]  }
  0xfa   :  { %4966 = vmatpush1.bf16.msra.mxu0 %v6775_v20 }
  0xfb   :  { %2115 = vmatpush1.bf16.msra.mxu1 %v6658_v5  ;;  %4967 = vmatprep.subr.bf16.mxu0 %v6783_v21 }
  0xfc   :  { %2116 = vmatprep.subr.bf16.mxu1 %v6666_v6 }
  0xfe   :  { %4968 = vmatpush1.bf16.msra.mxu0 %v6781_v24  ;;  %v6730_v24 = vld [vmem:[%s9641_s1 + $0x328] ss:$48 sps:$4 sm:$0xff]  }
  0xff   :  { %2117 = vmatpush1.bf16.msra.mxu1 %v6664_v9  ;;  %4969 = vmatprep.subr.bf16.mxu0 %v6789_v25 }
 0x100   :  { %2129 = vmatprep.subr.bf16.mxu1 %v6669_v10 }
 0x102   :  { %2119 = vmatmul.mubr.bf16.vlgmr.msra.gmra.mrb[8].mxu1 %v7477_v60  ;;  %4970 = vmatpush1.bf16.msra.mxu0 %v6787_v28 }
 0x103   :  { %2130 = vmatpush1.bf16.msra.mxu1 %v6667_v13  ;;  %2161 = vmatprep.mubr.bf16.mxu1 %v7255_v3  ;;  %v6724_v13 = vld [vmem:[%s9641_s1 + $0x2c8] ss:$48 sps:$4 sm:$0xff]  }
 0x104   :  { %2131 = vmatprep.subr.bf16.mxu1 %v6672_v14  ;;  %4971 = vmatprep.subr.bf16.mxu0 %v6795_v29 }
 0x106   :  { %4972 = vmatpush1.bf16.msra.mxu0 %v6793_v32  ;;  %v6744_v32 = vld [vmem:[%s9641_s1 + $0x3ec] ss:$48 sps:$4 sm:$0xff]  }
 0x107   :  { %2132 = vmatpush1.bf16.msra.mxu1 %v6670_v17  ;;  %4984 = vmatprep.subr.bf16.mxu0 %v6819_v34  ;;  %v346_v34 = vsub.s32 4, %v8184_v49 }
 0x108   :  { %2133 = vmatprep.subr.bf16.mxu1 %v6675_v18 }
 0x10b   :  { %2134 = vmatpush1.bf16.msra.mxu1 %v6673_v22 }
 0x10c   :  { %2135 = vmatprep.subr.bf16.mxu1 %v6678_v23 }
 0x10f   :  { %2136 = vmatpush1.bf16.msra.mxu1 %v6676_v26  ;;  %v6738_v26 = vld [vmem:[%s9641_s1 + $0x38c] ss:$48 sps:$4 sm:$0xff]  }
 0x110   :  { %2137 = vmatprep.subr.bf16.mxu1 %v6681_v27 }
 0x113   :  { %2138 = vmatpush1.bf16.msra.mxu1 %v6679_v30  ;;  %v6736_v30 = vld [vmem:[%s9641_s1 + $0x388] ss:$48 sps:$4 sm:$0xff]  }
 0x114   :  { %2139 = vmatprep.subr.bf16.mxu1 %v6684_v31 }
 0x117   :  { %2140 = vmatpush1.bf16.msra.mxu1 %v6682_v35  ;;  %v350_v35 = vsub.s32 5, %v8184_v49 }
 0x118   :  { %2141 = vmatprep.subr.bf16.mxu1 %v6687_v36 }
 0x11b   :  { %2142 = vmatpush1.bf16.msra.mxu1 %v6685_v37 }
 0x11c   :  { %2143 = vmatprep.subr.bf16.mxu1 %v6690_v38  ;;  %v6742_v38 = vld [vmem:[%s9641_s1 + $0x3e8] ss:$48 sps:$4 sm:$0xff]  }
 0x11f   :  { %2144 = vmatpush1.bf16.msra.mxu1 %v6688_v39  ;;  %v6750_v39 = vld [vmem:[%s9641_s1 + $0x44c] ss:$48 sps:$4 sm:$0xff]  }
 0x120   :  { %2258 = vmatprep.subr.bf16.mxu1 %v6693_v40 }
 0x122   :  { %2162 = vmatmul.mubr.bf16.vlgmr.msra.gmra.mrb[8].mxu1 %v7585_v33 }
 0x123   :  { %2259 = vmatpush1.bf16.msra.mxu1 %v6691_v41  ;;  %2290 = vmatprep.mubr.bf16.mxu1 %v7353_v19  ;;  %v6708_v19 = vld [vmem:[%s9641_s1 + $0x1ac] ss:$48 sps:$4 sm:$0xff]   ;;  %v347_v41 = vrot.slane %v8198_v52, %v346_v34 }
 0x124   :  { %2260 = vmatprep.subr.bf16.mxu1 %v6696_v42  ;;  %v6748_v42 = vld [vmem:[%s9641_s1 + $0x448] ss:$48 sps:$4 sm:$0xff]   ;;  %v6768_v34 = vld [vmem:[%s9641_s1 + $0x56c] ss:$48 sps:$4 sm:$0xff]  }
 0x127   :  { %2261 = vmatpush1.bf16.msra.mxu1 %v6694_v43  ;;  %v8277_v43 = vrot.slane %v8198_v52, %v350_v35 }
 0x128   :  { %2262 = vmatprep.subr.bf16.mxu1 %v6699_v44 }
 0x12b   :  { %2263 = vmatpush1.bf16.msra.mxu1 %v6697_v45 }
 0x12c   :  { %2264 = vmatprep.subr.bf16.mxu1 %v6702_v47  ;;  %v6756_v47 = vld [vmem:[%s9641_s1 + $0x4ac] ss:$48 sps:$4 sm:$0xff]  }
 0x12f   :  { %2265 = vmatpush1.bf16.msra.mxu1 %v6700_v48 }
 0x130   :  { %2266 = vmatprep.subr.bf16.mxu1 %v6708_v19 }
 0x133   :  { %2267 = vmatpush1.bf16.msra.mxu1 %v6706_v50 }
 0x134   :  { %2268 = vmatprep.subr.bf16.mxu1 %v6714_v54 }
 0x135   :  { %v1905_v59 = vpop.f32.mrb[0].mxu1 }
 0x136   :  { %v8216_v61 = vadd.f32 %v1905_v59, %v331_v55  ;;  %v1907_v62 = vpop.f32.mrb[1].mxu1  ;;  %v6754_v59 = vld [vmem:[%s9641_s1 + $0x4a8] ss:$48 sps:$4 sm:$0xff]  }
 0x137   :  { %v8218_v63 = vadd.f32 %v1907_v62, %v335_v56  ;;  %v1909_v0 = vpop.f32.mrb[2].mxu1  ;;  %2269 = vmatpush1.bf16.msra.mxu1 %v6712_v57 }
 0x138   :  { %v8227_v4 = vmul.f32 0.70710677, %v8216_v61  ;;  %v8229_v5 = vadd.f32 %v1909_v0, %v331_v55  ;;  %v1911_v6 = vpop.f32.mrb[3].mxu1  ;;  %2270 = vmatprep.subr.bf16.mxu1 %v6720_v58 }
 0x139   :  { %v8232_v7 = vmul.f32 0.70710677, %v8218_v63  ;;  %v8234_v8 = vadd.f32 %v1911_v6, %v335_v56 }
 0x13a   :  { %v2368_v9 = vand.u32 2147483647, %v8227_v4  ;;  %v8238_v10 = vmul.f32 0.70710677, %v8229_v5  ;;  %vm2848_vm0 = vcmp.ge.f32.partialorder %v8227_v4, 0.0 }
 0x13b   :  { %v2369_v11 = vand.u32 2147483647, %v8232_v7  ;;  %v8242_v12 = vmul.f32 0.70710677, %v8234_v8  ;;  %2271 = vmatpush1.bf16.msra.mxu1 %v6718_v1  ;;  %vm2849_vm1 = vcmp.ge.f32.partialorder %v8232_v7, 0.0 }
 0x13c   :  { %v2392_v14 = vmul.f32 0.3275911, %v2368_v9  ;;  %v2380_v15 = vand.u32 2147483647, %v8238_v10  ;;  %2272 = vmatprep.subr.bf16.mxu1 %v6726_v2  ;;  %v2704_v27 = vsub.f32 0.0, %v2368_v9  ;;  %v2077_v54 = vpop.f32.mrb[0].mxu0 }
 0x13d   :  { %v2393_v17 = vmul.f32 0.3275911, %v2369_v11  ;;  %v2381_v18 = vand.u32 2147483647, %v8242_v12  ;;  %v2705_v29 = vsub.f32 0.0, %v2369_v11  ;;  %v8288_v52 = vadd.f32 %v2077_v54, %v347_v41  ;;  %v2079_v57 = vpop.f32.mrb[1].mxu0 }
 0x13e   :  { %v2416_v20 = vadd.f32 1.0, %v2392_v14  ;;  %v2404_v21 = vmul.f32 0.3275911, %v2380_v15  ;;  %v2716_v31 = vsub.f32 0.0, %v2380_v15  ;;  %v2728_v36 = vmul.f32 %v2704_v27, %v2368_v9  ;;  %v2081_v0 = vpop.f32.mrb[2].mxu0 }
 0x13f   :  { %v2417_v22 = vadd.f32 1.0, %v2393_v17  ;;  %v2405_v23 = vmul.f32 0.3275911, %v2381_v18  ;;  %2273 = vmatpush1.bf16.msra.mxu1 %v6724_v13  ;;  %v2729_v37 = vmul.f32 %v2705_v29, %v2369_v11  ;;  %v2717_v46 = vsub.f32 0.0, %v2381_v18  ;;  %v6762_v9 = vld [vmem:[%s9641_s1 + $0x50c] ss:$48 sps:$4 sm:$0xff]  }
 0x140   :  { %7147 = vrcp.f32 %v2416_v20  ;;  %v2428_v25 = vadd.f32 1.0, %v2404_v21  ;;  %2274 = vmatprep.subr.bf16.mxu1 %v6732_v16  ;;  %v2740_v40 = vmul.f32 %v2716_v31, %v2380_v15  ;;  %v2752_v45 = vmul.f32 1.442695, %v2728_v36  ;;  %v2083_v14 = vpop.f32.mrb[3].mxu0 }
 0x141   :  { %7149 = vrcp.f32 %v2417_v22  ;;  %v2429_v28 = vadd.f32 1.0, %v2405_v23  ;;  %v2754_v50 = vmul.f32 1.442695, %v2729_v37  ;;  %v8294_v62 = vadd.f32 %v2079_v57, %v8277_v43 }
 0x142   :  { %7151 = vrcp.f32 %v2428_v25  ;;  %v2776_v56 = vmul.f32 1.442695, %v2740_v40  ;;  %v2741_v6 = vmul.f32 %v2717_v46, %v2381_v18  ;;  %v8302_v11 = vmul.f32 0.70710677, %v8288_v52 }
 0x143   :  { %2275 = vmatpush1.bf16.msra.mxu1 %v6730_v24  ;;  %7153 = vrcp.f32 %v2429_v28  ;;  %v8304_v13 = vadd.f32 %v2081_v0, %v347_v41  ;;  %v8309_v17 = vmul.f32 0.70710677, %v8294_v62  ;;  %vm2860_vm2 = vcmp.ge.f32.partialorder %v8238_v10, 0.0 }
 0x144   :  { %2276 = vmatprep.subr.bf16.mxu1 %v6738_v26  ;;  %7155 = vpow2.f32 %v2752_v45  ;;  %v2372_v21 = vand.u32 2147483647, %v8302_v11  ;;  %v6760_v26 = vld [vmem:[%s9641_s1 + $0x508] ss:$48 sps:$4 sm:$0xff]   ;;  %v2778_v28 = vmul.f32 1.442695, %v2741_v6 }
 0x145   :  { %v8316_v22 = vmul.f32 0.70710677, %v8304_v13  ;;  %7157 = vpow2.f32 %v2754_v50  ;;  %v2373_v35 = vand.u32 2147483647, %v8309_v17  ;;  %vm2861_vm3 = vcmp.ge.f32.partialorder %v8242_v12, 0.0 }
 0x146   :  { %7159 = vpow2.f32 %v2776_v56  ;;  %v2396_v29 = vmul.f32 0.3275911, %v2372_v21  ;;  %vm2852_vm4 = vcmp.ge.f32.partialorder %v8302_v11, 0.0  ;;  %v6808_v11 = vld [vmem:[%s9641_s1 + $0x8c8] ss:$48 sps:$4 sm:$0xff]   ;;  %vm2853_vm6 = vcmp.ge.f32.partialorder %v8309_v17, 0.0 }
 0x147   :  { %2277 = vmatpush1.bf16.msra.mxu1 %v6736_v30  ;;  %v2397_v45 = vmul.f32 0.3275911, %v2373_v35  ;;  %vm2864_vm5 = vcmp.ge.f32.partialorder %v8316_v22, 0.0  ;;  %v6815_v17 = vld [vmem:[%s9643_s3 + $0xf8] ss:$12 sps:$4 sm:$0xff]  }
 0x148   :  { %2278 = vmatprep.subr.bf16.mxu1 %v6744_v32  ;;  %v2420_v37 = vadd.f32 1.0, %v2396_v29 }
 0x149   :  { %v2421_v56 = vadd.f32 1.0, %v2397_v45 }
 0x14a   :  { %v8279_v44 = vpop.eup %7147  ;;  %7161 = vrcp.f32 %v2420_v37  ;;  %v8368_v37 = vmul.f32 0.5, %v8229_v5  ;;  %v6786_v5 = vld [vmem:[%s9641_s1 + $0x68c] ss:$48 sps:$4 sm:$0xff]  }
 0x14b   :  { %v8284_v48 = vpop.eup %7149  ;;  %v2488_v19 = vmul.f32 1.0614054, %v8279_v44  ;;  %2279 = vmatpush1.bf16.msra.mxu1 %v6742_v38  ;;  %v2708_v38 = vsub.f32 0.0, %v2372_v21  ;;  %7163 = vpow2.f32 %v2778_v28 }
 0x14c   :  { %v2489_v55 = vmul.f32 1.0614054, %v8284_v48  ;;  %2280 = vmatprep.subr.bf16.mxu1 %v6750_v39  ;;  %v8296_v1 = vpop.eup %7151  ;;  %v8330_v39 = vand.u32 2147483647, %v8316_v22  ;;  %7165 = vrcp.f32 %v2421_v56 }
 0x14d   :  { %v2512_v58 = vadd.f32 -1.4531521, %v2488_v19  ;;  %v2500_v16 = vmul.f32 1.0614054, %v8296_v1  ;;  %v8311_v20 = vpop.eup %7153 }
 0x14e   :  { %v2513_v2 = vadd.f32 -1.4531521, %v2489_v55  ;;  %v2501_v25 = vmul.f32 1.0614054, %v8311_v20  ;;  %v6766_v55 = vld [vmem:[%s9641_s1 + $0x568] ss:$48 sps:$4 sm:$0xff]  }
 0x14f   :  { %v2536_v15 = vmul.f32 %v8279_v44, %v2512_v58  ;;  %2281 = vmatpush1.bf16.msra.mxu1 %v6748_v42  ;;  %v2524_v24 = vadd.f32 -1.4531521, %v2500_v16  ;;  %v6774_v58 = vld [vmem:[%s9641_s1 + $0x5cc] ss:$48 sps:$4 sm:$0xff]   ;;  %v2408_v0 = vmul.f32 0.3275911, %v8330_v39 }
 0x150   :  { %v2537_v18 = vmul.f32 %v8284_v48, %v2513_v2  ;;  %2282 = vmatprep.subr.bf16.mxu1 %v6756_v47  ;;  %v2525_v32 = vadd.f32 -1.4531521, %v2501_v25  ;;  %v2709_v47 = vsub.f32 0.0, %v2373_v35  ;;  %v8348_v25 = vadd.f32 %v2083_v14, %v8277_v43 }
 0x151   :  { %v2560_v23 = vadd.f32 1.4214138, %v2536_v15  ;;  %v2548_v31 = vmul.f32 %v8296_v1, %v2524_v24  ;;  %v7156_v15 = vpop.eup %7155  ;;  %v2432_v24 = vadd.f32 1.0, %v2408_v0  ;;  %v8361_v14 = vmul.f32 0.5, %v8218_v63 }
 0x152   :  { %v2561_v27 = vadd.f32 1.4214138, %v2537_v18  ;;  %v2549_v42 = vmul.f32 %v8311_v20, %v2525_v32  ;;  %v6772_v18 = vld [vmem:[%s9641_s1 + $0x5c8] ss:$48 sps:$4 sm:$0xff]  }
 0x153   :  { %v2584_v30 = vmul.f32 %v8279_v44, %v2560_v23  ;;  %2283 = vmatpush1.bf16.msra.mxu1 %v6754_v59  ;;  %v2572_v41 = vadd.f32 1.4214138, %v2548_v31  ;;  %v2732_v59 = vmul.f32 %v2708_v38, %v2372_v21  ;;  %v2733_v23 = vmul.f32 %v2709_v47, %v2373_v35  ;;  %v6778_v35 = vld [vmem:[%s9641_s1 + $0x628] ss:$48 sps:$4 sm:$0xff]  }
 0x154   :  { %v2585_v36 = vmul.f32 %v8284_v48, %v2561_v27  ;;  %2284 = vmatprep.subr.bf16.mxu1 %v6762_v9  ;;  %v2573_v54 = vadd.f32 1.4214138, %v2549_v42  ;;  %v8352_v27 = vmul.f32 0.5, %v8216_v61  ;;  %7167 = vrcp.f32 %v2432_v24 }
 0x155   :  { %v2608_v40 = vadd.f32 -0.28449672, %v2584_v30  ;;  %v2596_v50 = vmul.f32 %v8296_v1, %v2572_v41  ;;  %v6780_v30 = vld [vmem:[%s9641_s1 + $0x62c] ss:$48 sps:$4 sm:$0xff]   ;;  %v2762_v38 = vmul.f32 1.442695, %v2733_v23 }
 0x156   :  { %v2609_v46 = vadd.f32 -0.28449672, %v2585_v36  ;;  %v2597_v9 = vmul.f32 %v8311_v20, %v2573_v54 }
 0x157   :  { %v2632_v19 = vmul.f32 %v8279_v44, %v2608_v40  ;;  %2285 = vmatpush1.bf16.msra.mxu1 %v6760_v26  ;;  %v2620_v6 = vadd.f32 -0.28449672, %v2596_v50  ;;  %v7158_v26 = vpop.eup %7157 }
 0x158   :  { %v2633_v57 = vmul.f32 %v8284_v48, %v2609_v46  ;;  %2286 = vmatprep.subr.bf16.mxu1 %v6768_v34  ;;  %v2621_v29 = vadd.f32 -0.28449672, %v2597_v9  ;;  %v7160_v31 = vpop.eup %7159  ;;  %v2720_v46 = vsub.f32 0.0, %v8330_v39 }
 0x159   :  { %v2656_v2 = vadd.f32 0.2548296, %v2632_v19  ;;  %v2644_v28 = vmul.f32 %v8296_v1, %v2620_v6  ;;  %v8375_v42 = vpop.eup %7161 }
 0x15a   :  { %v2657_v16 = vadd.f32 0.2548296, %v2633_v57  ;;  %v2645_v34 = vmul.f32 %v8311_v20, %v2621_v29  ;;  %v2492_v54 = vmul.f32 1.0614054, %v8375_v42  ;;  %v2933_v57 = vmul.f32 0.5, %v8234_v8 }
 0x15b   :  { %v2680_v21 = vmul.f32 %v8279_v44, %v2656_v2  ;;  %2287 = vmatpush1.bf16.msra.mxu1 %v6766_v55  ;;  %v2760_v44 = vmul.f32 1.442695, %v2732_v59  ;;  %v2668_v32 = vadd.f32 0.2548296, %v2644_v28  ;;  %v7164_v55 = vpop.eup %7163  ;;  %v6792_v8 = vld [vmem:[%s9641_s1 + $0x6ec] ss:$48 sps:$4 sm:$0xff]  }
 0x15c   :  { %v2681_v43 = vmul.f32 %v8284_v48, %v2657_v16  ;;  %2288 = vmatprep.subr.bf16.mxu1 %v6774_v58  ;;  %v8371_v48 = vmul.f32 0.70710677, %v8348_v25  ;;  %v2669_v41 = vadd.f32 0.2548296, %v2645_v34  ;;  %v8389_v59 = vpop.eup %7165  ;;  %v2516_v9 = vadd.f32 -1.4531521, %v2492_v54 }
 0x15d   :  { %v2800_v61 = vmul.f32 %v7156_v15, %v2680_v21  ;;  %v2692_v40 = vmul.f32 %v8296_v1, %v2668_v32  ;;  %7169 = vpow2.f32 %v2760_v44  ;;  %v2493_v4 = vmul.f32 1.0614054, %v8389_v59 }
 0x15e   :  { %v2801_v36 = vmul.f32 %v7158_v26, %v2681_v43  ;;  %v8382_v47 = vand.u32 2147483647, %v8371_v48  ;;  %v2693_v1 = vmul.f32 %v8311_v20, %v2669_v41  ;;  %7171 = vpow2.f32 %v2762_v38  ;;  %v6784_v20 = vld [vmem:[%s9641_s1 + $0x688] ss:$48 sps:$4 sm:$0xff]   ;;  %v6798_v26 = vld [vmem:[%s9641_s1 + $0x74c] ss:$48 sps:$4 sm:$0xff]  }
 0x15f   :  { %v2824_v63 = vsub.f32 1.0, %v2800_v61  ;;  %2289 = vmatpush1.bf16.msra.mxu1 %v6772_v18  ;;  %v2812_v50 = vmul.f32 %v7160_v31, %v2692_v40  ;;  %v2744_v15 = vmul.f32 %v2720_v46, %v8330_v39  ;;  %v2540_v7 = vmul.f32 %v8375_v42, %v2516_v9  ;;  %v8413_v39 = vpop.eup %7167  ;;  %v6824_v9 = vld [vmem:[%s9643_s3 + $0x19c] ss:$12 sps:$4 sm:$0xff]  }
 0x160   :  { %v2825_v45 = vsub.f32 1.0, %v2801_v36  ;;  %2301 = vmatprep.subr.bf16.mxu1 %v6780_v30  ;;  %v2409_v58 = vmul.f32 0.3275911, %v8382_v47  ;;  %v2813_v6 = vmul.f32 %v7164_v55, %v2693_v1  ;;  %v2517_v21 = vadd.f32 -1.4531521, %v2493_v4 }
 0x161   :  { %v2872_v19 = vsub.f32 0.0, %v2824_v63  ;;  %v2836_v2 = vsub.f32 1.0, %v2812_v50  ;;  %v2564_v31 = vadd.f32 1.4214138, %v2540_v7  ;;  %v2504_v10 = vmul.f32 1.0614054, %v8413_v39 }
 0x162   :  { %v2873_v56 = vsub.f32 0.0, %v2825_v45  ;;  %2291 = vmatmul.mubr.bf16.vlgmr.msra.gmra.mrb[12].mxu1 %v7477_v60  ;;  %v2433_v16 = vadd.f32 1.0, %v2409_v58  ;;  %v2837_v24 = vsub.f32 1.0, %v2813_v6  ;;  %v2541_v44 = vmul.f32 %v8389_v59, %v2517_v21  ;;  %v6799_v55 = vld [vmem:[%s9641_s1 + $0x7a8] ss:$48 sps:$4 sm:$0xff]  }
 0x163   :  { %v2896_v0 = vsel %vm2848_vm0, %v2824_v63, %v2872_v19  ;;  %2302 = vmatpush1.bf16.msra.mxu1 %v6778_v35  ;;  %2333 = vmatprep.mubr.bf16.mxu1 %v7255_v3  ;;  %v2884_v23 = vsub.f32 0.0, %v2836_v2  ;;  %v6790_v3 = vld [vmem:[%s9641_s1 + $0x6e8] ss:$48 sps:$4 sm:$0xff]   ;;  %v2784_v61 = vmul.f32 1.442695, %v2744_v15  ;;  %v2588_v35 = vmul.f32 %v8375_v42, %v2564_v31 }
 0x164   :  { %v2897_v60 = vsel %vm2849_vm1, %v2825_v45, %v2873_v56  ;;  %2303 = vmatprep.subr.bf16.mxu1 %v6786_v5  ;;  %v2944_v18 = vadd.f32 1.0, %v2896_v0  ;;  %7173 = vrcp.f32 %v2433_v16  ;;  %v2885_v30 = vsub.f32 0.0, %v2837_v24  ;;  %v6822_v4 = vld [vmem:[%s9643_s3 + $0x198] ss:$12 sps:$4 sm:$0xff]   ;;  %v6807_v7 = vld [vmem:[%s9641_s1 + $0x86c] ss:$48 sps:$4 sm:$0xff]  }
 0x165   :  { %v2945_v28 = vadd.f32 1.0, %v2897_v60  ;;  %v2908_v29 = vsel %vm2860_vm2, %v2836_v2, %v2884_v23  ;;  %v2721_v36 = vsub.f32 0.0, %v8382_v47  ;;  %v2565_v41 = vadd.f32 1.4214138, %v2541_v44  ;;  %v6817_v2 = vld [vmem:[%s9643_s3 + $0x180] ss:$12 sps:$4 sm:$0xff]  }
 0x166   :  { %v2956_v43 = vadd.f32 1.0, %v2908_v29  ;;  %v2968_v32 = vmul.f32 %v2944_v18, %v8352_v27  ;;  %v2909_v34 = vsel %vm2861_vm3, %v2837_v24, %v2885_v30  ;;  %v2528_v45 = vadd.f32 -1.4531521, %v2504_v10  ;;  %v6796_v27 = vld [vmem:[%s9641_s1 + $0x748] ss:$48 sps:$4 sm:$0xff]  }
 0x167   :  { %2304 = vmatpush1.bf16.msra.mxu1 %v6784_v20  ;;  %v7170_v38 = vpop.eup %7169  ;;  %v2957_v40 = vadd.f32 1.0, %v2909_v34  ;;  %v2969_v5 = vmul.f32 %v2945_v28, %v8361_v14  ;;  %v2612_v46 = vadd.f32 -0.28449672, %v2588_v35  ;;  %v2589_v1 = vmul.f32 %v8389_v59, %v2565_v41  ;;  %v6804_v20 = vld [vmem:[%s9641_s1 + $0x80c] ss:$48 sps:$4 sm:$0xff]  }
 0x168   :  { %2305 = vmatprep.subr.bf16.mxu1 %v6792_v8  ;;  %v2980_v63 = vmul.f32 %v2956_v43, %v8368_v37  ;;  %v7172_v12 = vpop.eup %7171  ;;  %v6801_v37 = vld [vmem:[%s9641_s1 + $0x7ac] ss:$48 sps:$4 sm:$0xff]   ;;  %v2552_v54 = vmul.f32 %v8413_v39, %v2528_v45  ;;  %7175 = vpow2.f32 %v2784_v61  ;;  %v2745_v0 = vmul.f32 %v2721_v36, %v8382_v47  ;;  %v6802_v18 = vld [vmem:[%s9641_s1 + $0x808] ss:$48 sps:$4 sm:$0xff]  }
 0x169   :  { %v2981_v50 = vmul.f32 %v2957_v40, %v2933_v57  ;;  %v2636_v14 = vmul.f32 %v8375_v42, %v2612_v46  ;;  %v2613_v58 = vadd.f32 -0.28449672, %v2589_v1  ;;  %v6827_v30 = vld [vmem:[%s9643_s3 + $0x1b0] ss:$12 sps:$4 sm:$0xff]   ;;  %v6805_v44 = vld [vmem:[%s9641_s1 + $0x868] ss:$48 sps:$4 sm:$0xff]  }
 0x16a   :  { %v8427_v19 = vpack.c.bf16 %v2980_v63, %v2968_v32  ;;  %v2576_v57 = vadd.f32 1.4214138, %v2552_v54  ;;  %v6834_v36 = vld [vmem:[%s9643_s3 + $0x1cc] ss:$12 sps:$4 sm:$0xff]   ;;  %v6832_v63 = vld [vmem:[%s9643_s3 + $0x1c8] ss:$12 sps:$4 sm:$0xff]  }
 0x16b   :  { %2306 = vmatpush1.bf16.msra.mxu1 %v6790_v3  ;;  %v8438_v56 = vpack.c.bf16 %v2981_v50, %v2969_v5  ;;  %v2660_v6 = vadd.f32 0.2548296, %v2636_v14  ;;  %v2637_v47 = vmul.f32 %v8389_v59, %v2613_v58  ;;  %v2786_v3 = vmul.f32 1.442695, %v2745_v0  ;;  %v6811_v5 = vld [vmem:[%s9643_s3 + $0xc8] ss:$12 sps:$4 sm:$0xff]  }
 0x16c   :  { %2307 = vmatprep.subr.bf16.mxu1 %v6798_v26  ;;  %v2600_v8 = vmul.f32 %v8413_v39, %v2576_v57  ;;  %v6812_v14 = vld [vmem:[%s9643_s3 + $0x8] ss:$12 sps:$4 sm:$0xff]   ;;  %v2936_v0 = vmul.f32 0.5, %v8304_v13  ;;  %v6814_v13 = vld [vmem:[%s9643_s3 + $0x20] ss:$12 sps:$4 sm:$0xff]   ;;  %vm2865_vm7 = vcmp.ge.f32.partialorder %v8371_v48, 0.0 }
 0x16d   :  { %4973 = vmatprep.mubr.bf16.mxu0 %v8438_v56  ;;  %v2684_v15 = vmul.f32 %v8375_v42, %v2660_v6  ;;  %v2661_v23 = vadd.f32 0.2548296, %v2637_v47  ;;  %v6829_v42 = vld [vmem:[%s9643_s3 + $0x1b4] ss:$12 sps:$4 sm:$0xff]   ;;  %7177 = vpow2.f32 %v2786_v3  ;;  %v6844_v58 = vld [vmem:[%s9643_s3 + $0x1fc] ss:$12 sps:$4 sm:$0xff]  }
 0x16e   :  { %v8450_v60 = vpop.eup %7173  ;;  %4974 = vmatmul.mubr.bf16.vlgmr.msra.gmra.mrb[8].mxu0 %v8427_v19  ;;  %v2624_v24 = vadd.f32 -0.28449672, %v2600_v8  ;;  %v2925_v3 = vmul.f32 0.5, %v8294_v62  ;;  %v6848_v62 = vld [vmem:[%s9643_s3 + $0x228] ss:$12 sps:$4 sm:$0xff]  }
 0x16f   :  { %2308 = vmatpush1.bf16.msra.mxu1 %v6796_v27  ;;  %v2505_v16 = vmul.f32 1.0614054, %v8450_v60  ;;  %4985 = vmatpush1.bf16.msra.mxu0 %v6817_v2  ;;  %v2804_v26 = vmul.f32 %v7170_v38, %v2684_v15  ;;  %v2685_v28 = vmul.f32 %v8389_v59, %v2661_v23  ;;  %v6810_v59 = vld [vmem:[%s9641_s1 + $0x8cc] ss:$48 sps:$4 sm:$0xff]  }
 0x170   :  { %2309 = vmatprep.subr.bf16.mxu1 %v6801_v37  ;;  %4986 = vmatprep.subr.bf16.mxu0 %v6824_v9  ;;  %v2648_v29 = vmul.f32 %v8413_v39, %v2624_v24  ;;  %v6837_v37 = vld [vmem:[%s9643_s3 + $0x1e0] ss:$12 sps:$4 sm:$0xff]   ;;  %v6842_v9 = vld [vmem:[%s9643_s3 + $0x1f8] ss:$12 sps:$4 sm:$0xff]  }
 0x171   :  { %v2529_v21 = vadd.f32 -1.4531521, %v2505_v16  ;;  %v2828_v31 = vsub.f32 1.0, %v2804_v26  ;;  %v2805_v34 = vmul.f32 %v7172_v12, %v2685_v28  ;;  %v2924_v12 = vmul.f32 0.5, %v8288_v52  ;;  %v6813_v52 = vld [vmem:[%s9643_s3 + $0xe0] ss:$12 sps:$4 sm:$0xff]  }
 0x172   :  { %v2672_v10 = vadd.f32 0.2548296, %v2648_v29  ;;  %v7176_v61 = vpop.eup %7175  ;;  %v6816_v24 = vld [vmem:[%s9643_s3 + $0x38] ss:$12 sps:$4 sm:$0xff]   ;;  %v6821_v28 = vld [vmem:[%s9643_s3 + $0x50] ss:$12 sps:$4 sm:$0xff]  }
 0x173   :  { %2310 = vmatpush1.bf16.msra.mxu1 %v6799_v55  ;;  %v2553_v43 = vmul.f32 %v8450_v60, %v2529_v21  ;;  %4987 = vmatpush1.bf16.msra.mxu0 %v6822_v4  ;;  %v2876_v32 = vsub.f32 0.0, %v2828_v31  ;;  %v2829_v27 = vsub.f32 1.0, %v2805_v34  ;;  %v6850_v21 = vld [vmem:[%s9643_s3 + $0x22c] ss:$12 sps:$4 sm:$0xff]   ;;  %v6858_v34 = vld [vmem:[%s9643_s3 + $0x25c] ss:$12 sps:$4 sm:$0xff]  }
 0x174   :  { %2311 = vmatprep.subr.bf16.mxu1 %v6804_v20  ;;  %4988 = vmatprep.subr.bf16.mxu0 %v6829_v42  ;;  %v2696_v38 = vmul.f32 %v8413_v39, %v2672_v10  ;;  %v6839_v39 = vld [vmem:[%s9643_s3 + $0x1e4] ss:$12 sps:$4 sm:$0xff]   ;;  %v2937_v42 = vmul.f32 0.5, %v8348_v25  ;;  %v8567_v10 = vsub.s32 2, %v8184_v49 }
 0x175   :  { %v2577_v35 = vadd.f32 1.4214138, %v2553_v43  ;;  %v2900_v41 = vsel %vm2852_vm4, %v2828_v31, %v2876_v32  ;;  %v2877_v57 = vsub.f32 0.0, %v2829_v27  ;;  %v6825_v31 = vld [vmem:[%s9643_s3 + $0x128] ss:$12 sps:$4 sm:$0xff]   ;;  %v342_v32 = vsub.s32 3, %v8184_v49 }
 0x176   :  { %v2816_v45 = vmul.f32 %v7176_v61, %v2696_v38  ;;  %v2948_v1 = vadd.f32 1.0, %v2900_v41  ;;  %v6853_v25 = vld [vmem:[%s9643_s3 + $0x244] ss:$12 sps:$4 sm:$0xff]   ;;  %v6826_v61 = vld [vmem:[%s9643_s3 + $0x68] ss:$12 sps:$4 sm:$0xff]  }
 0x177   :  { %2312 = vmatpush1.bf16.msra.mxu1 %v6802_v18  ;;  %v2601_v40 = vmul.f32 %v8450_v60, %v2577_v35  ;;  %4989 = vmatpush1.bf16.msra.mxu0 %v6827_v30  ;;  %v7178_v6 = vpop.eup %7177  ;;  %v2901_v22 = vsel %vm2853_vm6, %v2829_v27, %v2877_v57  ;;  %v6830_v35 = vld [vmem:[%s9643_s3 + $0x140] ss:$12 sps:$4 sm:$0xff]  }
 0x178   :  { %2313 = vmatprep.subr.bf16.mxu1 %v6807_v7  ;;  %4990 = vmatprep.subr.bf16.mxu0 %v6834_v36  ;;  %v2840_v50 = vsub.f32 1.0, %v2816_v45  ;;  %v2972_v47 = vmul.f32 %v2948_v1, %v2924_v12  ;;  %v6820_v7 = vld [vmem:[%s9643_s3 + $0x110] ss:$12 sps:$4 sm:$0xff]   ;;  %v8584_v36 = vld [vmem:[%s9644_s2] sm:$0xff]  ;;  %v6868_v1 = vld [vmem:[%s9643_s3 + $0x28c] ss:$12 sps:$4 sm:$0xff]  }
 0x179   :  { %v2625_v46 = vadd.f32 -0.28449672, %v2601_v40  ;;  %v339_v38 = vrot.slane %v8584_v36, %v8567_v10  ;;  %v343_v40 = vrot.slane %v8584_v36, %v342_v32  ;;  %v6863_v41 = vld [vmem:[%s9643_s3 + $0x274] ss:$12 sps:$4 sm:$0xff]   ;;  %v6835_v45 = vld [vmem:[%s9643_s3 + $0x158] ss:$12 sps:$4 sm:$0xff]  }
 0x17a   :  { %v2888_v55 = vsub.f32 0.0, %v2840_v50 }
 0x17b   :  { %2314 = vmatpush1.bf16.msra.mxu1 %v6805_v44  ;;  %v2649_v54 = vmul.f32 %v8450_v60, %v2625_v46  ;;  %4991 = vmatpush1.bf16.msra.mxu0 %v6832_v63  ;;  %v6851_v44 = vld [vmem:[%s9643_s3 + $0x240] ss:$12 sps:$4 sm:$0xff]   ;;  %v6856_v63 = vld [vmem:[%s9643_s3 + $0x258] ss:$12 sps:$4 sm:$0xff]   ;;  %v6861_v46 = vld [vmem:[%s9643_s3 + $0x270] ss:$12 sps:$4 sm:$0xff]  }
 0x17c   :  { %2315 = vmatprep.subr.bf16.mxu1 %v6810_v59  ;;  %4992 = vmatprep.subr.bf16.mxu0 %v6839_v39  ;;  %v2912_v20 = vsel %vm2864_vm5, %v2840_v50, %v2888_v55 }
 0x17d   :  { %v2673_v2 = vadd.f32 0.2548296, %v2649_v54  ;;  %v2960_v8 = vadd.f32 1.0, %v2912_v20  ;;  %v6866_v20 = vld [vmem:[%s9643_s3 + $0x288] ss:$12 sps:$4 sm:$0xff]  }
 0x17f   :  { %2316 = vmatpush1.bf16.msra.mxu1 %v6808_v11  ;;  %v2697_v4 = vmul.f32 %v8450_v60, %v2673_v2  ;;  %4993 = vmatpush1.bf16.msra.mxu0 %v6837_v37  ;;  %v2984_v15 = vmul.f32 %v2960_v8, %v2936_v0  ;;  %v6847_v60 = vld [vmem:[%s9643_s3 + $0x214] ss:$12 sps:$4 sm:$0xff]   ;;  %v6836_v37 = vld [vmem:[%s9643_s3 + $0x98] ss:$12 sps:$4 sm:$0xff]   ;;  %v6841_v0 = vld [vmem:[%s9643_s3 + $0xb0] ss:$12 sps:$4 sm:$0xff]  }
 0x180   :  { %6126 = vmatprep.subr.bf16.mxu1 %v6811_v5  ;;  %4994 = vmatprep.subr.bf16.mxu0 %v6844_v58  ;;  %v6831_v11 = vld [vmem:[%s9643_s3 + $0x80] ss:$12 sps:$4 sm:$0xff]   ;;  %v6873_v8 = vld [vmem:[%s9643_s3 + $0x2a4] ss:$12 sps:$4 sm:$0xff]  }
 0x181   :  { %v2817_v16 = vmul.f32 %v7178_v6, %v2697_v4  ;;  %v8537_v18 = vpack.c.bf16 %v2984_v15, %v2972_v47 }
 0x182   :  { %2334 = vmatmul.mubr.bf16.vlgmr.msra.gmra.mrb[12].mxu1 %v7585_v33  ;;  %v6845_v33 = vld [vmem:[%s9643_s3 + $0x210] ss:$12 sps:$4 sm:$0xff]  }
 0x183   :  { %6127 = vmatpush3.bf16.msra.mxu1 %v6812_v14  ;;  %5231 = vmatprep.mubr.bf16.mxu1 %v8438_v56  ;;  %v2841_v23 = vsub.f32 1.0, %v2817_v16  ;;  %v2949_v56 = vadd.f32 1.0, %v2901_v22  ;;  %v6855_v16 = vld [vmem:[%s9643_s3 + $0x188] ss:$12 sps:$4 sm:$0xff]  }
 0x184   :  { %6128 = vmatprep.subr.bf16.mxu1 %v6813_v52  ;;  %4995 = vmatpush1.bf16.msra.mxu0 %v6842_v9  ;;  %v6840_v52 = vld [vmem:[%s9643_s3 + $0x170] ss:$12 sps:$4 sm:$0xff]  }
 0x185   :  { %v2889_v26 = vsub.f32 0.0, %v2841_v23  ;;  %4996 = vmatprep.subr.bf16.mxu0 %v6847_v60  ;;  %v2973_v29 = vmul.f32 %v2949_v56, %v2925_v3  ;;  %v6878_v56 = vld [vmem:[%s9643_s3 + $0x2bc] ss:$12 sps:$4 sm:$0xff]  }
 0x187   :  { %6129 = vmatpush3.bf16.msra.mxu1 %v6814_v13  ;;  %v2913_v48 = vsel %vm2865_vm7, %v2841_v23, %v2889_v26  ;;  %v6871_v23 = vld [vmem:[%s9643_s3 + $0x2a0] ss:$12 sps:$4 sm:$0xff]  }
 0x188   :  { %6130 = vmatprep.subr.bf16.mxu1 %v6815_v17  ;;  %v2961_v30 = vadd.f32 1.0, %v2913_v48  ;;  %4997 = vmatpush1.bf16.msra.mxu0 %v6845_v33  ;;  %v6854_v17 = vld [vmem:[%s9643_s3 + $0x248] ss:$12 sps:$4 sm:$0xff]   ;;  %v6859_v26 = vld [vmem:[%s9643_s3 + $0x260] ss:$12 sps:$4 sm:$0xff]  }
 0x189   :  { %4998 = vmatprep.subr.bf16.mxu0 %v6850_v21  ;;  %v6860_v48 = vld [vmem:[%s9643_s3 + $0x1a0] ss:$12 sps:$4 sm:$0xff]  }
 0x18a   :  { %v2985_v43 = vmul.f32 %v2961_v30, %v2937_v42  ;;  %v6876_v42 = vld [vmem:[%s9643_s3 + $0x2b8] ss:$12 sps:$4 sm:$0xff]  }
 0x18b   :  { %6131 = vmatpush3.bf16.msra.mxu1 %v6816_v24 }
 0x18c   :  { %6132 = vmatprep.subr.bf16.mxu1 %v6820_v7  ;;  %4999 = vmatpush1.bf16.msra.mxu0 %v6848_v62  ;;  %v8569_v59 = vpack.c.bf16 %v2985_v43, %v2973_v29 }
 0x18d   :  { %5000 = vmatprep.subr.bf16.mxu0 %v6853_v25  ;;  %v6881_v25 = vld [vmem:[%s9643_s3 + $0x2d0] ss:$12 sps:$4 sm:$0xff]  }
 0x18f   :  { %6133 = vmatpush3.bf16.msra.mxu1 %v6821_v28  ;;  %v6883_v28 = vld [vmem:[%s9643_s3 + $0x2d4] ss:$12 sps:$4 sm:$0xff]  }
 0x190   :  { %6134 = vmatprep.subr.bf16.mxu1 %v6825_v31  ;;  %5001 = vmatpush1.bf16.msra.mxu0 %v6851_v44  ;;  %v325_v31 = vld [vmem:[%s9644_s2 + $0x8] sm:$0xf]  ;;  %v6865_v44 = vld [vmem:[%s9643_s3 + $0x1b8] ss:$12 sps:$4 sm:$0xff]  }
 0x191   :  { %5002 = vmatprep.subr.bf16.mxu0 %v6858_v34 }
 0x193   :  { %6135 = vmatpush3.bf16.msra.mxu1 %v6826_v61  ;;  %v6888_v61 = vld [vmem:[%s9643_s3 + $0x2ec] ss:$12 sps:$4 sm:$0xff]  }
 0x194   :  { %6136 = vmatprep.subr.bf16.mxu1 %v6830_v35  ;;  %5003 = vmatpush1.bf16.msra.mxu0 %v6856_v63  ;;  %v6869_v35 = vld [vmem:[%s9643_s3 + $0x290] ss:$12 sps:$4 sm:$0xff]  }
 0x195   :  { %v1991_v5 = vpop.f32.mrb[4].mxu1  ;;  %5004 = vmatprep.subr.bf16.mxu0 %v6863_v41 }
 0x196   :  { %v8603_v39 = vadd.f32 %v1991_v5, %v339_v38  ;;  %v1993_v27 = vpop.f32.mrb[5].mxu1  ;;  %v6874_v5 = vld [vmem:[%s9643_s3 + $0x2a8] ss:$12 sps:$4 sm:$0xff]  }
 0x197   :  { %v8608_v12 = vadd.f32 %v1993_v27, %v343_v40  ;;  %v1995_v50 = vpop.f32.mrb[6].mxu1  ;;  %6137 = vmatpush3.bf16.msra.mxu1 %v6831_v11  ;;  %v8699_v11 = vrot.slane %v325_v31, %v8201_v53  ;;  %v6886_v27 = vld [vmem:[%s9643_s3 + $0x2e8] ss:$12 sps:$4 sm:$0xff]  }
 0x198   :  { %v8617_v54 = vmul.f32 0.70710677, %v8603_v39  ;;  %v8619_v14 = vadd.f32 %v1995_v50, %v339_v38  ;;  %v1997_v55 = vpop.f32.mrb[7].mxu1  ;;  %6138 = vmatprep.subr.bf16.mxu1 %v6835_v45  ;;  %5005 = vmatpush1.bf16.msra.mxu0 %v6861_v46  ;;  %v363_v38 = vrot.slane %v325_v31, %v8193_v51  ;;  %v6893_v46 = vld [vmem:[%s9643_s3 + $0x304] ss:$12 sps:$4 sm:$0xff]  }
 0x199   :  { %v8625_v58 = vmul.f32 0.70710677, %v8608_v12  ;;  %v8627_v57 = vadd.f32 %v1997_v55, %v343_v40  ;;  %5006 = vmatprep.subr.bf16.mxu0 %v6868_v1  ;;  %v6870_v40 = vld [vmem:[%s9643_s3 + $0x1d0] ss:$12 sps:$4 sm:$0xff]  }
 0x19a   :  { %v2370_v2 = vand.u32 2147483647, %v8617_v54  ;;  %v8634_v6 = vmul.f32 0.70710677, %v8619_v14  ;;  %vm2850_vm8 = vcmp.ge.f32.partialorder %v8617_v54, 0.0 }
 0x19b   :  { %v2371_v9 = vand.u32 2147483647, %v8625_v58  ;;  %v8641_v47 = vmul.f32 0.70710677, %v8627_v57  ;;  %6139 = vmatpush3.bf16.msra.mxu1 %v6836_v37  ;;  %vm2851_vm9 = vcmp.ge.f32.partialorder %v8625_v58, 0.0 }
 0x19c   :  { %v2394_v4 = vmul.f32 0.3275911, %v2370_v2  ;;  %v2382_v13 = vand.u32 2147483647, %v8634_v6  ;;  %6140 = vmatprep.subr.bf16.mxu1 %v6840_v52  ;;  %5007 = vmatpush1.bf16.msra.mxu0 %v6866_v20  ;;  %v2706_v62 = vsub.f32 0.0, %v2370_v2  ;;  %v2249_v55 = vpop.f32.mrb[4].mxu0 }
 0x19d   :  { %v2395_v22 = vmul.f32 0.3275911, %v2371_v9  ;;  %v8651_v15 = vand.u32 2147483647, %v8641_v47  ;;  %5008 = vmatprep.subr.bf16.mxu0 %v6873_v8  ;;  %v2707_v29 = vsub.f32 0.0, %v2371_v9  ;;  %v2251_v20 = vpop.f32.mrb[5].mxu0 }
 0x19e   :  { %v2418_v60 = vadd.f32 1.0, %v2394_v4  ;;  %v2406_v33 = vmul.f32 0.3275911, %v2382_v13  ;;  %v2718_v30 = vsub.f32 0.0, %v2382_v13  ;;  %v2730_v43 = vmul.f32 %v2706_v62, %v2370_v2 }
 0x19f   :  { %v2419_v24 = vadd.f32 1.0, %v2395_v22  ;;  %v2407_v3 = vmul.f32 0.3275911, %v8651_v15  ;;  %6141 = vmatpush3.bf16.msra.mxu1 %v6841_v0  ;;  %v2731_v34 = vmul.f32 %v2707_v29, %v2371_v9  ;;  %v2719_v45 = vsub.f32 0.0, %v8651_v15 }
 0x1a0   :  { %7179 = vrcp.f32 %v2418_v60  ;;  %v2430_v7 = vadd.f32 1.0, %v2406_v33  ;;  %6148 = vmatprep.subr.bf16.mxu1 %v6854_v17  ;;  %5009 = vmatpush1.bf16.msra.mxu0 %v6871_v23  ;;  %v2742_v63 = vmul.f32 %v2718_v30, %v2382_v13  ;;  %v2756_v1 = vmul.f32 1.442695, %v2730_v43  ;;  %v2253_v13 = vpop.f32.mrb[6].mxu0 }
 0x1a1   :  { %7181 = vrcp.f32 %v2419_v24  ;;  %v2431_v21 = vadd.f32 1.0, %v2407_v3  ;;  %5010 = vmatprep.subr.bf16.mxu0 %v6878_v56  ;;  %v2758_v0 = vmul.f32 1.442695, %v2731_v34  ;;  %v8717_v2 = vadd.f32 %v2249_v55, %v363_v38  ;;  %v2255_v23 = vpop.f32.mrb[7].mxu0  ;;  %v6875_v56 = vld [vmem:[%s9643_s3 + $0x1e8] ss:$12 sps:$4 sm:$0xff]  }
 0x1a2   :  { %5232 = vmatmul.mubr.bf16.vlgmr.msra.gmra.mrb[16].mxu1 %v8427_v19  ;;  %7183 = vrcp.f32 %v2430_v7  ;;  %v6864_v19 = vld [vmem:[%s9643_s3 + $0x278] ss:$12 sps:$4 sm:$0xff]   ;;  %v2780_v8 = vmul.f32 1.442695, %v2742_v63  ;;  %v8720_v4 = vadd.f32 %v2251_v20, %v8699_v11  ;;  %v8728_v33 = vadd.f32 %v2253_v13, %v363_v38 }
 0x1a3   :  { %6149 = vmatpush3.bf16.msra.mxu1 %v6855_v16  ;;  %7185 = vrcp.f32 %v2431_v21  ;;  %v2743_v16 = vmul.f32 %v2719_v45, %v8651_v15  ;;  %v8726_v60 = vmul.f32 0.70710677, %v8717_v2  ;;  %v6879_v21 = vld [vmem:[%s9643_s3 + $0x2c0] ss:$12 sps:$4 sm:$0xff]   ;;  %v6884_v38 = vld [vmem:[%s9643_s3 + $0x2d8] ss:$12 sps:$4 sm:$0xff]  }
 0x1a4   :  { %6150 = vmatprep.subr.bf16.mxu1 %v6859_v26  ;;  %5011 = vmatpush1.bf16.msra.mxu0 %v6876_v42  ;;  %v8736_v7 = vmul.f32 0.70710677, %v8720_v4  ;;  %7187 = vpow2.f32 %v2756_v1  ;;  %v8746_v62 = vmul.f32 0.70710677, %v8728_v33  ;;  %vm2862_vm10 = vcmp.ge.f32.partialorder %v8634_v6, 0.0 }
 0x1a5   :  { %5012 = vmatprep.subr.bf16.mxu0 %v6883_v28  ;;  %v2376_v42 = vand.u32 2147483647, %v8726_v60  ;;  %7189 = vpow2.f32 %v2758_v0  ;;  %v2782_v30 = vmul.f32 1.442695, %v2743_v16  ;;  %vm2863_vm11 = vcmp.ge.f32.partialorder %v8641_v47, 0.0 }
 0x1a6   :  { %7191 = vpow2.f32 %v2780_v8  ;;  %v2377_v34 = vand.u32 2147483647, %v8736_v7  ;;  %v8760_v45 = vand.u32 2147483647, %v8746_v62  ;;  %vm2856_vm12 = vcmp.ge.f32.partialorder %v8726_v60, 0.0 }
 0x1a7   :  { %6151 = vmatpush3.bf16.msra.mxu1 %v6860_v48  ;;  %v2400_v31 = vmul.f32 0.3275911, %v2376_v42  ;;  %v6906_v60 = vld [vmem:[%s9643_s3 + $0x348] ss:$12 sps:$4 sm:$0xff]   ;;  %vm2868_vm13 = vcmp.ge.f32.partialorder %v8746_v62, 0.0  ;;  %vm2857_vm14 = vcmp.ge.f32.partialorder %v8736_v7, 0.0 }
 0x1a8   :  { %6152 = vmatprep.subr.bf16.mxu1 %v6864_v19  ;;  %5013 = vmatpush1.bf16.msra.mxu0 %v6881_v25  ;;  %v2713_v55 = vsub.f32 0.0, %v2377_v34  ;;  %v6923_v62 = vld [vmem:[%s9643_s3 + $0x394] ss:$12 sps:$4 sm:$0xff]  }
 0x1a9   :  { %5014 = vmatprep.subr.bf16.mxu0 %v6888_v61  ;;  %v6880_v61 = vld [vmem:[%s9643_s3 + $0x200] ss:$12 sps:$4 sm:$0xff]   ;;  %v2424_v63 = vadd.f32 1.0, %v2400_v31 }
 0x1aa   :  { %v8701_v41 = vpop.eup %7179 }
 0x1ab   :  { %v8713_v50 = vpop.eup %7181  ;;  %v2490_v37 = vmul.f32 1.0614054, %v8701_v41  ;;  %6153 = vmatpush3.bf16.msra.mxu1 %v6865_v44  ;;  %7193 = vrcp.f32 %v2424_v63 }
 0x1ac   :  { %v2491_v52 = vmul.f32 1.0614054, %v8713_v50  ;;  %6154 = vmatprep.subr.bf16.mxu1 %v6869_v35  ;;  %v8722_v17 = vpop.eup %7183  ;;  %5015 = vmatpush1.bf16.msra.mxu0 %v6886_v27  ;;  %7195 = vpow2.f32 %v2782_v30 }
 0x1ad   :  { %v2514_v9 = vadd.f32 -1.4531521, %v2490_v37  ;;  %v2502_v3 = vmul.f32 1.0614054, %v8722_v17  ;;  %5027 = vmatprep.subr.bf16.mxu0 %v6893_v46  ;;  %v8738_v15 = vpop.eup %7185  ;;  %v2401_v37 = vmul.f32 0.3275911, %v2377_v34 }
 0x1ae   :  { %v2515_v22 = vadd.f32 -1.4531521, %v2491_v52  ;;  %v2503_v29 = vmul.f32 1.0614054, %v8738_v15 }
 0x1af   :  { %v2538_v24 = vmul.f32 %v8701_v41, %v2514_v9  ;;  %6155 = vmatpush3.bf16.msra.mxu1 %v6870_v40  ;;  %v2526_v28 = vadd.f32 -1.4531521, %v2502_v3  ;;  %v2712_v40 = vsub.f32 0.0, %v2376_v42  ;;  %v6885_v9 = vld [vmem:[%s9643_s3 + $0x218] ss:$12 sps:$4 sm:$0xff]   ;;  %v2425_v8 = vadd.f32 1.0, %v2401_v37 }
 0x1b0   :  { %v2539_v26 = vmul.f32 %v8713_v50, %v2515_v22  ;;  %6156 = vmatprep.subr.bf16.mxu1 %v6874_v5  ;;  %v2527_v44 = vadd.f32 -1.4531521, %v2503_v29  ;;  %v6889_v22 = vld [vmem:[%s9643_s3 + $0x2f0] ss:$12 sps:$4 sm:$0xff]  }
 0x1b1   :  { %v2562_v48 = vadd.f32 1.4214138, %v2538_v24  ;;  %v2550_v43 = vmul.f32 %v8722_v17, %v2526_v28  ;;  %v2736_v16 = vmul.f32 %v2712_v40, %v2376_v42  ;;  %v2412_v24 = vmul.f32 0.3275911, %v8760_v45 }
 0x1b2   :  { %v2563_v19 = vadd.f32 1.4214138, %v2539_v26  ;;  %v2551_v46 = vmul.f32 %v8738_v15, %v2527_v44  ;;  %7197 = vrcp.f32 %v2425_v8  ;;  %v2737_v28 = vmul.f32 %v2713_v55, %v2377_v34  ;;  %v6890_v44 = vld [vmem:[%s9643_s3 + $0x230] ss:$12 sps:$4 sm:$0xff]  }
 0x1b3   :  { %v2586_v25 = vmul.f32 %v8701_v41, %v2562_v48  ;;  %6157 = vmatpush3.bf16.msra.mxu1 %v6875_v56  ;;  %v2574_v27 = vadd.f32 1.4214138, %v2550_v43  ;;  %v2436_v29 = vadd.f32 1.0, %v2412_v24  ;;  %v2934_v40 = vmul.f32 0.5, %v8619_v14 }
 0x1b4   :  { %v2587_v35 = vmul.f32 %v8713_v50, %v2563_v19  ;;  %6158 = vmatprep.subr.bf16.mxu1 %v6879_v21  ;;  %v2575_v20 = vadd.f32 1.4214138, %v2551_v46  ;;  %v7188_v21 = vpop.eup %7187  ;;  %v8775_v19 = vadd.f32 %v2255_v23, %v8699_v11  ;;  %v8788_v23 = vmul.f32 0.5, %v8608_v12 }
 0x1b5   :  { %v2610_v5 = vadd.f32 -0.28449672, %v2586_v25  ;;  %v2598_v0 = vmul.f32 %v8722_v17, %v2574_v27  ;;  %v7190_v30 = vpop.eup %7189  ;;  %v8779_v25 = vmul.f32 0.5, %v8603_v39  ;;  %v6894_v39 = vld [vmem:[%s9643_s3 + $0x3c8] ss:$12 sps:$4 sm:$0xff]   ;;  %7199 = vrcp.f32 %v2436_v29 }
 0x1b6   :  { %v2611_v1 = vadd.f32 -0.28449672, %v2587_v35  ;;  %v2599_v26 = vmul.f32 %v8738_v15, %v2575_v20  ;;  %v2724_v55 = vsub.f32 0.0, %v8760_v45 }
 0x1b7   :  { %v2634_v52 = vmul.f32 %v8701_v41, %v2610_v5  ;;  %6159 = vmatpush3.bf16.msra.mxu1 %v6880_v61  ;;  %v2622_v56 = vadd.f32 -0.28449672, %v2598_v0  ;;  %v7192_v61 = vpop.eup %7191  ;;  %v2770_v5 = vmul.f32 1.442695, %v2737_v28 }
 0x1b8   :  { %v2635_v13 = vmul.f32 %v8713_v50, %v2611_v1  ;;  %6160 = vmatprep.subr.bf16.mxu1 %v6884_v38  ;;  %v2623_v43 = vadd.f32 -0.28449672, %v2599_v26  ;;  %v8800_v37 = vpop.eup %7193 }
 0x1b9   :  { %v2658_v3 = vadd.f32 0.2548296, %v2634_v52  ;;  %v2646_v42 = vmul.f32 %v8722_v17, %v2622_v56  ;;  %v7196_v8 = vpop.eup %7195 }
 0x1ba   :  { %v2659_v48 = vadd.f32 0.2548296, %v2635_v13  ;;  %v2647_v38 = vmul.f32 %v8738_v15, %v2623_v43 }
 0x1bb   :  { %v2682_v31 = vmul.f32 %v8701_v41, %v2658_v3  ;;  %6161 = vmatpush3.bf16.msra.mxu1 %v6885_v9  ;;  %v2768_v41 = vmul.f32 1.442695, %v2736_v16  ;;  %v2670_v35 = vadd.f32 0.2548296, %v2646_v42  ;;  %v2496_v9 = vmul.f32 1.0614054, %v8800_v37 }
 0x1bc   :  { %v2683_v11 = vmul.f32 %v8713_v50, %v2659_v48  ;;  %6162 = vmatprep.subr.bf16.mxu1 %v6889_v22  ;;  %v8796_v50 = vmul.f32 0.70710677, %v8775_v19  ;;  %v2671_v46 = vadd.f32 0.2548296, %v2647_v38  ;;  %v8807_v16 = vpop.eup %7197  ;;  %v2748_v48 = vmul.f32 %v2724_v55, %v8760_v45 }
 0x1bd   :  { %v2802_v34 = vmul.f32 %v7188_v21, %v2682_v31  ;;  %v2694_v27 = vmul.f32 %v8722_v17, %v2670_v35  ;;  %7201 = vpow2.f32 %v2768_v41  ;;  %v2935_v17 = vmul.f32 0.5, %v8627_v57 }
 0x1be   :  { %v2803_v63 = vmul.f32 %v7190_v30, %v2683_v11  ;;  %v2389_v14 = vand.u32 2147483647, %v8796_v50  ;;  %v2695_v20 = vmul.f32 %v8738_v15, %v2671_v46  ;;  %7203 = vpow2.f32 %v2770_v5 }
 0x1bf   :  { %v2826_v12 = vsub.f32 1.0, %v2802_v34  ;;  %6163 = vmatpush3.bf16.msra.mxu1 %v6890_v44  ;;  %v2814_v0 = vmul.f32 %v7192_v61, %v2694_v27  ;;  %v2520_v26 = vadd.f32 -1.4531521, %v2496_v9  ;;  %v2497_v15 = vmul.f32 1.0614054, %v8807_v16  ;;  %v8818_v42 = vpop.eup %7199 }
 0x1c0   :  { %v2827_v1 = vsub.f32 1.0, %v2803_v63  ;;  %6170 = vmatprep.subr.bf16.mxu1 %v6894_v39  ;;  %v2413_v22 = vmul.f32 0.3275911, %v2389_v14  ;;  %v2815_v56 = vmul.f32 %v7196_v8, %v2695_v20  ;;  %v2508_v39 = vmul.f32 1.0614054, %v8818_v42 }
 0x1c1   :  { %v2874_v52 = vsub.f32 0.0, %v2826_v12  ;;  %v2838_v3 = vsub.f32 1.0, %v2814_v0  ;;  %v2544_v31 = vmul.f32 %v8800_v37, %v2520_v26  ;;  %v2521_v54 = vadd.f32 -1.4531521, %v2497_v15  ;;  %v6899_v26 = vld [vmem:[%s9643_s3 + $0x3e0] ss:$12 sps:$4 sm:$0xff]  }
 0x1c2   :  { %v2875_v13 = vsub.f32 0.0, %v2827_v1  ;;  %v2437_v28 = vadd.f32 1.0, %v2413_v22  ;;  %v2839_v30 = vsub.f32 1.0, %v2815_v56  ;;  %v2792_v41 = vmul.f32 1.442695, %v2748_v48 }
 0x1c3   :  { %v2898_v24 = vsel %vm2850_vm8, %v2826_v12, %v2874_v52  ;;  %v2886_v57 = vsub.f32 0.0, %v2838_v3  ;;  %v2568_v61 = vadd.f32 1.4214138, %v2544_v31  ;;  %v2545_v45 = vmul.f32 %v8807_v16, %v2521_v54  ;;  %v6898_v56 = vld [vmem:[%s9643_s3 + $0x31c] ss:$12 sps:$4 sm:$0xff]  }
 0x1c4   :  { %v2899_v21 = vsel %vm2851_vm9, %v2827_v1, %v2875_v13  ;;  %v2946_v29 = vadd.f32 1.0, %v2898_v24  ;;  %7205 = vrcp.f32 %v2437_v28  ;;  %v2887_v44 = vsub.f32 0.0, %v2839_v30  ;;  %v6900_v28 = vld [vmem:[%s9643_s3 + $0x320] ss:$12 sps:$4 sm:$0xff]  }
 0x1c5   :  { %v2947_v58 = vadd.f32 1.0, %v2899_v21  ;;  %v2910_v43 = vsel %vm2862_vm10, %v2838_v3, %v2886_v57  ;;  %v2592_v6 = vmul.f32 %v8800_v37, %v2568_v61  ;;  %v2725_v47 = vsub.f32 0.0, %v2389_v14 }
 0x1c6   :  { %v2958_v11 = vadd.f32 1.0, %v2910_v43  ;;  %v2970_v34 = vmul.f32 %v2946_v29, %v8779_v25  ;;  %v2911_v35 = vsel %vm2863_vm11, %v2839_v30, %v2887_v44  ;;  %v2569_v12 = vadd.f32 1.4214138, %v2545_v45  ;;  %v6891_v25 = vld [vmem:[%s9643_s3 + $0x300] ss:$12 sps:$4 sm:$0xff]  }
 0x1c7   :  { %v7202_v38 = vpop.eup %7201  ;;  %v2959_v5 = vadd.f32 1.0, %v2911_v35  ;;  %v2532_v27 = vadd.f32 -1.4531521, %v2508_v39  ;;  %v2971_v46 = vmul.f32 %v2947_v58, %v8788_v23  ;;  %v2616_v1 = vadd.f32 -0.28449672, %v2592_v6 }
 0x1c8   :  { %v2982_v63 = vmul.f32 %v2958_v11, %v2934_v40  ;;  %v7204_v55 = vpop.eup %7203  ;;  %v2593_v20 = vmul.f32 %v8807_v16, %v2569_v12  ;;  %7207 = vpow2.f32 %v2792_v41  ;;  %v6895_v23 = vld [vmem:[%s9643_s3 + $0x308] ss:$12 sps:$4 sm:$0xff]   ;;  %v2749_v24 = vmul.f32 %v2725_v47, %v2389_v14  ;;  %v6896_v14 = vld [vmem:[%s9643_s3 + $0x318] ss:$12 sps:$4 sm:$0xff]  }
 0x1c9   :  { %v2983_v0 = vmul.f32 %v2959_v5, %v2935_v17  ;;  %v2556_v9 = vmul.f32 %v8818_v42, %v2532_v27  ;;  %v2640_v8 = vmul.f32 %v8800_v37, %v2616_v1  ;;  %v6904_v43 = vld [vmem:[%s9643_s3 + $0x3f8] ss:$12 sps:$4 sm:$0xff]   ;;  %vm2869_vm15 = vcmp.ge.f32.partialorder %v8796_v50, 0.0 }
 0x1ca   :  { %v2994_v52 = vpack.c.bf16 %v2982_v63, %v2970_v34  ;;  %v2617_v13 = vadd.f32 -0.28449672, %v2593_v20  ;;  %v2794_v31 = vmul.f32 1.442695, %v2749_v24  ;;  %v6905_v41 = vld [vmem:[%s9643_s3 + $0x338] ss:$12 sps:$4 sm:$0xff]  }
 0x1cb   :  { %v2995_v40 = vpack.c.bf16 %v2983_v0, %v2971_v46  ;;  %v2580_v22 = vadd.f32 1.4214138, %v2556_v9  ;;  %v2664_v17 = vadd.f32 0.2548296, %v2640_v8  ;;  %v6910_v46 = vld [vmem:[%s9643_s3 + $0x350] ss:$12 sps:$4 sm:$0xff]  }
 0x1cc   :  { %v2641_v21 = vmul.f32 %v8807_v16, %v2617_v13  ;;  %7209 = vpow2.f32 %v2794_v31  ;;  %v6913_v1 = vld [vmem:[%s9643_s3 + $0x364] ss:$12 sps:$4 sm:$0xff]   ;;  %v2928_v20 = vmul.f32 0.5, %v8717_v2  ;;  %v6911_v8 = vld [vmem:[%s9643_s3 + $0x360] ss:$12 sps:$4 sm:$0xff]  }
 0x1cd   :  { %5016 = vmatprep.mubr.bf16.mxu0 %v2995_v40  ;;  %5272 = vmatprep.mubr.bf16.mxu1 %v2995_v40  ;;  %v2604_v15 = vmul.f32 %v8818_v42, %v2580_v22  ;;  %v2688_v48 = vmul.f32 %v8800_v37, %v2664_v17  ;;  %v6903_v37 = vld [vmem:[%s9643_s3 + $0x334] ss:$12 sps:$4 sm:$0xff]   ;;  %v6918_v2 = vld [vmem:[%s9643_s3 + $0x37c] ss:$12 sps:$4 sm:$0xff]   ;;  %v2940_v22 = vmul.f32 0.5, %v8728_v33 }
 0x1ce   :  { %v8834_v3 = vpop.eup %7205  ;;  %5017 = vmatmul.mubr.bf16.vlgmr.msra.gmra.mrb[8].mxu0 %v2994_v52  ;;  %5273 = vmatmul.mubr.bf16.vlgmr.msra.gmra.mrb[20].mxu1 %v2994_v52  ;;  %v2665_v57 = vadd.f32 0.2548296, %v2641_v21  ;;  %v6914_v52 = vld [vmem:[%s9643_s3 + $0x428] ss:$12 sps:$4 sm:$0xff]   ;;  %v6919_v17 = vld [vmem:[%s9643_s3 + $0x440] ss:$12 sps:$4 sm:$0xff]  }
 0x1cf   :  { %v2509_v29 = vmul.f32 1.0614054, %v8834_v3  ;;  %5028 = vmatpush1.bf16.msra.mxu0 %v6891_v25  ;;  %6171 = vmatpush3.bf16.msra.mxu1 %v6895_v23  ;;  %v2628_v30 = vadd.f32 -0.28449672, %v2604_v15  ;;  %v2808_v54 = vmul.f32 %v7202_v38, %v2688_v48  ;;  %v6909_v38 = vld [vmem:[%s9643_s3 + $0x410] ss:$12 sps:$4 sm:$0xff]  }
 0x1d0   :  { %5059 = vmatprep.mubr.bf16.mxu0 %v8569_v59  ;;  %5313 = vmatprep.mubr.bf16.mxu1 %v8569_v59  ;;  %v2689_v44 = vmul.f32 %v8807_v16, %v2665_v57  ;;  %v6901_v59 = vld [vmem:[%s9643_s3 + $0x330] ss:$12 sps:$4 sm:$0xff]   ;;  %v6908_v16 = vld [vmem:[%s9643_s3 + $0x34c] ss:$12 sps:$4 sm:$0xff]   ;;  %v6915_v23 = vld [vmem:[%s9643_s3 + $0x368] ss:$12 sps:$4 sm:$0xff]  }
 0x1d1   :  { %v2533_v58 = vadd.f32 -1.4531521, %v2509_v29  ;;  %5029 = vmatprep.subr.bf16.mxu0 %v6898_v56  ;;  %6172 = vmatprep.subr.bf16.mxu1 %v6899_v26  ;;  %v2652_v61 = vmul.f32 %v8818_v42, %v2628_v30  ;;  %v2832_v11 = vsub.f32 1.0, %v2808_v54  ;;  %v6916_v33 = vld [vmem:[%s9643_s3 + $0x378] ss:$12 sps:$4 sm:$0xff]   ;;  %v2929_v54 = vmul.f32 0.5, %v8720_v4 }
 0x1d2   :  { %v7208_v34 = vpop.eup %7207  ;;  %v2809_v6 = vmul.f32 %v7204_v55, %v2689_v44  ;;  %v6920_v48 = vld [vmem:[%s9643_s3 + $0x380] ss:$12 sps:$4 sm:$0xff]   ;;  %v6921_v31 = vld [vmem:[%s9643_s3 + $0x390] ss:$12 sps:$4 sm:$0xff]  }
 0x1d3   :  { %v2557_v45 = vmul.f32 %v8834_v3, %v2533_v58  ;;  %5030 = vmatpush1.bf16.msra.mxu0 %v6896_v14  ;;  %6173 = vmatpush3.bf16.msra.mxu1 %v6900_v28  ;;  %v2676_v39 = vadd.f32 0.2548296, %v2652_v61  ;;  %v2880_v35 = vsub.f32 0.0, %v2832_v11  ;;  %v6928_v44 = vld [vmem:[%s9643_s3 + $0x3ac] ss:$12 sps:$4 sm:$0xff]   ;;  %v2941_v61 = vmul.f32 0.5, %v8775_v19 }
 0x1d4   :  { %5031 = vmatprep.subr.bf16.mxu0 %v6903_v37  ;;  %6174 = vmatprep.subr.bf16.mxu1 %v6904_v43  ;;  %v2833_v55 = vsub.f32 1.0, %v2809_v6  ;;  %v6925_v37 = vld [vmem:[%s9643_s3 + $0x398] ss:$12 sps:$4 sm:$0xff]   ;;  %v6929_v4 = vld [vmem:[%s9643_s3 + $0x470] ss:$12 sps:$4 sm:$0xff]  }
 0x1d5   :  { %v2581_v47 = vadd.f32 1.4214138, %v2557_v45  ;;  %v2700_v63 = vmul.f32 %v8818_v42, %v2676_v39  ;;  %v2904_v12 = vsel %vm2856_vm12, %v2832_v11, %v2880_v35  ;;  %v6930_v39 = vld [vmem:[%s9643_s3 + $0x3b0] ss:$12 sps:$4 sm:$0xff]   ;;  %v6958_v19 = vld [vmem:[%s9643_s3 + $0x548] ss:$12 sps:$4 sm:$0xff]  }
 0x1d6   :  { %v2952_v9 = vadd.f32 1.0, %v2904_v12  ;;  %v2881_v13 = vsub.f32 0.0, %v2833_v55  ;;  %v7210_v56 = vpop.eup %7209  ;;  %v354_v35 = vsub.s32 6, %v8184_v49  ;;  %v6959_v6 = vld [vmem:[%s9643_s3 + $0x488] ss:$12 sps:$4 sm:$0xff]  }
 0x1d7   :  { %v2605_v5 = vmul.f32 %v8834_v3, %v2581_v47  ;;  %v2820_v27 = vmul.f32 %v7208_v34, %v2700_v63  ;;  %5032 = vmatpush1.bf16.msra.mxu0 %v6901_v59  ;;  %6175 = vmatpush3.bf16.msra.mxu1 %v6905_v41  ;;  %v6926_v59 = vld [vmem:[%s9643_s3 + $0x3a8] ss:$12 sps:$4 sm:$0xff]   ;;  %v6933_v41 = vld [vmem:[%s9643_s3 + $0x3c4] ss:$12 sps:$4 sm:$0xff]   ;;  %v6931_v34 = vld [vmem:[%s9643_s3 + $0x3c0] ss:$12 sps:$4 sm:$0xff]  }
 0x1d8   :  { %5033 = vmatprep.subr.bf16.mxu0 %v6908_v16  ;;  %6176 = vmatprep.subr.bf16.mxu1 %v6909_v38  ;;  %v2976_v21 = vmul.f32 %v2952_v9, %v2928_v20  ;;  %v2905_v28 = vsel %vm2857_vm14, %v2833_v55, %v2881_v13  ;;  %v6936_v38 = vld [vmem:[%s9643_s3 + $0x3dc] ss:$12 sps:$4 sm:$0xff]   ;;  %v358_v63 = vsub.s32 7, %v8184_v49  ;;  %v6934_v12 = vld [vmem:[%s9643_s3 + $0x3d8] ss:$12 sps:$4 sm:$0xff]  }
 0x1d9   :  { %v2629_v42 = vadd.f32 -0.28449672, %v2605_v5  ;;  %v2844_v0 = vsub.f32 1.0, %v2820_v27  ;;  %v2953_v58 = vadd.f32 1.0, %v2905_v28  ;;  %v6963_v5 = vld [vmem:[%s9643_s3 + $0x560] ss:$12 sps:$4 sm:$0xff]   ;;  %v355_v27 = vrot.slane %v8584_v36, %v354_v35 }
 0x1da   :  { %v6968_v55 = vld [vmem:[%s9643_s3 + $0x578] ss:$12 sps:$4 sm:$0xff]   ;;  %v6993_v35 = vld [vmem:[%s9643_s3 + $0x5f0] ss:$12 sps:$4 sm:$0xff]  }
 0x1db   :  { %v2653_v25 = vmul.f32 %v8834_v3, %v2629_v42  ;;  %v2892_v40 = vsub.f32 0.0, %v2844_v0  ;;  %5034 = vmatpush1.bf16.msra.mxu0 %v6906_v60  ;;  %6177 = vmatpush3.bf16.msra.mxu1 %v6910_v46  ;;  %v2977_v11 = vmul.f32 %v2953_v58, %v2929_v54  ;;  %v6964_v60 = vld [vmem:[%s9643_s3 + $0x4a0] ss:$12 sps:$4 sm:$0xff]   ;;  %v6969_v9 = vld [vmem:[%s9643_s3 + $0x4b8] ss:$12 sps:$4 sm:$0xff]  }
 0x1dc   :  { %5035 = vmatprep.subr.bf16.mxu0 %v6913_v1  ;;  %6178 = vmatprep.subr.bf16.mxu1 %v6914_v52  ;;  %v6939_v46 = vld [vmem:[%s9643_s3 + $0x3f4] ss:$12 sps:$4 sm:$0xff]   ;;  %v359_v1 = vrot.slane %v8584_v36, %v358_v63 }
 0x1dd   :  { %v2677_v24 = vadd.f32 0.2548296, %v2653_v25  ;;  %v2916_v26 = vsel %vm2868_vm13, %v2844_v0, %v2892_v40  ;;  %v6937_v0 = vld [vmem:[%s9643_s3 + $0x3f0] ss:$12 sps:$4 sm:$0xff]   ;;  %v6979_v58 = vld [vmem:[%s9643_s3 + $0x4e8] ss:$12 sps:$4 sm:$0xff]  }
 0x1de   :  { %v2964_v15 = vadd.f32 1.0, %v2916_v26  ;;  %v6973_v40 = vld [vmem:[%s9643_s3 + $0x590] ss:$12 sps:$4 sm:$0xff]  }
 0x1df   :  { %v2701_v14 = vmul.f32 %v8834_v3, %v2677_v24  ;;  %5036 = vmatpush1.bf16.msra.mxu0 %v6911_v8  ;;  %6179 = vmatpush3.bf16.msra.mxu1 %v6915_v23  ;;  %v6924_v3 = vld [vmem:[%s9643_s3 + $0x458] ss:$12 sps:$4 sm:$0xff]  }
 0x1e0   :  { %v2988_v29 = vmul.f32 %v2964_v15, %v2940_v22  ;;  %5037 = vmatprep.subr.bf16.mxu0 %v6918_v2  ;;  %6180 = vmatprep.subr.bf16.mxu1 %v6919_v17  ;;  %v6942_v8 = vld [vmem:[%s9643_s3 + $0x40c] ss:$12 sps:$4 sm:$0xff]   ;;  %v6940_v17 = vld [vmem:[%s9643_s3 + $0x408] ss:$12 sps:$4 sm:$0xff]   ;;  %v6974_v15 = vld [vmem:[%s9643_s3 + $0x4d0] ss:$12 sps:$4 sm:$0xff]  }
 0x1e1   :  { %v2821_v7 = vmul.f32 %v7210_v56, %v2701_v14  ;;  %v6945_v56 = vld [vmem:[%s9643_s3 + $0x424] ss:$12 sps:$4 sm:$0xff]  }
 0x1e2   :  { %v8922_v57 = vpack.c.bf16 %v2988_v29, %v2976_v21 }
 0x1e3   :  { %v2845_v30 = vsub.f32 1.0, %v2821_v7  ;;  %5038 = vmatpush1.bf16.msra.mxu0 %v6916_v33  ;;  %6181 = vmatpush3.bf16.msra.mxu1 %v6920_v48  ;;  %v6978_v48 = vld [vmem:[%s9643_s3 + $0x5a8] ss:$12 sps:$4 sm:$0xff]   ;;  %v6943_v7 = vld [vmem:[%s9643_s3 + $0x420] ss:$12 sps:$4 sm:$0xff]  }
 0x1e4   :  { %5039 = vmatprep.subr.bf16.mxu0 %v6923_v62  ;;  %6182 = vmatprep.subr.bf16.mxu1 %v6924_v3 }
 0x1e5   :  { %v2893_v43 = vsub.f32 0.0, %v2845_v30 }
 0x1e7   :  { %v2917_v50 = vsel %vm2869_vm15, %v2845_v30, %v2893_v43  ;;  %5040 = vmatpush1.bf16.msra.mxu0 %v6921_v31  ;;  %6183 = vmatpush3.bf16.msra.mxu1 %v6925_v37  ;;  %v6948_v30 = vld [vmem:[%s9643_s3 + $0x43c] ss:$12 sps:$4 sm:$0xff]  }
 0x1e8   :  { %v2965_v45 = vadd.f32 1.0, %v2917_v50  ;;  %5041 = vmatprep.subr.bf16.mxu0 %v6928_v44  ;;  %6184 = vmatprep.subr.bf16.mxu1 %v6929_v4  ;;  %v6983_v44 = vld [vmem:[%s9643_s3 + $0x5c0] ss:$12 sps:$4 sm:$0xff]   ;;  %v6946_v50 = vld [vmem:[%s9643_s3 + $0x438] ss:$12 sps:$4 sm:$0xff]  }
 0x1ea   :  { %v2989_v16 = vmul.f32 %v2965_v45, %v2941_v61  ;;  %v6951_v45 = vld [vmem:[%s9643_s3 + $0x454] ss:$12 sps:$4 sm:$0xff]  }
 0x1eb   :  { %5042 = vmatpush1.bf16.msra.mxu0 %v6926_v59  ;;  %6185 = vmatpush3.bf16.msra.mxu1 %v6930_v39  ;;  %v6988_v59 = vld [vmem:[%s9643_s3 + $0x5d8] ss:$12 sps:$4 sm:$0xff]  }
 0x1ec   :  { %v8958_v47 = vpack.c.bf16 %v2989_v16, %v2977_v11  ;;  %5043 = vmatprep.subr.bf16.mxu0 %v6933_v41  ;;  %6192 = vmatprep.subr.bf16.mxu1 %v6958_v19  ;;  %v6984_v11 = vld [vmem:[%s9643_s3 + $0x500] ss:$12 sps:$4 sm:$0xff]   ;;  %v6949_v41 = vld [vmem:[%s9643_s3 + $0x450] ss:$12 sps:$4 sm:$0xff]   ;;  %v6989_v19 = vld [vmem:[%s9643_s3 + $0x518] ss:$12 sps:$4 sm:$0xff]  }
 0x1ee   :  { %5314 = vmatmul.mubr.bf16.vlgmr.msra.gmra.mrb[24].mxu1 %v8537_v18 }
 0x1ef   :  { %5044 = vmatpush1.bf16.msra.mxu0 %v6931_v34  ;;  %6193 = vmatpush3.bf16.msra.mxu1 %v6959_v6  ;;  %v6954_v34 = vld [vmem:[%s9643_s3 + $0x46c] ss:$12 sps:$4 sm:$0xff]  }
 0x1f0   :  { %5045 = vmatprep.subr.bf16.mxu0 %v6936_v38  ;;  %6194 = vmatprep.subr.bf16.mxu1 %v6963_v5  ;;  %v6952_v5 = vld [vmem:[%s9643_s3 + $0x468] ss:$12 sps:$4 sm:$0xff]  }
 0x1f3   :  { %5046 = vmatpush1.bf16.msra.mxu0 %v6934_v12  ;;  %6195 = vmatpush3.bf16.msra.mxu1 %v6964_v60  ;;  %v6994_v12 = vld [vmem:[%s9643_s3 + $0x530] ss:$12 sps:$4 sm:$0xff]  }
 0x1f4   :  { %5047 = vmatprep.subr.bf16.mxu0 %v6939_v46  ;;  %6196 = vmatprep.subr.bf16.mxu1 %v6968_v55  ;;  %v6998_v55 = vld [vmem:[%s9643_s3 + $0x6c8] ss:$12 sps:$4 sm:$0xff]  }
 0x1f5   :  { %v2163_v42 = vpop.f32.mrb[8].mxu1 }
 0x1f6   :  { %v8982_v52 = vadd.f32 %v2163_v42, %v355_v27  ;;  %v2165_v20 = vpop.f32.mrb[9].mxu1 }
 0x1f7   :  { %v8990_v36 = vadd.f32 %v2165_v20, %v359_v1  ;;  %v2167_v25 = vpop.f32.mrb[10].mxu1  ;;  %5048 = vmatpush1.bf16.msra.mxu0 %v6937_v0  ;;  %6197 = vmatpush3.bf16.msra.mxu1 %v6969_v9 }
 0x1f8   :  { %v8999_v23 = vmul.f32 0.70710677, %v8982_v52  ;;  %v9001_v2 = vadd.f32 %v2167_v25, %v355_v27  ;;  %v2169_v13 = vpop.f32.mrb[11].mxu1  ;;  %5049 = vmatprep.subr.bf16.mxu0 %v6942_v8  ;;  %6198 = vmatprep.subr.bf16.mxu1 %v6973_v40 }
 0x1f9   :  { %v9004_v22 = vmul.f32 0.70710677, %v8990_v36  ;;  %v9006_v24 = vadd.f32 %v2169_v13, %v359_v1  ;;  %v6957_v1 = vld [vmem:[%s9643_s3 + $0x484] ss:$12 sps:$4 sm:$0xff]   ;;  %v6955_v13 = vld [vmem:[%s9643_s3 + $0x480] ss:$12 sps:$4 sm:$0xff]  }
 0x1fa   :  { %v2374_v26 = vand.u32 2147483647, %v8999_v23  ;;  %v9016_v21 = vmul.f32 0.70710677, %v9001_v2  ;;  %vm2854_vm0 = vcmp.ge.f32.partialorder %v8999_v23, 0.0 }
 0x1fb   :  { %v2375_v14 = vand.u32 2147483647, %v9004_v22  ;;  %v9023_v33 = vmul.f32 0.70710677, %v9006_v24  ;;  %5050 = vmatpush1.bf16.msra.mxu0 %v6940_v17  ;;  %6199 = vmatpush3.bf16.msra.mxu1 %v6974_v15  ;;  %v6962_v15 = vld [vmem:[%s9643_s3 + $0x49c] ss:$12 sps:$4 sm:$0xff]  }
 0x1fc   :  { %v2398_v28 = vmul.f32 0.3275911, %v2374_v26  ;;  %v2386_v29 = vand.u32 2147483647, %v9016_v21  ;;  %5051 = vmatprep.subr.bf16.mxu0 %v6945_v56  ;;  %6200 = vmatprep.subr.bf16.mxu1 %v6978_v48  ;;  %v2710_v39 = vsub.f32 0.0, %v2374_v26  ;;  %vm2855_vm1 = vcmp.ge.f32.partialorder %v9004_v22, 0.0 }
 0x1fd   :  { %v2399_v62 = vmul.f32 0.3275911, %v2375_v14  ;;  %v9033_v3 = vand.u32 2147483647, %v9023_v33  ;;  %v2711_v16 = vsub.f32 0.0, %v2375_v14  ;;  %vm2866_vm2 = vcmp.ge.f32.partialorder %v9016_v21, 0.0 }
 0x1fe   :  { %v2422_v31 = vadd.f32 1.0, %v2398_v28  ;;  %v2410_v54 = vmul.f32 0.3275911, %v2386_v29  ;;  %v2734_v38 = vmul.f32 %v2710_v39, %v2374_v26  ;;  %v2722_v63 = vsub.f32 0.0, %v2386_v29  ;;  %v6992_v22 = vld [vmem:[%s9643_s3 + $0x52c] ss:$12 sps:$4 sm:$0xff]  }
 0x1ff   :  { %v2423_v37 = vadd.f32 1.0, %v2399_v62  ;;  %v2411_v43 = vmul.f32 0.3275911, %v9033_v3  ;;  %5052 = vmatpush1.bf16.msra.mxu0 %v6943_v7  ;;  %6201 = vmatpush3.bf16.msra.mxu1 %v6979_v58  ;;  %v2735_v46 = vmul.f32 %v2711_v16, %v2375_v14  ;;  %v2723_v0 = vsub.f32 0.0, %v9033_v3 }
 0x200   :  { %7211 = vrcp.f32 %v2422_v31  ;;  %v2434_v4 = vadd.f32 1.0, %v2410_v54  ;;  %5053 = vmatprep.subr.bf16.mxu0 %v6948_v30  ;;  %6202 = vmatprep.subr.bf16.mxu1 %v6983_v44  ;;  %v2764_v25 = vmul.f32 1.442695, %v2734_v38  ;;  %v2746_v40 = vmul.f32 %v2722_v63, %v2386_v29  ;;  %v6960_v54 = vld [vmem:[%s9643_s3 + $0x498] ss:$12 sps:$4 sm:$0xff]  }
 0x201   :  { %7213 = vrcp.f32 %v2423_v37  ;;  %v2435_v61 = vadd.f32 1.0, %v2411_v43  ;;  %v2766_v56 = vmul.f32 1.442695, %v2735_v46  ;;  %v2747_v28 = vmul.f32 %v2723_v0, %v9033_v3  ;;  %v6967_v43 = vld [vmem:[%s9643_s3 + $0x4b4] ss:$12 sps:$4 sm:$0xff]  }
 0x202   :  { %7215 = vrcp.f32 %v2434_v4  ;;  %v2788_v31 = vmul.f32 1.442695, %v2746_v40  ;;  %vm2867_vm3 = vcmp.ge.f32.partialorder %v9023_v33, 0.0  ;;  %v2927_v21 = vmul.f32 0.5, %v8990_v36 }
 0x203   :  { %7217 = vrcp.f32 %v2435_v61  ;;  %5054 = vmatpush1.bf16.msra.mxu0 %v6946_v50  ;;  %6203 = vmatpush3.bf16.msra.mxu1 %v6984_v11  ;;  %v2790_v44 = vmul.f32 1.442695, %v2747_v28 }
 0x204   :  { %5055 = vmatprep.subr.bf16.mxu0 %v6951_v45  ;;  %6204 = vmatprep.subr.bf16.mxu1 %v6988_v59  ;;  %7219 = vpow2.f32 %v2764_v25  ;;  %v6965_v45 = vld [vmem:[%s9643_s3 + $0x4b0] ss:$12 sps:$4 sm:$0xff]  }
 0x205   :  { %7221 = vpow2.f32 %v2766_v56 }
 0x206   :  { %7223 = vpow2.f32 %v2788_v31 }
 0x207   :  { %5056 = vmatpush1.bf16.msra.mxu0 %v6949_v41  ;;  %6205 = vmatpush3.bf16.msra.mxu1 %v6989_v19  ;;  %v6972_v19 = vld [vmem:[%s9643_s3 + $0x4cc] ss:$12 sps:$4 sm:$0xff]   ;;  %7225 = vpow2.f32 %v2790_v44 }
 0x208   :  { %5057 = vmatprep.subr.bf16.mxu0 %v6954_v34  ;;  %6206 = vmatprep.subr.bf16.mxu1 %v6993_v35 }
 0x20a   :  { %v9069_v6 = vpop.eup %7211 }
 0x20b   :  { %v9077_v27 = vpop.eup %7213  ;;  %v2494_v60 = vmul.f32 1.0614054, %v9069_v6  ;;  %5058 = vmatpush1.bf16.msra.mxu0 %v6952_v5  ;;  %6207 = vmatpush3.bf16.msra.mxu1 %v6994_v12  ;;  %v6970_v5 = vld [vmem:[%s9643_s3 + $0x4c8] ss:$12 sps:$4 sm:$0xff]  }
 0x20c   :  { %v2495_v42 = vmul.f32 1.0614054, %v9077_v27  ;;  %v9088_v9 = vpop.eup %7215  ;;  %5070 = vmatprep.subr.bf16.mxu0 %v6957_v1  ;;  %6214 = vmatprep.subr.bf16.mxu1 %v6998_v55  ;;  %v6977_v1 = vld [vmem:[%s9643_s3 + $0x4e4] ss:$12 sps:$4 sm:$0xff]  }
 0x20d   :  { %v2518_v20 = vadd.f32 -1.4531521, %v2494_v60  ;;  %v2506_v26 = vmul.f32 1.0614054, %v9088_v9  ;;  %v9098_v14 = vpop.eup %7217 }
 0x20e   :  { %v2519_v8 = vadd.f32 -1.4531521, %v2495_v42  ;;  %v2507_v62 = vmul.f32 1.0614054, %v9098_v14  ;;  %5060 = vmatmul.mubr.bf16.vlgmr.msra.gmra.mrb[8].mxu0 %v8537_v18  ;;  %v7220_v55 = vpop.eup %7219 }
 0x20f   :  { %v2542_v17 = vmul.f32 %v9069_v6, %v2518_v20  ;;  %v2530_v7 = vadd.f32 -1.4531521, %v2506_v26  ;;  %5071 = vmatpush1.bf16.msra.mxu0 %v6955_v13  ;;  %v7222_v0 = vpop.eup %7221 }
 0x210   :  { %v2543_v48 = vmul.f32 %v9077_v27, %v2519_v8  ;;  %v2531_v3 = vadd.f32 -1.4531521, %v2507_v62  ;;  %5072 = vmatprep.subr.bf16.mxu0 %v6962_v15  ;;  %v7224_v26 = vpop.eup %7223 }
 0x211   :  { %v2566_v29 = vadd.f32 1.4214138, %v2542_v17  ;;  %v2554_v37 = vmul.f32 %v9088_v9, %v2530_v7  ;;  %v7226_v7 = vpop.eup %7225 }
 0x212   :  { %v2567_v30 = vadd.f32 1.4214138, %v2543_v48  ;;  %v2555_v50 = vmul.f32 %v9098_v14, %v2531_v3 }
 0x213   :  { %v2590_v58 = vmul.f32 %v9069_v6, %v2566_v29  ;;  %v2578_v61 = vadd.f32 1.4214138, %v2554_v37  ;;  %5073 = vmatpush1.bf16.msra.mxu0 %v6960_v54 }
 0x214   :  { %v2591_v18 = vmul.f32 %v9077_v27, %v2567_v30  ;;  %v2579_v41 = vadd.f32 1.4214138, %v2555_v50  ;;  %5074 = vmatprep.subr.bf16.mxu0 %v6967_v43  ;;  %v6985_v43 = vld [vmem:[%s9643_s3 + $0x510] ss:$12 sps:$4 sm:$0xff]   ;;  %v2938_v50 = vmul.f32 0.5, %v9001_v2 }
 0x215   :  { %v2614_v4 = vadd.f32 -0.28449672, %v2590_v58  ;;  %v2602_v39 = vmul.f32 %v9088_v9, %v2578_v61  ;;  %v6987_v58 = vld [vmem:[%s9643_s3 + $0x514] ss:$12 sps:$4 sm:$0xff]   ;;  %v6997_v2 = vld [vmem:[%s9643_s3 + $0x544] ss:$12 sps:$4 sm:$0xff]  }
 0x216   :  { %v2615_v11 = vadd.f32 -0.28449672, %v2591_v18  ;;  %v2603_v38 = vmul.f32 %v9098_v14, %v2579_v41  ;;  %v2926_v18 = vmul.f32 0.5, %v8982_v52  ;;  %v2939_v52 = vmul.f32 0.5, %v9006_v24  ;;  %v6995_v24 = vld [vmem:[%s9643_s3 + $0x540] ss:$12 sps:$4 sm:$0xff]  }
 0x217   :  { %v2638_v59 = vmul.f32 %v9069_v6, %v2614_v4  ;;  %v2626_v35 = vadd.f32 -0.28449672, %v2602_v39  ;;  %5075 = vmatpush1.bf16.msra.mxu0 %v6965_v45 }
 0x218   :  { %v2639_v16 = vmul.f32 %v9077_v27, %v2615_v11  ;;  %v2627_v46 = vadd.f32 -0.28449672, %v2603_v38  ;;  %5076 = vmatprep.subr.bf16.mxu0 %v6972_v19  ;;  %v6990_v19 = vld [vmem:[%s9643_s3 + $0x528] ss:$12 sps:$4 sm:$0xff]  }
 0x219   :  { %v2662_v34 = vadd.f32 0.2548296, %v2638_v59  ;;  %v2650_v60 = vmul.f32 %v9088_v9, %v2626_v35  ;;  %v6999_v35 = vld [vmem:[%s9643_s3 + $0x608] ss:$12 sps:$4 sm:$0xff]  }
 0x21a   :  { %v2663_v63 = vadd.f32 0.2548296, %v2639_v16  ;;  %v2651_v8 = vmul.f32 %v9098_v14, %v2627_v46  ;;  %v7002_v38 = vld [vmem:[%s9643_s3 + $0x55c] ss:$12 sps:$4 sm:$0xff]   ;;  %v7008_v46 = vld [vmem:[%s9643_s3 + $0x6f8] ss:$12 sps:$4 sm:$0xff]  }
 0x21b   :  { %v2686_v12 = vmul.f32 %v9069_v6, %v2662_v34  ;;  %v2674_v25 = vadd.f32 0.2548296, %v2650_v60  ;;  %5077 = vmatpush1.bf16.msra.mxu0 %v6970_v5  ;;  %v6975_v6 = vld [vmem:[%s9643_s3 + $0x4e0] ss:$12 sps:$4 sm:$0xff]   ;;  %v7000_v5 = vld [vmem:[%s9643_s3 + $0x558] ss:$12 sps:$4 sm:$0xff]  }
 0x21c   :  { %v2687_v42 = vmul.f32 %v9077_v27, %v2663_v63  ;;  %v2675_v56 = vadd.f32 0.2548296, %v2651_v8  ;;  %5078 = vmatprep.subr.bf16.mxu0 %v6977_v1  ;;  %v6982_v27 = vld [vmem:[%s9643_s3 + $0x4fc] ss:$12 sps:$4 sm:$0xff]   ;;  %v7003_v63 = vld [vmem:[%s9643_s3 + $0x6e0] ss:$12 sps:$4 sm:$0xff]  }
 0x21d   :  { %v2806_v20 = vmul.f32 %v7220_v55, %v2686_v12  ;;  %v2698_v17 = vmul.f32 %v9088_v9, %v2674_v25  ;;  %v6980_v9 = vld [vmem:[%s9643_s3 + $0x4f8] ss:$12 sps:$4 sm:$0xff]   ;;  %v7004_v12 = vld [vmem:[%s9643_s3 + $0x620] ss:$12 sps:$4 sm:$0xff]   ;;  %v7005_v1 = vld [vmem:[%s9643_s3 + $0x570] ss:$12 sps:$4 sm:$0xff]  }
 0x21e   :  { %v2807_v40 = vmul.f32 %v7222_v0, %v2687_v42  ;;  %v2699_v29 = vmul.f32 %v9098_v14, %v2675_v56  ;;  %v7007_v60 = vld [vmem:[%s9643_s3 + $0x574] ss:$12 sps:$4 sm:$0xff]   ;;  %v7009_v55 = vld [vmem:[%s9643_s3 + $0x638] ss:$12 sps:$4 sm:$0xff]   ;;  %v7013_v0 = vld [vmem:[%s9643_s3 + $0x710] ss:$12 sps:$4 sm:$0xff]  }
 0x21f   :  { %v2830_v13 = vsub.f32 1.0, %v2806_v20  ;;  %v2818_v28 = vmul.f32 %v7224_v26, %v2698_v17  ;;  %5079 = vmatpush1.bf16.msra.mxu0 %v6975_v6  ;;  %v7012_v42 = vld [vmem:[%s9643_s3 + $0x58c] ss:$12 sps:$4 sm:$0xff]   ;;  %v7010_v20 = vld [vmem:[%s9643_s3 + $0x588] ss:$12 sps:$4 sm:$0xff]  }
 0x220   :  { %v2831_v15 = vsub.f32 1.0, %v2807_v40  ;;  %v2819_v54 = vmul.f32 %v7226_v7, %v2699_v29  ;;  %5080 = vmatprep.subr.bf16.mxu0 %v6982_v27  ;;  %v7014_v25 = vld [vmem:[%s9643_s3 + $0x650] ss:$12 sps:$4 sm:$0xff]   ;;  %v7018_v40 = vld [vmem:[%s9643_s3 + $0x728] ss:$12 sps:$4 sm:$0xff]  }
 0x221   :  { %v2878_v48 = vsub.f32 0.0, %v2830_v13  ;;  %v2842_v31 = vsub.f32 1.0, %v2818_v28  ;;  %v7017_v8 = vld [vmem:[%s9643_s3 + $0x5a4] ss:$12 sps:$4 sm:$0xff]   ;;  %v7015_v6 = vld [vmem:[%s9643_s3 + $0x5a0] ss:$12 sps:$4 sm:$0xff]  }
 0x222   :  { %v2879_v62 = vsub.f32 0.0, %v2831_v15  ;;  %v2843_v3 = vsub.f32 1.0, %v2819_v54  ;;  %v7022_v17 = vld [vmem:[%s9643_s3 + $0x5bc] ss:$12 sps:$4 sm:$0xff]   ;;  %v7023_v56 = vld [vmem:[%s9643_s3 + $0x740] ss:$12 sps:$4 sm:$0xff]  }
 0x223   :  { %v2902_v30 = vsel %vm2854_vm0, %v2830_v13, %v2878_v48  ;;  %v2890_v37 = vsub.f32 0.0, %v2842_v31  ;;  %5081 = vmatpush1.bf16.msra.mxu0 %v6980_v9  ;;  %v7019_v13 = vld [vmem:[%s9643_s3 + $0x668] ss:$12 sps:$4 sm:$0xff]   ;;  %v7020_v27 = vld [vmem:[%s9643_s3 + $0x5b8] ss:$12 sps:$4 sm:$0xff]  }
 0x224   :  { %v2903_v14 = vsel %vm2855_vm1, %v2831_v15, %v2879_v62  ;;  %v2950_v23 = vadd.f32 1.0, %v2902_v30  ;;  %v2891_v4 = vsub.f32 0.0, %v2843_v3  ;;  %5082 = vmatprep.subr.bf16.mxu0 %v6987_v58  ;;  %v7024_v26 = vld [vmem:[%s9643_s3 + $0x680] ss:$12 sps:$4 sm:$0xff]   ;;  %v7028_v48 = vld [vmem:[%s9643_s3 + $0x758] ss:$12 sps:$4 sm:$0xff]  }
 0x225   :  { %v2914_v44 = vsel %vm2866_vm2, %v2842_v31, %v2890_v37  ;;  %v2951_v61 = vadd.f32 1.0, %v2903_v14  ;;  %v7027_v15 = vld [vmem:[%s9643_s3 + $0x5d4] ss:$12 sps:$4 sm:$0xff]   ;;  %v7025_v28 = vld [vmem:[%s9643_s3 + $0x5d0] ss:$12 sps:$4 sm:$0xff]  }
 0x226   :  { %v2962_v11 = vadd.f32 1.0, %v2914_v44  ;;  %v2915_v45 = vsel %vm2867_vm3, %v2843_v3, %v2891_v4  ;;  %v2974_v59 = vmul.f32 %v2950_v23, %v2926_v18  ;;  %v7029_v29 = vld [vmem:[%s9643_s3 + $0x698] ss:$12 sps:$4 sm:$0xff]   ;;  %v7033_v62 = vld [vmem:[%s9643_s3 + $0x770] ss:$12 sps:$4 sm:$0xff]  }
 0x227   :  { %v2963_v41 = vadd.f32 1.0, %v2915_v45  ;;  %5083 = vmatpush1.bf16.msra.mxu0 %v6985_v43  ;;  %v2975_v16 = vmul.f32 %v2951_v61, %v2927_v21  ;;  %v7032_v7 = vld [vmem:[%s9643_s3 + $0x5ec] ss:$12 sps:$4 sm:$0xff]   ;;  %v7030_v9 = vld [vmem:[%s9643_s3 + $0x5e8] ss:$12 sps:$4 sm:$0xff]  }
 0x228   :  { %v2986_v39 = vmul.f32 %v2962_v11, %v2938_v50  ;;  %5084 = vmatprep.subr.bf16.mxu0 %v6992_v22  ;;  %v7034_v30 = vld [vmem:[%s9643_s3 + $0x6b0] ss:$12 sps:$4 sm:$0xff]   ;;  %v7062_v54 = vld [vmem:[%s9643_s3 + $0x848] ss:$12 sps:$4 sm:$0xff]   ;;  %v7035_v58 = vld [vmem:[%s9643_s3 + $0x600] ss:$12 sps:$4 sm:$0xff]  }
 0x229   :  { %v2987_v36 = vmul.f32 %v2963_v41, %v2939_v52  ;;  %v7037_v31 = vld [vmem:[%s9643_s3 + $0x604] ss:$12 sps:$4 sm:$0xff]   ;;  %v7040_v14 = vld [vmem:[%s9643_s3 + $0x61c] ss:$12 sps:$4 sm:$0xff]   ;;  %v7067_v3 = vld [vmem:[%s9643_s3 + $0x860] ss:$12 sps:$4 sm:$0xff]  }
 0x22a   :  { %v9168_v33 = vpack.c.bf16 %v2986_v39, %v2974_v59  ;;  %v7063_v37 = vld [vmem:[%s9643_s3 + $0x788] ss:$12 sps:$4 sm:$0xff]   ;;  %v7038_v23 = vld [vmem:[%s9643_s3 + $0x618] ss:$12 sps:$4 sm:$0xff]   ;;  %v7041_v11 = vld [vmem:[%s9643_s3 + $0x630] ss:$12 sps:$4 sm:$0xff]  }
 0x22b   :  { %5085 = vmatpush1.bf16.msra.mxu0 %v6990_v19  ;;  %v2999_v34 = vpack.c.bf16 %v2987_v36, %v2975_v16  ;;  %v7248_v43 = vld [vmem:[%s9644_s2 + $0x8] sm:$0xf]  ;;  %v7043_v44 = vld [vmem:[%s9643_s3 + $0x634] ss:$12 sps:$4 sm:$0xff]   ;;  %v7072_v22 = vld [vmem:[%s9643_s3 + $0x878] ss:$12 sps:$4 sm:$0xff]  }
 0x22c   :  { %5086 = vmatprep.subr.bf16.mxu0 %v6997_v2  ;;  %v371_v18 = vrot.slane %v7248_v43, %v8567_v10  ;;  %v375_v4 = vrot.slane %v7248_v43, %v342_v32  ;;  %v7046_v45 = vld [vmem:[%s9643_s3 + $0x64c] ss:$12 sps:$4 sm:$0xff]   ;;  %v7077_v19 = vld [vmem:[%s9643_s3 + $0x890] ss:$12 sps:$4 sm:$0xff]  }
 0x22d   :  { %5102 = vmatprep.mubr.bf16.mxu0 %v2999_v34  ;;  %5354 = vmatprep.mubr.bf16.mxu1 %v2999_v34  ;;  %v7073_v59 = vld [vmem:[%s9643_s3 + $0x7b8] ss:$12 sps:$4 sm:$0xff]  }
 0x22e   :  { %5355 = vmatmul.mubr.bf16.vlgmr.msra.gmra.mrb[28].mxu1 %v9168_v33  ;;  %v7049_v34 = vld [vmem:[%s9643_s3 + $0x664] ss:$12 sps:$4 sm:$0xff]  }
 0x22f   :  { %5087 = vmatpush1.bf16.msra.mxu0 %v6995_v24  ;;  %6215 = vmatpush3.bf16.msra.mxu1 %v6999_v35  ;;  %v7061_v43 = vld [vmem:[%s9643_s3 + $0x6c4] ss:$12 sps:$4 sm:$0xff]  }
 0x230   :  { %5395 = vmatprep.mubr.bf16.mxu1 %v8958_v47  ;;  %5088 = vmatprep.subr.bf16.mxu0 %v7002_v38 }
 0x231   :  { %6216 = vmatprep.subr.bf16.mxu1 %v7003_v63  ;;  %v7078_v63 = vld [vmem:[%s9643_s3 + $0x7d0] ss:$12 sps:$4 sm:$0xff]  }
 0x233   :  { %5089 = vmatpush1.bf16.msra.mxu0 %v7000_v5  ;;  %6217 = vmatpush3.bf16.msra.mxu1 %v7004_v12 }
 0x234   :  { %5090 = vmatprep.subr.bf16.mxu0 %v7007_v60  ;;  %6218 = vmatprep.subr.bf16.mxu1 %v7008_v46  ;;  %v7082_v60 = vld [vmem:[%s9643_s3 + $0x8a8] ss:$12 sps:$4 sm:$0xff]  }
 0x237   :  { %5091 = vmatpush1.bf16.msra.mxu0 %v7005_v1  ;;  %6219 = vmatpush3.bf16.msra.mxu1 %v7009_v55  ;;  %v7047_v55 = vld [vmem:[%s9643_s3 + $0x660] ss:$12 sps:$4 sm:$0xff]  }
 0x238   :  { %5092 = vmatprep.subr.bf16.mxu0 %v7012_v42  ;;  %6220 = vmatprep.subr.bf16.mxu1 %v7013_v0 }
 0x23b   :  { %5093 = vmatpush1.bf16.msra.mxu0 %v7010_v20  ;;  %6221 = vmatpush3.bf16.msra.mxu1 %v7014_v25  ;;  %v7052_v20 = vld [vmem:[%s9643_s3 + $0x67c] ss:$12 sps:$4 sm:$0xff]  }
 0x23c   :  { %5094 = vmatprep.subr.bf16.mxu0 %v7017_v8  ;;  %6222 = vmatprep.subr.bf16.mxu1 %v7018_v40  ;;  %v7083_v40 = vld [vmem:[%s9643_s3 + $0x7e8] ss:$12 sps:$4 sm:$0xff]  }
 0x23f   :  { %5095 = vmatpush1.bf16.msra.mxu0 %v7015_v6  ;;  %6223 = vmatpush3.bf16.msra.mxu1 %v7019_v13  ;;  %v7087_v13 = vld [vmem:[%s9643_s3 + $0x8c0] ss:$12 sps:$4 sm:$0xff]  }
 0x240   :  { %5096 = vmatprep.subr.bf16.mxu0 %v7022_v17  ;;  %6224 = vmatprep.subr.bf16.mxu1 %v7023_v56  ;;  %v7050_v56 = vld [vmem:[%s9643_s3 + $0x678] ss:$12 sps:$4 sm:$0xff]  }
 0x243   :  { %5097 = vmatpush1.bf16.msra.mxu0 %v7020_v27  ;;  %6225 = vmatpush3.bf16.msra.mxu1 %v7024_v26  ;;  %v7055_v27 = vld [vmem:[%s9643_s3 + $0x694] ss:$12 sps:$4 sm:$0xff]  }
 0x244   :  { %5098 = vmatprep.subr.bf16.mxu0 %v7027_v15  ;;  %6226 = vmatprep.subr.bf16.mxu1 %v7028_v48  ;;  %v7088_v26 = vld [vmem:[%s9643_s3 + $0x800] ss:$12 sps:$4 sm:$0xff]   ;;  %v7092_v48 = vld [vmem:[%s9643_s3 + $0x8d8] ss:$12 sps:$4 sm:$0xff]  }
 0x247   :  { %5099 = vmatpush1.bf16.msra.mxu0 %v7025_v28  ;;  %6227 = vmatpush3.bf16.msra.mxu1 %v7029_v29  ;;  %v7053_v29 = vld [vmem:[%s9643_s3 + $0x690] ss:$12 sps:$4 sm:$0xff]  }
 0x248   :  { %5100 = vmatprep.subr.bf16.mxu0 %v7032_v7  ;;  %6228 = vmatprep.subr.bf16.mxu1 %v7033_v62  ;;  %v7058_v7 = vld [vmem:[%s9643_s3 + $0x6ac] ss:$12 sps:$4 sm:$0xff]  }
 0x249   :  { %v7093_v62 = vld [vmem:[%s9643_s3 + $0x818] ss:$12 sps:$4 sm:$0xff]  }
 0x24b   :  { %5101 = vmatpush1.bf16.msra.mxu0 %v7030_v9  ;;  %6229 = vmatpush3.bf16.msra.mxu1 %v7034_v30 }
 0x24c   :  { %5113 = vmatprep.subr.bf16.mxu0 %v7037_v31  ;;  %6236 = vmatprep.subr.bf16.mxu1 %v7062_v54  ;;  %v7097_v31 = vld [vmem:[%s9643_s3 + $0x8f0] ss:$12 sps:$4 sm:$0xff]  }
 0x24e   :  { %5103 = vmatmul.mubr.bf16.vlgmr.msra.gmra.mrb[8].mxu0 %v9168_v33  ;;  %5396 = vmatmul.mubr.bf16.vlgmr.msra.gmra.mrb[32].mxu1 %v8922_v57  ;;  %v7044_v33 = vld [vmem:[%s9643_s3 + $0x648] ss:$12 sps:$4 sm:$0xff]  }
 0x24f   :  { %5114 = vmatpush1.bf16.msra.mxu0 %v7035_v58  ;;  %5145 = vmatprep.mubr.bf16.mxu0 %v8958_v47  ;;  %v7068_v47 = vld [vmem:[%s9643_s3 + $0x7a0] ss:$12 sps:$4 sm:$0xff]  }
 0x250   :  { %5115 = vmatprep.subr.bf16.mxu0 %v7040_v14  ;;  %6237 = vmatpush3.bf16.msra.mxu1 %v7063_v37  ;;  %v7056_v37 = vld [vmem:[%s9643_s3 + $0x6a8] ss:$12 sps:$4 sm:$0xff]  }
 0x251   :  { %6238 = vmatprep.subr.bf16.mxu1 %v7067_v3 }
 0x253   :  { %5116 = vmatpush1.bf16.msra.mxu0 %v7038_v23 }
 0x254   :  { %5117 = vmatprep.subr.bf16.mxu0 %v7043_v44  ;;  %6239 = vmatpush3.bf16.msra.mxu1 %v7068_v47 }
 0x255   :  { %v2335_v61 = vpop.f32.mrb[12].mxu1  ;;  %6240 = vmatprep.subr.bf16.mxu1 %v7072_v22 }
 0x256   :  { %v9301_v50 = vadd.f32 %v2335_v61, %v371_v18  ;;  %v2337_v49 = vpop.f32.mrb[13].mxu1 }
 0x257   :  { %v9306_v32 = vadd.f32 %v2337_v49, %v375_v4  ;;  %v2339_v21 = vpop.f32.mrb[14].mxu1  ;;  %5118 = vmatpush1.bf16.msra.mxu0 %v7041_v11 }
 0x258   :  { %v9315_v39 = vmul.f32 0.70710677, %v9301_v50  ;;  %v9317_v52 = vadd.f32 %v2339_v21, %v371_v18  ;;  %v2341_v41 = vpop.f32.mrb[15].mxu1  ;;  %5119 = vmatprep.subr.bf16.mxu0 %v7046_v45  ;;  %6241 = vmatpush3.bf16.msra.mxu1 %v7073_v59  ;;  %v7098_v18 = vld [vmem:[%s9643_s3 + $0x830] ss:$12 sps:$4 sm:$0xff]  }
 0x259   :  { %v9323_v2 = vmul.f32 0.70710677, %v9306_v32  ;;  %v9325_v16 = vadd.f32 %v2341_v41, %v375_v4  ;;  %6242 = vmatprep.subr.bf16.mxu1 %v7077_v19  ;;  %v7059_v45 = vld [vmem:[%s9643_s3 + $0x6c0] ss:$12 sps:$4 sm:$0xff]   ;;  %v7066_v19 = vld [vmem:[%s9643_s3 + $0x6dc] ss:$12 sps:$4 sm:$0xff]  }
 0x25a   :  { %v2378_v36 = vand.u32 2147483647, %v9315_v39  ;;  %v9332_v24 = vmul.f32 0.70710677, %v9317_v52  ;;  %vm2858_vm4 = vcmp.ge.f32.partialorder %v9315_v39, 0.0 }
 0x25b   :  { %v2379_v35 = vand.u32 2147483647, %v9323_v2  ;;  %v9339_v38 = vmul.f32 0.70710677, %v9325_v16  ;;  %5120 = vmatpush1.bf16.msra.mxu0 %v7044_v33  ;;  %vm2859_vm5 = vcmp.ge.f32.partialorder %v9323_v2, 0.0 }
 0x25c   :  { %v2402_v5 = vmul.f32 0.3275911, %v2378_v36  ;;  %v2390_v12 = vand.u32 2147483647, %v9332_v24  ;;  %5121 = vmatprep.subr.bf16.mxu0 %v7049_v34  ;;  %6243 = vmatpush3.bf16.msra.mxu1 %v7078_v63  ;;  %v2714_v15 = vsub.f32 0.0, %v2378_v36  ;;  %vm2870_vm6 = vcmp.ge.f32.partialorder %v9332_v24, 0.0 }
 0x25d   :  { %v2403_v46 = vmul.f32 0.3275911, %v2379_v35  ;;  %v2391_v1 = vand.u32 2147483647, %v9339_v38  ;;  %6244 = vmatprep.subr.bf16.mxu1 %v7082_v60  ;;  %v2715_v28 = vsub.f32 0.0, %v2379_v35  ;;  %vm2871_vm7 = vcmp.ge.f32.partialorder %v9339_v38, 0.0 }
 0x25e   :  { %v2426_v42 = vadd.f32 1.0, %v2402_v5  ;;  %v2414_v0 = vmul.f32 0.3275911, %v2390_v12  ;;  %v2738_v9 = vmul.f32 %v2714_v15, %v2378_v36  ;;  %v2726_v30 = vsub.f32 0.0, %v2390_v12  ;;  %v7096_v2 = vld [vmem:[%s9643_s3 + $0x76c] ss:$12 sps:$4 sm:$0xff]  }
 0x25f   :  { %v2427_v25 = vadd.f32 1.0, %v2403_v46  ;;  %v2415_v8 = vmul.f32 0.3275911, %v2391_v1  ;;  %5122 = vmatpush1.bf16.msra.mxu0 %v7047_v55  ;;  %v2739_v54 = vmul.f32 %v2715_v28, %v2379_v35  ;;  %v2727_v14 = vsub.f32 0.0, %v2391_v1  ;;  %v7064_v46 = vld [vmem:[%s9643_s3 + $0x6d8] ss:$12 sps:$4 sm:$0xff]  }
 0x260   :  { %7227 = vrcp.f32 %v2426_v42  ;;  %v2438_v6 = vadd.f32 1.0, %v2414_v0  ;;  %5123 = vmatprep.subr.bf16.mxu0 %v7052_v20  ;;  %6245 = vmatpush3.bf16.msra.mxu1 %v7083_v40  ;;  %v2772_v44 = vmul.f32 1.442695, %v2738_v9  ;;  %v2750_v47 = vmul.f32 %v2726_v30, %v2390_v12  ;;  %v7071_v0 = vld [vmem:[%s9643_s3 + $0x6f4] ss:$12 sps:$4 sm:$0xff]  }
 0x261   :  { %7229 = vrcp.f32 %v2427_v25  ;;  %v2439_v17 = vadd.f32 1.0, %v2415_v8  ;;  %6246 = vmatprep.subr.bf16.mxu1 %v7087_v13  ;;  %v2774_v61 = vmul.f32 1.442695, %v2739_v54  ;;  %v2751_v21 = vmul.f32 %v2727_v14, %v2391_v1 }
 0x262   :  { %7231 = vrcp.f32 %v2438_v6  ;;  %v2796_v34 = vmul.f32 1.442695, %v2750_v47  ;;  %v7081_v47 = vld [vmem:[%s9643_s3 + $0x724] ss:$12 sps:$4 sm:$0xff]   ;;  %v2931_v24 = vmul.f32 0.5, %v9306_v32 }
 0x263   :  { %7233 = vrcp.f32 %v2439_v17  ;;  %5124 = vmatpush1.bf16.msra.mxu0 %v7050_v56  ;;  %v2798_v60 = vmul.f32 1.442695, %v2751_v21  ;;  %v7069_v17 = vld [vmem:[%s9643_s3 + $0x6f0] ss:$12 sps:$4 sm:$0xff]  }
 0x264   :  { %5125 = vmatprep.subr.bf16.mxu0 %v7055_v27  ;;  %6247 = vmatpush3.bf16.msra.mxu1 %v7088_v26  ;;  %7235 = vpow2.f32 %v2772_v44 }
 0x265   :  { %6248 = vmatprep.subr.bf16.mxu1 %v7092_v48  ;;  %7237 = vpow2.f32 %v2774_v61 }
 0x266   :  { %7239 = vpow2.f32 %v2796_v34 }
 0x267   :  { %5126 = vmatpush1.bf16.msra.mxu0 %v7053_v29  ;;  %7241 = vpow2.f32 %v2798_v60  ;;  %v7076_v29 = vld [vmem:[%s9643_s3 + $0x70c] ss:$12 sps:$4 sm:$0xff]  }
 0x268   :  { %5127 = vmatprep.subr.bf16.mxu0 %v7058_v7  ;;  %6249 = vmatpush3.bf16.msra.mxu1 %v7093_v62 }
 0x269   :  { %6250 = vmatprep.subr.bf16.mxu1 %v7097_v31 }
 0x26a   :  { %v9385_v58 = vpop.eup %7227 }
 0x26b   :  { %v9390_v3 = vpop.eup %7229  ;;  %v2498_v23 = vmul.f32 1.0614054, %v9385_v58  ;;  %5128 = vmatpush1.bf16.msra.mxu0 %v7056_v37 }
 0x26c   :  { %v2499_v4 = vmul.f32 1.0614054, %v9390_v3  ;;  %v9400_v11 = vpop.eup %7231  ;;  %5129 = vmatprep.subr.bf16.mxu0 %v7061_v43  ;;  %6251 = vmatpush3.bf16.msra.mxu1 %v7098_v18 }
 0x26d   :  { %v2522_v22 = vadd.f32 -1.4531521, %v2498_v23  ;;  %v2510_v41 = vmul.f32 1.0614054, %v9400_v11  ;;  %v9410_v33 = vpop.eup %7233  ;;  %v7074_v23 = vld [vmem:[%s9643_s3 + $0x708] ss:$12 sps:$4 sm:$0xff]  }
 0x26e   :  { %v2523_v49 = vadd.f32 -1.4531521, %v2499_v4  ;;  %v2511_v5 = vmul.f32 1.0614054, %v9410_v33  ;;  %v7236_v54 = vpop.eup %7235 }
 0x26f   :  { %v2546_v59 = vmul.f32 %v9385_v58, %v2522_v22  ;;  %v2534_v63 = vadd.f32 -1.4531521, %v2510_v41  ;;  %5130 = vmatpush1.bf16.msra.mxu0 %v7059_v45  ;;  %v7238_v43 = vpop.eup %7237 }
 0x270   :  { %v2547_v36 = vmul.f32 %v9390_v3, %v2523_v49  ;;  %v2535_v42 = vadd.f32 -1.4531521, %v2511_v5  ;;  %5131 = vmatprep.subr.bf16.mxu0 %v7066_v19  ;;  %v7240_v45 = vpop.eup %7239 }
 0x271   :  { %v2570_v35 = vadd.f32 1.4214138, %v2546_v59  ;;  %v2558_v55 = vmul.f32 %v9400_v11, %v2534_v63  ;;  %v7242_v34 = vpop.eup %7241 }
 0x272   :  { %v2571_v12 = vadd.f32 1.4214138, %v2547_v36  ;;  %v2559_v40 = vmul.f32 %v9410_v33, %v2535_v42  ;;  %v7091_v42 = vld [vmem:[%s9643_s3 + $0x754] ss:$12 sps:$4 sm:$0xff]  }
 0x273   :  { %v2594_v1 = vmul.f32 %v9385_v58, %v2570_v35  ;;  %v2582_v8 = vadd.f32 1.4214138, %v2558_v55  ;;  %5132 = vmatpush1.bf16.msra.mxu0 %v7064_v46 }
 0x274   :  { %v2595_v20 = vmul.f32 %v9390_v3, %v2571_v12  ;;  %v2583_v15 = vadd.f32 1.4214138, %v2559_v40  ;;  %5133 = vmatprep.subr.bf16.mxu0 %v7071_v0 }
 0x275   :  { %v2618_v25 = vadd.f32 -0.28449672, %v2594_v1  ;;  %v6142_v6 = vpop.f32.mrb[16].mxu1  ;;  %v2606_v26 = vmul.f32 %v9400_v11, %v2582_v8  ;;  %v2930_v8 = vmul.f32 0.5, %v9301_v50  ;;  %v2943_v50 = vmul.f32 0.5, %v9325_v16 }
 0x276   :  { %v2619_v13 = vadd.f32 -0.28449672, %v2595_v20  ;;  %v6143_v56 = vpop.f32.mrb[17].mxu1  ;;  %v2607_v31 = vmul.f32 %v9410_v33, %v2583_v15  ;;  %v7099_v16 = vld [vmem:[%s9643_s3 + $0x780] ss:$12 sps:$4 sm:$0xff]  }
 0x277   :  { %v2642_v27 = vmul.f32 %v9385_v58, %v2618_v25  ;;  %v9429_v48 = vadd.f32 %v6143_v56, %v6142_v6  ;;  %v6145_v28 = vpop.f32.mrb[18].mxu1  ;;  %v2630_v30 = vadd.f32 -0.28449672, %v2606_v26  ;;  %5134 = vmatpush1.bf16.msra.mxu0 %v7069_v17  ;;  %v7089_v25 = vld [vmem:[%s9643_s3 + $0x750] ss:$12 sps:$4 sm:$0xff]   ;;  %v2942_v17 = vmul.f32 0.5, %v9317_v52 }
 0x278   :  { %v2643_v7 = vmul.f32 %v9390_v3, %v2619_v13  ;;  %v6146_v62 = vpop.f32.mrb[19].mxu1  ;;  %v2631_v4 = vadd.f32 -0.28449672, %v2607_v31  ;;  %5135 = vmatprep.subr.bf16.mxu0 %v7076_v29  ;;  %v7094_v29 = vld [vmem:[%s9643_s3 + $0x768] ss:$12 sps:$4 sm:$0xff]  }
 0x279   :  { %v2666_v9 = vadd.f32 0.2548296, %v2642_v27  ;;  %v9436_v37 = vadd.f32 %v6146_v62, %v6145_v28  ;;  %v2654_v44 = vmul.f32 %v9400_v11, %v2630_v30  ;;  %v7101_v52 = vld [vmem:[%s9643_s3 + $0x784] ss:$12 sps:$4 sm:$0xff]   ;;  %v7107_v31 = vld [vmem:[%s9643_s3 + $0x7b4] ss:$12 sps:$4 sm:$0xff]  }
 0x27a   :  { %v2667_v14 = vadd.f32 0.2548296, %v2643_v7  ;;  %v2655_v21 = vmul.f32 %v9410_v33, %v2631_v4  ;;  %v7102_v30 = vld [vmem:[%s9643_s3 + $0x798] ss:$12 sps:$4 sm:$0xff]  }
 0x27b   :  { %v2690_v18 = vmul.f32 %v9385_v58, %v2666_v9  ;;  %v2678_v49 = vadd.f32 0.2548296, %v2654_v44  ;;  %5136 = vmatpush1.bf16.msra.mxu0 %v7074_v23  ;;  %v7079_v58 = vld [vmem:[%s9643_s3 + $0x720] ss:$12 sps:$4 sm:$0xff]   ;;  %v7104_v9 = vld [vmem:[%s9643_s3 + $0x79c] ss:$12 sps:$4 sm:$0xff]  }
 0x27c   :  { %v2691_v22 = vmul.f32 %v9390_v3, %v2667_v14  ;;  %v2679_v36 = vadd.f32 0.2548296, %v2655_v21  ;;  %5137 = vmatprep.subr.bf16.mxu0 %v7081_v47  ;;  %v7086_v3 = vld [vmem:[%s9643_s3 + $0x73c] ss:$12 sps:$4 sm:$0xff]   ;;  %v7113_v23 = vld [vmem:[%s9643_s3 + $0x7e4] ss:$12 sps:$4 sm:$0xff]  }
 0x27d   :  { %v2810_v61 = vmul.f32 %v7236_v54, %v2690_v18  ;;  %v2702_v19 = vmul.f32 %v9400_v11, %v2678_v49  ;;  %v7084_v11 = vld [vmem:[%s9643_s3 + $0x738] ss:$12 sps:$4 sm:$0xff]   ;;  %v7105_v54 = vld [vmem:[%s9643_s3 + $0x7b0] ss:$12 sps:$4 sm:$0xff]   ;;  %v7108_v14 = vld [vmem:[%s9643_s3 + $0x7c8] ss:$12 sps:$4 sm:$0xff]  }
 0x27e   :  { %v2811_v59 = vmul.f32 %v7238_v43, %v2691_v22  ;;  %v2703_v12 = vmul.f32 %v9410_v33, %v2679_v36  ;;  %v7111_v43 = vld [vmem:[%s9643_s3 + $0x7e0] ss:$12 sps:$4 sm:$0xff]   ;;  %v7116_v44 = vld [vmem:[%s9643_s3 + $0x7fc] ss:$12 sps:$4 sm:$0xff]   ;;  %v7114_v47 = vld [vmem:[%s9643_s3 + $0x7f8] ss:$12 sps:$4 sm:$0xff]  }
 0x27f   :  { %v2834_v41 = vsub.f32 1.0, %v2810_v61  ;;  %v2822_v5 = vmul.f32 %v7240_v45, %v2702_v19  ;;  %5138 = vmatpush1.bf16.msra.mxu0 %v7079_v58  ;;  %v9516_v18 = vld [vmem:[%s9645_s4] sm:$0x7]  ;;  %v7117_v58 = vld [vmem:[%s9643_s3 + $0x810] ss:$12 sps:$4 sm:$0xff]  }
 0x280   :  { %v2835_v35 = vsub.f32 1.0, %v2811_v59  ;;  %v2823_v55 = vmul.f32 %v7242_v34, %v2703_v12  ;;  %5139 = vmatprep.subr.bf16.mxu0 %v7086_v3  ;;  %v3401_v4 = vrot.slane %v9516_v18, %v8567_v10  ;;  %v7119_v22 = vld [vmem:[%s9643_s3 + $0x814] ss:$12 sps:$4 sm:$0xff]   ;;  %v7122_v19 = vld [vmem:[%s9643_s3 + $0x82c] ss:$12 sps:$4 sm:$0xff]  }
 0x281   :  { %v2882_v63 = vsub.f32 0.0, %v2834_v41  ;;  %v2846_v1 = vsub.f32 1.0, %v2822_v5  ;;  %v7123_v5 = vld [vmem:[%s9643_s3 + $0x840] ss:$12 sps:$4 sm:$0xff]   ;;  %v7126_v12 = vld [vmem:[%s9643_s3 + $0x858] ss:$12 sps:$4 sm:$0xff]  }
 0x282   :  { %v2883_v60 = vsub.f32 0.0, %v2835_v35  ;;  %v2847_v20 = vsub.f32 1.0, %v2823_v55  ;;  %v5234_v21 = vadd.f32 %v9429_v48, %v3401_v4  ;;  %v5237_v36 = vadd.f32 %v9436_v37, %v3401_v4  ;;  %v7120_v48 = vld [vmem:[%s9643_s3 + $0x828] ss:$12 sps:$4 sm:$0xff]   ;;  %v7137_v55 = vld [vmem:[%s9643_s3 + $0x8a4] ss:$12 sps:$4 sm:$0xff]  }
 0x283   :  { %v2906_v46 = vsel %vm2858_vm4, %v2834_v41, %v2882_v63  ;;  %v2894_v33 = vsub.f32 0.0, %v2846_v1  ;;  %5140 = vmatpush1.bf16.msra.mxu0 %v7084_v11  ;;  %v7125_v63 = vld [vmem:[%s9643_s3 + $0x844] ss:$12 sps:$4 sm:$0xff]   ;;  %v7128_v37 = vld [vmem:[%s9643_s3 + $0x85c] ss:$12 sps:$4 sm:$0xff]  }
 0x284   :  { %v2907_v0 = vsel %vm2859_vm5, %v2835_v35, %v2883_v60  ;;  %v2954_v39 = vadd.f32 1.0, %v2906_v46  ;;  %v2895_v6 = vsub.f32 0.0, %v2847_v20  ;;  %5141 = vmatprep.subr.bf16.mxu0 %v7091_v42  ;;  %v7131_v60 = vld [vmem:[%s9643_s3 + $0x874] ss:$12 sps:$4 sm:$0xff]   ;;  %v7129_v11 = vld [vmem:[%s9643_s3 + $0x870] ss:$12 sps:$4 sm:$0xff]  }
 0x285   :  { %v2918_v40 = vsel %vm2870_vm6, %v2846_v1, %v2894_v33  ;;  %v2955_v13 = vadd.f32 1.0, %v2907_v0  ;;  %v7134_v46 = vld [vmem:[%s9643_s3 + $0x88c] ss:$12 sps:$4 sm:$0xff]   ;;  %v7132_v1 = vld [vmem:[%s9643_s3 + $0x888] ss:$12 sps:$4 sm:$0xff]  }
 0x286   :  { %v2966_v56 = vadd.f32 1.0, %v2918_v40  ;;  %v2919_v27 = vsel %vm2871_vm7, %v2847_v20, %v2895_v6  ;;  %v2978_v26 = vmul.f32 %v2954_v39, %v2930_v8  ;;  %v7135_v42 = vld [vmem:[%s9643_s3 + $0x8a0] ss:$12 sps:$4 sm:$0xff]   ;;  %v7140_v0 = vld [vmem:[%s9643_s3 + $0x8bc] ss:$12 sps:$4 sm:$0xff]  }
 0x287   :  { %v2967_v28 = vadd.f32 1.0, %v2919_v27  ;;  %5142 = vmatpush1.bf16.msra.mxu0 %v7089_v25  ;;  %v2979_v7 = vmul.f32 %v2955_v13, %v2931_v24  ;;  %v7138_v33 = vld [vmem:[%s9643_s3 + $0x8b8] ss:$12 sps:$4 sm:$0xff]   ;;  %v7143_v20 = vld [vmem:[%s9643_s3 + $0x8d4] ss:$12 sps:$4 sm:$0xff]  }
 0x288   :  { %v2990_v15 = vmul.f32 %v2966_v56, %v2942_v17  ;;  %5143 = vmatprep.subr.bf16.mxu0 %v7096_v2  ;;  %v7141_v6 = vld [vmem:[%s9643_s3 + $0x8d0] ss:$12 sps:$4 sm:$0xff]   ;;  %v7146_v13 = vld [vmem:[%s9643_s3 + $0x8ec] ss:$12 sps:$4 sm:$0xff]   ;;  %v7144_v27 = vld [vmem:[%s9643_s3 + $0x8e8] ss:$12 sps:$4 sm:$0xff]  }
 0x289   :  { %v2991_v32 = vmul.f32 %v2967_v28, %v2943_v50 }
 0x28a   :  { %v9482_v38 = vpack.c.bf16 %v2990_v15, %v2978_v26 }
 0x28b   :  { %5144 = vmatpush1.bf16.msra.mxu0 %v7094_v29  ;;  %v3003_v62 = vpack.c.bf16 %v2991_v32, %v2979_v7 }
 0x28c   :  { %5156 = vmatprep.subr.bf16.mxu0 %v7101_v52 }
 0x28d   :  { %5436 = vmatprep.mubr.bf16.mxu1 %v3003_v62 }
 0x28e   :  { %5146 = vmatmul.mubr.bf16.vlgmr.msra.gmra.mrb[8].mxu0 %v8922_v57  ;;  %5437 = vmatmul.mubr.bf16.vlgmr.msra.gmra.mrb[36].mxu1 %v9482_v38  ;;  %v7110_v57 = vld [vmem:[%s9643_s3 + $0x7cc] ss:$12 sps:$4 sm:$0xff]  }
 0x28f   :  { %5157 = vmatpush1.bf16.msra.mxu0 %v7099_v16  ;;  %5188 = vmatprep.mubr.bf16.mxu0 %v3003_v62 }
 0x290   :  { %5158 = vmatprep.subr.bf16.mxu0 %v7104_v9 }
 0x293   :  { %5159 = vmatpush1.bf16.msra.mxu0 %v7102_v30 }
 0x294   :  { %5160 = vmatprep.subr.bf16.mxu0 %v7107_v31 }
 0x297   :  { %5161 = vmatpush1.bf16.msra.mxu0 %v7105_v54 }
 0x298   :  { %5162 = vmatprep.subr.bf16.mxu0 %v7110_v57 }
 0x29b   :  { %5163 = vmatpush1.bf16.msra.mxu0 %v7108_v14 }
 0x29c   :  { %5164 = vmatprep.subr.bf16.mxu0 %v7113_v23 }
 0x29f   :  { %5165 = vmatpush1.bf16.msra.mxu0 %v7111_v43 }
 0x2a0   :  { %5166 = vmatprep.subr.bf16.mxu0 %v7116_v44 }
 0x2a1   :  { %v6164_v61 = vpop.f32.mrb[20].mxu1 }
 0x2a2   :  { %v6165_v49 = vpop.f32.mrb[21].mxu1 }
 0x2a3   :  { %5167 = vmatpush1.bf16.msra.mxu0 %v7114_v47  ;;  %v6166_v45 = vadd.f32 %v6165_v49, %v6164_v61  ;;  %v6167_v59 = vpop.f32.mrb[22].mxu1  ;;  %v3393_v49 = vrot.slane %v9516_v18, %v8193_v51 }
 0x2a4   :  { %v6168_v41 = vpop.f32.mrb[23].mxu1  ;;  %5168 = vmatprep.subr.bf16.mxu0 %v7119_v22 }
 0x2a5   :  { %v5275_v3 = vadd.f32 %v6166_v45, %v5234_v21  ;;  %v6169_v34 = vadd.f32 %v6168_v41, %v6167_v59  ;;  %v3397_v21 = vrot.slane %v9516_v18, %v8201_v53  ;;  %v7251_v18 = vld [vmem:[%s9642_s0 + $0x18] sm:$0xff] }
 0x2a7   :  { %v5278_v35 = vadd.f32 %v6169_v34, %v5237_v36  ;;  %5169 = vmatpush1.bf16.msra.mxu0 %v7117_v58  ;;  %v7249_v36 = vld [vmem:[%s9642_s0] sm:$0xff] }
 0x2a8   :  { %5170 = vmatprep.subr.bf16.mxu0 %v7122_v19 }
 0x2ab   :  { %5171 = vmatpush1.bf16.msra.mxu0 %v7120_v48  ;;  %v7250_v48 = vld [vmem:[%s9642_s0 + $0x8] sm:$0xff] }
 0x2ac   :  { %5172 = vmatprep.subr.bf16.mxu0 %v7125_v63 }
 0x2af   :  { %5173 = vmatpush1.bf16.msra.mxu0 %v7123_v5 }
 0x2b0   :  { %5174 = vmatprep.subr.bf16.mxu0 %v7128_v37 }
 0x2b3   :  { %5175 = vmatpush1.bf16.msra.mxu0 %v7126_v12  ;;  %v7252_v12 = vld [vmem:[%s9642_s0 + $0x20] sm:$0xff] }
 0x2b4   :  { %5176 = vmatprep.subr.bf16.mxu0 %v7131_v60 }
 0x2b7   :  { %5177 = vmatpush1.bf16.msra.mxu0 %v7129_v11  ;;  %v7253_v11 = vld [vmem:[%s9642_s0 + $0x10] sm:$0xff] }
 0x2b8   :  { %5178 = vmatprep.subr.bf16.mxu0 %v7134_v46 }
 0x2bb   :  { %5179 = vmatpush1.bf16.msra.mxu0 %v7132_v1 }
 0x2bc   :  { %5180 = vmatprep.subr.bf16.mxu0 %v7137_v55 }
 0x2bf   :  { %5181 = vmatpush1.bf16.msra.mxu0 %v7135_v42 }
 0x2c0   :  { %5182 = vmatprep.subr.bf16.mxu0 %v7140_v0  ;;  %v7254_v0 = vld [vmem:[%s9642_s0 + $0x28] sm:$0xff] }
 0x2c1   :  { %v6186_v39 = vpop.f32.mrb[24].mxu1 }
 0x2c2   :  { %v6187_v25 = vpop.f32.mrb[25].mxu1 }
 0x2c3   :  { %v6188_v8 = vadd.f32 %v6187_v25, %v6186_v39  ;;  %5183 = vmatpush1.bf16.msra.mxu0 %v7138_v33  ;;  %v6189_v40 = vpop.f32.mrb[26].mxu1 }
 0x2c4   :  { %v6190_v2 = vpop.f32.mrb[27].mxu1  ;;  %5184 = vmatprep.subr.bf16.mxu0 %v7143_v20 }
 0x2c5   :  { %v5316_v17 = vadd.f32 %v6188_v8, %v5275_v3  ;;  %v6191_v56 = vadd.f32 %v6190_v2, %v6189_v40 }
 0x2c7   :  { %v5319_v24 = vadd.f32 %v6191_v56, %v5278_v35  ;;  %5185 = vmatpush1.bf16.msra.mxu0 %v7141_v6 }
 0x2c8   :  { %5186 = vmatprep.subr.bf16.mxu0 %v7146_v13 }
 0x2cb   :  { %5187 = vmatpush1.bf16.msra.mxu0 %v7144_v27 }
 0x2ce   :  { %5189 = vmatmul.mubr.bf16.vlgmr.msra.gmra.mrb[8].mxu0 %v9482_v38 }
 0x301   :  { %v6208_v26 = vpop.f32.mrb[28].mxu1 }
 0x302   :  { %v6209_v15 = vpop.f32.mrb[29].mxu1 }
 0x303   :  { %v6210_v50 = vadd.f32 %v6209_v15, %v6208_v26  ;;  %v6211_v28 = vpop.f32.mrb[30].mxu1 }
 0x304   :  { %v6212_v29 = vpop.f32.mrb[31].mxu1 }
 0x305   :  { %v5357_v52 = vadd.f32 %v6210_v50, %v5316_v17  ;;  %v6213_v7 = vadd.f32 %v6212_v29, %v6211_v28 }
 0x307   :  { %v5360_v32 = vadd.f32 %v6213_v7, %v5319_v24 }
 0x321   :  { %v6230_v16 = vpop.f32.mrb[32].mxu1 }
 0x322   :  { %v6231_v62 = vpop.f32.mrb[33].mxu1 }
 0x323   :  { %v6232_v9 = vadd.f32 %v6231_v62, %v6230_v16  ;;  %v6233_v30 = vpop.f32.mrb[34].mxu1 }
 0x324   :  { %v6234_v31 = vpop.f32.mrb[35].mxu1 }
 0x325   :  { %v5398_v54 = vadd.f32 %v6232_v9, %v5357_v52  ;;  %v6235_v57 = vadd.f32 %v6234_v31, %v6233_v30 }
 0x327   :  { %v5401_v14 = vadd.f32 %v6235_v57, %v5360_v32 }
 0x361   :  { %v6252_v23 = vpop.f32.mrb[36].mxu1 }
 0x362   :  { %v6253_v43 = vpop.f32.mrb[37].mxu1 }
 0x363   :  { %v6254_v44 = vadd.f32 %v6253_v43, %v6252_v23  ;;  %v6255_v38 = vpop.f32.mrb[38].mxu1  ;;  %v5452_v23 = vld [vmem:[%s9647_s6] sm:$0x7] }
 0x364   :  { %v6256_v4 = vpop.f32.mrb[39].mxu1 }
 0x365   :  { %v5439_v47 = vadd.f32 %v6254_v44, %v5398_v54  ;;  %v6257_v22 = vadd.f32 %v6256_v4, %v6255_v38 }
 0x367   :  { %v5442_v61 = vadd.f32 %v6257_v22, %v5401_v14  ;;  %v5447_v46 = vadd.f32 %v7253_v11, %v5439_v47  ;;  %v5451_v14 = vld [vmem:[%s9646_s5] sm:$0x7]  ;;  %v5522_v47 = vrot.slane %v5452_v23, %v8193_v51  ;;  %v5526_v22 = vrot.slane %v5452_v23, %v8201_v53 }
 0x368   :  { %v5500_v43 = vrot.slane %v5451_v14, %v8193_v51  ;;  %v5504_v44 = vrot.slane %v5451_v14, %v8201_v53  ;;  %v5508_v38 = vrot.slane %v5451_v14, %v8567_v10 }
 0x369   :  { %v5450_v33 = vadd.f32 %v7254_v0, %v5442_v61  ;;  %v5530_v61 = vrot.slane %v5452_v23, %v8567_v10 }
 0x3a1   :  { %v5190_v45 = vpop.f32.mrb[8].mxu0 }
 0x3a2   :  { %v6282_v59 = vadd.f32 %v5190_v45, %v3393_v49  ;;  %v5192_v58 = vpop.f32.mrb[9].mxu0 }
 0x3a3   :  { %v6283_v41 = vadd.f32 %v5192_v58, %v3397_v21  ;;  %v5194_v19 = vpop.f32.mrb[10].mxu0 }
 0x3a4   :  { %v5445_v3 = vadd.f32 %v7249_v36, %v6282_v59  ;;  %v6284_v34 = vadd.f32 %v5194_v19, %v3393_v49  ;;  %v5196_v35 = vpop.f32.mrb[11].mxu0 }
 0x3a5   :  { %v5446_v63 = vadd.f32 %v7250_v48, %v6283_v41  ;;  %v6285_v5 = vadd.f32 %v5196_v35, %v3397_v21 }
 0x3a6   :  { %v5448_v37 = vadd.f32 %v7251_v18, %v6284_v34 }
 0x3a7   :  { %v5449_v60 = vadd.f32 %v7252_v12, %v6285_v5  ;;  %v5453_v1 = vadd.f32 %v5446_v63, %v5445_v3 }
 0x3a9   :  { %v5454_v55 = vadd.f32 %v5453_v1, %v5447_v46  ;;  %v5457_v42 = vadd.f32 %v5449_v60, %v5448_v37 }
 0x3ab   :  { %5455 = vadd.xlane.f32.xlu0 %v5454_v55  ;;  %v5458_v20 = vadd.f32 %v5457_v42, %v5450_v33 }
 0x3af   :  { %5459 = vadd.xlane.f32.xlu0 %v5458_v20 }
 0x438   :  { %v5456_v39 = vpop.xlane.xlu0 %5455 }
 0x439   :  { %v5462_v25 = vmul.f32 0.0026041667, %v5456_v39 }
 0x43b   :  { %v5464_v8 = vsub.f32 %v5445_v3, %v5462_v25  ;;  %v5465_v40 = vsub.f32 %v5446_v63, %v5462_v25  ;;  %v5466_v6 = vsub.f32 %v5447_v46, %v5462_v25 }
 0x43c   :  { %v5460_v2 = vpop.xlane.xlu0 %5459 }
 0x43d   :  { %v5463_v13 = vmul.f32 0.0026041667, %v5460_v2  ;;  %v5470_v17 = vmul.f32 %v5464_v8, %v5464_v8  ;;  %v5471_v56 = vmul.f32 %v5465_v40, %v5465_v40  ;;  %v5472_v24 = vmul.f32 %v5466_v6, %v5466_v6 }
 0x43f   :  { %v5467_v27 = vsub.f32 %v5448_v37, %v5463_v13  ;;  %v5468_v26 = vsub.f32 %v5449_v60, %v5463_v13  ;;  %v5469_v15 = vsub.f32 %v5450_v33, %v5463_v13  ;;  %v5476_v50 = vadd.f32 %v5471_v56, %v5470_v17 }
 0x441   :  { %v5477_v28 = vadd.f32 %v5476_v50, %v5472_v24  ;;  %v5473_v29 = vmul.f32 %v5467_v27, %v5467_v27  ;;  %v5474_v52 = vmul.f32 %v5468_v26, %v5468_v26  ;;  %v5475_v7 = vmul.f32 %v5469_v15, %v5469_v15 }
 0x443   :  { %5478 = vadd.xlane.f32.xlu1 %v5477_v28  ;;  %v5480_v32 = vadd.f32 %v5474_v52, %v5473_v29 }
 0x445   :  { %v5481_v16 = vadd.f32 %v5480_v32, %v5475_v7 }
 0x447   :  { %5482 = vadd.xlane.f32.xlu1 %v5481_v16 }
 0x4d0   :  { %v5479_v62 = vpop.xlane.xlu1 %5478 }
 0x4d1   :  { %v5484_v9 = vmul.f32 0.0026041667, %v5479_v62 }
 0x4d3   :  { %v5486_v30 = vadd.f32 1e-12, %v5484_v9 }
 0x4d4   :  { %v5483_v31 = vpop.xlane.xlu1 %5482 }
 0x4d5   :  { %7243 = vrsqrt.f32 %v5486_v30  ;;  %v5485_v54 = vmul.f32 0.0026041667, %v5483_v31 }
 0x4d7   :  { %v5487_v57 = vadd.f32 1e-12, %v5485_v54 }
 0x4d9   :  { %7245 = vrsqrt.f32 %v5487_v57 }
 0x4df   :  { %v7244_v4 = vpop.eup %7243 }
 0x4e0   :  { %v5490_v49 = vmul.f32 %v7244_v4, %v5464_v8  ;;  %v5491_v21 = vmul.f32 %v7244_v4, %v5465_v40  ;;  %v5492_v45 = vmul.f32 %v7244_v4, %v5466_v6 }
 0x4e2   :  { %v5512_v59 = vmul.f32 %v5500_v43, %v5490_v49  ;;  %v5513_v58 = vmul.f32 %v5504_v44, %v5491_v21  ;;  %v5514_v41 = vmul.f32 %v5508_v38, %v5492_v45 }
 0x4e3   :  { %v7246_v19 = vpop.eup %7245 }
 0x4e4   :  { %v5534_v36 = vadd.f32 %v5522_v47, %v5512_v59  ;;  %v5535_v3 = vadd.f32 %v5526_v22, %v5513_v58  ;;  %v5536_v34 = vadd.f32 %v5530_v61, %v5514_v41  ;;  %v5493_v35 = vmul.f32 %v7246_v19, %v5467_v27 }
 0x4e5   :  { %v5494_v48 = vmul.f32 %v7246_v19, %v5468_v26  ;;  %v5495_v63 = vmul.f32 %v7246_v19, %v5469_v15 }
 0x4e6   :  { %5540 = vst [vmem:[%s9648_s7] sm:$0xff] %v5534_v36  ;;  %5541 = vst [vmem:[%s9648_s7 + $0x8] sm:$0xff] %v5535_v3  ;;  %v5515_v51 = vmul.f32 %v5500_v43, %v5493_v35 }
 0x4e7   :  { %5542 = vst [vmem:[%s9648_s7 + $0x10] sm:$0xff] %v5536_v34  ;;  %v5516_v53 = vmul.f32 %v5504_v44, %v5494_v48  ;;  %v5517_v10 = vmul.f32 %v5508_v38, %v5495_v63 }
 0x4e8   :  { %v5537_v5 = vadd.f32 %v5522_v47, %v5515_v51 }
 0x4e9   :  { %v5538_v18 = vadd.f32 %v5526_v22, %v5516_v53  ;;  %v5539_v37 = vadd.f32 %v5530_v61, %v5517_v10 }
 0x4ea   :  { %5543 = vst [vmem:[%s9648_s7 + $0x18] sm:$0xff] %v5537_v5 }
 0x4eb   :  { %5544 = vst [vmem:[%s9648_s7 + $0x20] sm:$0xff] %v5538_v18  ;;  %5545 = vst [vmem:[%s9648_s7 + $0x28] sm:$0xff] %v5539_v37 }

</bundles_post_ra>
